<compile_context>
chip_gen: v7x
topology: tpu7x:2x2x1
jax: 0.10.0
libtpu: 0.0.40
codegen_flags: <defaults>
</compile_context>

<pallas_src>
import math

import jax
import jax.numpy as jnp
from jax import lax
from jax.experimental import pallas as pl
from jax.experimental.pallas import tpu as pltpu

_INV_SQRT2 = 0.7071067811865476

# MXU operand precision (bf16-native on v5e/v6e/v7x) and gate-preactivation
# scratch precision.  Flip both to jnp.float32 for exact-f32 numerics.
MXU_DTYPE = jnp.bfloat16
GI_DTYPE = jnp.bfloat16


def _gelu_exact(x):
    # PyTorch nn.GELU() default: exact erf-based GELU.
    return 0.5 * x * (1.0 + lax.erf(x * _INV_SQRT2))


def _round_up(n, m):
    return ((n + m - 1) // m) * m


# ------------------------------- kernel --------------------------------------
def gptgru_kernel(x_ref,
                  wih_f_ref, whh_f_ref, bgi_f_ref, bhn_f_ref,
                  wih_b_ref, whh_b_ref, bgi_b_ref, bhn_b_ref,
                  out_ref,
                  gi_ref):
    # x_ref / out_ref: (T, TB, C) f32 time-major block; gi_ref: (T, TB, 3C).
    T, TB, C = x_ref.shape
    unroll_rec = True if T <= 16 else 4      # sweep 4-8 for long T

    # ---- Stage 1a: ONE fused input-side gate GEMM for the forward GRU ------
    # (T*TB, C) @ (C, 3C).  TB is a multiple of 8, so the (T, TB) -> (T*TB)
    # sublane merge is tile-exact; this stage is off the serial critical path.
    xf = x_ref[...].reshape(T * TB, C).astype(MXU_DTYPE)
    gi = jnp.dot(xf, wih_f_ref[...], preferred_element_type=jnp.float32)
    gi = gi + bgi_f_ref[...]
    gi_ref[...] = gi.reshape(T, TB, 3 * C).astype(gi_ref.dtype)

    # ---- Stage 1b: forward recurrence (h carried in the loop carry) --------
    bhn_f = bhn_f_ref[...]                    # (1, C), broadcasts over batch
    h0 = jnp.zeros((TB, C), jnp.float32)

    def fwd_body(t, h):
        gi_t = gi_ref[t].astype(jnp.float32)                        # (TB, 3C)
        gh = jnp.dot(h.astype(MXU_DTYPE), whh_f_ref[...],
                     preferred_element_type=jnp.float32)
        r = jax.nn.sigmoid(gi_t[:, :C] + gh[:, :C])
        z = jax.nn.sigmoid(gi_t[:, C:2 * C] + gh[:, C:2 * C])
        n = jnp.tanh(gi_t[:, 2 * C:] + r * (gh[:, 2 * C:] + bhn_f))
        h_new = (1.0 - z) * n + z * h
        out_ref[t] = h_new                    # raw h; GELU hoisted off the loop
        return h_new

    lax.fori_loop(0, T, fwd_body, h0, unroll=unroll_rec)

    # ---- Stage 2a: fused input-side gate GEMM for the backward GRU ---------
    # GELU applied here as one vectorized pass (off the EUP-bound serial loop).
    # out_ref still holds raw forward h; its entire dependence is captured in
    # gi_ref before the backward loop overwrites it.
    mid = _gelu_exact(out_ref[...]).reshape(T * TB, C).astype(MXU_DTYPE)
    gi = jnp.dot(mid, wih_b_ref[...], preferred_element_type=jnp.float32)
    gi = gi + bgi_b_ref[...]
    gi_ref[...] = gi.reshape(T, TB, 3 * C).astype(gi_ref.dtype)

    # ---- Stage 2b: time-reversed recurrence; flip-back folded into index ---
    bhn_b = bhn_b_ref[...]

    def bwd_body(s, h):
        t = T - 1 - s
        gi_t = gi_ref[t].astype(jnp.float32)
        gh = jnp.dot(h.astype(MXU_DTYPE), whh_b_ref[...],
                     preferred_element_type=jnp.float32)
        r = jax.nn.sigmoid(gi_t[:, :C] + gh[:, :C])
        z = jax.nn.sigmoid(gi_t[:, C:2 * C] + gh[:, C:2 * C])
        n = jnp.tanh(gi_t[:, 2 * C:] + r * (gh[:, 2 * C:] + bhn_b))
        h_new = (1.0 - z) * n + z * h
        out_ref[t] = h_new
        return h_new

    lax.fori_loop(0, T, bwd_body, h0, unroll=unroll_rec)

    # ---- Final vectorized GELU; Dropout(p=0.2) is identity in eval mode ----
    out_ref[...] = _gelu_exact(out_ref[...])
    # TODO(synk): training-mode Dropout(p=0.2) would need pltpu.prng_seed /
    # prng_random_bits to build the keep-mask; the module runs in eval mode here.


# ------------------------------- wrapper --------------------------------------
def _vmem_capacity_bytes():
    try:
        return int(pltpu.get_tpu_info().vmem_capacity_bytes)
    except Exception:
        return 64 * 1024 * 1024        # conservative (v7x-sized) fallback


def _choose_tiling(B_pad, T, Cp):
    """Largest sublane-aligned batch tile fitting the per-generation VMEM cap,
    preferring >= 2 grid steps so v7x's second TensorCore gets work."""
    cap = max(int(0.80 * _vmem_capacity_bytes()), 16 * 1024 * 1024)

    w_item = jnp.dtype(MXU_DTYPE).itemsize
    gi_item = jnp.dtype(GI_DTYPE).itemsize
    weights = 2 * 4 * 3 * Cp * Cp * w_item      # 4 matrices, double-buffered

    def need(tb):
        elem = T * tb * Cp
        xo = 16 * elem                          # x + out blocks, 2 bufs, f32
        gi = 3 * elem * gi_item                 # gi scratch
        tmp = 22 * elem                         # fused-GEMM temporaries
        return int(xo + gi + tmp + weights + (2 << 20))

    cands = [c for c in range(8, min(B_pad, 256) + 1, 8) if B_pad % c == 0]
    fit = [c for c in cands if need(c) <= cap]
    if fit:
        multi = [c for c in fit if B_pad // c >= 2]
        tb = max(multi) if multi else max(fit)
    else:
        tb = 8
        # TODO(synk): for very long T, stream (T_chunk, tb, C) slabs via
        # pltpu.emit_pipeline instead of shrinking tb (needs explicit mid buf).
    vmem_limit = int(min(max(need(tb), 16 * 1024 * 1024), cap))
    return tb, vmem_limit


def gptgru_forward(x, kparams):
    """x: (B, T, C) batch_first float32 -> (B, T, C) float32."""
    B, T, C = x.shape
    Cp = kparams["wih_f"].shape[0]              # channels padded to mult of 128
    assert Cp == _round_up(C, 128)

    x = x.astype(jnp.float32)
    # Pad channels to a multiple of 128 (lane-dense gate slices / stores) and
    # batch to a multiple of 8 (sublane-aligned tiles).  Padding is numerically
    # exact: padded weight rows/cols are zero so padded channels stay 0.
    B_pad = _round_up(B, 8)
    if Cp != C or B_pad != B:
        x = jnp.pad(x, ((0, B_pad - B), (0, 0), (0, Cp - C)))

    # Time-major so each recurrence step is a contiguous (TB, Cp) slab.
    # TODO(synk): the batch_first <-> time-major transposes cost extra HBM
    # passes; keep the surrounding graph time-major to elide them entirely.
    x_tm = jnp.transpose(x, (1, 0, 2))

    tb, vmem_limit = _choose_tiling(B_pad, T, Cp)
    grid = (B_pad // tb,)

    xspec = pl.BlockSpec((T, tb, Cp), lambda b: (0, b, 0))
    ospec = pl.BlockSpec((T, tb, Cp), lambda b: (0, b, 0))

    def build(weight_pipeline_mode):
        wkw = ({} if weight_pipeline_mode is None
               else dict(pipeline_mode=weight_pipeline_mode))
        wspec = pl.BlockSpec((Cp, 3 * Cp), lambda b: (0, 0), **wkw)
        bgspec = pl.BlockSpec((1, 3 * Cp), lambda b: (0, 0), **wkw)
        bnspec = pl.BlockSpec((1, Cp), lambda b: (0, 0), **wkw)
        return pl.pallas_call(
            gptgru_kernel,
            out_shape=jax.ShapeDtypeStruct((T, B_pad, Cp), jnp.float32),
            grid=grid,
            in_specs=[xspec,
                      wspec, wspec, bgspec, bnspec,
                      wspec, wspec, bgspec, bnspec],
            out_specs=ospec,
            scratch_shapes=[pltpu.VMEM((T, tb, 3 * Cp), GI_DTYPE)],
            compiler_params=pltpu.CompilerParams(
                dimension_semantics=("parallel",),
                vmem_limit_bytes=vmem_limit),
        )

    args = (x_tm,
            kparams["wih_f"], kparams["whh_f"], kparams["bgi_f"], kparams["bhn_f"],
            kparams["wih_b"], kparams["whh_b"], kparams["bgi_b"], kparams["bhn_b"])

    try:
        # Weights/biases are grid-invariant: single-buffer them to free VMEM
        # for a larger batch tile (matters most on v7x's 64 MiB VMEM).
        out_tm = build(pl.Buffered(1))(*args)
    except Exception:
        out_tm = build(None)(*args)

    out = jnp.transpose(out_tm, (1, 0, 2))
    return out[:B, :, :C]


# ------------------------------ parameters -----------------------------------
def init_params(key, C):
    """PyTorch-layout GRU params: xavier_uniform weights, zero biases."""
    ks = jax.random.split(key, 4)

    def xavier(k, fan_out, fan_in):
        bound = math.sqrt(6.0 / (fan_in + fan_out))
        return jax.random.uniform(k, (fan_out, fan_in), jnp.float32, -bound, bound)

    zeros = jnp.zeros((3 * C,), jnp.float32)
    return dict(
        wih_f=xavier(ks[0], 3 * C, C), whh_f=xavier(ks[1], 3 * C, C),
        bih_f=zeros, bhh_f=zeros,
        wih_b=xavier(ks[2], 3 * C, C), whh_b=xavier(ks[3], 3 * C, C),
        bih_b=zeros, bhh_b=zeros,
    )


def prep_kernel_params(raw, C):
    """PyTorch layout -> kernel layout.

    * channel dim zero-padded to a multiple of 128 per gate (lane alignment)
    * weights transposed to (Cp, 3Cp) [r|z|n] and stored in MXU_DTYPE (bf16)
    * r/z biases pre-summed (b_ih + b_hh); b_hh_n kept separate (scaled by r)
    """
    Cp = _round_up(C, 128)

    def pad_w(w):                 # (3C, C) -> (Cp, 3Cp), per-gate transpose+pad
        out = jnp.zeros((Cp, 3 * Cp), jnp.float32)
        for g in range(3):
            out = out.at[:C, g * Cp:g * Cp + C].set(w[g * C:(g + 1) * C, :].T)
        return out.astype(MXU_DTYPE)

    def pad_b(b):                 # (3C,) -> (1, 3Cp), per-gate pad
        out = jnp.zeros((3 * Cp,), jnp.float32)
        for g in range(3):
            out = out.at[g * Cp:g * Cp + C].set(b[g * C:(g + 1) * C])
        return out.reshape(1, 3 * Cp)

    def conv(wih, whh, bih, bhh):
        bgi = pad_b(jnp.concatenate([bih[:2 * C] + bhh[:2 * C], bih[2 * C:]]))
        bhn = jnp.zeros((Cp,), jnp.float32).at[:C].set(bhh[2 * C:]).reshape(1, Cp)
        return pad_w(wih), pad_w(whh), bgi, bhn

    wih_f, whh_f, bgi_f, bhn_f = conv(raw["wih_f"], raw["whh_f"],
                                      raw["bih_f"], raw["bhh_f"])
    wih_b, whh_b, bgi_b, bhn_b = conv(raw["wih_b"], raw["whh_b"],
                                      raw["bih_b"], raw["bhh_b"])
    return dict(wih_f=wih_f, whh_f=whh_f, bgi_f=bgi_f, bhn_f=bhn_f,
                wih_b=wih_b, whh_b=whh_b, bgi_b=bgi_b, bhn_b=bhn_b)


# --------------------------- pure-JAX reference -------------------------------
def _gru_ref(x_tm, wih, whh, bih, bhh, *, mxu_precision):
    """Mirrors the kernel math.  mxu_precision emulates the kernel's bf16 MXU
    operands / bf16 gate-preactivation storage (padding is numerically exact,
    so it needs no emulation)."""
    T, B = x_tm.shape[0], x_tm.shape[1]
    C = whh.shape[1]

    def dot(a, b):
        if mxu_precision:
            a = a.astype(MXU_DTYPE)
            b = b.astype(MXU_DTYPE)
        return jnp.dot(a, b, preferred_element_type=jnp.float32)

    bgi = jnp.concatenate([bih[:2 * C] + bhh[:2 * C], bih[2 * C:]])
    gi_all = dot(x_tm.reshape(T * B, C), wih.T) + bgi
    if mxu_precision:
        gi_all = gi_all.astype(GI_DTYPE).astype(jnp.float32)
    gi_all = gi_all.reshape(T, B, 3 * C)
    bhn = bhh[2 * C:]

    def step(h, gi):
        gh = dot(h, whh.T)
        r = jax.nn.sigmoid(gi[:, :C] + gh[:, :C])
        z = jax.nn.sigmoid(gi[:, C:2 * C] + gh[:, C:2 * C])
        n = jnp.tanh(gi[:, 2 * C:] + r * (gh[:, 2 * C:] + bhn))
        h_new = (1.0 - z) * n + z * h
        return h_new, h_new

    h0 = jnp.zeros((B, C), jnp.float32)
    return lax.scan(step, h0, gi_all)[1]


def gptgru_reference(x, raw, *, mxu_precision=False):
    x_tm = jnp.transpose(x, (1, 0, 2)).astype(jnp.float32)
    mid = _gelu_exact(_gru_ref(x_tm, raw["wih_f"], raw["whh_f"],
                               raw["bih_f"], raw["bhh_f"],
                               mxu_precision=mxu_precision))
    hb = _gru_ref(mid[::-1], raw["wih_b"], raw["whh_b"],
                  raw["bih_b"], raw["bhh_b"], mxu_precision=mxu_precision)
    y = _gelu_exact(hb[::-1])
    return jnp.transpose(y, (1, 0, 2))


if __name__ == "__main__":
    B, T, C = 2, 8, 32
    key = jax.random.PRNGKey(0)
    kx, kp = jax.random.split(key)
    x = jax.random.normal(kx, (B, T, C), jnp.float32)

    raw = init_params(kp, C)
    kparams = prep_kernel_params(raw, C)

    out = gptgru_forward(x, kparams)
    jax.block_until_ready(out)
    assert out.shape == (B, T, C) and out.dtype == jnp.float32

    # Tight check vs a reference that emulates the kernel's MXU precision
    # (bf16 operands, f32 accumulation, bf16 gate-preactivation storage).
    ref_mxu = gptgru_reference(x, raw, mxu_precision=True)
    err = float(jnp.max(jnp.abs(out - ref_mxu)))
    assert jnp.allclose(out, ref_mxu, atol=5e-3, rtol=5e-3), err

    # Loose sanity check vs the exact-f32 PyTorch-equivalent reference
    # (gap is purely bf16 MXU operand / gi-storage rounding).
    ref_f32 = gptgru_reference(x, raw, mxu_precision=False)
    err32 = float(jnp.max(jnp.abs(out - ref_f32)))
    assert jnp.allclose(out, ref_f32, atol=1e-1, rtol=1e-1), err32

    print("KERNEL_OK")
</pallas_src>

<mosaic_0001>
module attributes {stable_mosaic.version = 11 : i64} {
  func.func @gptgru_kernel(%arg0: i32, %arg1: memref<8x8x128xf32, #tpu.memory_space<vmem>>, %arg2: memref<128x384xbf16, #tpu.memory_space<vmem>>, %arg3: memref<128x384xbf16, #tpu.memory_space<vmem>>, %arg4: memref<1x384xf32, #tpu.memory_space<vmem>>, %arg5: memref<1x128xf32, #tpu.memory_space<vmem>>, %arg6: memref<128x384xbf16, #tpu.memory_space<vmem>>, %arg7: memref<128x384xbf16, #tpu.memory_space<vmem>>, %arg8: memref<1x384xf32, #tpu.memory_space<vmem>>, %arg9: memref<1x128xf32, #tpu.memory_space<vmem>>, %arg10: memref<8x8x128xf32, #tpu.memory_space<vmem>>, %arg11: memref<8x8x384xbf16, #tpu.memory_space<vmem>>) attributes {dimension_semantics = [#tpu.dimension_semantics<parallel>], iteration_bounds = array<i64: 1>, scalar_prefetch = 0 : i64, scratch_operands = 1 : i64, tpu.core_type = #tpu.core_type<tc>, window_params = [{transform_indices = @transform_0, window_bounds = array<i64: 8, 8, 128>}, {pipeline_mode = #tpu.pipeline_mode<synchronous>, transform_indices = @transform_1, window_bounds = array<i64: 128, 384>}, {pipeline_mode = #tpu.pipeline_mode<synchronous>, transform_indices = @transform_2, window_bounds = array<i64: 128, 384>}, {pipeline_mode = #tpu.pipeline_mode<synchronous>, transform_indices = @transform_3, window_bounds = array<i64: 1, 384>}, {pipeline_mode = #tpu.pipeline_mode<synchronous>, transform_indices = @transform_4, window_bounds = array<i64: 1, 128>}, {pipeline_mode = #tpu.pipeline_mode<synchronous>, transform_indices = @transform_5, window_bounds = array<i64: 128, 384>}, {pipeline_mode = #tpu.pipeline_mode<synchronous>, transform_indices = @transform_6, window_bounds = array<i64: 128, 384>}, {pipeline_mode = #tpu.pipeline_mode<synchronous>, transform_indices = @transform_7, window_bounds = array<i64: 1, 384>}, {pipeline_mode = #tpu.pipeline_mode<synchronous>, transform_indices = @transform_8, window_bounds = array<i64: 1, 128>}, {transform_indices = @transform_9, window_bounds = array<i64: 8, 8, 128>}]} {
    %c0 = arith.constant 0 : index
    %c0_0 = arith.constant 0 : index
    %c0_1 = arith.constant 0 : index
    %0 = vector.load %arg1[%c0, %c0_0, %c0_1] : memref<8x8x128xf32, #tpu.memory_space<vmem>>, vector<8x8x128xf32>
    %1 = vector.shape_cast %0 : vector<8x8x128xf32> to vector<64x128xf32>
    %2 = arith.truncf %1 : vector<64x128xf32> to vector<64x128xbf16>
    %c0_2 = arith.constant 0 : index
    %c0_3 = arith.constant 0 : index
    %3 = vector.load %arg2[%c0_2, %c0_3] : memref<128x384xbf16, #tpu.memory_space<vmem>>, vector<128x384xbf16>
    %cst = arith.constant dense<0.000000e+00> : vector<64x384xf32>
    %4 = tpu.matmul %2, %3, %cst {dimension_numbers = #tpu.dot_dimension_numbers<[1], [0], [0], [1], [0, 0, 1, 1], [], []>} : vector<64x128xbf16>, vector<128x384xbf16>, vector<64x384xf32> -> vector<64x384xf32>
    %c0_4 = arith.constant 0 : index
    %c0_5 = arith.constant 0 : index
    %5 = vector.load %arg4[%c0_4, %c0_5] : memref<1x384xf32, #tpu.memory_space<vmem>>, vector<1x384xf32>
    %6 = vector.broadcast %5 : vector<1x384xf32> to vector<64x384xf32>
    %7 = arith.addf %4, %6 : vector<64x384xf32>
    %8 = vector.shape_cast %7 : vector<64x384xf32> to vector<8x8x384xf32>
    %9 = arith.truncf %8 : vector<8x8x384xf32> to vector<8x8x384xbf16>
    %c0_6 = arith.constant 0 : index
    %c0_7 = arith.constant 0 : index
    %c0_8 = arith.constant 0 : index
    %10 = vector.load %arg11[%c0_6, %c0_7, %c0_8] : memref<8x8x384xbf16, #tpu.memory_space<vmem>>, vector<8x8x384xbf16>
    tpu.vector_store %arg11[%c0_6, %c0_7, %c0_8], %9 {strides = array<i32>} : memref<8x8x384xbf16, #tpu.memory_space<vmem>>, vector<8x8x384xbf16>,
    %c0_9 = arith.constant 0 : index
    %c0_10 = arith.constant 0 : index
    %11 = vector.load %arg5[%c0_9, %c0_10] : memref<1x128xf32, #tpu.memory_space<vmem>>, vector<1x128xf32>
    %cst_11 = arith.constant 0.000000e+00 : f32
    %12 = vector.broadcast %cst_11 : f32 to vector<8x128xf32>
    %c0_i32 = arith.constant 0 : i32
    %13 = arith.index_cast %c0_i32 : i32 to index
    %c0_12 = arith.constant 0 : index
    %c0_13 = arith.constant 0 : index
    %14 = vector.load %arg11[%13, %c0_12, %c0_13] : memref<8x8x384xbf16, #tpu.memory_space<vmem>>, vector<1x8x384xbf16>
    %15 = vector.shape_cast %14 : vector<1x8x384xbf16> to vector<8x384xbf16>
    %16 = arith.extf %15 : vector<8x384xbf16> to vector<8x384xf32>
    %17 = arith.truncf %12 : vector<8x128xf32> to vector<8x128xbf16>
    %c0_14 = arith.constant 0 : index
    %c0_15 = arith.constant 0 : index
    %18 = vector.load %arg3[%c0_14, %c0_15] : memref<128x384xbf16, #tpu.memory_space<vmem>>, vector<128x384xbf16>
    %cst_16 = arith.constant dense<0.000000e+00> : vector<8x384xf32>
    %19 = tpu.matmul %17, %18, %cst_16 {dimension_numbers = #tpu.dot_dimension_numbers<[1], [0], [0], [1], [0, 0, 1, 1], [], []>} : vector<8x128xbf16>, vector<128x384xbf16>, vector<8x384xf32> -> vector<8x384xf32>
    %20 = vector.extract_strided_slice %16 {offsets = [0, 0], sizes = [8, 128], strides = [1, 1]} : vector<8x384xf32> to vector<8x128xf32>
    %21 = vector.extract_strided_slice %19 {offsets = [0, 0], sizes = [8, 128], strides = [1, 1]} : vector<8x384xf32> to vector<8x128xf32>
    %22 = arith.addf %20, %21 : vector<8x128xf32>
    %23 = arith.negf %22 : vector<8x128xf32>
    %24 = math.exp %23 : vector<8x128xf32>
    %cst_17 = arith.constant 1.000000e+00 : f32
    %25 = vector.broadcast %cst_17 : f32 to vector<8x128xf32>
    %26 = arith.addf %25, %24 : vector<8x128xf32>
    %27 = arith.divf %25, %26 : vector<8x128xf32>
    %28 = vector.extract_strided_slice %16 {offsets = [0, 128], sizes = [8, 128], strides = [1, 1]} : vector<8x384xf32> to vector<8x128xf32>
    %29 = vector.extract_strided_slice %19 {offsets = [0, 128], sizes = [8, 128], strides = [1, 1]} : vector<8x384xf32> to vector<8x128xf32>
    %30 = arith.addf %28, %29 : vector<8x128xf32>
    %31 = arith.negf %30 : vector<8x128xf32>
    %32 = math.exp %31 : vector<8x128xf32>
    %cst_18 = arith.constant 1.000000e+00 : f32
    %33 = vector.broadcast %cst_18 : f32 to vector<8x128xf32>
    %34 = arith.addf %33, %32 : vector<8x128xf32>
    %35 = arith.divf %33, %34 : vector<8x128xf32>
    %36 = vector.extract_strided_slice %16 {offsets = [0, 256], sizes = [8, 128], strides = [1, 1]} : vector<8x384xf32> to vector<8x128xf32>
    %37 = vector.extract_strided_slice %19 {offsets = [0, 256], sizes = [8, 128], strides = [1, 1]} : vector<8x384xf32> to vector<8x128xf32>
    %38 = vector.broadcast %11 : vector<1x128xf32> to vector<8x128xf32>
    %39 = arith.addf %37, %38 : vector<8x128xf32>
    %40 = arith.mulf %27, %39 : vector<8x128xf32>
    %41 = arith.addf %36, %40 : vector<8x128xf32>
    %42 = math.tanh %41 : vector<8x128xf32>
    %cst_19 = arith.constant 1.000000e+00 : f32
    %43 = vector.broadcast %cst_19 : f32 to vector<8x128xf32>
    %44 = arith.subf %43, %35 : vector<8x128xf32>
    %45 = arith.mulf %44, %42 : vector<8x128xf32>
    %46 = arith.mulf %35, %12 : vector<8x128xf32>
    %47 = arith.addf %45, %46 : vector<8x128xf32>
    %48 = arith.index_cast %c0_i32 : i32 to index
    %c0_20 = arith.constant 0 : index
    %c0_21 = arith.constant 0 : index
    %49 = vector.load %arg10[%48, %c0_20, %c0_21] : memref<8x8x128xf32, #tpu.memory_space<vmem>>, vector<1x8x128xf32>
    %50 = vector.shape_cast %49 : vector<1x8x128xf32> to vector<8x128xf32>
    %51 = vector.shape_cast %47 : vector<8x128xf32> to vector<1x8x128xf32>
    tpu.vector_store %arg10[%48, %c0_20, %c0_21], %51 {strides = array<i32>} : memref<8x8x128xf32, #tpu.memory_space<vmem>>, vector<1x8x128xf32>,
    %c1_i32 = arith.constant 1 : i32
    %52 = arith.index_cast %c1_i32 : i32 to index
    %c0_22 = arith.constant 0 : index
    %c0_23 = arith.constant 0 : index
    %53 = vector.load %arg11[%52, %c0_22, %c0_23] : memref<8x8x384xbf16, #tpu.memory_space<vmem>>, vector<1x8x384xbf16>
    %54 = vector.shape_cast %53 : vector<1x8x384xbf16> to vector<8x384xbf16>
    %55 = arith.extf %54 : vector<8x384xbf16> to vector<8x384xf32>
    %56 = arith.truncf %47 : vector<8x128xf32> to vector<8x128xbf16>
    %c0_24 = arith.constant 0 : index
    %c0_25 = arith.constant 0 : index
    %57 = vector.load %arg3[%c0_24, %c0_25] : memref<128x384xbf16, #tpu.memory_space<vmem>>, vector<128x384xbf16>
    %cst_26 = arith.constant dense<0.000000e+00> : vector<8x384xf32>
    %58 = tpu.matmul %56, %57, %cst_26 {dimension_numbers = #tpu.dot_dimension_numbers<[1], [0], [0], [1], [0, 0, 1, 1], [], []>} : vector<8x128xbf16>, vector<128x384xbf16>, vector<8x384xf32> -> vector<8x384xf32>
    %59 = vector.extract_strided_slice %55 {offsets = [0, 0], sizes = [8, 128], strides = [1, 1]} : vector<8x384xf32> to vector<8x128xf32>
    %60 = vector.extract_strided_slice %58 {offsets = [0, 0], sizes = [8, 128], strides = [1, 1]} : vector<8x384xf32> to vector<8x128xf32>
    %61 = arith.addf %59, %60 : vector<8x128xf32>
    %62 = arith.negf %61 : vector<8x128xf32>
    %63 = math.exp %62 : vector<8x128xf32>
    %cst_27 = arith.constant 1.000000e+00 : f32
    %64 = vector.broadcast %cst_27 : f32 to vector<8x128xf32>
    %65 = arith.addf %64, %63 : vector<8x128xf32>
    %66 = arith.divf %64, %65 : vector<8x128xf32>
    %67 = vector.extract_strided_slice %55 {offsets = [0, 128], sizes = [8, 128], strides = [1, 1]} : vector<8x384xf32> to vector<8x128xf32>
    %68 = vector.extract_strided_slice %58 {offsets = [0, 128], sizes = [8, 128], strides = [1, 1]} : vector<8x384xf32> to vector<8x128xf32>
    %69 = arith.addf %67, %68 : vector<8x128xf32>
    %70 = arith.negf %69 : vector<8x128xf32>
    %71 = math.exp %70 : vector<8x128xf32>
    %cst_28 = arith.constant 1.000000e+00 : f32
    %72 = vector.broadcast %cst_28 : f32 to vector<8x128xf32>
    %73 = arith.addf %72, %71 : vector<8x128xf32>
    %74 = arith.divf %72, %73 : vector<8x128xf32>
    %75 = vector.extract_strided_slice %55 {offsets = [0, 256], sizes = [8, 128], strides = [1, 1]} : vector<8x384xf32> to vector<8x128xf32>
    %76 = vector.extract_strided_slice %58 {offsets = [0, 256], sizes = [8, 128], strides = [1, 1]} : vector<8x384xf32> to vector<8x128xf32>
    %77 = vector.broadcast %11 : vector<1x128xf32> to vector<8x128xf32>
    %78 = arith.addf %76, %77 : vector<8x128xf32>
    %79 = arith.mulf %66, %78 : vector<8x128xf32>
    %80 = arith.addf %75, %79 : vector<8x128xf32>
    %81 = math.tanh %80 : vector<8x128xf32>
    %cst_29 = arith.constant 1.000000e+00 : f32
    %82 = vector.broadcast %cst_29 : f32 to vector<8x128xf32>
    %83 = arith.subf %82, %74 : vector<8x128xf32>
    %84 = arith.mulf %83, %81 : vector<8x128xf32>
    %85 = arith.mulf %74, %47 : vector<8x128xf32>
    %86 = arith.addf %84, %85 : vector<8x128xf32>
    %87 = arith.index_cast %c1_i32 : i32 to index
    %c0_30 = arith.constant 0 : index
    %c0_31 = arith.constant 0 : index
    %88 = vector.load %arg10[%87, %c0_30, %c0_31] : memref<8x8x128xf32, #tpu.memory_space<vmem>>, vector<1x8x128xf32>
    %89 = vector.shape_cast %88 : vector<1x8x128xf32> to vector<8x128xf32>
    %90 = vector.shape_cast %86 : vector<8x128xf32> to vector<1x8x128xf32>
    tpu.vector_store %arg10[%87, %c0_30, %c0_31], %90 {strides = array<i32>} : memref<8x8x128xf32, #tpu.memory_space<vmem>>, vector<1x8x128xf32>,
    %c2_i32 = arith.constant 2 : i32
    %91 = arith.index_cast %c2_i32 : i32 to index
    %c0_32 = arith.constant 0 : index
    %c0_33 = arith.constant 0 : index
    %92 = vector.load %arg11[%91, %c0_32, %c0_33] : memref<8x8x384xbf16, #tpu.memory_space<vmem>>, vector<1x8x384xbf16>
    %93 = vector.shape_cast %92 : vector<1x8x384xbf16> to vector<8x384xbf16>
    %94 = arith.extf %93 : vector<8x384xbf16> to vector<8x384xf32>
    %95 = arith.truncf %86 : vector<8x128xf32> to vector<8x128xbf16>
    %c0_34 = arith.constant 0 : index
    %c0_35 = arith.constant 0 : index
    %96 = vector.load %arg3[%c0_34, %c0_35] : memref<128x384xbf16, #tpu.memory_space<vmem>>, vector<128x384xbf16>
    %cst_36 = arith.constant dense<0.000000e+00> : vector<8x384xf32>
    %97 = tpu.matmul %95, %96, %cst_36 {dimension_numbers = #tpu.dot_dimension_numbers<[1], [0], [0], [1], [0, 0, 1, 1], [], []>} : vector<8x128xbf16>, vector<128x384xbf16>, vector<8x384xf32> -> vector<8x384xf32>
    %98 = vector.extract_strided_slice %94 {offsets = [0, 0], sizes = [8, 128], strides = [1, 1]} : vector<8x384xf32> to vector<8x128xf32>
    %99 = vector.extract_strided_slice %97 {offsets = [0, 0], sizes = [8, 128], strides = [1, 1]} : vector<8x384xf32> to vector<8x128xf32>
    %100 = arith.addf %98, %99 : vector<8x128xf32>
    %101 = arith.negf %100 : vector<8x128xf32>
    %102 = math.exp %101 : vector<8x128xf32>
    %cst_37 = arith.constant 1.000000e+00 : f32
    %103 = vector.broadcast %cst_37 : f32 to vector<8x128xf32>
    %104 = arith.addf %103, %102 : vector<8x128xf32>
    %105 = arith.divf %103, %104 : vector<8x128xf32>
    %106 = vector.extract_strided_slice %94 {offsets = [0, 128], sizes = [8, 128], strides = [1, 1]} : vector<8x384xf32> to vector<8x128xf32>
    %107 = vector.extract_strided_slice %97 {offsets = [0, 128], sizes = [8, 128], strides = [1, 1]} : vector<8x384xf32> to vector<8x128xf32>
    %108 = arith.addf %106, %107 : vector<8x128xf32>
    %109 = arith.negf %108 : vector<8x128xf32>
    %110 = math.exp %109 : vector<8x128xf32>
    %cst_38 = arith.constant 1.000000e+00 : f32
    %111 = vector.broadcast %cst_38 : f32 to vector<8x128xf32>
    %112 = arith.addf %111, %110 : vector<8x128xf32>
    %113 = arith.divf %111, %112 : vector<8x128xf32>
    %114 = vector.extract_strided_slice %94 {offsets = [0, 256], sizes = [8, 128], strides = [1, 1]} : vector<8x384xf32> to vector<8x128xf32>
    %115 = vector.extract_strided_slice %97 {offsets = [0, 256], sizes = [8, 128], strides = [1, 1]} : vector<8x384xf32> to vector<8x128xf32>
    %116 = vector.broadcast %11 : vector<1x128xf32> to vector<8x128xf32>
    %117 = arith.addf %115, %116 : vector<8x128xf32>
    %118 = arith.mulf %105, %117 : vector<8x128xf32>
    %119 = arith.addf %114, %118 : vector<8x128xf32>
    %120 = math.tanh %119 : vector<8x128xf32>
    %cst_39 = arith.constant 1.000000e+00 : f32
    %121 = vector.broadcast %cst_39 : f32 to vector<8x128xf32>
    %122 = arith.subf %121, %113 : vector<8x128xf32>
    %123 = arith.mulf %122, %120 : vector<8x128xf32>
    %124 = arith.mulf %113, %86 : vector<8x128xf32>
    %125 = arith.addf %123, %124 : vector<8x128xf32>
    %126 = arith.index_cast %c2_i32 : i32 to index
    %c0_40 = arith.constant 0 : index
    %c0_41 = arith.constant 0 : index
    %127 = vector.load %arg10[%126, %c0_40, %c0_41] : memref<8x8x128xf32, #tpu.memory_space<vmem>>, vector<1x8x128xf32>
    %128 = vector.shape_cast %127 : vector<1x8x128xf32> to vector<8x128xf32>
    %129 = vector.shape_cast %125 : vector<8x128xf32> to vector<1x8x128xf32>
    tpu.vector_store %arg10[%126, %c0_40, %c0_41], %129 {strides = array<i32>} : memref<8x8x128xf32, #tpu.memory_space<vmem>>, vector<1x8x128xf32>,
    %c3_i32 = arith.constant 3 : i32
    %130 = arith.index_cast %c3_i32 : i32 to index
    %c0_42 = arith.constant 0 : index
    %c0_43 = arith.constant 0 : index
    %131 = vector.load %arg11[%130, %c0_42, %c0_43] : memref<8x8x384xbf16, #tpu.memory_space<vmem>>, vector<1x8x384xbf16>
    %132 = vector.shape_cast %131 : vector<1x8x384xbf16> to vector<8x384xbf16>
    %133 = arith.extf %132 : vector<8x384xbf16> to vector<8x384xf32>
    %134 = arith.truncf %125 : vector<8x128xf32> to vector<8x128xbf16>
    %c0_44 = arith.constant 0 : index
    %c0_45 = arith.constant 0 : index
    %135 = vector.load %arg3[%c0_44, %c0_45] : memref<128x384xbf16, #tpu.memory_space<vmem>>, vector<128x384xbf16>
    %cst_46 = arith.constant dense<0.000000e+00> : vector<8x384xf32>
    %136 = tpu.matmul %134, %135, %cst_46 {dimension_numbers = #tpu.dot_dimension_numbers<[1], [0], [0], [1], [0, 0, 1, 1], [], []>} : vector<8x128xbf16>, vector<128x384xbf16>, vector<8x384xf32> -> vector<8x384xf32>
    %137 = vector.extract_strided_slice %133 {offsets = [0, 0], sizes = [8, 128], strides = [1, 1]} : vector<8x384xf32> to vector<8x128xf32>
    %138 = vector.extract_strided_slice %136 {offsets = [0, 0], sizes = [8, 128], strides = [1, 1]} : vector<8x384xf32> to vector<8x128xf32>
    %139 = arith.addf %137, %138 : vector<8x128xf32>
    %140 = arith.negf %139 : vector<8x128xf32>
    %141 = math.exp %140 : vector<8x128xf32>
    %cst_47 = arith.constant 1.000000e+00 : f32
    %142 = vector.broadcast %cst_47 : f32 to vector<8x128xf32>
    %143 = arith.addf %142, %141 : vector<8x128xf32>
    %144 = arith.divf %142, %143 : vector<8x128xf32>
    %145 = vector.extract_strided_slice %133 {offsets = [0, 128], sizes = [8, 128], strides = [1, 1]} : vector<8x384xf32> to vector<8x128xf32>
    %146 = vector.extract_strided_slice %136 {offsets = [0, 128], sizes = [8, 128], strides = [1, 1]} : vector<8x384xf32> to vector<8x128xf32>
    %147 = arith.addf %145, %146 : vector<8x128xf32>
    %148 = arith.negf %147 : vector<8x128xf32>
    %149 = math.exp %148 : vector<8x128xf32>
    %cst_48 = arith.constant 1.000000e+00 : f32
    %150 = vector.broadcast %cst_48 : f32 to vector<8x128xf32>
    %151 = arith.addf %150, %149 : vector<8x128xf32>
    %152 = arith.divf %150, %151 : vector<8x128xf32>
    %153 = vector.extract_strided_slice %133 {offsets = [0, 256], sizes = [8, 128], strides = [1, 1]} : vector<8x384xf32> to vector<8x128xf32>
    %154 = vector.extract_strided_slice %136 {offsets = [0, 256], sizes = [8, 128], strides = [1, 1]} : vector<8x384xf32> to vector<8x128xf32>
    %155 = vector.broadcast %11 : vector<1x128xf32> to vector<8x128xf32>
    %156 = arith.addf %154, %155 : vector<8x128xf32>
    %157 = arith.mulf %144, %156 : vector<8x128xf32>
    %158 = arith.addf %153, %157 : vector<8x128xf32>
    %159 = math.tanh %158 : vector<8x128xf32>
    %cst_49 = arith.constant 1.000000e+00 : f32
    %160 = vector.broadcast %cst_49 : f32 to vector<8x128xf32>
    %161 = arith.subf %160, %152 : vector<8x128xf32>
    %162 = arith.mulf %161, %159 : vector<8x128xf32>
    %163 = arith.mulf %152, %125 : vector<8x128xf32>
    %164 = arith.addf %162, %163 : vector<8x128xf32>
    %165 = arith.index_cast %c3_i32 : i32 to index
    %c0_50 = arith.constant 0 : index
    %c0_51 = arith.constant 0 : index
    %166 = vector.load %arg10[%165, %c0_50, %c0_51] : memref<8x8x128xf32, #tpu.memory_space<vmem>>, vector<1x8x128xf32>
    %167 = vector.shape_cast %166 : vector<1x8x128xf32> to vector<8x128xf32>
    %168 = vector.shape_cast %164 : vector<8x128xf32> to vector<1x8x128xf32>
    tpu.vector_store %arg10[%165, %c0_50, %c0_51], %168 {strides = array<i32>} : memref<8x8x128xf32, #tpu.memory_space<vmem>>, vector<1x8x128xf32>,
    %c4_i32 = arith.constant 4 : i32
    %169 = arith.index_cast %c4_i32 : i32 to index
    %c0_52 = arith.constant 0 : index
    %c0_53 = arith.constant 0 : index
    %170 = vector.load %arg11[%169, %c0_52, %c0_53] : memref<8x8x384xbf16, #tpu.memory_space<vmem>>, vector<1x8x384xbf16>
    %171 = vector.shape_cast %170 : vector<1x8x384xbf16> to vector<8x384xbf16>
    %172 = arith.extf %171 : vector<8x384xbf16> to vector<8x384xf32>
    %173 = arith.truncf %164 : vector<8x128xf32> to vector<8x128xbf16>
    %c0_54 = arith.constant 0 : index
    %c0_55 = arith.constant 0 : index
    %174 = vector.load %arg3[%c0_54, %c0_55] : memref<128x384xbf16, #tpu.memory_space<vmem>>, vector<128x384xbf16>
    %cst_56 = arith.constant dense<0.000000e+00> : vector<8x384xf32>
    %175 = tpu.matmul %173, %174, %cst_56 {dimension_numbers = #tpu.dot_dimension_numbers<[1], [0], [0], [1], [0, 0, 1, 1], [], []>} : vector<8x128xbf16>, vector<128x384xbf16>, vector<8x384xf32> -> vector<8x384xf32>
    %176 = vector.extract_strided_slice %172 {offsets = [0, 0], sizes = [8, 128], strides = [1, 1]} : vector<8x384xf32> to vector<8x128xf32>
    %177 = vector.extract_strided_slice %175 {offsets = [0, 0], sizes = [8, 128], strides = [1, 1]} : vector<8x384xf32> to vector<8x128xf32>
    %178 = arith.addf %176, %177 : vector<8x128xf32>
    %179 = arith.negf %178 : vector<8x128xf32>
    %180 = math.exp %179 : vector<8x128xf32>
    %cst_57 = arith.constant 1.000000e+00 : f32
    %181 = vector.broadcast %cst_57 : f32 to vector<8x128xf32>
    %182 = arith.addf %181, %180 : vector<8x128xf32>
    %183 = arith.divf %181, %182 : vector<8x128xf32>
    %184 = vector.extract_strided_slice %172 {offsets = [0, 128], sizes = [8, 128], strides = [1, 1]} : vector<8x384xf32> to vector<8x128xf32>
    %185 = vector.extract_strided_slice %175 {offsets = [0, 128], sizes = [8, 128], strides = [1, 1]} : vector<8x384xf32> to vector<8x128xf32>
    %186 = arith.addf %184, %185 : vector<8x128xf32>
    %187 = arith.negf %186 : vector<8x128xf32>
    %188 = math.exp %187 : vector<8x128xf32>
    %cst_58 = arith.constant 1.000000e+00 : f32
    %189 = vector.broadcast %cst_58 : f32 to vector<8x128xf32>
    %190 = arith.addf %189, %188 : vector<8x128xf32>
    %191 = arith.divf %189, %190 : vector<8x128xf32>
    %192 = vector.extract_strided_slice %172 {offsets = [0, 256], sizes = [8, 128], strides = [1, 1]} : vector<8x384xf32> to vector<8x128xf32>
    %193 = vector.extract_strided_slice %175 {offsets = [0, 256], sizes = [8, 128], strides = [1, 1]} : vector<8x384xf32> to vector<8x128xf32>
    %194 = vector.broadcast %11 : vector<1x128xf32> to vector<8x128xf32>
    %195 = arith.addf %193, %194 : vector<8x128xf32>
    %196 = arith.mulf %183, %195 : vector<8x128xf32>
    %197 = arith.addf %192, %196 : vector<8x128xf32>
    %198 = math.tanh %197 : vector<8x128xf32>
    %cst_59 = arith.constant 1.000000e+00 : f32
    %199 = vector.broadcast %cst_59 : f32 to vector<8x128xf32>
    %200 = arith.subf %199, %191 : vector<8x128xf32>
    %201 = arith.mulf %200, %198 : vector<8x128xf32>
    %202 = arith.mulf %191, %164 : vector<8x128xf32>
    %203 = arith.addf %201, %202 : vector<8x128xf32>
    %204 = arith.index_cast %c4_i32 : i32 to index
    %c0_60 = arith.constant 0 : index
    %c0_61 = arith.constant 0 : index
    %205 = vector.load %arg10[%204, %c0_60, %c0_61] : memref<8x8x128xf32, #tpu.memory_space<vmem>>, vector<1x8x128xf32>
    %206 = vector.shape_cast %205 : vector<1x8x128xf32> to vector<8x128xf32>
    %207 = vector.shape_cast %203 : vector<8x128xf32> to vector<1x8x128xf32>
    tpu.vector_store %arg10[%204, %c0_60, %c0_61], %207 {strides = array<i32>} : memref<8x8x128xf32, #tpu.memory_space<vmem>>, vector<1x8x128xf32>,
    %c5_i32 = arith.constant 5 : i32
    %208 = arith.index_cast %c5_i32 : i32 to index
    %c0_62 = arith.constant 0 : index
    %c0_63 = arith.constant 0 : index
    %209 = vector.load %arg11[%208, %c0_62, %c0_63] : memref<8x8x384xbf16, #tpu.memory_space<vmem>>, vector<1x8x384xbf16>
    %210 = vector.shape_cast %209 : vector<1x8x384xbf16> to vector<8x384xbf16>
    %211 = arith.extf %210 : vector<8x384xbf16> to vector<8x384xf32>
    %212 = arith.truncf %203 : vector<8x128xf32> to vector<8x128xbf16>
    %c0_64 = arith.constant 0 : index
    %c0_65 = arith.constant 0 : index
    %213 = vector.load %arg3[%c0_64, %c0_65] : memref<128x384xbf16, #tpu.memory_space<vmem>>, vector<128x384xbf16>
    %cst_66 = arith.constant dense<0.000000e+00> : vector<8x384xf32>
    %214 = tpu.matmul %212, %213, %cst_66 {dimension_numbers = #tpu.dot_dimension_numbers<[1], [0], [0], [1], [0, 0, 1, 1], [], []>} : vector<8x128xbf16>, vector<128x384xbf16>, vector<8x384xf32> -> vector<8x384xf32>
    %215 = vector.extract_strided_slice %211 {offsets = [0, 0], sizes = [8, 128], strides = [1, 1]} : vector<8x384xf32> to vector<8x128xf32>
    %216 = vector.extract_strided_slice %214 {offsets = [0, 0], sizes = [8, 128], strides = [1, 1]} : vector<8x384xf32> to vector<8x128xf32>
    %217 = arith.addf %215, %216 : vector<8x128xf32>
    %218 = arith.negf %217 : vector<8x128xf32>
    %219 = math.exp %218 : vector<8x128xf32>
    %cst_67 = arith.constant 1.000000e+00 : f32
    %220 = vector.broadcast %cst_67 : f32 to vector<8x128xf32>
    %221 = arith.addf %220, %219 : vector<8x128xf32>
    %222 = arith.divf %220, %221 : vector<8x128xf32>
    %223 = vector.extract_strided_slice %211 {offsets = [0, 128], sizes = [8, 128], strides = [1, 1]} : vector<8x384xf32> to vector<8x128xf32>
    %224 = vector.extract_strided_slice %214 {offsets = [0, 128], sizes = [8, 128], strides = [1, 1]} : vector<8x384xf32> to vector<8x128xf32>
    %225 = arith.addf %223, %224 : vector<8x128xf32>
    %226 = arith.negf %225 : vector<8x128xf32>
    %227 = math.exp %226 : vector<8x128xf32>
    %cst_68 = arith.constant 1.000000e+00 : f32
    %228 = vector.broadcast %cst_68 : f32 to vector<8x128xf32>
    %229 = arith.addf %228, %227 : vector<8x128xf32>
    %230 = arith.divf %228, %229 : vector<8x128xf32>
    %231 = vector.extract_strided_slice %211 {offsets = [0, 256], sizes = [8, 128], strides = [1, 1]} : vector<8x384xf32> to vector<8x128xf32>
    %232 = vector.extract_strided_slice %214 {offsets = [0, 256], sizes = [8, 128], strides = [1, 1]} : vector<8x384xf32> to vector<8x128xf32>
    %233 = vector.broadcast %11 : vector<1x128xf32> to vector<8x128xf32>
    %234 = arith.addf %232, %233 : vector<8x128xf32>
    %235 = arith.mulf %222, %234 : vector<8x128xf32>
    %236 = arith.addf %231, %235 : vector<8x128xf32>
    %237 = math.tanh %236 : vector<8x128xf32>
    %cst_69 = arith.constant 1.000000e+00 : f32
    %238 = vector.broadcast %cst_69 : f32 to vector<8x128xf32>
    %239 = arith.subf %238, %230 : vector<8x128xf32>
    %240 = arith.mulf %239, %237 : vector<8x128xf32>
    %241 = arith.mulf %230, %203 : vector<8x128xf32>
    %242 = arith.addf %240, %241 : vector<8x128xf32>
    %243 = arith.index_cast %c5_i32 : i32 to index
    %c0_70 = arith.constant 0 : index
    %c0_71 = arith.constant 0 : index
    %244 = vector.load %arg10[%243, %c0_70, %c0_71] : memref<8x8x128xf32, #tpu.memory_space<vmem>>, vector<1x8x128xf32>
    %245 = vector.shape_cast %244 : vector<1x8x128xf32> to vector<8x128xf32>
    %246 = vector.shape_cast %242 : vector<8x128xf32> to vector<1x8x128xf32>
    tpu.vector_store %arg10[%243, %c0_70, %c0_71], %246 {strides = array<i32>} : memref<8x8x128xf32, #tpu.memory_space<vmem>>, vector<1x8x128xf32>,
    %c6_i32 = arith.constant 6 : i32
    %247 = arith.index_cast %c6_i32 : i32 to index
    %c0_72 = arith.constant 0 : index
    %c0_73 = arith.constant 0 : index
    %248 = vector.load %arg11[%247, %c0_72, %c0_73] : memref<8x8x384xbf16, #tpu.memory_space<vmem>>, vector<1x8x384xbf16>
    %249 = vector.shape_cast %248 : vector<1x8x384xbf16> to vector<8x384xbf16>
    %250 = arith.extf %249 : vector<8x384xbf16> to vector<8x384xf32>
    %251 = arith.truncf %242 : vector<8x128xf32> to vector<8x128xbf16>
    %c0_74 = arith.constant 0 : index
    %c0_75 = arith.constant 0 : index
    %252 = vector.load %arg3[%c0_74, %c0_75] : memref<128x384xbf16, #tpu.memory_space<vmem>>, vector<128x384xbf16>
    %cst_76 = arith.constant dense<0.000000e+00> : vector<8x384xf32>
    %253 = tpu.matmul %251, %252, %cst_76 {dimension_numbers = #tpu.dot_dimension_numbers<[1], [0], [0], [1], [0, 0, 1, 1], [], []>} : vector<8x128xbf16>, vector<128x384xbf16>, vector<8x384xf32> -> vector<8x384xf32>
    %254 = vector.extract_strided_slice %250 {offsets = [0, 0], sizes = [8, 128], strides = [1, 1]} : vector<8x384xf32> to vector<8x128xf32>
    %255 = vector.extract_strided_slice %253 {offsets = [0, 0], sizes = [8, 128], strides = [1, 1]} : vector<8x384xf32> to vector<8x128xf32>
    %256 = arith.addf %254, %255 : vector<8x128xf32>
    %257 = arith.negf %256 : vector<8x128xf32>
    %258 = math.exp %257 : vector<8x128xf32>
    %cst_77 = arith.constant 1.000000e+00 : f32
    %259 = vector.broadcast %cst_77 : f32 to vector<8x128xf32>
    %260 = arith.addf %259, %258 : vector<8x128xf32>
    %261 = arith.divf %259, %260 : vector<8x128xf32>
    %262 = vector.extract_strided_slice %250 {offsets = [0, 128], sizes = [8, 128], strides = [1, 1]} : vector<8x384xf32> to vector<8x128xf32>
    %263 = vector.extract_strided_slice %253 {offsets = [0, 128], sizes = [8, 128], strides = [1, 1]} : vector<8x384xf32> to vector<8x128xf32>
    %264 = arith.addf %262, %263 : vector<8x128xf32>
    %265 = arith.negf %264 : vector<8x128xf32>
    %266 = math.exp %265 : vector<8x128xf32>
    %cst_78 = arith.constant 1.000000e+00 : f32
    %267 = vector.broadcast %cst_78 : f32 to vector<8x128xf32>
    %268 = arith.addf %267, %266 : vector<8x128xf32>
    %269 = arith.divf %267, %268 : vector<8x128xf32>
    %270 = vector.extract_strided_slice %250 {offsets = [0, 256], sizes = [8, 128], strides = [1, 1]} : vector<8x384xf32> to vector<8x128xf32>
    %271 = vector.extract_strided_slice %253 {offsets = [0, 256], sizes = [8, 128], strides = [1, 1]} : vector<8x384xf32> to vector<8x128xf32>
    %272 = vector.broadcast %11 : vector<1x128xf32> to vector<8x128xf32>
    %273 = arith.addf %271, %272 : vector<8x128xf32>
    %274 = arith.mulf %261, %273 : vector<8x128xf32>
    %275 = arith.addf %270, %274 : vector<8x128xf32>
    %276 = math.tanh %275 : vector<8x128xf32>
    %cst_79 = arith.constant 1.000000e+00 : f32
    %277 = vector.broadcast %cst_79 : f32 to vector<8x128xf32>
    %278 = arith.subf %277, %269 : vector<8x128xf32>
    %279 = arith.mulf %278, %276 : vector<8x128xf32>
    %280 = arith.mulf %269, %242 : vector<8x128xf32>
    %281 = arith.addf %279, %280 : vector<8x128xf32>
    %282 = arith.index_cast %c6_i32 : i32 to index
    %c0_80 = arith.constant 0 : index
    %c0_81 = arith.constant 0 : index
    %283 = vector.load %arg10[%282, %c0_80, %c0_81] : memref<8x8x128xf32, #tpu.memory_space<vmem>>, vector<1x8x128xf32>
    %284 = vector.shape_cast %283 : vector<1x8x128xf32> to vector<8x128xf32>
    %285 = vector.shape_cast %281 : vector<8x128xf32> to vector<1x8x128xf32>
    tpu.vector_store %arg10[%282, %c0_80, %c0_81], %285 {strides = array<i32>} : memref<8x8x128xf32, #tpu.memory_space<vmem>>, vector<1x8x128xf32>,
    %c7_i32 = arith.constant 7 : i32
    %286 = arith.index_cast %c7_i32 : i32 to index
    %c0_82 = arith.constant 0 : index
    %c0_83 = arith.constant 0 : index
    %287 = vector.load %arg11[%286, %c0_82, %c0_83] : memref<8x8x384xbf16, #tpu.memory_space<vmem>>, vector<1x8x384xbf16>
    %288 = vector.shape_cast %287 : vector<1x8x384xbf16> to vector<8x384xbf16>
    %289 = arith.extf %288 : vector<8x384xbf16> to vector<8x384xf32>
    %290 = arith.truncf %281 : vector<8x128xf32> to vector<8x128xbf16>
    %c0_84 = arith.constant 0 : index
    %c0_85 = arith.constant 0 : index
    %291 = vector.load %arg3[%c0_84, %c0_85] : memref<128x384xbf16, #tpu.memory_space<vmem>>, vector<128x384xbf16>
    %cst_86 = arith.constant dense<0.000000e+00> : vector<8x384xf32>
    %292 = tpu.matmul %290, %291, %cst_86 {dimension_numbers = #tpu.dot_dimension_numbers<[1], [0], [0], [1], [0, 0, 1, 1], [], []>} : vector<8x128xbf16>, vector<128x384xbf16>, vector<8x384xf32> -> vector<8x384xf32>
    %293 = vector.extract_strided_slice %289 {offsets = [0, 0], sizes = [8, 128], strides = [1, 1]} : vector<8x384xf32> to vector<8x128xf32>
    %294 = vector.extract_strided_slice %292 {offsets = [0, 0], sizes = [8, 128], strides = [1, 1]} : vector<8x384xf32> to vector<8x128xf32>
    %295 = arith.addf %293, %294 : vector<8x128xf32>
    %296 = arith.negf %295 : vector<8x128xf32>
    %297 = math.exp %296 : vector<8x128xf32>
    %cst_87 = arith.constant 1.000000e+00 : f32
    %298 = vector.broadcast %cst_87 : f32 to vector<8x128xf32>
    %299 = arith.addf %298, %297 : vector<8x128xf32>
    %300 = arith.divf %298, %299 : vector<8x128xf32>
    %301 = vector.extract_strided_slice %289 {offsets = [0, 128], sizes = [8, 128], strides = [1, 1]} : vector<8x384xf32> to vector<8x128xf32>
    %302 = vector.extract_strided_slice %292 {offsets = [0, 128], sizes = [8, 128], strides = [1, 1]} : vector<8x384xf32> to vector<8x128xf32>
    %303 = arith.addf %301, %302 : vector<8x128xf32>
    %304 = arith.negf %303 : vector<8x128xf32>
    %305 = math.exp %304 : vector<8x128xf32>
    %cst_88 = arith.constant 1.000000e+00 : f32
    %306 = vector.broadcast %cst_88 : f32 to vector<8x128xf32>
    %307 = arith.addf %306, %305 : vector<8x128xf32>
    %308 = arith.divf %306, %307 : vector<8x128xf32>
    %309 = vector.extract_strided_slice %289 {offsets = [0, 256], sizes = [8, 128], strides = [1, 1]} : vector<8x384xf32> to vector<8x128xf32>
    %310 = vector.extract_strided_slice %292 {offsets = [0, 256], sizes = [8, 128], strides = [1, 1]} : vector<8x384xf32> to vector<8x128xf32>
    %311 = vector.broadcast %11 : vector<1x128xf32> to vector<8x128xf32>
    %312 = arith.addf %310, %311 : vector<8x128xf32>
    %313 = arith.mulf %300, %312 : vector<8x128xf32>
    %314 = arith.addf %309, %313 : vector<8x128xf32>
    %315 = math.tanh %314 : vector<8x128xf32>
    %cst_89 = arith.constant 1.000000e+00 : f32
    %316 = vector.broadcast %cst_89 : f32 to vector<8x128xf32>
    %317 = arith.subf %316, %308 : vector<8x128xf32>
    %318 = arith.mulf %317, %315 : vector<8x128xf32>
    %319 = arith.mulf %308, %281 : vector<8x128xf32>
    %320 = arith.addf %318, %319 : vector<8x128xf32>
    %321 = arith.index_cast %c7_i32 : i32 to index
    %c0_90 = arith.constant 0 : index
    %c0_91 = arith.constant 0 : index
    %322 = vector.load %arg10[%321, %c0_90, %c0_91] : memref<8x8x128xf32, #tpu.memory_space<vmem>>, vector<1x8x128xf32>
    %323 = vector.shape_cast %322 : vector<1x8x128xf32> to vector<8x128xf32>
    %324 = vector.shape_cast %320 : vector<8x128xf32> to vector<1x8x128xf32>
    tpu.vector_store %arg10[%321, %c0_90, %c0_91], %324 {strides = array<i32>} : memref<8x8x128xf32, #tpu.memory_space<vmem>>, vector<1x8x128xf32>,
    %c8_i32 = arith.constant 8 : i32
    %c0_92 = arith.constant 0 : index
    %c0_93 = arith.constant 0 : index
    %c0_94 = arith.constant 0 : index
    %325 = vector.load %arg10[%c0_92, %c0_93, %c0_94] : memref<8x8x128xf32, #tpu.memory_space<vmem>>, vector<8x8x128xf32>
    %cst_95 = arith.constant 5.000000e-01 : f32
    %326 = vector.broadcast %cst_95 : f32 to vector<8x8x128xf32>
    %327 = arith.mulf %326, %325 : vector<8x8x128xf32>
    %cst_96 = arith.constant 0.707106769 : f32
    %328 = vector.broadcast %cst_96 : f32 to vector<8x8x128xf32>
    %329 = arith.mulf %325, %328 : vector<8x8x128xf32>
    %330 = math.erf %329 : vector<8x8x128xf32>
    %cst_97 = arith.constant 1.000000e+00 : f32
    %331 = vector.broadcast %cst_97 : f32 to vector<8x8x128xf32>
    %332 = arith.addf %331, %330 : vector<8x8x128xf32>
    %333 = arith.mulf %327, %332 : vector<8x8x128xf32>
    %334 = vector.shape_cast %333 : vector<8x8x128xf32> to vector<64x128xf32>
    %335 = arith.truncf %334 : vector<64x128xf32> to vector<64x128xbf16>
    %c0_98 = arith.constant 0 : index
    %c0_99 = arith.constant 0 : index
    %336 = vector.load %arg6[%c0_98, %c0_99] : memref<128x384xbf16, #tpu.memory_space<vmem>>, vector<128x384xbf16>
    %cst_100 = arith.constant dense<0.000000e+00> : vector<64x384xf32>
    %337 = tpu.matmul %335, %336, %cst_100 {dimension_numbers = #tpu.dot_dimension_numbers<[1], [0], [0], [1], [0, 0, 1, 1], [], []>} : vector<64x128xbf16>, vector<128x384xbf16>, vector<64x384xf32> -> vector<64x384xf32>
    %c0_101 = arith.constant 0 : index
    %c0_102 = arith.constant 0 : index
    %338 = vector.load %arg8[%c0_101, %c0_102] : memref<1x384xf32, #tpu.memory_space<vmem>>, vector<1x384xf32>
    %339 = vector.broadcast %338 : vector<1x384xf32> to vector<64x384xf32>
    %340 = arith.addf %337, %339 : vector<64x384xf32>
    %341 = vector.shape_cast %340 : vector<64x384xf32> to vector<8x8x384xf32>
    %342 = arith.truncf %341 : vector<8x8x384xf32> to vector<8x8x384xbf16>
    %c0_103 = arith.constant 0 : index
    %c0_104 = arith.constant 0 : index
    %c0_105 = arith.constant 0 : index
    %343 = vector.load %arg11[%c0_103, %c0_104, %c0_105] : memref<8x8x384xbf16, #tpu.memory_space<vmem>>, vector<8x8x384xbf16>
    tpu.vector_store %arg11[%c0_103, %c0_104, %c0_105], %342 {strides = array<i32>} : memref<8x8x384xbf16, #tpu.memory_space<vmem>>, vector<8x8x384xbf16>,
    %c0_106 = arith.constant 0 : index
    %c0_107 = arith.constant 0 : index
    %344 = vector.load %arg9[%c0_106, %c0_107] : memref<1x128xf32, #tpu.memory_space<vmem>>, vector<1x128xf32>
    %c0_i32_108 = arith.constant 0 : i32
    %c7_i32_109 = arith.constant 7 : i32
    %345 = arith.subi %c7_i32_109, %c0_i32_108 : i32
    %346 = arith.index_cast %345 : i32 to index
    %c0_110 = arith.constant 0 : index
    %c0_111 = arith.constant 0 : index
    %347 = vector.load %arg11[%346, %c0_110, %c0_111] : memref<8x8x384xbf16, #tpu.memory_space<vmem>>, vector<1x8x384xbf16>
    %348 = vector.shape_cast %347 : vector<1x8x384xbf16> to vector<8x384xbf16>
    %349 = arith.extf %348 : vector<8x384xbf16> to vector<8x384xf32>
    %350 = arith.truncf %12 : vector<8x128xf32> to vector<8x128xbf16>
    %c0_112 = arith.constant 0 : index
    %c0_113 = arith.constant 0 : index
    %351 = vector.load %arg7[%c0_112, %c0_113] : memref<128x384xbf16, #tpu.memory_space<vmem>>, vector<128x384xbf16>
    %cst_114 = arith.constant dense<0.000000e+00> : vector<8x384xf32>
    %352 = tpu.matmul %350, %351, %cst_114 {dimension_numbers = #tpu.dot_dimension_numbers<[1], [0], [0], [1], [0, 0, 1, 1], [], []>} : vector<8x128xbf16>, vector<128x384xbf16>, vector<8x384xf32> -> vector<8x384xf32>
    %353 = vector.extract_strided_slice %349 {offsets = [0, 0], sizes = [8, 128], strides = [1, 1]} : vector<8x384xf32> to vector<8x128xf32>
    %354 = vector.extract_strided_slice %352 {offsets = [0, 0], sizes = [8, 128], strides = [1, 1]} : vector<8x384xf32> to vector<8x128xf32>
    %355 = arith.addf %353, %354 : vector<8x128xf32>
    %356 = arith.negf %355 : vector<8x128xf32>
    %357 = math.exp %356 : vector<8x128xf32>
    %cst_115 = arith.constant 1.000000e+00 : f32
    %358 = vector.broadcast %cst_115 : f32 to vector<8x128xf32>
    %359 = arith.addf %358, %357 : vector<8x128xf32>
    %360 = arith.divf %358, %359 : vector<8x128xf32>
    %361 = vector.extract_strided_slice %349 {offsets = [0, 128], sizes = [8, 128], strides = [1, 1]} : vector<8x384xf32> to vector<8x128xf32>
    %362 = vector.extract_strided_slice %352 {offsets = [0, 128], sizes = [8, 128], strides = [1, 1]} : vector<8x384xf32> to vector<8x128xf32>
    %363 = arith.addf %361, %362 : vector<8x128xf32>
    %364 = arith.negf %363 : vector<8x128xf32>
    %365 = math.exp %364 : vector<8x128xf32>
    %cst_116 = arith.constant 1.000000e+00 : f32
    %366 = vector.broadcast %cst_116 : f32 to vector<8x128xf32>
    %367 = arith.addf %366, %365 : vector<8x128xf32>
    %368 = arith.divf %366, %367 : vector<8x128xf32>
    %369 = vector.extract_strided_slice %349 {offsets = [0, 256], sizes = [8, 128], strides = [1, 1]} : vector<8x384xf32> to vector<8x128xf32>
    %370 = vector.extract_strided_slice %352 {offsets = [0, 256], sizes = [8, 128], strides = [1, 1]} : vector<8x384xf32> to vector<8x128xf32>
    %371 = vector.broadcast %344 : vector<1x128xf32> to vector<8x128xf32>
    %372 = arith.addf %370, %371 : vector<8x128xf32>
    %373 = arith.mulf %360, %372 : vector<8x128xf32>
    %374 = arith.addf %369, %373 : vector<8x128xf32>
    %375 = math.tanh %374 : vector<8x128xf32>
    %cst_117 = arith.constant 1.000000e+00 : f32
    %376 = vector.broadcast %cst_117 : f32 to vector<8x128xf32>
    %377 = arith.subf %376, %368 : vector<8x128xf32>
    %378 = arith.mulf %377, %375 : vector<8x128xf32>
    %379 = arith.mulf %368, %12 : vector<8x128xf32>
    %380 = arith.addf %378, %379 : vector<8x128xf32>
    %381 = arith.index_cast %345 : i32 to index
    %c0_118 = arith.constant 0 : index
    %c0_119 = arith.constant 0 : index
    %382 = vector.load %arg10[%381, %c0_118, %c0_119] : memref<8x8x128xf32, #tpu.memory_space<vmem>>, vector<1x8x128xf32>
    %383 = vector.shape_cast %382 : vector<1x8x128xf32> to vector<8x128xf32>
    %384 = vector.shape_cast %380 : vector<8x128xf32> to vector<1x8x128xf32>
    tpu.vector_store %arg10[%381, %c0_118, %c0_119], %384 {strides = array<i32>} : memref<8x8x128xf32, #tpu.memory_space<vmem>>, vector<1x8x128xf32>,
    %c1_i32_120 = arith.constant 1 : i32
    %c7_i32_121 = arith.constant 7 : i32
    %385 = arith.subi %c7_i32_121, %c1_i32_120 : i32
    %386 = arith.index_cast %385 : i32 to index
    %c0_122 = arith.constant 0 : index
    %c0_123 = arith.constant 0 : index
    %387 = vector.load %arg11[%386, %c0_122, %c0_123] : memref<8x8x384xbf16, #tpu.memory_space<vmem>>, vector<1x8x384xbf16>
    %388 = vector.shape_cast %387 : vector<1x8x384xbf16> to vector<8x384xbf16>
    %389 = arith.extf %388 : vector<8x384xbf16> to vector<8x384xf32>
    %390 = arith.truncf %380 : vector<8x128xf32> to vector<8x128xbf16>
    %c0_124 = arith.constant 0 : index
    %c0_125 = arith.constant 0 : index
    %391 = vector.load %arg7[%c0_124, %c0_125] : memref<128x384xbf16, #tpu.memory_space<vmem>>, vector<128x384xbf16>
    %cst_126 = arith.constant dense<0.000000e+00> : vector<8x384xf32>
    %392 = tpu.matmul %390, %391, %cst_126 {dimension_numbers = #tpu.dot_dimension_numbers<[1], [0], [0], [1], [0, 0, 1, 1], [], []>} : vector<8x128xbf16>, vector<128x384xbf16>, vector<8x384xf32> -> vector<8x384xf32>
    %393 = vector.extract_strided_slice %389 {offsets = [0, 0], sizes = [8, 128], strides = [1, 1]} : vector<8x384xf32> to vector<8x128xf32>
    %394 = vector.extract_strided_slice %392 {offsets = [0, 0], sizes = [8, 128], strides = [1, 1]} : vector<8x384xf32> to vector<8x128xf32>
    %395 = arith.addf %393, %394 : vector<8x128xf32>
    %396 = arith.negf %395 : vector<8x128xf32>
    %397 = math.exp %396 : vector<8x128xf32>
    %cst_127 = arith.constant 1.000000e+00 : f32
    %398 = vector.broadcast %cst_127 : f32 to vector<8x128xf32>
    %399 = arith.addf %398, %397 : vector<8x128xf32>
    %400 = arith.divf %398, %399 : vector<8x128xf32>
    %401 = vector.extract_strided_slice %389 {offsets = [0, 128], sizes = [8, 128], strides = [1, 1]} : vector<8x384xf32> to vector<8x128xf32>
    %402 = vector.extract_strided_slice %392 {offsets = [0, 128], sizes = [8, 128], strides = [1, 1]} : vector<8x384xf32> to vector<8x128xf32>
    %403 = arith.addf %401, %402 : vector<8x128xf32>
    %404 = arith.negf %403 : vector<8x128xf32>
    %405 = math.exp %404 : vector<8x128xf32>
    %cst_128 = arith.constant 1.000000e+00 : f32
    %406 = vector.broadcast %cst_128 : f32 to vector<8x128xf32>
    %407 = arith.addf %406, %405 : vector<8x128xf32>
    %408 = arith.divf %406, %407 : vector<8x128xf32>
    %409 = vector.extract_strided_slice %389 {offsets = [0, 256], sizes = [8, 128], strides = [1, 1]} : vector<8x384xf32> to vector<8x128xf32>
    %410 = vector.extract_strided_slice %392 {offsets = [0, 256], sizes = [8, 128], strides = [1, 1]} : vector<8x384xf32> to vector<8x128xf32>
    %411 = vector.broadcast %344 : vector<1x128xf32> to vector<8x128xf32>
    %412 = arith.addf %410, %411 : vector<8x128xf32>
    %413 = arith.mulf %400, %412 : vector<8x128xf32>
    %414 = arith.addf %409, %413 : vector<8x128xf32>
    %415 = math.tanh %414 : vector<8x128xf32>
    %cst_129 = arith.constant 1.000000e+00 : f32
    %416 = vector.broadcast %cst_129 : f32 to vector<8x128xf32>
    %417 = arith.subf %416, %408 : vector<8x128xf32>
    %418 = arith.mulf %417, %415 : vector<8x128xf32>
    %419 = arith.mulf %408, %380 : vector<8x128xf32>
    %420 = arith.addf %418, %419 : vector<8x128xf32>
    %421 = arith.index_cast %385 : i32 to index
    %c0_130 = arith.constant 0 : index
    %c0_131 = arith.constant 0 : index
    %422 = vector.load %arg10[%421, %c0_130, %c0_131] : memref<8x8x128xf32, #tpu.memory_space<vmem>>, vector<1x8x128xf32>
    %423 = vector.shape_cast %422 : vector<1x8x128xf32> to vector<8x128xf32>
    %424 = vector.shape_cast %420 : vector<8x128xf32> to vector<1x8x128xf32>
    tpu.vector_store %arg10[%421, %c0_130, %c0_131], %424 {strides = array<i32>} : memref<8x8x128xf32, #tpu.memory_space<vmem>>, vector<1x8x128xf32>,
    %c2_i32_132 = arith.constant 2 : i32
    %c7_i32_133 = arith.constant 7 : i32
    %425 = arith.subi %c7_i32_133, %c2_i32_132 : i32
    %426 = arith.index_cast %425 : i32 to index
    %c0_134 = arith.constant 0 : index
    %c0_135 = arith.constant 0 : index
    %427 = vector.load %arg11[%426, %c0_134, %c0_135] : memref<8x8x384xbf16, #tpu.memory_space<vmem>>, vector<1x8x384xbf16>
    %428 = vector.shape_cast %427 : vector<1x8x384xbf16> to vector<8x384xbf16>
    %429 = arith.extf %428 : vector<8x384xbf16> to vector<8x384xf32>
    %430 = arith.truncf %420 : vector<8x128xf32> to vector<8x128xbf16>
    %c0_136 = arith.constant 0 : index
    %c0_137 = arith.constant 0 : index
    %431 = vector.load %arg7[%c0_136, %c0_137] : memref<128x384xbf16, #tpu.memory_space<vmem>>, vector<128x384xbf16>
    %cst_138 = arith.constant dense<0.000000e+00> : vector<8x384xf32>
    %432 = tpu.matmul %430, %431, %cst_138 {dimension_numbers = #tpu.dot_dimension_numbers<[1], [0], [0], [1], [0, 0, 1, 1], [], []>} : vector<8x128xbf16>, vector<128x384xbf16>, vector<8x384xf32> -> vector<8x384xf32>
    %433 = vector.extract_strided_slice %429 {offsets = [0, 0], sizes = [8, 128], strides = [1, 1]} : vector<8x384xf32> to vector<8x128xf32>
    %434 = vector.extract_strided_slice %432 {offsets = [0, 0], sizes = [8, 128], strides = [1, 1]} : vector<8x384xf32> to vector<8x128xf32>
    %435 = arith.addf %433, %434 : vector<8x128xf32>
    %436 = arith.negf %435 : vector<8x128xf32>
    %437 = math.exp %436 : vector<8x128xf32>
    %cst_139 = arith.constant 1.000000e+00 : f32
    %438 = vector.broadcast %cst_139 : f32 to vector<8x128xf32>
    %439 = arith.addf %438, %437 : vector<8x128xf32>
    %440 = arith.divf %438, %439 : vector<8x128xf32>
    %441 = vector.extract_strided_slice %429 {offsets = [0, 128], sizes = [8, 128], strides = [1, 1]} : vector<8x384xf32> to vector<8x128xf32>
    %442 = vector.extract_strided_slice %432 {offsets = [0, 128], sizes = [8, 128], strides = [1, 1]} : vector<8x384xf32> to vector<8x128xf32>
    %443 = arith.addf %441, %442 : vector<8x128xf32>
    %444 = arith.negf %443 : vector<8x128xf32>
    %445 = math.exp %444 : vector<8x128xf32>
    %cst_140 = arith.constant 1.000000e+00 : f32
    %446 = vector.broadcast %cst_140 : f32 to vector<8x128xf32>
    %447 = arith.addf %446, %445 : vector<8x128xf32>
    %448 = arith.divf %446, %447 : vector<8x128xf32>
    %449 = vector.extract_strided_slice %429 {offsets = [0, 256], sizes = [8, 128], strides = [1, 1]} : vector<8x384xf32> to vector<8x128xf32>
    %450 = vector.extract_strided_slice %432 {offsets = [0, 256], sizes = [8, 128], strides = [1, 1]} : vector<8x384xf32> to vector<8x128xf32>
    %451 = vector.broadcast %344 : vector<1x128xf32> to vector<8x128xf32>
    %452 = arith.addf %450, %451 : vector<8x128xf32>
    %453 = arith.mulf %440, %452 : vector<8x128xf32>
    %454 = arith.addf %449, %453 : vector<8x128xf32>
    %455 = math.tanh %454 : vector<8x128xf32>
    %cst_141 = arith.constant 1.000000e+00 : f32
    %456 = vector.broadcast %cst_141 : f32 to vector<8x128xf32>
    %457 = arith.subf %456, %448 : vector<8x128xf32>
    %458 = arith.mulf %457, %455 : vector<8x128xf32>
    %459 = arith.mulf %448, %420 : vector<8x128xf32>
    %460 = arith.addf %458, %459 : vector<8x128xf32>
    %461 = arith.index_cast %425 : i32 to index
    %c0_142 = arith.constant 0 : index
    %c0_143 = arith.constant 0 : index
    %462 = vector.load %arg10[%461, %c0_142, %c0_143] : memref<8x8x128xf32, #tpu.memory_space<vmem>>, vector<1x8x128xf32>
    %463 = vector.shape_cast %462 : vector<1x8x128xf32> to vector<8x128xf32>
    %464 = vector.shape_cast %460 : vector<8x128xf32> to vector<1x8x128xf32>
    tpu.vector_store %arg10[%461, %c0_142, %c0_143], %464 {strides = array<i32>} : memref<8x8x128xf32, #tpu.memory_space<vmem>>, vector<1x8x128xf32>,
    %c3_i32_144 = arith.constant 3 : i32
    %c7_i32_145 = arith.constant 7 : i32
    %465 = arith.subi %c7_i32_145, %c3_i32_144 : i32
    %466 = arith.index_cast %465 : i32 to index
    %c0_146 = arith.constant 0 : index
    %c0_147 = arith.constant 0 : index
    %467 = vector.load %arg11[%466, %c0_146, %c0_147] : memref<8x8x384xbf16, #tpu.memory_space<vmem>>, vector<1x8x384xbf16>
    %468 = vector.shape_cast %467 : vector<1x8x384xbf16> to vector<8x384xbf16>
    %469 = arith.extf %468 : vector<8x384xbf16> to vector<8x384xf32>
    %470 = arith.truncf %460 : vector<8x128xf32> to vector<8x128xbf16>
    %c0_148 = arith.constant 0 : index
    %c0_149 = arith.constant 0 : index
    %471 = vector.load %arg7[%c0_148, %c0_149] : memref<128x384xbf16, #tpu.memory_space<vmem>>, vector<128x384xbf16>
    %cst_150 = arith.constant dense<0.000000e+00> : vector<8x384xf32>
    %472 = tpu.matmul %470, %471, %cst_150 {dimension_numbers = #tpu.dot_dimension_numbers<[1], [0], [0], [1], [0, 0, 1, 1], [], []>} : vector<8x128xbf16>, vector<128x384xbf16>, vector<8x384xf32> -> vector<8x384xf32>
    %473 = vector.extract_strided_slice %469 {offsets = [0, 0], sizes = [8, 128], strides = [1, 1]} : vector<8x384xf32> to vector<8x128xf32>
    %474 = vector.extract_strided_slice %472 {offsets = [0, 0], sizes = [8, 128], strides = [1, 1]} : vector<8x384xf32> to vector<8x128xf32>
    %475 = arith.addf %473, %474 : vector<8x128xf32>
    %476 = arith.negf %475 : vector<8x128xf32>
    %477 = math.exp %476 : vector<8x128xf32>
    %cst_151 = arith.constant 1.000000e+00 : f32
    %478 = vector.broadcast %cst_151 : f32 to vector<8x128xf32>
    %479 = arith.addf %478, %477 : vector<8x128xf32>
    %480 = arith.divf %478, %479 : vector<8x128xf32>
    %481 = vector.extract_strided_slice %469 {offsets = [0, 128], sizes = [8, 128], strides = [1, 1]} : vector<8x384xf32> to vector<8x128xf32>
    %482 = vector.extract_strided_slice %472 {offsets = [0, 128], sizes = [8, 128], strides = [1, 1]} : vector<8x384xf32> to vector<8x128xf32>
    %483 = arith.addf %481, %482 : vector<8x128xf32>
    %484 = arith.negf %483 : vector<8x128xf32>
    %485 = math.exp %484 : vector<8x128xf32>
    %cst_152 = arith.constant 1.000000e+00 : f32
    %486 = vector.broadcast %cst_152 : f32 to vector<8x128xf32>
    %487 = arith.addf %486, %485 : vector<8x128xf32>
    %488 = arith.divf %486, %487 : vector<8x128xf32>
    %489 = vector.extract_strided_slice %469 {offsets = [0, 256], sizes = [8, 128], strides = [1, 1]} : vector<8x384xf32> to vector<8x128xf32>
    %490 = vector.extract_strided_slice %472 {offsets = [0, 256], sizes = [8, 128], strides = [1, 1]} : vector<8x384xf32> to vector<8x128xf32>
    %491 = vector.broadcast %344 : vector<1x128xf32> to vector<8x128xf32>
    %492 = arith.addf %490, %491 : vector<8x128xf32>
    %493 = arith.mulf %480, %492 : vector<8x128xf32>
    %494 = arith.addf %489, %493 : vector<8x128xf32>
    %495 = math.tanh %494 : vector<8x128xf32>
    %cst_153 = arith.constant 1.000000e+00 : f32
    %496 = vector.broadcast %cst_153 : f32 to vector<8x128xf32>
    %497 = arith.subf %496, %488 : vector<8x128xf32>
    %498 = arith.mulf %497, %495 : vector<8x128xf32>
    %499 = arith.mulf %488, %460 : vector<8x128xf32>
    %500 = arith.addf %498, %499 : vector<8x128xf32>
    %501 = arith.index_cast %465 : i32 to index
    %c0_154 = arith.constant 0 : index
    %c0_155 = arith.constant 0 : index
    %502 = vector.load %arg10[%501, %c0_154, %c0_155] : memref<8x8x128xf32, #tpu.memory_space<vmem>>, vector<1x8x128xf32>
    %503 = vector.shape_cast %502 : vector<1x8x128xf32> to vector<8x128xf32>
    %504 = vector.shape_cast %500 : vector<8x128xf32> to vector<1x8x128xf32>
    tpu.vector_store %arg10[%501, %c0_154, %c0_155], %504 {strides = array<i32>} : memref<8x8x128xf32, #tpu.memory_space<vmem>>, vector<1x8x128xf32>,
    %c4_i32_156 = arith.constant 4 : i32
    %c7_i32_157 = arith.constant 7 : i32
    %505 = arith.subi %c7_i32_157, %c4_i32_156 : i32
    %506 = arith.index_cast %505 : i32 to index
    %c0_158 = arith.constant 0 : index
    %c0_159 = arith.constant 0 : index
    %507 = vector.load %arg11[%506, %c0_158, %c0_159] : memref<8x8x384xbf16, #tpu.memory_space<vmem>>, vector<1x8x384xbf16>
    %508 = vector.shape_cast %507 : vector<1x8x384xbf16> to vector<8x384xbf16>
    %509 = arith.extf %508 : vector<8x384xbf16> to vector<8x384xf32>
    %510 = arith.truncf %500 : vector<8x128xf32> to vector<8x128xbf16>
    %c0_160 = arith.constant 0 : index
    %c0_161 = arith.constant 0 : index
    %511 = vector.load %arg7[%c0_160, %c0_161] : memref<128x384xbf16, #tpu.memory_space<vmem>>, vector<128x384xbf16>
    %cst_162 = arith.constant dense<0.000000e+00> : vector<8x384xf32>
    %512 = tpu.matmul %510, %511, %cst_162 {dimension_numbers = #tpu.dot_dimension_numbers<[1], [0], [0], [1], [0, 0, 1, 1], [], []>} : vector<8x128xbf16>, vector<128x384xbf16>, vector<8x384xf32> -> vector<8x384xf32>
    %513 = vector.extract_strided_slice %509 {offsets = [0, 0], sizes = [8, 128], strides = [1, 1]} : vector<8x384xf32> to vector<8x128xf32>
    %514 = vector.extract_strided_slice %512 {offsets = [0, 0], sizes = [8, 128], strides = [1, 1]} : vector<8x384xf32> to vector<8x128xf32>
    %515 = arith.addf %513, %514 : vector<8x128xf32>
    %516 = arith.negf %515 : vector<8x128xf32>
    %517 = math.exp %516 : vector<8x128xf32>
    %cst_163 = arith.constant 1.000000e+00 : f32
    %518 = vector.broadcast %cst_163 : f32 to vector<8x128xf32>
    %519 = arith.addf %518, %517 : vector<8x128xf32>
    %520 = arith.divf %518, %519 : vector<8x128xf32>
    %521 = vector.extract_strided_slice %509 {offsets = [0, 128], sizes = [8, 128], strides = [1, 1]} : vector<8x384xf32> to vector<8x128xf32>
    %522 = vector.extract_strided_slice %512 {offsets = [0, 128], sizes = [8, 128], strides = [1, 1]} : vector<8x384xf32> to vector<8x128xf32>
    %523 = arith.addf %521, %522 : vector<8x128xf32>
    %524 = arith.negf %523 : vector<8x128xf32>
    %525 = math.exp %524 : vector<8x128xf32>
    %cst_164 = arith.constant 1.000000e+00 : f32
    %526 = vector.broadcast %cst_164 : f32 to vector<8x128xf32>
    %527 = arith.addf %526, %525 : vector<8x128xf32>
    %528 = arith.divf %526, %527 : vector<8x128xf32>
    %529 = vector.extract_strided_slice %509 {offsets = [0, 256], sizes = [8, 128], strides = [1, 1]} : vector<8x384xf32> to vector<8x128xf32>
    %530 = vector.extract_strided_slice %512 {offsets = [0, 256], sizes = [8, 128], strides = [1, 1]} : vector<8x384xf32> to vector<8x128xf32>
    %531 = vector.broadcast %344 : vector<1x128xf32> to vector<8x128xf32>
    %532 = arith.addf %530, %531 : vector<8x128xf32>
    %533 = arith.mulf %520, %532 : vector<8x128xf32>
    %534 = arith.addf %529, %533 : vector<8x128xf32>
    %535 = math.tanh %534 : vector<8x128xf32>
    %cst_165 = arith.constant 1.000000e+00 : f32
    %536 = vector.broadcast %cst_165 : f32 to vector<8x128xf32>
    %537 = arith.subf %536, %528 : vector<8x128xf32>
    %538 = arith.mulf %537, %535 : vector<8x128xf32>
    %539 = arith.mulf %528, %500 : vector<8x128xf32>
    %540 = arith.addf %538, %539 : vector<8x128xf32>
    %541 = arith.index_cast %505 : i32 to index
    %c0_166 = arith.constant 0 : index
    %c0_167 = arith.constant 0 : index
    %542 = vector.load %arg10[%541, %c0_166, %c0_167] : memref<8x8x128xf32, #tpu.memory_space<vmem>>, vector<1x8x128xf32>
    %543 = vector.shape_cast %542 : vector<1x8x128xf32> to vector<8x128xf32>
    %544 = vector.shape_cast %540 : vector<8x128xf32> to vector<1x8x128xf32>
    tpu.vector_store %arg10[%541, %c0_166, %c0_167], %544 {strides = array<i32>} : memref<8x8x128xf32, #tpu.memory_space<vmem>>, vector<1x8x128xf32>,
    %c5_i32_168 = arith.constant 5 : i32
    %c7_i32_169 = arith.constant 7 : i32
    %545 = arith.subi %c7_i32_169, %c5_i32_168 : i32
    %546 = arith.index_cast %545 : i32 to index
    %c0_170 = arith.constant 0 : index
    %c0_171 = arith.constant 0 : index
    %547 = vector.load %arg11[%546, %c0_170, %c0_171] : memref<8x8x384xbf16, #tpu.memory_space<vmem>>, vector<1x8x384xbf16>
    %548 = vector.shape_cast %547 : vector<1x8x384xbf16> to vector<8x384xbf16>
    %549 = arith.extf %548 : vector<8x384xbf16> to vector<8x384xf32>
    %550 = arith.truncf %540 : vector<8x128xf32> to vector<8x128xbf16>
    %c0_172 = arith.constant 0 : index
    %c0_173 = arith.constant 0 : index
    %551 = vector.load %arg7[%c0_172, %c0_173] : memref<128x384xbf16, #tpu.memory_space<vmem>>, vector<128x384xbf16>
    %cst_174 = arith.constant dense<0.000000e+00> : vector<8x384xf32>
    %552 = tpu.matmul %550, %551, %cst_174 {dimension_numbers = #tpu.dot_dimension_numbers<[1], [0], [0], [1], [0, 0, 1, 1], [], []>} : vector<8x128xbf16>, vector<128x384xbf16>, vector<8x384xf32> -> vector<8x384xf32>
    %553 = vector.extract_strided_slice %549 {offsets = [0, 0], sizes = [8, 128], strides = [1, 1]} : vector<8x384xf32> to vector<8x128xf32>
    %554 = vector.extract_strided_slice %552 {offsets = [0, 0], sizes = [8, 128], strides = [1, 1]} : vector<8x384xf32> to vector<8x128xf32>
    %555 = arith.addf %553, %554 : vector<8x128xf32>
    %556 = arith.negf %555 : vector<8x128xf32>
    %557 = math.exp %556 : vector<8x128xf32>
    %cst_175 = arith.constant 1.000000e+00 : f32
    %558 = vector.broadcast %cst_175 : f32 to vector<8x128xf32>
    %559 = arith.addf %558, %557 : vector<8x128xf32>
    %560 = arith.divf %558, %559 : vector<8x128xf32>
    %561 = vector.extract_strided_slice %549 {offsets = [0, 128], sizes = [8, 128], strides = [1, 1]} : vector<8x384xf32> to vector<8x128xf32>
    %562 = vector.extract_strided_slice %552 {offsets = [0, 128], sizes = [8, 128], strides = [1, 1]} : vector<8x384xf32> to vector<8x128xf32>
    %563 = arith.addf %561, %562 : vector<8x128xf32>
    %564 = arith.negf %563 : vector<8x128xf32>
    %565 = math.exp %564 : vector<8x128xf32>
    %cst_176 = arith.constant 1.000000e+00 : f32
    %566 = vector.broadcast %cst_176 : f32 to vector<8x128xf32>
    %567 = arith.addf %566, %565 : vector<8x128xf32>
    %568 = arith.divf %566, %567 : vector<8x128xf32>
    %569 = vector.extract_strided_slice %549 {offsets = [0, 256], sizes = [8, 128], strides = [1, 1]} : vector<8x384xf32> to vector<8x128xf32>
    %570 = vector.extract_strided_slice %552 {offsets = [0, 256], sizes = [8, 128], strides = [1, 1]} : vector<8x384xf32> to vector<8x128xf32>
    %571 = vector.broadcast %344 : vector<1x128xf32> to vector<8x128xf32>
    %572 = arith.addf %570, %571 : vector<8x128xf32>
    %573 = arith.mulf %560, %572 : vector<8x128xf32>
    %574 = arith.addf %569, %573 : vector<8x128xf32>
    %575 = math.tanh %574 : vector<8x128xf32>
    %cst_177 = arith.constant 1.000000e+00 : f32
    %576 = vector.broadcast %cst_177 : f32 to vector<8x128xf32>
    %577 = arith.subf %576, %568 : vector<8x128xf32>
    %578 = arith.mulf %577, %575 : vector<8x128xf32>
    %579 = arith.mulf %568, %540 : vector<8x128xf32>
    %580 = arith.addf %578, %579 : vector<8x128xf32>
    %581 = arith.index_cast %545 : i32 to index
    %c0_178 = arith.constant 0 : index
    %c0_179 = arith.constant 0 : index
    %582 = vector.load %arg10[%581, %c0_178, %c0_179] : memref<8x8x128xf32, #tpu.memory_space<vmem>>, vector<1x8x128xf32>
    %583 = vector.shape_cast %582 : vector<1x8x128xf32> to vector<8x128xf32>
    %584 = vector.shape_cast %580 : vector<8x128xf32> to vector<1x8x128xf32>
    tpu.vector_store %arg10[%581, %c0_178, %c0_179], %584 {strides = array<i32>} : memref<8x8x128xf32, #tpu.memory_space<vmem>>, vector<1x8x128xf32>,
    %c6_i32_180 = arith.constant 6 : i32
    %c7_i32_181 = arith.constant 7 : i32
    %585 = arith.subi %c7_i32_181, %c6_i32_180 : i32
    %586 = arith.index_cast %585 : i32 to index
    %c0_182 = arith.constant 0 : index
    %c0_183 = arith.constant 0 : index
    %587 = vector.load %arg11[%586, %c0_182, %c0_183] : memref<8x8x384xbf16, #tpu.memory_space<vmem>>, vector<1x8x384xbf16>
    %588 = vector.shape_cast %587 : vector<1x8x384xbf16> to vector<8x384xbf16>
    %589 = arith.extf %588 : vector<8x384xbf16> to vector<8x384xf32>
    %590 = arith.truncf %580 : vector<8x128xf32> to vector<8x128xbf16>
    %c0_184 = arith.constant 0 : index
    %c0_185 = arith.constant 0 : index
    %591 = vector.load %arg7[%c0_184, %c0_185] : memref<128x384xbf16, #tpu.memory_space<vmem>>, vector<128x384xbf16>
    %cst_186 = arith.constant dense<0.000000e+00> : vector<8x384xf32>
    %592 = tpu.matmul %590, %591, %cst_186 {dimension_numbers = #tpu.dot_dimension_numbers<[1], [0], [0], [1], [0, 0, 1, 1], [], []>} : vector<8x128xbf16>, vector<128x384xbf16>, vector<8x384xf32> -> vector<8x384xf32>
    %593 = vector.extract_strided_slice %589 {offsets = [0, 0], sizes = [8, 128], strides = [1, 1]} : vector<8x384xf32> to vector<8x128xf32>
    %594 = vector.extract_strided_slice %592 {offsets = [0, 0], sizes = [8, 128], strides = [1, 1]} : vector<8x384xf32> to vector<8x128xf32>
    %595 = arith.addf %593, %594 : vector<8x128xf32>
    %596 = arith.negf %595 : vector<8x128xf32>
    %597 = math.exp %596 : vector<8x128xf32>
    %cst_187 = arith.constant 1.000000e+00 : f32
    %598 = vector.broadcast %cst_187 : f32 to vector<8x128xf32>
    %599 = arith.addf %598, %597 : vector<8x128xf32>
    %600 = arith.divf %598, %599 : vector<8x128xf32>
    %601 = vector.extract_strided_slice %589 {offsets = [0, 128], sizes = [8, 128], strides = [1, 1]} : vector<8x384xf32> to vector<8x128xf32>
    %602 = vector.extract_strided_slice %592 {offsets = [0, 128], sizes = [8, 128], strides = [1, 1]} : vector<8x384xf32> to vector<8x128xf32>
    %603 = arith.addf %601, %602 : vector<8x128xf32>
    %604 = arith.negf %603 : vector<8x128xf32>
    %605 = math.exp %604 : vector<8x128xf32>
    %cst_188 = arith.constant 1.000000e+00 : f32
    %606 = vector.broadcast %cst_188 : f32 to vector<8x128xf32>
    %607 = arith.addf %606, %605 : vector<8x128xf32>
    %608 = arith.divf %606, %607 : vector<8x128xf32>
    %609 = vector.extract_strided_slice %589 {offsets = [0, 256], sizes = [8, 128], strides = [1, 1]} : vector<8x384xf32> to vector<8x128xf32>
    %610 = vector.extract_strided_slice %592 {offsets = [0, 256], sizes = [8, 128], strides = [1, 1]} : vector<8x384xf32> to vector<8x128xf32>
    %611 = vector.broadcast %344 : vector<1x128xf32> to vector<8x128xf32>
    %612 = arith.addf %610, %611 : vector<8x128xf32>
    %613 = arith.mulf %600, %612 : vector<8x128xf32>
    %614 = arith.addf %609, %613 : vector<8x128xf32>
    %615 = math.tanh %614 : vector<8x128xf32>
    %cst_189 = arith.constant 1.000000e+00 : f32
    %616 = vector.broadcast %cst_189 : f32 to vector<8x128xf32>
    %617 = arith.subf %616, %608 : vector<8x128xf32>
    %618 = arith.mulf %617, %615 : vector<8x128xf32>
    %619 = arith.mulf %608, %580 : vector<8x128xf32>
    %620 = arith.addf %618, %619 : vector<8x128xf32>
    %621 = arith.index_cast %585 : i32 to index
    %c0_190 = arith.constant 0 : index
    %c0_191 = arith.constant 0 : index
    %622 = vector.load %arg10[%621, %c0_190, %c0_191] : memref<8x8x128xf32, #tpu.memory_space<vmem>>, vector<1x8x128xf32>
    %623 = vector.shape_cast %622 : vector<1x8x128xf32> to vector<8x128xf32>
    %624 = vector.shape_cast %620 : vector<8x128xf32> to vector<1x8x128xf32>
    tpu.vector_store %arg10[%621, %c0_190, %c0_191], %624 {strides = array<i32>} : memref<8x8x128xf32, #tpu.memory_space<vmem>>, vector<1x8x128xf32>,
    %c7_i32_192 = arith.constant 7 : i32
    %c7_i32_193 = arith.constant 7 : i32
    %625 = arith.subi %c7_i32_193, %c7_i32_192 : i32
    %626 = arith.index_cast %625 : i32 to index
    %c0_194 = arith.constant 0 : index
    %c0_195 = arith.constant 0 : index
    %627 = vector.load %arg11[%626, %c0_194, %c0_195] : memref<8x8x384xbf16, #tpu.memory_space<vmem>>, vector<1x8x384xbf16>
    %628 = vector.shape_cast %627 : vector<1x8x384xbf16> to vector<8x384xbf16>
    %629 = arith.extf %628 : vector<8x384xbf16> to vector<8x384xf32>
    %630 = arith.truncf %620 : vector<8x128xf32> to vector<8x128xbf16>
    %c0_196 = arith.constant 0 : index
    %c0_197 = arith.constant 0 : index
    %631 = vector.load %arg7[%c0_196, %c0_197] : memref<128x384xbf16, #tpu.memory_space<vmem>>, vector<128x384xbf16>
    %cst_198 = arith.constant dense<0.000000e+00> : vector<8x384xf32>
    %632 = tpu.matmul %630, %631, %cst_198 {dimension_numbers = #tpu.dot_dimension_numbers<[1], [0], [0], [1], [0, 0, 1, 1], [], []>} : vector<8x128xbf16>, vector<128x384xbf16>, vector<8x384xf32> -> vector<8x384xf32>
    %633 = vector.extract_strided_slice %629 {offsets = [0, 0], sizes = [8, 128], strides = [1, 1]} : vector<8x384xf32> to vector<8x128xf32>
    %634 = vector.extract_strided_slice %632 {offsets = [0, 0], sizes = [8, 128], strides = [1, 1]} : vector<8x384xf32> to vector<8x128xf32>
    %635 = arith.addf %633, %634 : vector<8x128xf32>
    %636 = arith.negf %635 : vector<8x128xf32>
    %637 = math.exp %636 : vector<8x128xf32>
    %cst_199 = arith.constant 1.000000e+00 : f32
    %638 = vector.broadcast %cst_199 : f32 to vector<8x128xf32>
    %639 = arith.addf %638, %637 : vector<8x128xf32>
    %640 = arith.divf %638, %639 : vector<8x128xf32>
    %641 = vector.extract_strided_slice %629 {offsets = [0, 128], sizes = [8, 128], strides = [1, 1]} : vector<8x384xf32> to vector<8x128xf32>
    %642 = vector.extract_strided_slice %632 {offsets = [0, 128], sizes = [8, 128], strides = [1, 1]} : vector<8x384xf32> to vector<8x128xf32>
    %643 = arith.addf %641, %642 : vector<8x128xf32>
    %644 = arith.negf %643 : vector<8x128xf32>
    %645 = math.exp %644 : vector<8x128xf32>
    %cst_200 = arith.constant 1.000000e+00 : f32
    %646 = vector.broadcast %cst_200 : f32 to vector<8x128xf32>
    %647 = arith.addf %646, %645 : vector<8x128xf32>
    %648 = arith.divf %646, %647 : vector<8x128xf32>
    %649 = vector.extract_strided_slice %629 {offsets = [0, 256], sizes = [8, 128], strides = [1, 1]} : vector<8x384xf32> to vector<8x128xf32>
    %650 = vector.extract_strided_slice %632 {offsets = [0, 256], sizes = [8, 128], strides = [1, 1]} : vector<8x384xf32> to vector<8x128xf32>
    %651 = vector.broadcast %344 : vector<1x128xf32> to vector<8x128xf32>
    %652 = arith.addf %650, %651 : vector<8x128xf32>
    %653 = arith.mulf %640, %652 : vector<8x128xf32>
    %654 = arith.addf %649, %653 : vector<8x128xf32>
    %655 = math.tanh %654 : vector<8x128xf32>
    %cst_201 = arith.constant 1.000000e+00 : f32
    %656 = vector.broadcast %cst_201 : f32 to vector<8x128xf32>
    %657 = arith.subf %656, %648 : vector<8x128xf32>
    %658 = arith.mulf %657, %655 : vector<8x128xf32>
    %659 = arith.mulf %648, %620 : vector<8x128xf32>
    %660 = arith.addf %658, %659 : vector<8x128xf32>
    %661 = arith.index_cast %625 : i32 to index
    %c0_202 = arith.constant 0 : index
    %c0_203 = arith.constant 0 : index
    %662 = vector.load %arg10[%661, %c0_202, %c0_203] : memref<8x8x128xf32, #tpu.memory_space<vmem>>, vector<1x8x128xf32>
    %663 = vector.shape_cast %662 : vector<1x8x128xf32> to vector<8x128xf32>
    %664 = vector.shape_cast %660 : vector<8x128xf32> to vector<1x8x128xf32>
    tpu.vector_store %arg10[%661, %c0_202, %c0_203], %664 {strides = array<i32>} : memref<8x8x128xf32, #tpu.memory_space<vmem>>, vector<1x8x128xf32>,
    %c8_i32_204 = arith.constant 8 : i32
    %c0_205 = arith.constant 0 : index
    %c0_206 = arith.constant 0 : index
    %c0_207 = arith.constant 0 : index
    %665 = vector.load %arg10[%c0_205, %c0_206, %c0_207] : memref<8x8x128xf32, #tpu.memory_space<vmem>>, vector<8x8x128xf32>
    %cst_208 = arith.constant 5.000000e-01 : f32
    %666 = vector.broadcast %cst_208 : f32 to vector<8x8x128xf32>
    %667 = arith.mulf %666, %665 : vector<8x8x128xf32>
    %cst_209 = arith.constant 0.707106769 : f32
    %668 = vector.broadcast %cst_209 : f32 to vector<8x8x128xf32>
    %669 = arith.mulf %665, %668 : vector<8x8x128xf32>
    %670 = math.erf %669 : vector<8x8x128xf32>
    %cst_210 = arith.constant 1.000000e+00 : f32
    %671 = vector.broadcast %cst_210 : f32 to vector<8x8x128xf32>
    %672 = arith.addf %671, %670 : vector<8x8x128xf32>
    %673 = arith.mulf %667, %672 : vector<8x8x128xf32>
    %c0_211 = arith.constant 0 : index
    %c0_212 = arith.constant 0 : index
    %c0_213 = arith.constant 0 : index
    %674 = vector.load %arg10[%c0_211, %c0_212, %c0_213] : memref<8x8x128xf32, #tpu.memory_space<vmem>>, vector<8x8x128xf32>
    tpu.vector_store %arg10[%c0_211, %c0_212, %c0_213], %673 {strides = array<i32>} : memref<8x8x128xf32, #tpu.memory_space<vmem>>, vector<8x8x128xf32>,
    return
  }
  func.func @transform_0(%arg0: i32) -> (i32, i32, i32) {
    %c0_i32 = arith.constant 0 : i32
    %c0_i32_0 = arith.constant 0 : i32
    %c0_i32_1 = arith.constant 0 : i32
    return %c0_i32, %arg0, %c0_i32_0 : i32, i32, i32
  }
  func.func @transform_1(%arg0: i32) -> (i32, i32) {
    %c0_i32 = arith.constant 0 : i32
    %c0_i32_0 = arith.constant 0 : i32
    %c0_i32_1 = arith.constant 0 : i32
    return %c0_i32, %c0_i32_0 : i32, i32
  }
  func.func @transform_2(%arg0: i32) -> (i32, i32) {
    %c0_i32 = arith.constant 0 : i32
    %c0_i32_0 = arith.constant 0 : i32
    %c0_i32_1 = arith.constant 0 : i32
    return %c0_i32, %c0_i32_0 : i32, i32
  }
  func.func @transform_3(%arg0: i32) -> (i32, i32) {
    %c0_i32 = arith.constant 0 : i32
    %c0_i32_0 = arith.constant 0 : i32
    %c0_i32_1 = arith.constant 0 : i32
    return %c0_i32, %c0_i32_0 : i32, i32
  }
  func.func @transform_4(%arg0: i32) -> (i32, i32) {
    %c0_i32 = arith.constant 0 : i32
    %c0_i32_0 = arith.constant 0 : i32
    %c0_i32_1 = arith.constant 0 : i32
    return %c0_i32, %c0_i32_0 : i32, i32
  }
  func.func @transform_5(%arg0: i32) -> (i32, i32) {
    %c0_i32 = arith.constant 0 : i32
    %c0_i32_0 = arith.constant 0 : i32
    %c0_i32_1 = arith.constant 0 : i32
    return %c0_i32, %c0_i32_0 : i32, i32
  }
  func.func @transform_6(%arg0: i32) -> (i32, i32) {
    %c0_i32 = arith.constant 0 : i32
    %c0_i32_0 = arith.constant 0 : i32
    %c0_i32_1 = arith.constant 0 : i32
    return %c0_i32, %c0_i32_0 : i32, i32
  }
  func.func @transform_7(%arg0: i32) -> (i32, i32) {
    %c0_i32 = arith.constant 0 : i32
    %c0_i32_0 = arith.constant 0 : i32
    %c0_i32_1 = arith.constant 0 : i32
    return %c0_i32, %c0_i32_0 : i32, i32
  }
  func.func @transform_8(%arg0: i32) -> (i32, i32) {
    %c0_i32 = arith.constant 0 : i32
    %c0_i32_0 = arith.constant 0 : i32
    %c0_i32_1 = arith.constant 0 : i32
    return %c0_i32, %c0_i32_0 : i32, i32
  }
  func.func @transform_9(%arg0: i32) -> (i32, i32, i32) {
    %c0_i32 = arith.constant 0 : i32
    %c0_i32_0 = arith.constant 0 : i32
    %c0_i32_1 = arith.constant 0 : i32
    return %c0_i32, %arg0, %c0_i32_0 : i32, i32, i32
  }
}

module attributes {stable_mosaic.version = 11 : i64} {
  func.func @gptgru_kernel(%arg0: i32, %arg1: memref<8x8x128xf32, #tpu.memory_space<vmem>>, %arg2: memref<128x384xbf16, #tpu.memory_space<vmem>>, %arg3: memref<128x384xbf16, #tpu.memory_space<vmem>>, %arg4: memref<1x384xf32, #tpu.memory_space<vmem>>, %arg5: memref<1x128xf32, #tpu.memory_space<vmem>>, %arg6: memref<128x384xbf16, #tpu.memory_space<vmem>>, %arg7: memref<128x384xbf16, #tpu.memory_space<vmem>>, %arg8: memref<1x384xf32, #tpu.memory_space<vmem>>, %arg9: memref<1x128xf32, #tpu.memory_space<vmem>>, %arg10: memref<8x8x128xf32, #tpu.memory_space<vmem>>, %arg11: memref<8x8x384xbf16, #tpu.memory_space<vmem>>) attributes {dimension_semantics = [#tpu.dimension_semantics<parallel>], iteration_bounds = array<i64: 1>, scalar_prefetch = 0 : i64, scratch_operands = 1 : i64, tpu.core_type = #tpu.core_type<tc>, window_params = [{transform_indices = @transform_0, window_bounds = array<i64: 8, 8, 128>}, {pipeline_mode = #tpu.pipeline_mode<synchronous>, transform_indices = @transform_1, window_bounds = array<i64: 128, 384>}, {pipeline_mode = #tpu.pipeline_mode<synchronous>, transform_indices = @transform_2, window_bounds = array<i64: 128, 384>}, {pipeline_mode = #tpu.pipeline_mode<synchronous>, transform_indices = @transform_3, window_bounds = array<i64: 1, 384>}, {pipeline_mode = #tpu.pipeline_mode<synchronous>, transform_indices = @transform_4, window_bounds = array<i64: 1, 128>}, {pipeline_mode = #tpu.pipeline_mode<synchronous>, transform_indices = @transform_5, window_bounds = array<i64: 128, 384>}, {pipeline_mode = #tpu.pipeline_mode<synchronous>, transform_indices = @transform_6, window_bounds = array<i64: 128, 384>}, {pipeline_mode = #tpu.pipeline_mode<synchronous>, transform_indices = @transform_7, window_bounds = array<i64: 1, 384>}, {pipeline_mode = #tpu.pipeline_mode<synchronous>, transform_indices = @transform_8, window_bounds = array<i64: 1, 128>}, {transform_indices = @transform_9, window_bounds = array<i64: 8, 8, 128>}]} {
    %c0 = arith.constant 0 : index
    %c0_0 = arith.constant 0 : index
    %c0_1 = arith.constant 0 : index
    %0 = vector.load %arg1[%c0, %c0_0, %c0_1] : memref<8x8x128xf32, #tpu.memory_space<vmem>>, vector<8x8x128xf32>
    %1 = vector.shape_cast %0 : vector<8x8x128xf32> to vector<64x128xf32>
    %2 = arith.truncf %1 : vector<64x128xf32> to vector<64x128xbf16>
    %c0_2 = arith.constant 0 : index
    %c0_3 = arith.constant 0 : index
    %3 = vector.load %arg2[%c0_2, %c0_3] : memref<128x384xbf16, #tpu.memory_space<vmem>>, vector<128x384xbf16>
    %cst = arith.constant dense<0.000000e+00> : vector<64x384xf32>
    %4 = tpu.matmul %2, %3, %cst {dimension_numbers = #tpu.dot_dimension_numbers<[1], [0], [0], [1], [0, 0, 1, 1], [], []>} : vector<64x128xbf16>, vector<128x384xbf16>, vector<64x384xf32> -> vector<64x384xf32>
    %c0_4 = arith.constant 0 : index
    %c0_5 = arith.constant 0 : index
    %5 = vector.load %arg4[%c0_4, %c0_5] : memref<1x384xf32, #tpu.memory_space<vmem>>, vector<1x384xf32>
    %6 = vector.broadcast %5 : vector<1x384xf32> to vector<64x384xf32>
    %7 = arith.addf %4, %6 : vector<64x384xf32>
    %8 = vector.shape_cast %7 : vector<64x384xf32> to vector<8x8x384xf32>
    %9 = arith.truncf %8 : vector<8x8x384xf32> to vector<8x8x384xbf16>
    %c0_6 = arith.constant 0 : index
    %c0_7 = arith.constant 0 : index
    %c0_8 = arith.constant 0 : index
    %10 = vector.load %arg11[%c0_6, %c0_7, %c0_8] : memref<8x8x384xbf16, #tpu.memory_space<vmem>>, vector<8x8x384xbf16>
    tpu.vector_store %arg11[%c0_6, %c0_7, %c0_8], %9 {strides = array<i32>} : memref<8x8x384xbf16, #tpu.memory_space<vmem>>, vector<8x8x384xbf16>,
    %c0_9 = arith.constant 0 : index
    %c0_10 = arith.constant 0 : index
    %11 = vector.load %arg5[%c0_9, %c0_10] : memref<1x128xf32, #tpu.memory_space<vmem>>, vector<1x128xf32>
    %cst_11 = arith.constant 0.000000e+00 : f32
    %12 = vector.broadcast %cst_11 : f32 to vector<8x128xf32>
    %c0_i32 = arith.constant 0 : i32
    %13 = arith.index_cast %c0_i32 : i32 to index
    %c0_12 = arith.constant 0 : index
    %c0_13 = arith.constant 0 : index
    %14 = vector.load %arg11[%13, %c0_12, %c0_13] : memref<8x8x384xbf16, #tpu.memory_space<vmem>>, vector<1x8x384xbf16>
    %15 = vector.shape_cast %14 : vector<1x8x384xbf16> to vector<8x384xbf16>
    %16 = arith.extf %15 : vector<8x384xbf16> to vector<8x384xf32>
    %17 = arith.truncf %12 : vector<8x128xf32> to vector<8x128xbf16>
    %c0_14 = arith.constant 0 : index
    %c0_15 = arith.constant 0 : index
    %18 = vector.load %arg3[%c0_14, %c0_15] : memref<128x384xbf16, #tpu.memory_space<vmem>>, vector<128x384xbf16>
    %cst_16 = arith.constant dense<0.000000e+00> : vector<8x384xf32>
    %19 = tpu.matmul %17, %18, %cst_16 {dimension_numbers = #tpu.dot_dimension_numbers<[1], [0], [0], [1], [0, 0, 1, 1], [], []>} : vector<8x128xbf16>, vector<128x384xbf16>, vector<8x384xf32> -> vector<8x384xf32>
    %20 = vector.extract_strided_slice %16 {offsets = [0, 0], sizes = [8, 128], strides = [1, 1]} : vector<8x384xf32> to vector<8x128xf32>
    %21 = vector.extract_strided_slice %19 {offsets = [0, 0], sizes = [8, 128], strides = [1, 1]} : vector<8x384xf32> to vector<8x128xf32>
    %22 = arith.addf %20, %21 : vector<8x128xf32>
    %23 = arith.negf %22 : vector<8x128xf32>
    %24 = math.exp %23 : vector<8x128xf32>
    %cst_17 = arith.constant 1.000000e+00 : f32
    %25 = vector.broadcast %cst_17 : f32 to vector<8x128xf32>
    %26 = arith.addf %25, %24 : vector<8x128xf32>
    %27 = arith.divf %25, %26 : vector<8x128xf32>
    %28 = vector.extract_strided_slice %16 {offsets = [0, 128], sizes = [8, 128], strides = [1, 1]} : vector<8x384xf32> to vector<8x128xf32>
    %29 = vector.extract_strided_slice %19 {offsets = [0, 128], sizes = [8, 128], strides = [1, 1]} : vector<8x384xf32> to vector<8x128xf32>
    %30 = arith.addf %28, %29 : vector<8x128xf32>
    %31 = arith.negf %30 : vector<8x128xf32>
    %32 = math.exp %31 : vector<8x128xf32>
    %cst_18 = arith.constant 1.000000e+00 : f32
    %33 = vector.broadcast %cst_18 : f32 to vector<8x128xf32>
    %34 = arith.addf %33, %32 : vector<8x128xf32>
    %35 = arith.divf %33, %34 : vector<8x128xf32>
    %36 = vector.extract_strided_slice %16 {offsets = [0, 256], sizes = [8, 128], strides = [1, 1]} : vector<8x384xf32> to vector<8x128xf32>
    %37 = vector.extract_strided_slice %19 {offsets = [0, 256], sizes = [8, 128], strides = [1, 1]} : vector<8x384xf32> to vector<8x128xf32>
    %38 = vector.broadcast %11 : vector<1x128xf32> to vector<8x128xf32>
    %39 = arith.addf %37, %38 : vector<8x128xf32>
    %40 = arith.mulf %27, %39 : vector<8x128xf32>
    %41 = arith.addf %36, %40 : vector<8x128xf32>
    %42 = math.tanh %41 : vector<8x128xf32>
    %cst_19 = arith.constant 1.000000e+00 : f32
    %43 = vector.broadcast %cst_19 : f32 to vector<8x128xf32>
    %44 = arith.subf %43, %35 : vector<8x128xf32>
    %45 = arith.mulf %44, %42 : vector<8x128xf32>
    %46 = arith.mulf %35, %12 : vector<8x128xf32>
    %47 = arith.addf %45, %46 : vector<8x128xf32>
    %48 = arith.index_cast %c0_i32 : i32 to index
    %c0_20 = arith.constant 0 : index
    %c0_21 = arith.constant 0 : index
    %49 = vector.load %arg10[%48, %c0_20, %c0_21] : memref<8x8x128xf32, #tpu.memory_space<vmem>>, vector<1x8x128xf32>
    %50 = vector.shape_cast %49 : vector<1x8x128xf32> to vector<8x128xf32>
    %51 = vector.shape_cast %47 : vector<8x128xf32> to vector<1x8x128xf32>
    tpu.vector_store %arg10[%48, %c0_20, %c0_21], %51 {strides = array<i32>} : memref<8x8x128xf32, #tpu.memory_space<vmem>>, vector<1x8x128xf32>,
    %c1_i32 = arith.constant 1 : i32
    %52 = arith.index_cast %c1_i32 : i32 to index
    %c0_22 = arith.constant 0 : index
    %c0_23 = arith.constant 0 : index
    %53 = vector.load %arg11[%52, %c0_22, %c0_23] : memref<8x8x384xbf16, #tpu.memory_space<vmem>>, vector<1x8x384xbf16>
    %54 = vector.shape_cast %53 : vector<1x8x384xbf16> to vector<8x384xbf16>
    %55 = arith.extf %54 : vector<8x384xbf16> to vector<8x384xf32>
    %56 = arith.truncf %47 : vector<8x128xf32> to vector<8x128xbf16>
    %c0_24 = arith.constant 0 : index
    %c0_25 = arith.constant 0 : index
    %57 = vector.load %arg3[%c0_24, %c0_25] : memref<128x384xbf16, #tpu.memory_space<vmem>>, vector<128x384xbf16>
    %cst_26 = arith.constant dense<0.000000e+00> : vector<8x384xf32>
    %58 = tpu.matmul %56, %57, %cst_26 {dimension_numbers = #tpu.dot_dimension_numbers<[1], [0], [0], [1], [0, 0, 1, 1], [], []>} : vector<8x128xbf16>, vector<128x384xbf16>, vector<8x384xf32> -> vector<8x384xf32>
    %59 = vector.extract_strided_slice %55 {offsets = [0, 0], sizes = [8, 128], strides = [1, 1]} : vector<8x384xf32> to vector<8x128xf32>
    %60 = vector.extract_strided_slice %58 {offsets = [0, 0], sizes = [8, 128], strides = [1, 1]} : vector<8x384xf32> to vector<8x128xf32>
    %61 = arith.addf %59, %60 : vector<8x128xf32>
    %62 = arith.negf %61 : vector<8x128xf32>
    %63 = math.exp %62 : vector<8x128xf32>
    %cst_27 = arith.constant 1.000000e+00 : f32
    %64 = vector.broadcast %cst_27 : f32 to vector<8x128xf32>
    %65 = arith.addf %64, %63 : vector<8x128xf32>
    %66 = arith.divf %64, %65 : vector<8x128xf32>
    %67 = vector.extract_strided_slice %55 {offsets = [0, 128], sizes = [8, 128], strides = [1, 1]} : vector<8x384xf32> to vector<8x128xf32>
    %68 = vector.extract_strided_slice %58 {offsets = [0, 128], sizes = [8, 128], strides = [1, 1]} : vector<8x384xf32> to vector<8x128xf32>
    %69 = arith.addf %67, %68 : vector<8x128xf32>
    %70 = arith.negf %69 : vector<8x128xf32>
    %71 = math.exp %70 : vector<8x128xf32>
    %cst_28 = arith.constant 1.000000e+00 : f32
    %72 = vector.broadcast %cst_28 : f32 to vector<8x128xf32>
    %73 = arith.addf %72, %71 : vector<8x128xf32>
    %74 = arith.divf %72, %73 : vector<8x128xf32>
    %75 = vector.extract_strided_slice %55 {offsets = [0, 256], sizes = [8, 128], strides = [1, 1]} : vector<8x384xf32> to vector<8x128xf32>
    %76 = vector.extract_strided_slice %58 {offsets = [0, 256], sizes = [8, 128], strides = [1, 1]} : vector<8x384xf32> to vector<8x128xf32>
    %77 = vector.broadcast %11 : vector<1x128xf32> to vector<8x128xf32>
    %78 = arith.addf %76, %77 : vector<8x128xf32>
    %79 = arith.mulf %66, %78 : vector<8x128xf32>
    %80 = arith.addf %75, %79 : vector<8x128xf32>
    %81 = math.tanh %80 : vector<8x128xf32>
    %cst_29 = arith.constant 1.000000e+00 : f32
    %82 = vector.broadcast %cst_29 : f32 to vector<8x128xf32>
    %83 = arith.subf %82, %74 : vector<8x128xf32>
    %84 = arith.mulf %83, %81 : vector<8x128xf32>
    %85 = arith.mulf %74, %47 : vector<8x128xf32>
    %86 = arith.addf %84, %85 : vector<8x128xf32>
    %87 = arith.index_cast %c1_i32 : i32 to index
    %c0_30 = arith.constant 0 : index
    %c0_31 = arith.constant 0 : index
    %88 = vector.load %arg10[%87, %c0_30, %c0_31] : memref<8x8x128xf32, #tpu.memory_space<vmem>>, vector<1x8x128xf32>
    %89 = vector.shape_cast %88 : vector<1x8x128xf32> to vector<8x128xf32>
    %90 = vector.shape_cast %86 : vector<8x128xf32> to vector<1x8x128xf32>
    tpu.vector_store %arg10[%87, %c0_30, %c0_31], %90 {strides = array<i32>} : memref<8x8x128xf32, #tpu.memory_space<vmem>>, vector<1x8x128xf32>,
    %c2_i32 = arith.constant 2 : i32
    %91 = arith.index_cast %c2_i32 : i32 to index
    %c0_32 = arith.constant 0 : index
    %c0_33 = arith.constant 0 : index
    %92 = vector.load %arg11[%91, %c0_32, %c0_33] : memref<8x8x384xbf16, #tpu.memory_space<vmem>>, vector<1x8x384xbf16>
    %93 = vector.shape_cast %92 : vector<1x8x384xbf16> to vector<8x384xbf16>
    %94 = arith.extf %93 : vector<8x384xbf16> to vector<8x384xf32>
    %95 = arith.truncf %86 : vector<8x128xf32> to vector<8x128xbf16>
    %c0_34 = arith.constant 0 : index
    %c0_35 = arith.constant 0 : index
    %96 = vector.load %arg3[%c0_34, %c0_35] : memref<128x384xbf16, #tpu.memory_space<vmem>>, vector<128x384xbf16>
    %cst_36 = arith.constant dense<0.000000e+00> : vector<8x384xf32>
    %97 = tpu.matmul %95, %96, %cst_36 {dimension_numbers = #tpu.dot_dimension_numbers<[1], [0], [0], [1], [0, 0, 1, 1], [], []>} : vector<8x128xbf16>, vector<128x384xbf16>, vector<8x384xf32> -> vector<8x384xf32>
    %98 = vector.extract_strided_slice %94 {offsets = [0, 0], sizes = [8, 128], strides = [1, 1]} : vector<8x384xf32> to vector<8x128xf32>
    %99 = vector.extract_strided_slice %97 {offsets = [0, 0], sizes = [8, 128], strides = [1, 1]} : vector<8x384xf32> to vector<8x128xf32>
    %100 = arith.addf %98, %99 : vector<8x128xf32>
    %101 = arith.negf %100 : vector<8x128xf32>
    %102 = math.exp %101 : vector<8x128xf32>
    %cst_37 = arith.constant 1.000000e+00 : f32
    %103 = vector.broadcast %cst_37 : f32 to vector<8x128xf32>
    %104 = arith.addf %103, %102 : vector<8x128xf32>
    %105 = arith.divf %103, %104 : vector<8x128xf32>
    %106 = vector.extract_strided_slice %94 {offsets = [0, 128], sizes = [8, 128], strides = [1, 1]} : vector<8x384xf32> to vector<8x128xf32>
    %107 = vector.extract_strided_slice %97 {offsets = [0, 128], sizes = [8, 128], strides = [1, 1]} : vector<8x384xf32> to vector<8x128xf32>
    %108 = arith.addf %106, %107 : vector<8x128xf32>
    %109 = arith.negf %108 : vector<8x128xf32>
    %110 = math.exp %109 : vector<8x128xf32>
    %cst_38 = arith.constant 1.000000e+00 : f32
    %111 = vector.broadcast %cst_38 : f32 to vector<8x128xf32>
    %112 = arith.addf %111, %110 : vector<8x128xf32>
    %113 = arith.divf %111, %112 : vector<8x128xf32>
    %114 = vector.extract_strided_slice %94 {offsets = [0, 256], sizes = [8, 128], strides = [1, 1]} : vector<8x384xf32> to vector<8x128xf32>
    %115 = vector.extract_strided_slice %97 {offsets = [0, 256], sizes = [8, 128], strides = [1, 1]} : vector<8x384xf32> to vector<8x128xf32>
    %116 = vector.broadcast %11 : vector<1x128xf32> to vector<8x128xf32>
    %117 = arith.addf %115, %116 : vector<8x128xf32>
    %118 = arith.mulf %105, %117 : vector<8x128xf32>
    %119 = arith.addf %114, %118 : vector<8x128xf32>
    %120 = math.tanh %119 : vector<8x128xf32>
    %cst_39 = arith.constant 1.000000e+00 : f32
    %121 = vector.broadcast %cst_39 : f32 to vector<8x128xf32>
    %122 = arith.subf %121, %113 : vector<8x128xf32>
    %123 = arith.mulf %122, %120 : vector<8x128xf32>
    %124 = arith.mulf %113, %86 : vector<8x128xf32>
    %125 = arith.addf %123, %124 : vector<8x128xf32>
    %126 = arith.index_cast %c2_i32 : i32 to index
    %c0_40 = arith.constant 0 : index
    %c0_41 = arith.constant 0 : index
    %127 = vector.load %arg10[%126, %c0_40, %c0_41] : memref<8x8x128xf32, #tpu.memory_space<vmem>>, vector<1x8x128xf32>
    %128 = vector.shape_cast %127 : vector<1x8x128xf32> to vector<8x128xf32>
    %129 = vector.shape_cast %125 : vector<8x128xf32> to vector<1x8x128xf32>
    tpu.vector_store %arg10[%126, %c0_40, %c0_41], %129 {strides = array<i32>} : memref<8x8x128xf32, #tpu.memory_space<vmem>>, vector<1x8x128xf32>,
    %c3_i32 = arith.constant 3 : i32
    %130 = arith.index_cast %c3_i32 : i32 to index
    %c0_42 = arith.constant 0 : index
    %c0_43 = arith.constant 0 : index
    %131 = vector.load %arg11[%130, %c0_42, %c0_43] : memref<8x8x384xbf16, #tpu.memory_space<vmem>>, vector<1x8x384xbf16>
    %132 = vector.shape_cast %131 : vector<1x8x384xbf16> to vector<8x384xbf16>
    %133 = arith.extf %132 : vector<8x384xbf16> to vector<8x384xf32>
    %134 = arith.truncf %125 : vector<8x128xf32> to vector<8x128xbf16>
    %c0_44 = arith.constant 0 : index
    %c0_45 = arith.constant 0 : index
    %135 = vector.load %arg3[%c0_44, %c0_45] : memref<128x384xbf16, #tpu.memory_space<vmem>>, vector<128x384xbf16>
    %cst_46 = arith.constant dense<0.000000e+00> : vector<8x384xf32>
    %136 = tpu.matmul %134, %135, %cst_46 {dimension_numbers = #tpu.dot_dimension_numbers<[1], [0], [0], [1], [0, 0, 1, 1], [], []>} : vector<8x128xbf16>, vector<128x384xbf16>, vector<8x384xf32> -> vector<8x384xf32>
    %137 = vector.extract_strided_slice %133 {offsets = [0, 0], sizes = [8, 128], strides = [1, 1]} : vector<8x384xf32> to vector<8x128xf32>
    %138 = vector.extract_strided_slice %136 {offsets = [0, 0], sizes = [8, 128], strides = [1, 1]} : vector<8x384xf32> to vector<8x128xf32>
    %139 = arith.addf %137, %138 : vector<8x128xf32>
    %140 = arith.negf %139 : vector<8x128xf32>
    %141 = math.exp %140 : vector<8x128xf32>
    %cst_47 = arith.constant 1.000000e+00 : f32
    %142 = vector.broadcast %cst_47 : f32 to vector<8x128xf32>
    %143 = arith.addf %142, %141 : vector<8x128xf32>
    %144 = arith.divf %142, %143 : vector<8x128xf32>
    %145 = vector.extract_strided_slice %133 {offsets = [0, 128], sizes = [8, 128], strides = [1, 1]} : vector<8x384xf32> to vector<8x128xf32>
    %146 = vector.extract_strided_slice %136 {offsets = [0, 128], sizes = [8, 128], strides = [1, 1]} : vector<8x384xf32> to vector<8x128xf32>
    %147 = arith.addf %145, %146 : vector<8x128xf32>
    %148 = arith.negf %147 : vector<8x128xf32>
    %149 = math.exp %148 : vector<8x128xf32>
    %cst_48 = arith.constant 1.000000e+00 : f32
    %150 = vector.broadcast %cst_48 : f32 to vector<8x128xf32>
    %151 = arith.addf %150, %149 : vector<8x128xf32>
    %152 = arith.divf %150, %151 : vector<8x128xf32>
    %153 = vector.extract_strided_slice %133 {offsets = [0, 256], sizes = [8, 128], strides = [1, 1]} : vector<8x384xf32> to vector<8x128xf32>
    %154 = vector.extract_strided_slice %136 {offsets = [0, 256], sizes = [8, 128], strides = [1, 1]} : vector<8x384xf32> to vector<8x128xf32>
    %155 = vector.broadcast %11 : vector<1x128xf32> to vector<8x128xf32>
    %156 = arith.addf %154, %155 : vector<8x128xf32>
    %157 = arith.mulf %144, %156 : vector<8x128xf32>
    %158 = arith.addf %153, %157 : vector<8x128xf32>
    %159 = math.tanh %158 : vector<8x128xf32>
    %cst_49 = arith.constant 1.000000e+00 : f32
    %160 = vector.broadcast %cst_49 : f32 to vector<8x128xf32>
    %161 = arith.subf %160, %152 : vector<8x128xf32>
    %162 = arith.mulf %161, %159 : vector<8x128xf32>
    %163 = arith.mulf %152, %125 : vector<8x128xf32>
    %164 = arith.addf %162, %163 : vector<8x128xf32>
    %165 = arith.index_cast %c3_i32 : i32 to index
    %c0_50 = arith.constant 0 : index
    %c0_51 = arith.constant 0 : index
    %166 = vector.load %arg10[%165, %c0_50, %c0_51] : memref<8x8x128xf32, #tpu.memory_space<vmem>>, vector<1x8x128xf32>
    %167 = vector.shape_cast %166 : vector<1x8x128xf32> to vector<8x128xf32>
    %168 = vector.shape_cast %164 : vector<8x128xf32> to vector<1x8x128xf32>
    tpu.vector_store %arg10[%165, %c0_50, %c0_51], %168 {strides = array<i32>} : memref<8x8x128xf32, #tpu.memory_space<vmem>>, vector<1x8x128xf32>,
    %c4_i32 = arith.constant 4 : i32
    %169 = arith.index_cast %c4_i32 : i32 to index
    %c0_52 = arith.constant 0 : index
    %c0_53 = arith.constant 0 : index
    %170 = vector.load %arg11[%169, %c0_52, %c0_53] : memref<8x8x384xbf16, #tpu.memory_space<vmem>>, vector<1x8x384xbf16>
    %171 = vector.shape_cast %170 : vector<1x8x384xbf16> to vector<8x384xbf16>
    %172 = arith.extf %171 : vector<8x384xbf16> to vector<8x384xf32>
    %173 = arith.truncf %164 : vector<8x128xf32> to vector<8x128xbf16>
    %c0_54 = arith.constant 0 : index
    %c0_55 = arith.constant 0 : index
    %174 = vector.load %arg3[%c0_54, %c0_55] : memref<128x384xbf16, #tpu.memory_space<vmem>>, vector<128x384xbf16>
    %cst_56 = arith.constant dense<0.000000e+00> : vector<8x384xf32>
    %175 = tpu.matmul %173, %174, %cst_56 {dimension_numbers = #tpu.dot_dimension_numbers<[1], [0], [0], [1], [0, 0, 1, 1], [], []>} : vector<8x128xbf16>, vector<128x384xbf16>, vector<8x384xf32> -> vector<8x384xf32>
    %176 = vector.extract_strided_slice %172 {offsets = [0, 0], sizes = [8, 128], strides = [1, 1]} : vector<8x384xf32> to vector<8x128xf32>
    %177 = vector.extract_strided_slice %175 {offsets = [0, 0], sizes = [8, 128], strides = [1, 1]} : vector<8x384xf32> to vector<8x128xf32>
    %178 = arith.addf %176, %177 : vector<8x128xf32>
    %179 = arith.negf %178 : vector<8x128xf32>
    %180 = math.exp %179 : vector<8x128xf32>
    %cst_57 = arith.constant 1.000000e+00 : f32
    %181 = vector.broadcast %cst_57 : f32 to vector<8x128xf32>
    %182 = arith.addf %181, %180 : vector<8x128xf32>
    %183 = arith.divf %181, %182 : vector<8x128xf32>
    %184 = vector.extract_strided_slice %172 {offsets = [0, 128], sizes = [8, 128], strides = [1, 1]} : vector<8x384xf32> to vector<8x128xf32>
    %185 = vector.extract_strided_slice %175 {offsets = [0, 128], sizes = [8, 128], strides = [1, 1]} : vector<8x384xf32> to vector<8x128xf32>
    %186 = arith.addf %184, %185 : vector<8x128xf32>
    %187 = arith.negf %186 : vector<8x128xf32>
    %188 = math.exp %187 : vector<8x128xf32>
    %cst_58 = arith.constant 1.000000e+00 : f32
    %189 = vector.broadcast %cst_58 : f32 to vector<8x128xf32>
    %190 = arith.addf %189, %188 : vector<8x128xf32>
    %191 = arith.divf %189, %190 : vector<8x128xf32>
    %192 = vector.extract_strided_slice %172 {offsets = [0, 256], sizes = [8, 128], strides = [1, 1]} : vector<8x384xf32> to vector<8x128xf32>
    %193 = vector.extract_strided_slice %175 {offsets = [0, 256], sizes = [8, 128], strides = [1, 1]} : vector<8x384xf32> to vector<8x128xf32>
    %194 = vector.broadcast %11 : vector<1x128xf32> to vector<8x128xf32>
    %195 = arith.addf %193, %194 : vector<8x128xf32>
    %196 = arith.mulf %183, %195 : vector<8x128xf32>
    %197 = arith.addf %192, %196 : vector<8x128xf32>
    %198 = math.tanh %197 : vector<8x128xf32>
    %cst_59 = arith.constant 1.000000e+00 : f32
    %199 = vector.broadcast %cst_59 : f32 to vector<8x128xf32>
    %200 = arith.subf %199, %191 : vector<8x128xf32>
    %201 = arith.mulf %200, %198 : vector<8x128xf32>
    %202 = arith.mulf %191, %164 : vector<8x128xf32>
    %203 = arith.addf %201, %202 : vector<8x128xf32>
    %204 = arith.index_cast %c4_i32 : i32 to index
    %c0_60 = arith.constant 0 : index
    %c0_61 = arith.constant 0 : index
    %205 = vector.load %arg10[%204, %c0_60, %c0_61] : memref<8x8x128xf32, #tpu.memory_space<vmem>>, vector<1x8x128xf32>
    %206 = vector.shape_cast %205 : vector<1x8x128xf32> to vector<8x128xf32>
    %207 = vector.shape_cast %203 : vector<8x128xf32> to vector<1x8x128xf32>
    tpu.vector_store %arg10[%204, %c0_60, %c0_61], %207 {strides = array<i32>} : memref<8x8x128xf32, #tpu.memory_space<vmem>>, vector<1x8x128xf32>,
    %c5_i32 = arith.constant 5 : i32
    %208 = arith.index_cast %c5_i32 : i32 to index
    %c0_62 = arith.constant 0 : index
    %c0_63 = arith.constant 0 : index
    %209 = vector.load %arg11[%208, %c0_62, %c0_63] : memref<8x8x384xbf16, #tpu.memory_space<vmem>>, vector<1x8x384xbf16>
    %210 = vector.shape_cast %209 : vector<1x8x384xbf16> to vector<8x384xbf16>
    %211 = arith.extf %210 : vector<8x384xbf16> to vector<8x384xf32>
    %212 = arith.truncf %203 : vector<8x128xf32> to vector<8x128xbf16>
    %c0_64 = arith.constant 0 : index
    %c0_65 = arith.constant 0 : index
    %213 = vector.load %arg3[%c0_64, %c0_65] : memref<128x384xbf16, #tpu.memory_space<vmem>>, vector<128x384xbf16>
    %cst_66 = arith.constant dense<0.000000e+00> : vector<8x384xf32>
    %214 = tpu.matmul %212, %213, %cst_66 {dimension_numbers = #tpu.dot_dimension_numbers<[1], [0], [0], [1], [0, 0, 1, 1], [], []>} : vector<8x128xbf16>, vector<128x384xbf16>, vector<8x384xf32> -> vector<8x384xf32>
    %215 = vector.extract_strided_slice %211 {offsets = [0, 0], sizes = [8, 128], strides = [1, 1]} : vector<8x384xf32> to vector<8x128xf32>
    %216 = vector.extract_strided_slice %214 {offsets = [0, 0], sizes = [8, 128], strides = [1, 1]} : vector<8x384xf32> to vector<8x128xf32>
    %217 = arith.addf %215, %216 : vector<8x128xf32>
    %218 = arith.negf %217 : vector<8x128xf32>
    %219 = math.exp %218 : vector<8x128xf32>
    %cst_67 = arith.constant 1.000000e+00 : f32
    %220 = vector.broadcast %cst_67 : f32 to vector<8x128xf32>
    %221 = arith.addf %220, %219 : vector<8x128xf32>
    %222 = arith.divf %220, %221 : vector<8x128xf32>
    %223 = vector.extract_strided_slice %211 {offsets = [0, 128], sizes = [8, 128], strides = [1, 1]} : vector<8x384xf32> to vector<8x128xf32>
    %224 = vector.extract_strided_slice %214 {offsets = [0, 128], sizes = [8, 128], strides = [1, 1]} : vector<8x384xf32> to vector<8x128xf32>
    %225 = arith.addf %223, %224 : vector<8x128xf32>
    %226 = arith.negf %225 : vector<8x128xf32>
    %227 = math.exp %226 : vector<8x128xf32>
    %cst_68 = arith.constant 1.000000e+00 : f32
    %228 = vector.broadcast %cst_68 : f32 to vector<8x128xf32>
    %229 = arith.addf %228, %227 : vector<8x128xf32>
    %230 = arith.divf %228, %229 : vector<8x128xf32>
    %231 = vector.extract_strided_slice %211 {offsets = [0, 256], sizes = [8, 128], strides = [1, 1]} : vector<8x384xf32> to vector<8x128xf32>
    %232 = vector.extract_strided_slice %214 {offsets = [0, 256], sizes = [8, 128], strides = [1, 1]} : vector<8x384xf32> to vector<8x128xf32>
    %233 = vector.broadcast %11 : vector<1x128xf32> to vector<8x128xf32>
    %234 = arith.addf %232, %233 : vector<8x128xf32>
    %235 = arith.mulf %222, %234 : vector<8x128xf32>
    %236 = arith.addf %231, %235 : vector<8x128xf32>
    %237 = math.tanh %236 : vector<8x128xf32>
    %cst_69 = arith.constant 1.000000e+00 : f32
    %238 = vector.broadcast %cst_69 : f32 to vector<8x128xf32>
    %239 = arith.subf %238, %230 : vector<8x128xf32>
    %240 = arith.mulf %239, %237 : vector<8x128xf32>
    %241 = arith.mulf %230, %203 : vector<8x128xf32>
    %242 = arith.addf %240, %241 : vector<8x128xf32>
    %243 = arith.index_cast %c5_i32 : i32 to index
    %c0_70 = arith.constant 0 : index
    %c0_71 = arith.constant 0 : index
    %244 = vector.load %arg10[%243, %c0_70, %c0_71] : memref<8x8x128xf32, #tpu.memory_space<vmem>>, vector<1x8x128xf32>
    %245 = vector.shape_cast %244 : vector<1x8x128xf32> to vector<8x128xf32>
    %246 = vector.shape_cast %242 : vector<8x128xf32> to vector<1x8x128xf32>
    tpu.vector_store %arg10[%243, %c0_70, %c0_71], %246 {strides = array<i32>} : memref<8x8x128xf32, #tpu.memory_space<vmem>>, vector<1x8x128xf32>,
    %c6_i32 = arith.constant 6 : i32
    %247 = arith.index_cast %c6_i32 : i32 to index
    %c0_72 = arith.constant 0 : index
    %c0_73 = arith.constant 0 : index
    %248 = vector.load %arg11[%247, %c0_72, %c0_73] : memref<8x8x384xbf16, #tpu.memory_space<vmem>>, vector<1x8x384xbf16>
    %249 = vector.shape_cast %248 : vector<1x8x384xbf16> to vector<8x384xbf16>
    %250 = arith.extf %249 : vector<8x384xbf16> to vector<8x384xf32>
    %251 = arith.truncf %242 : vector<8x128xf32> to vector<8x128xbf16>
    %c0_74 = arith.constant 0 : index
    %c0_75 = arith.constant 0 : index
    %252 = vector.load %arg3[%c0_74, %c0_75] : memref<128x384xbf16, #tpu.memory_space<vmem>>, vector<128x384xbf16>
    %cst_76 = arith.constant dense<0.000000e+00> : vector<8x384xf32>
    %253 = tpu.matmul %251, %252, %cst_76 {dimension_numbers = #tpu.dot_dimension_numbers<[1], [0], [0], [1], [0, 0, 1, 1], [], []>} : vector<8x128xbf16>, vector<128x384xbf16>, vector<8x384xf32> -> vector<8x384xf32>
    %254 = vector.extract_strided_slice %250 {offsets = [0, 0], sizes = [8, 128], strides = [1, 1]} : vector<8x384xf32> to vector<8x128xf32>
    %255 = vector.extract_strided_slice %253 {offsets = [0, 0], sizes = [8, 128], strides = [1, 1]} : vector<8x384xf32> to vector<8x128xf32>
    %256 = arith.addf %254, %255 : vector<8x128xf32>
    %257 = arith.negf %256 : vector<8x128xf32>
    %258 = math.exp %257 : vector<8x128xf32>
    %cst_77 = arith.constant 1.000000e+00 : f32
    %259 = vector.broadcast %cst_77 : f32 to vector<8x128xf32>
    %260 = arith.addf %259, %258 : vector<8x128xf32>
    %261 = arith.divf %259, %260 : vector<8x128xf32>
    %262 = vector.extract_strided_slice %250 {offsets = [0, 128], sizes = [8, 128], strides = [1, 1]} : vector<8x384xf32> to vector<8x128xf32>
    %263 = vector.extract_strided_slice %253 {offsets = [0, 128], sizes = [8, 128], strides = [1, 1]} : vector<8x384xf32> to vector<8x128xf32>
    %264 = arith.addf %262, %263 : vector<8x128xf32>
    %265 = arith.negf %264 : vector<8x128xf32>
    %266 = math.exp %265 : vector<8x128xf32>
    %cst_78 = arith.constant 1.000000e+00 : f32
    %267 = vector.broadcast %cst_78 : f32 to vector<8x128xf32>
    %268 = arith.addf %267, %266 : vector<8x128xf32>
    %269 = arith.divf %267, %268 : vector<8x128xf32>
    %270 = vector.extract_strided_slice %250 {offsets = [0, 256], sizes = [8, 128], strides = [1, 1]} : vector<8x384xf32> to vector<8x128xf32>
    %271 = vector.extract_strided_slice %253 {offsets = [0, 256], sizes = [8, 128], strides = [1, 1]} : vector<8x384xf32> to vector<8x128xf32>
    %272 = vector.broadcast %11 : vector<1x128xf32> to vector<8x128xf32>
    %273 = arith.addf %271, %272 : vector<8x128xf32>
    %274 = arith.mulf %261, %273 : vector<8x128xf32>
    %275 = arith.addf %270, %274 : vector<8x128xf32>
    %276 = math.tanh %275 : vector<8x128xf32>
    %cst_79 = arith.constant 1.000000e+00 : f32
    %277 = vector.broadcast %cst_79 : f32 to vector<8x128xf32>
    %278 = arith.subf %277, %269 : vector<8x128xf32>
    %279 = arith.mulf %278, %276 : vector<8x128xf32>
    %280 = arith.mulf %269, %242 : vector<8x128xf32>
    %281 = arith.addf %279, %280 : vector<8x128xf32>
    %282 = arith.index_cast %c6_i32 : i32 to index
    %c0_80 = arith.constant 0 : index
    %c0_81 = arith.constant 0 : index
    %283 = vector.load %arg10[%282, %c0_80, %c0_81] : memref<8x8x128xf32, #tpu.memory_space<vmem>>, vector<1x8x128xf32>
    %284 = vector.shape_cast %283 : vector<1x8x128xf32> to vector<8x128xf32>
    %285 = vector.shape_cast %281 : vector<8x128xf32> to vector<1x8x128xf32>
    tpu.vector_store %arg10[%282, %c0_80, %c0_81], %285 {strides = array<i32>} : memref<8x8x128xf32, #tpu.memory_space<vmem>>, vector<1x8x128xf32>,
    %c7_i32 = arith.constant 7 : i32
    %286 = arith.index_cast %c7_i32 : i32 to index
    %c0_82 = arith.constant 0 : index
    %c0_83 = arith.constant 0 : index
    %287 = vector.load %arg11[%286, %c0_82, %c0_83] : memref<8x8x384xbf16, #tpu.memory_space<vmem>>, vector<1x8x384xbf16>
    %288 = vector.shape_cast %287 : vector<1x8x384xbf16> to vector<8x384xbf16>
    %289 = arith.extf %288 : vector<8x384xbf16> to vector<8x384xf32>
    %290 = arith.truncf %281 : vector<8x128xf32> to vector<8x128xbf16>
    %c0_84 = arith.constant 0 : index
    %c0_85 = arith.constant 0 : index
    %291 = vector.load %arg3[%c0_84, %c0_85] : memref<128x384xbf16, #tpu.memory_space<vmem>>, vector<128x384xbf16>
    %cst_86 = arith.constant dense<0.000000e+00> : vector<8x384xf32>
    %292 = tpu.matmul %290, %291, %cst_86 {dimension_numbers = #tpu.dot_dimension_numbers<[1], [0], [0], [1], [0, 0, 1, 1], [], []>} : vector<8x128xbf16>, vector<128x384xbf16>, vector<8x384xf32> -> vector<8x384xf32>
    %293 = vector.extract_strided_slice %289 {offsets = [0, 0], sizes = [8, 128], strides = [1, 1]} : vector<8x384xf32> to vector<8x128xf32>
    %294 = vector.extract_strided_slice %292 {offsets = [0, 0], sizes = [8, 128], strides = [1, 1]} : vector<8x384xf32> to vector<8x128xf32>
    %295 = arith.addf %293, %294 : vector<8x128xf32>
    %296 = arith.negf %295 : vector<8x128xf32>
    %297 = math.exp %296 : vector<8x128xf32>
    %cst_87 = arith.constant 1.000000e+00 : f32
    %298 = vector.broadcast %cst_87 : f32 to vector<8x128xf32>
    %299 = arith.addf %298, %297 : vector<8x128xf32>
    %300 = arith.divf %298, %299 : vector<8x128xf32>
    %301 = vector.extract_strided_slice %289 {offsets = [0, 128], sizes = [8, 128], strides = [1, 1]} : vector<8x384xf32> to vector<8x128xf32>
    %302 = vector.extract_strided_slice %292 {offsets = [0, 128], sizes = [8, 128], strides = [1, 1]} : vector<8x384xf32> to vector<8x128xf32>
    %303 = arith.addf %301, %302 : vector<8x128xf32>
    %304 = arith.negf %303 : vector<8x128xf32>
    %305 = math.exp %304 : vector<8x128xf32>
    %cst_88 = arith.constant 1.000000e+00 : f32
    %306 = vector.broadcast %cst_88 : f32 to vector<8x128xf32>
    %307 = arith.addf %306, %305 : vector<8x128xf32>
    %308 = arith.divf %306, %307 : vector<8x128xf32>
    %309 = vector.extract_strided_slice %289 {offsets = [0, 256], sizes = [8, 128], strides = [1, 1]} : vector<8x384xf32> to vector<8x128xf32>
    %310 = vector.extract_strided_slice %292 {offsets = [0, 256], sizes = [8, 128], strides = [1, 1]} : vector<8x384xf32> to vector<8x128xf32>
    %311 = vector.broadcast %11 : vector<1x128xf32> to vector<8x128xf32>
    %312 = arith.addf %310, %311 : vector<8x128xf32>
    %313 = arith.mulf %300, %312 : vector<8x128xf32>
    %314 = arith.addf %309, %313 : vector<8x128xf32>
    %315 = math.tanh %314 : vector<8x128xf32>
    %cst_89 = arith.constant 1.000000e+00 : f32
    %316 = vector.broadcast %cst_89 : f32 to vector<8x128xf32>
    %317 = arith.subf %316, %308 : vector<8x128xf32>
    %318 = arith.mulf %317, %315 : vector<8x128xf32>
    %319 = arith.mulf %308, %281 : vector<8x128xf32>
    %320 = arith.addf %318, %319 : vector<8x128xf32>
    %321 = arith.index_cast %c7_i32 : i32 to index
    %c0_90 = arith.constant 0 : index
    %c0_91 = arith.constant 0 : index
    %322 = vector.load %arg10[%321, %c0_90, %c0_91] : memref<8x8x128xf32, #tpu.memory_space<vmem>>, vector<1x8x128xf32>
    %323 = vector.shape_cast %322 : vector<1x8x128xf32> to vector<8x128xf32>
    %324 = vector.shape_cast %320 : vector<8x128xf32> to vector<1x8x128xf32>
    tpu.vector_store %arg10[%321, %c0_90, %c0_91], %324 {strides = array<i32>} : memref<8x8x128xf32, #tpu.memory_space<vmem>>, vector<1x8x128xf32>,
    %c8_i32 = arith.constant 8 : i32
    %c0_92 = arith.constant 0 : index
    %c0_93 = arith.constant 0 : index
    %c0_94 = arith.constant 0 : index
    %325 = vector.load %arg10[%c0_92, %c0_93, %c0_94] : memref<8x8x128xf32, #tpu.memory_space<vmem>>, vector<8x8x128xf32>
    %cst_95 = arith.constant 5.000000e-01 : f32
    %326 = vector.broadcast %cst_95 : f32 to vector<8x8x128xf32>
    %327 = arith.mulf %326, %325 : vector<8x8x128xf32>
    %cst_96 = arith.constant 0.707106769 : f32
    %328 = vector.broadcast %cst_96 : f32 to vector<8x8x128xf32>
    %329 = arith.mulf %325, %328 : vector<8x8x128xf32>
    %330 = math.erf %329 : vector<8x8x128xf32>
    %cst_97 = arith.constant 1.000000e+00 : f32
    %331 = vector.broadcast %cst_97 : f32 to vector<8x8x128xf32>
    %332 = arith.addf %331, %330 : vector<8x8x128xf32>
    %333 = arith.mulf %327, %332 : vector<8x8x128xf32>
    %334 = vector.shape_cast %333 : vector<8x8x128xf32> to vector<64x128xf32>
    %335 = arith.truncf %334 : vector<64x128xf32> to vector<64x128xbf16>
    %c0_98 = arith.constant 0 : index
    %c0_99 = arith.constant 0 : index
    %336 = vector.load %arg6[%c0_98, %c0_99] : memref<128x384xbf16, #tpu.memory_space<vmem>>, vector<128x384xbf16>
    %cst_100 = arith.constant dense<0.000000e+00> : vector<64x384xf32>
    %337 = tpu.matmul %335, %336, %cst_100 {dimension_numbers = #tpu.dot_dimension_numbers<[1], [0], [0], [1], [0, 0, 1, 1], [], []>} : vector<64x128xbf16>, vector<128x384xbf16>, vector<64x384xf32> -> vector<64x384xf32>
    %c0_101 = arith.constant 0 : index
    %c0_102 = arith.constant 0 : index
    %338 = vector.load %arg8[%c0_101, %c0_102] : memref<1x384xf32, #tpu.memory_space<vmem>>, vector<1x384xf32>
    %339 = vector.broadcast %338 : vector<1x384xf32> to vector<64x384xf32>
    %340 = arith.addf %337, %339 : vector<64x384xf32>
    %341 = vector.shape_cast %340 : vector<64x384xf32> to vector<8x8x384xf32>
    %342 = arith.truncf %341 : vector<8x8x384xf32> to vector<8x8x384xbf16>
    %c0_103 = arith.constant 0 : index
    %c0_104 = arith.constant 0 : index
    %c0_105 = arith.constant 0 : index
    %343 = vector.load %arg11[%c0_103, %c0_104, %c0_105] : memref<8x8x384xbf16, #tpu.memory_space<vmem>>, vector<8x8x384xbf16>
    tpu.vector_store %arg11[%c0_103, %c0_104, %c0_105], %342 {strides = array<i32>} : memref<8x8x384xbf16, #tpu.memory_space<vmem>>, vector<8x8x384xbf16>,
    %c0_106 = arith.constant 0 : index
    %c0_107 = arith.constant 0 : index
    %344 = vector.load %arg9[%c0_106, %c0_107] : memref<1x128xf32, #tpu.memory_space<vmem>>, vector<1x128xf32>
    %c0_i32_108 = arith.constant 0 : i32
    %c7_i32_109 = arith.constant 7 : i32
    %345 = arith.subi %c7_i32_109, %c0_i32_108 : i32
    %346 = arith.index_cast %345 : i32 to index
    %c0_110 = arith.constant 0 : index
    %c0_111 = arith.constant 0 : index
    %347 = vector.load %arg11[%346, %c0_110, %c0_111] : memref<8x8x384xbf16, #tpu.memory_space<vmem>>, vector<1x8x384xbf16>
    %348 = vector.shape_cast %347 : vector<1x8x384xbf16> to vector<8x384xbf16>
    %349 = arith.extf %348 : vector<8x384xbf16> to vector<8x384xf32>
    %350 = arith.truncf %12 : vector<8x128xf32> to vector<8x128xbf16>
    %c0_112 = arith.constant 0 : index
    %c0_113 = arith.constant 0 : index
    %351 = vector.load %arg7[%c0_112, %c0_113] : memref<128x384xbf16, #tpu.memory_space<vmem>>, vector<128x384xbf16>
    %cst_114 = arith.constant dense<0.000000e+00> : vector<8x384xf32>
    %352 = tpu.matmul %350, %351, %cst_114 {dimension_numbers = #tpu.dot_dimension_numbers<[1], [0], [0], [1], [0, 0, 1, 1], [], []>} : vector<8x128xbf16>, vector<128x384xbf16>, vector<8x384xf32> -> vector<8x384xf32>
    %353 = vector.extract_strided_slice %349 {offsets = [0, 0], sizes = [8, 128], strides = [1, 1]} : vector<8x384xf32> to vector<8x128xf32>
    %354 = vector.extract_strided_slice %352 {offsets = [0, 0], sizes = [8, 128], strides = [1, 1]} : vector<8x384xf32> to vector<8x128xf32>
    %355 = arith.addf %353, %354 : vector<8x128xf32>
    %356 = arith.negf %355 : vector<8x128xf32>
    %357 = math.exp %356 : vector<8x128xf32>
    %cst_115 = arith.constant 1.000000e+00 : f32
    %358 = vector.broadcast %cst_115 : f32 to vector<8x128xf32>
    %359 = arith.addf %358, %357 : vector<8x128xf32>
    %360 = arith.divf %358, %359 : vector<8x128xf32>
    %361 = vector.extract_strided_slice %349 {offsets = [0, 128], sizes = [8, 128], strides = [1, 1]} : vector<8x384xf32> to vector<8x128xf32>
    %362 = vector.extract_strided_slice %352 {offsets = [0, 128], sizes = [8, 128], strides = [1, 1]} : vector<8x384xf32> to vector<8x128xf32>
    %363 = arith.addf %361, %362 : vector<8x128xf32>
    %364 = arith.negf %363 : vector<8x128xf32>
    %365 = math.exp %364 : vector<8x128xf32>
    %cst_116 = arith.constant 1.000000e+00 : f32
    %366 = vector.broadcast %cst_116 : f32 to vector<8x128xf32>
    %367 = arith.addf %366, %365 : vector<8x128xf32>
    %368 = arith.divf %366, %367 : vector<8x128xf32>
    %369 = vector.extract_strided_slice %349 {offsets = [0, 256], sizes = [8, 128], strides = [1, 1]} : vector<8x384xf32> to vector<8x128xf32>
    %370 = vector.extract_strided_slice %352 {offsets = [0, 256], sizes = [8, 128], strides = [1, 1]} : vector<8x384xf32> to vector<8x128xf32>
    %371 = vector.broadcast %344 : vector<1x128xf32> to vector<8x128xf32>
    %372 = arith.addf %370, %371 : vector<8x128xf32>
    %373 = arith.mulf %360, %372 : vector<8x128xf32>
    %374 = arith.addf %369, %373 : vector<8x128xf32>
    %375 = math.tanh %374 : vector<8x128xf32>
    %cst_117 = arith.constant 1.000000e+00 : f32
    %376 = vector.broadcast %cst_117 : f32 to vector<8x128xf32>
    %377 = arith.subf %376, %368 : vector<8x128xf32>
    %378 = arith.mulf %377, %375 : vector<8x128xf32>
    %379 = arith.mulf %368, %12 : vector<8x128xf32>
    %380 = arith.addf %378, %379 : vector<8x128xf32>
    %381 = arith.index_cast %345 : i32 to index
    %c0_118 = arith.constant 0 : index
    %c0_119 = arith.constant 0 : index
    %382 = vector.load %arg10[%381, %c0_118, %c0_119] : memref<8x8x128xf32, #tpu.memory_space<vmem>>, vector<1x8x128xf32>
    %383 = vector.shape_cast %382 : vector<1x8x128xf32> to vector<8x128xf32>
    %384 = vector.shape_cast %380 : vector<8x128xf32> to vector<1x8x128xf32>
    tpu.vector_store %arg10[%381, %c0_118, %c0_119], %384 {strides = array<i32>} : memref<8x8x128xf32, #tpu.memory_space<vmem>>, vector<1x8x128xf32>,
    %c1_i32_120 = arith.constant 1 : i32
    %c7_i32_121 = arith.constant 7 : i32
    %385 = arith.subi %c7_i32_121, %c1_i32_120 : i32
    %386 = arith.index_cast %385 : i32 to index
    %c0_122 = arith.constant 0 : index
    %c0_123 = arith.constant 0 : index
    %387 = vector.load %arg11[%386, %c0_122, %c0_123] : memref<8x8x384xbf16, #tpu.memory_space<vmem>>, vector<1x8x384xbf16>
    %388 = vector.shape_cast %387 : vector<1x8x384xbf16> to vector<8x384xbf16>
    %389 = arith.extf %388 : vector<8x384xbf16> to vector<8x384xf32>
    %390 = arith.truncf %380 : vector<8x128xf32> to vector<8x128xbf16>
    %c0_124 = arith.constant 0 : index
    %c0_125 = arith.constant 0 : index
    %391 = vector.load %arg7[%c0_124, %c0_125] : memref<128x384xbf16, #tpu.memory_space<vmem>>, vector<128x384xbf16>
    %cst_126 = arith.constant dense<0.000000e+00> : vector<8x384xf32>
    %392 = tpu.matmul %390, %391, %cst_126 {dimension_numbers = #tpu.dot_dimension_numbers<[1], [0], [0], [1], [0, 0, 1, 1], [], []>} : vector<8x128xbf16>, vector<128x384xbf16>, vector<8x384xf32> -> vector<8x384xf32>
    %393 = vector.extract_strided_slice %389 {offsets = [0, 0], sizes = [8, 128], strides = [1, 1]} : vector<8x384xf32> to vector<8x128xf32>
    %394 = vector.extract_strided_slice %392 {offsets = [0, 0], sizes = [8, 128], strides = [1, 1]} : vector<8x384xf32> to vector<8x128xf32>
    %395 = arith.addf %393, %394 : vector<8x128xf32>
    %396 = arith.negf %395 : vector<8x128xf32>
    %397 = math.exp %396 : vector<8x128xf32>
    %cst_127 = arith.constant 1.000000e+00 : f32
    %398 = vector.broadcast %cst_127 : f32 to vector<8x128xf32>
    %399 = arith.addf %398, %397 : vector<8x128xf32>
    %400 = arith.divf %398, %399 : vector<8x128xf32>
    %401 = vector.extract_strided_slice %389 {offsets = [0, 128], sizes = [8, 128], strides = [1, 1]} : vector<8x384xf32> to vector<8x128xf32>
    %402 = vector.extract_strided_slice %392 {offsets = [0, 128], sizes = [8, 128], strides = [1, 1]} : vector<8x384xf32> to vector<8x128xf32>
    %403 = arith.addf %401, %402 : vector<8x128xf32>
    %404 = arith.negf %403 : vector<8x128xf32>
    %405 = math.exp %404 : vector<8x128xf32>
    %cst_128 = arith.constant 1.000000e+00 : f32
    %406 = vector.broadcast %cst_128 : f32 to vector<8x128xf32>
    %407 = arith.addf %406, %405 : vector<8x128xf32>
    %408 = arith.divf %406, %407 : vector<8x128xf32>
    %409 = vector.extract_strided_slice %389 {offsets = [0, 256], sizes = [8, 128], strides = [1, 1]} : vector<8x384xf32> to vector<8x128xf32>
    %410 = vector.extract_strided_slice %392 {offsets = [0, 256], sizes = [8, 128], strides = [1, 1]} : vector<8x384xf32> to vector<8x128xf32>
    %411 = vector.broadcast %344 : vector<1x128xf32> to vector<8x128xf32>
    %412 = arith.addf %410, %411 : vector<8x128xf32>
    %413 = arith.mulf %400, %412 : vector<8x128xf32>
    %414 = arith.addf %409, %413 : vector<8x128xf32>
    %415 = math.tanh %414 : vector<8x128xf32>
    %cst_129 = arith.constant 1.000000e+00 : f32
    %416 = vector.broadcast %cst_129 : f32 to vector<8x128xf32>
    %417 = arith.subf %416, %408 : vector<8x128xf32>
    %418 = arith.mulf %417, %415 : vector<8x128xf32>
    %419 = arith.mulf %408, %380 : vector<8x128xf32>
    %420 = arith.addf %418, %419 : vector<8x128xf32>
    %421 = arith.index_cast %385 : i32 to index
    %c0_130 = arith.constant 0 : index
    %c0_131 = arith.constant 0 : index
    %422 = vector.load %arg10[%421, %c0_130, %c0_131] : memref<8x8x128xf32, #tpu.memory_space<vmem>>, vector<1x8x128xf32>
    %423 = vector.shape_cast %422 : vector<1x8x128xf32> to vector<8x128xf32>
    %424 = vector.shape_cast %420 : vector<8x128xf32> to vector<1x8x128xf32>
    tpu.vector_store %arg10[%421, %c0_130, %c0_131], %424 {strides = array<i32>} : memref<8x8x128xf32, #tpu.memory_space<vmem>>, vector<1x8x128xf32>,
    %c2_i32_132 = arith.constant 2 : i32
    %c7_i32_133 = arith.constant 7 : i32
    %425 = arith.subi %c7_i32_133, %c2_i32_132 : i32
    %426 = arith.index_cast %425 : i32 to index
    %c0_134 = arith.constant 0 : index
    %c0_135 = arith.constant 0 : index
    %427 = vector.load %arg11[%426, %c0_134, %c0_135] : memref<8x8x384xbf16, #tpu.memory_space<vmem>>, vector<1x8x384xbf16>
    %428 = vector.shape_cast %427 : vector<1x8x384xbf16> to vector<8x384xbf16>
    %429 = arith.extf %428 : vector<8x384xbf16> to vector<8x384xf32>
    %430 = arith.truncf %420 : vector<8x128xf32> to vector<8x128xbf16>
    %c0_136 = arith.constant 0 : index
    %c0_137 = arith.constant 0 : index
    %431 = vector.load %arg7[%c0_136, %c0_137] : memref<128x384xbf16, #tpu.memory_space<vmem>>, vector<128x384xbf16>
    %cst_138 = arith.constant dense<0.000000e+00> : vector<8x384xf32>
    %432 = tpu.matmul %430, %431, %cst_138 {dimension_numbers = #tpu.dot_dimension_numbers<[1], [0], [0], [1], [0, 0, 1, 1], [], []>} : vector<8x128xbf16>, vector<128x384xbf16>, vector<8x384xf32> -> vector<8x384xf32>
    %433 = vector.extract_strided_slice %429 {offsets = [0, 0], sizes = [8, 128], strides = [1, 1]} : vector<8x384xf32> to vector<8x128xf32>
    %434 = vector.extract_strided_slice %432 {offsets = [0, 0], sizes = [8, 128], strides = [1, 1]} : vector<8x384xf32> to vector<8x128xf32>
    %435 = arith.addf %433, %434 : vector<8x128xf32>
    %436 = arith.negf %435 : vector<8x128xf32>
    %437 = math.exp %436 : vector<8x128xf32>
    %cst_139 = arith.constant 1.000000e+00 : f32
    %438 = vector.broadcast %cst_139 : f32 to vector<8x128xf32>
    %439 = arith.addf %438, %437 : vector<8x128xf32>
    %440 = arith.divf %438, %439 : vector<8x128xf32>
    %441 = vector.extract_strided_slice %429 {offsets = [0, 128], sizes = [8, 128], strides = [1, 1]} : vector<8x384xf32> to vector<8x128xf32>
    %442 = vector.extract_strided_slice %432 {offsets = [0, 128], sizes = [8, 128], strides = [1, 1]} : vector<8x384xf32> to vector<8x128xf32>
    %443 = arith.addf %441, %442 : vector<8x128xf32>
    %444 = arith.negf %443 : vector<8x128xf32>
    %445 = math.exp %444 : vector<8x128xf32>
    %cst_140 = arith.constant 1.000000e+00 : f32
    %446 = vector.broadcast %cst_140 : f32 to vector<8x128xf32>
    %447 = arith.addf %446, %445 : vector<8x128xf32>
    %448 = arith.divf %446, %447 : vector<8x128xf32>
    %449 = vector.extract_strided_slice %429 {offsets = [0, 256], sizes = [8, 128], strides = [1, 1]} : vector<8x384xf32> to vector<8x128xf32>
    %450 = vector.extract_strided_slice %432 {offsets = [0, 256], sizes = [8, 128], strides = [1, 1]} : vector<8x384xf32> to vector<8x128xf32>
    %451 = vector.broadcast %344 : vector<1x128xf32> to vector<8x128xf32>
    %452 = arith.addf %450, %451 : vector<8x128xf32>
    %453 = arith.mulf %440, %452 : vector<8x128xf32>
    %454 = arith.addf %449, %453 : vector<8x128xf32>
    %455 = math.tanh %454 : vector<8x128xf32>
    %cst_141 = arith.constant 1.000000e+00 : f32
    %456 = vector.broadcast %cst_141 : f32 to vector<8x128xf32>
    %457 = arith.subf %456, %448 : vector<8x128xf32>
    %458 = arith.mulf %457, %455 : vector<8x128xf32>
    %459 = arith.mulf %448, %420 : vector<8x128xf32>
    %460 = arith.addf %458, %459 : vector<8x128xf32>
    %461 = arith.index_cast %425 : i32 to index
    %c0_142 = arith.constant 0 : index
    %c0_143 = arith.constant 0 : index
    %462 = vector.load %arg10[%461, %c0_142, %c0_143] : memref<8x8x128xf32, #tpu.memory_space<vmem>>, vector<1x8x128xf32>
    %463 = vector.shape_cast %462 : vector<1x8x128xf32> to vector<8x128xf32>
    %464 = vector.shape_cast %460 : vector<8x128xf32> to vector<1x8x128xf32>
    tpu.vector_store %arg10[%461, %c0_142, %c0_143], %464 {strides = array<i32>} : memref<8x8x128xf32, #tpu.memory_space<vmem>>, vector<1x8x128xf32>,
    %c3_i32_144 = arith.constant 3 : i32
    %c7_i32_145 = arith.constant 7 : i32
    %465 = arith.subi %c7_i32_145, %c3_i32_144 : i32
    %466 = arith.index_cast %465 : i32 to index
    %c0_146 = arith.constant 0 : index
    %c0_147 = arith.constant 0 : index
    %467 = vector.load %arg11[%466, %c0_146, %c0_147] : memref<8x8x384xbf16, #tpu.memory_space<vmem>>, vector<1x8x384xbf16>
    %468 = vector.shape_cast %467 : vector<1x8x384xbf16> to vector<8x384xbf16>
    %469 = arith.extf %468 : vector<8x384xbf16> to vector<8x384xf32>
    %470 = arith.truncf %460 : vector<8x128xf32> to vector<8x128xbf16>
    %c0_148 = arith.constant 0 : index
    %c0_149 = arith.constant 0 : index
    %471 = vector.load %arg7[%c0_148, %c0_149] : memref<128x384xbf16, #tpu.memory_space<vmem>>, vector<128x384xbf16>
    %cst_150 = arith.constant dense<0.000000e+00> : vector<8x384xf32>
    %472 = tpu.matmul %470, %471, %cst_150 {dimension_numbers = #tpu.dot_dimension_numbers<[1], [0], [0], [1], [0, 0, 1, 1], [], []>} : vector<8x128xbf16>, vector<128x384xbf16>, vector<8x384xf32> -> vector<8x384xf32>
    %473 = vector.extract_strided_slice %469 {offsets = [0, 0], sizes = [8, 128], strides = [1, 1]} : vector<8x384xf32> to vector<8x128xf32>
    %474 = vector.extract_strided_slice %472 {offsets = [0, 0], sizes = [8, 128], strides = [1, 1]} : vector<8x384xf32> to vector<8x128xf32>
    %475 = arith.addf %473, %474 : vector<8x128xf32>
    %476 = arith.negf %475 : vector<8x128xf32>
    %477 = math.exp %476 : vector<8x128xf32>
    %cst_151 = arith.constant 1.000000e+00 : f32
    %478 = vector.broadcast %cst_151 : f32 to vector<8x128xf32>
    %479 = arith.addf %478, %477 : vector<8x128xf32>
    %480 = arith.divf %478, %479 : vector<8x128xf32>
    %481 = vector.extract_strided_slice %469 {offsets = [0, 128], sizes = [8, 128], strides = [1, 1]} : vector<8x384xf32> to vector<8x128xf32>
    %482 = vector.extract_strided_slice %472 {offsets = [0, 128], sizes = [8, 128], strides = [1, 1]} : vector<8x384xf32> to vector<8x128xf32>
    %483 = arith.addf %481, %482 : vector<8x128xf32>
    %484 = arith.negf %483 : vector<8x128xf32>
    %485 = math.exp %484 : vector<8x128xf32>
    %cst_152 = arith.constant 1.000000e+00 : f32
    %486 = vector.broadcast %cst_152 : f32 to vector<8x128xf32>
    %487 = arith.addf %486, %485 : vector<8x128xf32>
    %488 = arith.divf %486, %487 : vector<8x128xf32>
    %489 = vector.extract_strided_slice %469 {offsets = [0, 256], sizes = [8, 128], strides = [1, 1]} : vector<8x384xf32> to vector<8x128xf32>
    %490 = vector.extract_strided_slice %472 {offsets = [0, 256], sizes = [8, 128], strides = [1, 1]} : vector<8x384xf32> to vector<8x128xf32>
    %491 = vector.broadcast %344 : vector<1x128xf32> to vector<8x128xf32>
    %492 = arith.addf %490, %491 : vector<8x128xf32>
    %493 = arith.mulf %480, %492 : vector<8x128xf32>
    %494 = arith.addf %489, %493 : vector<8x128xf32>
    %495 = math.tanh %494 : vector<8x128xf32>
    %cst_153 = arith.constant 1.000000e+00 : f32
    %496 = vector.broadcast %cst_153 : f32 to vector<8x128xf32>
    %497 = arith.subf %496, %488 : vector<8x128xf32>
    %498 = arith.mulf %497, %495 : vector<8x128xf32>
    %499 = arith.mulf %488, %460 : vector<8x128xf32>
    %500 = arith.addf %498, %499 : vector<8x128xf32>
    %501 = arith.index_cast %465 : i32 to index
    %c0_154 = arith.constant 0 : index
    %c0_155 = arith.constant 0 : index
    %502 = vector.load %arg10[%501, %c0_154, %c0_155] : memref<8x8x128xf32, #tpu.memory_space<vmem>>, vector<1x8x128xf32>
    %503 = vector.shape_cast %502 : vector<1x8x128xf32> to vector<8x128xf32>
    %504 = vector.shape_cast %500 : vector<8x128xf32> to vector<1x8x128xf32>
    tpu.vector_store %arg10[%501, %c0_154, %c0_155], %504 {strides = array<i32>} : memref<8x8x128xf32, #tpu.memory_space<vmem>>, vector<1x8x128xf32>,
    %c4_i32_156 = arith.constant 4 : i32
    %c7_i32_157 = arith.constant 7 : i32
    %505 = arith.subi %c7_i32_157, %c4_i32_156 : i32
    %506 = arith.index_cast %505 : i32 to index
    %c0_158 = arith.constant 0 : index
    %c0_159 = arith.constant 0 : index
    %507 = vector.load %arg11[%506, %c0_158, %c0_159] : memref<8x8x384xbf16, #tpu.memory_space<vmem>>, vector<1x8x384xbf16>
    %508 = vector.shape_cast %507 : vector<1x8x384xbf16> to vector<8x384xbf16>
    %509 = arith.extf %508 : vector<8x384xbf16> to vector<8x384xf32>
    %510 = arith.truncf %500 : vector<8x128xf32> to vector<8x128xbf16>
    %c0_160 = arith.constant 0 : index
    %c0_161 = arith.constant 0 : index
    %511 = vector.load %arg7[%c0_160, %c0_161] : memref<128x384xbf16, #tpu.memory_space<vmem>>, vector<128x384xbf16>
    %cst_162 = arith.constant dense<0.000000e+00> : vector<8x384xf32>
    %512 = tpu.matmul %510, %511, %cst_162 {dimension_numbers = #tpu.dot_dimension_numbers<[1], [0], [0], [1], [0, 0, 1, 1], [], []>} : vector<8x128xbf16>, vector<128x384xbf16>, vector<8x384xf32> -> vector<8x384xf32>
    %513 = vector.extract_strided_slice %509 {offsets = [0, 0], sizes = [8, 128], strides = [1, 1]} : vector<8x384xf32> to vector<8x128xf32>
    %514 = vector.extract_strided_slice %512 {offsets = [0, 0], sizes = [8, 128], strides = [1, 1]} : vector<8x384xf32> to vector<8x128xf32>
    %515 = arith.addf %513, %514 : vector<8x128xf32>
    %516 = arith.negf %515 : vector<8x128xf32>
    %517 = math.exp %516 : vector<8x128xf32>
    %cst_163 = arith.constant 1.000000e+00 : f32
    %518 = vector.broadcast %cst_163 : f32 to vector<8x128xf32>
    %519 = arith.addf %518, %517 : vector<8x128xf32>
    %520 = arith.divf %518, %519 : vector<8x128xf32>
    %521 = vector.extract_strided_slice %509 {offsets = [0, 128], sizes = [8, 128], strides = [1, 1]} : vector<8x384xf32> to vector<8x128xf32>
    %522 = vector.extract_strided_slice %512 {offsets = [0, 128], sizes = [8, 128], strides = [1, 1]} : vector<8x384xf32> to vector<8x128xf32>
    %523 = arith.addf %521, %522 : vector<8x128xf32>
    %524 = arith.negf %523 : vector<8x128xf32>
    %525 = math.exp %524 : vector<8x128xf32>
    %cst_164 = arith.constant 1.000000e+00 : f32
    %526 = vector.broadcast %cst_164 : f32 to vector<8x128xf32>
    %527 = arith.addf %526, %525 : vector<8x128xf32>
    %528 = arith.divf %526, %527 : vector<8x128xf32>
    %529 = vector.extract_strided_slice %509 {offsets = [0, 256], sizes = [8, 128], strides = [1, 1]} : vector<8x384xf32> to vector<8x128xf32>
    %530 = vector.extract_strided_slice %512 {offsets = [0, 256], sizes = [8, 128], strides = [1, 1]} : vector<8x384xf32> to vector<8x128xf32>
    %531 = vector.broadcast %344 : vector<1x128xf32> to vector<8x128xf32>
    %532 = arith.addf %530, %531 : vector<8x128xf32>
    %533 = arith.mulf %520, %532 : vector<8x128xf32>
    %534 = arith.addf %529, %533 : vector<8x128xf32>
    %535 = math.tanh %534 : vector<8x128xf32>
    %cst_165 = arith.constant 1.000000e+00 : f32
    %536 = vector.broadcast %cst_165 : f32 to vector<8x128xf32>
    %537 = arith.subf %536, %528 : vector<8x128xf32>
    %538 = arith.mulf %537, %535 : vector<8x128xf32>
    %539 = arith.mulf %528, %500 : vector<8x128xf32>
    %540 = arith.addf %538, %539 : vector<8x128xf32>
    %541 = arith.index_cast %505 : i32 to index
    %c0_166 = arith.constant 0 : index
    %c0_167 = arith.constant 0 : index
    %542 = vector.load %arg10[%541, %c0_166, %c0_167] : memref<8x8x128xf32, #tpu.memory_space<vmem>>, vector<1x8x128xf32>
    %543 = vector.shape_cast %542 : vector<1x8x128xf32> to vector<8x128xf32>
    %544 = vector.shape_cast %540 : vector<8x128xf32> to vector<1x8x128xf32>
    tpu.vector_store %arg10[%541, %c0_166, %c0_167], %544 {strides = array<i32>} : memref<8x8x128xf32, #tpu.memory_space<vmem>>, vector<1x8x128xf32>,
    %c5_i32_168 = arith.constant 5 : i32
    %c7_i32_169 = arith.constant 7 : i32
    %545 = arith.subi %c7_i32_169, %c5_i32_168 : i32
    %546 = arith.index_cast %545 : i32 to index
    %c0_170 = arith.constant 0 : index
    %c0_171 = arith.constant 0 : index
    %547 = vector.load %arg11[%546, %c0_170, %c0_171] : memref<8x8x384xbf16, #tpu.memory_space<vmem>>, vector<1x8x384xbf16>
    %548 = vector.shape_cast %547 : vector<1x8x384xbf16> to vector<8x384xbf16>
    %549 = arith.extf %548 : vector<8x384xbf16> to vector<8x384xf32>
    %550 = arith.truncf %540 : vector<8x128xf32> to vector<8x128xbf16>
    %c0_172 = arith.constant 0 : index
    %c0_173 = arith.constant 0 : index
    %551 = vector.load %arg7[%c0_172, %c0_173] : memref<128x384xbf16, #tpu.memory_space<vmem>>, vector<128x384xbf16>
    %cst_174 = arith.constant dense<0.000000e+00> : vector<8x384xf32>
    %552 = tpu.matmul %550, %551, %cst_174 {dimension_numbers = #tpu.dot_dimension_numbers<[1], [0], [0], [1], [0, 0, 1, 1], [], []>} : vector<8x128xbf16>, vector<128x384xbf16>, vector<8x384xf32> -> vector<8x384xf32>
    %553 = vector.extract_strided_slice %549 {offsets = [0, 0], sizes = [8, 128], strides = [1, 1]} : vector<8x384xf32> to vector<8x128xf32>
    %554 = vector.extract_strided_slice %552 {offsets = [0, 0], sizes = [8, 128], strides = [1, 1]} : vector<8x384xf32> to vector<8x128xf32>
    %555 = arith.addf %553, %554 : vector<8x128xf32>
    %556 = arith.negf %555 : vector<8x128xf32>
    %557 = math.exp %556 : vector<8x128xf32>
    %cst_175 = arith.constant 1.000000e+00 : f32
    %558 = vector.broadcast %cst_175 : f32 to vector<8x128xf32>
    %559 = arith.addf %558, %557 : vector<8x128xf32>
    %560 = arith.divf %558, %559 : vector<8x128xf32>
    %561 = vector.extract_strided_slice %549 {offsets = [0, 128], sizes = [8, 128], strides = [1, 1]} : vector<8x384xf32> to vector<8x128xf32>
    %562 = vector.extract_strided_slice %552 {offsets = [0, 128], sizes = [8, 128], strides = [1, 1]} : vector<8x384xf32> to vector<8x128xf32>
    %563 = arith.addf %561, %562 : vector<8x128xf32>
    %564 = arith.negf %563 : vector<8x128xf32>
    %565 = math.exp %564 : vector<8x128xf32>
    %cst_176 = arith.constant 1.000000e+00 : f32
    %566 = vector.broadcast %cst_176 : f32 to vector<8x128xf32>
    %567 = arith.addf %566, %565 : vector<8x128xf32>
    %568 = arith.divf %566, %567 : vector<8x128xf32>
    %569 = vector.extract_strided_slice %549 {offsets = [0, 256], sizes = [8, 128], strides = [1, 1]} : vector<8x384xf32> to vector<8x128xf32>
    %570 = vector.extract_strided_slice %552 {offsets = [0, 256], sizes = [8, 128], strides = [1, 1]} : vector<8x384xf32> to vector<8x128xf32>
    %571 = vector.broadcast %344 : vector<1x128xf32> to vector<8x128xf32>
    %572 = arith.addf %570, %571 : vector<8x128xf32>
    %573 = arith.mulf %560, %572 : vector<8x128xf32>
    %574 = arith.addf %569, %573 : vector<8x128xf32>
    %575 = math.tanh %574 : vector<8x128xf32>
    %cst_177 = arith.constant 1.000000e+00 : f32
    %576 = vector.broadcast %cst_177 : f32 to vector<8x128xf32>
    %577 = arith.subf %576, %568 : vector<8x128xf32>
    %578 = arith.mulf %577, %575 : vector<8x128xf32>
    %579 = arith.mulf %568, %540 : vector<8x128xf32>
    %580 = arith.addf %578, %579 : vector<8x128xf32>
    %581 = arith.index_cast %545 : i32 to index
    %c0_178 = arith.constant 0 : index
    %c0_179 = arith.constant 0 : index
    %582 = vector.load %arg10[%581, %c0_178, %c0_179] : memref<8x8x128xf32, #tpu.memory_space<vmem>>, vector<1x8x128xf32>
    %583 = vector.shape_cast %582 : vector<1x8x128xf32> to vector<8x128xf32>
    %584 = vector.shape_cast %580 : vector<8x128xf32> to vector<1x8x128xf32>
    tpu.vector_store %arg10[%581, %c0_178, %c0_179], %584 {strides = array<i32>} : memref<8x8x128xf32, #tpu.memory_space<vmem>>, vector<1x8x128xf32>,
    %c6_i32_180 = arith.constant 6 : i32
    %c7_i32_181 = arith.constant 7 : i32
    %585 = arith.subi %c7_i32_181, %c6_i32_180 : i32
    %586 = arith.index_cast %585 : i32 to index
    %c0_182 = arith.constant 0 : index
    %c0_183 = arith.constant 0 : index
    %587 = vector.load %arg11[%586, %c0_182, %c0_183] : memref<8x8x384xbf16, #tpu.memory_space<vmem>>, vector<1x8x384xbf16>
    %588 = vector.shape_cast %587 : vector<1x8x384xbf16> to vector<8x384xbf16>
    %589 = arith.extf %588 : vector<8x384xbf16> to vector<8x384xf32>
    %590 = arith.truncf %580 : vector<8x128xf32> to vector<8x128xbf16>
    %c0_184 = arith.constant 0 : index
    %c0_185 = arith.constant 0 : index
    %591 = vector.load %arg7[%c0_184, %c0_185] : memref<128x384xbf16, #tpu.memory_space<vmem>>, vector<128x384xbf16>
    %cst_186 = arith.constant dense<0.000000e+00> : vector<8x384xf32>
    %592 = tpu.matmul %590, %591, %cst_186 {dimension_numbers = #tpu.dot_dimension_numbers<[1], [0], [0], [1], [0, 0, 1, 1], [], []>} : vector<8x128xbf16>, vector<128x384xbf16>, vector<8x384xf32> -> vector<8x384xf32>
    %593 = vector.extract_strided_slice %589 {offsets = [0, 0], sizes = [8, 128], strides = [1, 1]} : vector<8x384xf32> to vector<8x128xf32>
    %594 = vector.extract_strided_slice %592 {offsets = [0, 0], sizes = [8, 128], strides = [1, 1]} : vector<8x384xf32> to vector<8x128xf32>
    %595 = arith.addf %593, %594 : vector<8x128xf32>
    %596 = arith.negf %595 : vector<8x128xf32>
    %597 = math.exp %596 : vector<8x128xf32>
    %cst_187 = arith.constant 1.000000e+00 : f32
    %598 = vector.broadcast %cst_187 : f32 to vector<8x128xf32>
    %599 = arith.addf %598, %597 : vector<8x128xf32>
    %600 = arith.divf %598, %599 : vector<8x128xf32>
    %601 = vector.extract_strided_slice %589 {offsets = [0, 128], sizes = [8, 128], strides = [1, 1]} : vector<8x384xf32> to vector<8x128xf32>
    %602 = vector.extract_strided_slice %592 {offsets = [0, 128], sizes = [8, 128], strides = [1, 1]} : vector<8x384xf32> to vector<8x128xf32>
    %603 = arith.addf %601, %602 : vector<8x128xf32>
    %604 = arith.negf %603 : vector<8x128xf32>
    %605 = math.exp %604 : vector<8x128xf32>
    %cst_188 = arith.constant 1.000000e+00 : f32
    %606 = vector.broadcast %cst_188 : f32 to vector<8x128xf32>
    %607 = arith.addf %606, %605 : vector<8x128xf32>
    %608 = arith.divf %606, %607 : vector<8x128xf32>
    %609 = vector.extract_strided_slice %589 {offsets = [0, 256], sizes = [8, 128], strides = [1, 1]} : vector<8x384xf32> to vector<8x128xf32>
    %610 = vector.extract_strided_slice %592 {offsets = [0, 256], sizes = [8, 128], strides = [1, 1]} : vector<8x384xf32> to vector<8x128xf32>
    %611 = vector.broadcast %344 : vector<1x128xf32> to vector<8x128xf32>
    %612 = arith.addf %610, %611 : vector<8x128xf32>
    %613 = arith.mulf %600, %612 : vector<8x128xf32>
    %614 = arith.addf %609, %613 : vector<8x128xf32>
    %615 = math.tanh %614 : vector<8x128xf32>
    %cst_189 = arith.constant 1.000000e+00 : f32
    %616 = vector.broadcast %cst_189 : f32 to vector<8x128xf32>
    %617 = arith.subf %616, %608 : vector<8x128xf32>
    %618 = arith.mulf %617, %615 : vector<8x128xf32>
    %619 = arith.mulf %608, %580 : vector<8x128xf32>
    %620 = arith.addf %618, %619 : vector<8x128xf32>
    %621 = arith.index_cast %585 : i32 to index
    %c0_190 = arith.constant 0 : index
    %c0_191 = arith.constant 0 : index
    %622 = vector.load %arg10[%621, %c0_190, %c0_191] : memref<8x8x128xf32, #tpu.memory_space<vmem>>, vector<1x8x128xf32>
    %623 = vector.shape_cast %622 : vector<1x8x128xf32> to vector<8x128xf32>
    %624 = vector.shape_cast %620 : vector<8x128xf32> to vector<1x8x128xf32>
    tpu.vector_store %arg10[%621, %c0_190, %c0_191], %624 {strides = array<i32>} : memref<8x8x128xf32, #tpu.memory_space<vmem>>, vector<1x8x128xf32>,
    %c7_i32_192 = arith.constant 7 : i32
    %c7_i32_193 = arith.constant 7 : i32
    %625 = arith.subi %c7_i32_193, %c7_i32_192 : i32
    %626 = arith.index_cast %625 : i32 to index
    %c0_194 = arith.constant 0 : index
    %c0_195 = arith.constant 0 : index
    %627 = vector.load %arg11[%626, %c0_194, %c0_195] : memref<8x8x384xbf16, #tpu.memory_space<vmem>>, vector<1x8x384xbf16>
    %628 = vector.shape_cast %627 : vector<1x8x384xbf16> to vector<8x384xbf16>
    %629 = arith.extf %628 : vector<8x384xbf16> to vector<8x384xf32>
    %630 = arith.truncf %620 : vector<8x128xf32> to vector<8x128xbf16>
    %c0_196 = arith.constant 0 : index
    %c0_197 = arith.constant 0 : index
    %631 = vector.load %arg7[%c0_196, %c0_197] : memref<128x384xbf16, #tpu.memory_space<vmem>>, vector<128x384xbf16>
    %cst_198 = arith.constant dense<0.000000e+00> : vector<8x384xf32>
    %632 = tpu.matmul %630, %631, %cst_198 {dimension_numbers = #tpu.dot_dimension_numbers<[1], [0], [0], [1], [0, 0, 1, 1], [], []>} : vector<8x128xbf16>, vector<128x384xbf16>, vector<8x384xf32> -> vector<8x384xf32>
    %633 = vector.extract_strided_slice %629 {offsets = [0, 0], sizes = [8, 128], strides = [1, 1]} : vector<8x384xf32> to vector<8x128xf32>
    %634 = vector.extract_strided_slice %632 {offsets = [0, 0], sizes = [8, 128], strides = [1, 1]} : vector<8x384xf32> to vector<8x128xf32>
    %635 = arith.addf %633, %634 : vector<8x128xf32>
    %636 = arith.negf %635 : vector<8x128xf32>
    %637 = math.exp %636 : vector<8x128xf32>
    %cst_199 = arith.constant 1.000000e+00 : f32
    %638 = vector.broadcast %cst_199 : f32 to vector<8x128xf32>
    %639 = arith.addf %638, %637 : vector<8x128xf32>
    %640 = arith.divf %638, %639 : vector<8x128xf32>
    %641 = vector.extract_strided_slice %629 {offsets = [0, 128], sizes = [8, 128], strides = [1, 1]} : vector<8x384xf32> to vector<8x128xf32>
    %642 = vector.extract_strided_slice %632 {offsets = [0, 128], sizes = [8, 128], strides = [1, 1]} : vector<8x384xf32> to vector<8x128xf32>
    %643 = arith.addf %641, %642 : vector<8x128xf32>
    %644 = arith.negf %643 : vector<8x128xf32>
    %645 = math.exp %644 : vector<8x128xf32>
    %cst_200 = arith.constant 1.000000e+00 : f32
    %646 = vector.broadcast %cst_200 : f32 to vector<8x128xf32>
    %647 = arith.addf %646, %645 : vector<8x128xf32>
    %648 = arith.divf %646, %647 : vector<8x128xf32>
    %649 = vector.extract_strided_slice %629 {offsets = [0, 256], sizes = [8, 128], strides = [1, 1]} : vector<8x384xf32> to vector<8x128xf32>
    %650 = vector.extract_strided_slice %632 {offsets = [0, 256], sizes = [8, 128], strides = [1, 1]} : vector<8x384xf32> to vector<8x128xf32>
    %651 = vector.broadcast %344 : vector<1x128xf32> to vector<8x128xf32>
    %652 = arith.addf %650, %651 : vector<8x128xf32>
    %653 = arith.mulf %640, %652 : vector<8x128xf32>
    %654 = arith.addf %649, %653 : vector<8x128xf32>
    %655 = math.tanh %654 : vector<8x128xf32>
    %cst_201 = arith.constant 1.000000e+00 : f32
    %656 = vector.broadcast %cst_201 : f32 to vector<8x128xf32>
    %657 = arith.subf %656, %648 : vector<8x128xf32>
    %658 = arith.mulf %657, %655 : vector<8x128xf32>
    %659 = arith.mulf %648, %620 : vector<8x128xf32>
    %660 = arith.addf %658, %659 : vector<8x128xf32>
    %661 = arith.index_cast %625 : i32 to index
    %c0_202 = arith.constant 0 : index
    %c0_203 = arith.constant 0 : index
    %662 = vector.load %arg10[%661, %c0_202, %c0_203] : memref<8x8x128xf32, #tpu.memory_space<vmem>>, vector<1x8x128xf32>
    %663 = vector.shape_cast %662 : vector<1x8x128xf32> to vector<8x128xf32>
    %664 = vector.shape_cast %660 : vector<8x128xf32> to vector<1x8x128xf32>
    tpu.vector_store %arg10[%661, %c0_202, %c0_203], %664 {strides = array<i32>} : memref<8x8x128xf32, #tpu.memory_space<vmem>>, vector<1x8x128xf32>,
    %c8_i32_204 = arith.constant 8 : i32
    %c0_205 = arith.constant 0 : index
    %c0_206 = arith.constant 0 : index
    %c0_207 = arith.constant 0 : index
    %665 = vector.load %arg10[%c0_205, %c0_206, %c0_207] : memref<8x8x128xf32, #tpu.memory_space<vmem>>, vector<8x8x128xf32>
    %cst_208 = arith.constant 5.000000e-01 : f32
    %666 = vector.broadcast %cst_208 : f32 to vector<8x8x128xf32>
    %667 = arith.mulf %666, %665 : vector<8x8x128xf32>
    %cst_209 = arith.constant 0.707106769 : f32
    %668 = vector.broadcast %cst_209 : f32 to vector<8x8x128xf32>
    %669 = arith.mulf %665, %668 : vector<8x8x128xf32>
    %670 = math.erf %669 : vector<8x8x128xf32>
    %cst_210 = arith.constant 1.000000e+00 : f32
    %671 = vector.broadcast %cst_210 : f32 to vector<8x8x128xf32>
    %672 = arith.addf %671, %670 : vector<8x8x128xf32>
    %673 = arith.mulf %667, %672 : vector<8x8x128xf32>
    %c0_211 = arith.constant 0 : index
    %c0_212 = arith.constant 0 : index
    %c0_213 = arith.constant 0 : index
    %674 = vector.load %arg10[%c0_211, %c0_212, %c0_213] : memref<8x8x128xf32, #tpu.memory_space<vmem>>, vector<8x8x128xf32>
    tpu.vector_store %arg10[%c0_211, %c0_212, %c0_213], %673 {strides = array<i32>} : memref<8x8x128xf32, #tpu.memory_space<vmem>>, vector<8x8x128xf32>,
    return
  }
  func.func @transform_0(%arg0: i32) -> (i32, i32, i32) {
    %c0_i32 = arith.constant 0 : i32
    %c0_i32_0 = arith.constant 0 : i32
    %c0_i32_1 = arith.constant 0 : i32
    return %c0_i32, %arg0, %c0_i32_0 : i32, i32, i32
  }
  func.func @transform_1(%arg0: i32) -> (i32, i32) {
    %c0_i32 = arith.constant 0 : i32
    %c0_i32_0 = arith.constant 0 : i32
    %c0_i32_1 = arith.constant 0 : i32
    return %c0_i32, %c0_i32_0 : i32, i32
  }
  func.func @transform_2(%arg0: i32) -> (i32, i32) {
    %c0_i32 = arith.constant 0 : i32
    %c0_i32_0 = arith.constant 0 : i32
    %c0_i32_1 = arith.constant 0 : i32
    return %c0_i32, %c0_i32_0 : i32, i32
  }
  func.func @transform_3(%arg0: i32) -> (i32, i32) {
    %c0_i32 = arith.constant 0 : i32
    %c0_i32_0 = arith.constant 0 : i32
    %c0_i32_1 = arith.constant 0 : i32
    return %c0_i32, %c0_i32_0 : i32, i32
  }
  func.func @transform_4(%arg0: i32) -> (i32, i32) {
    %c0_i32 = arith.constant 0 : i32
    %c0_i32_0 = arith.constant 0 : i32
    %c0_i32_1 = arith.constant 0 : i32
    return %c0_i32, %c0_i32_0 : i32, i32
  }
  func.func @transform_5(%arg0: i32) -> (i32, i32) {
    %c0_i32 = arith.constant 0 : i32
    %c0_i32_0 = arith.constant 0 : i32
    %c0_i32_1 = arith.constant 0 : i32
    return %c0_i32, %c0_i32_0 : i32, i32
  }
  func.func @transform_6(%arg0: i32) -> (i32, i32) {
    %c0_i32 = arith.constant 0 : i32
    %c0_i32_0 = arith.constant 0 : i32
    %c0_i32_1 = arith.constant 0 : i32
    return %c0_i32, %c0_i32_0 : i32, i32
  }
  func.func @transform_7(%arg0: i32) -> (i32, i32) {
    %c0_i32 = arith.constant 0 : i32
    %c0_i32_0 = arith.constant 0 : i32
    %c0_i32_1 = arith.constant 0 : i32
    return %c0_i32, %c0_i32_0 : i32, i32
  }
  func.func @transform_8(%arg0: i32) -> (i32, i32) {
    %c0_i32 = arith.constant 0 : i32
    %c0_i32_0 = arith.constant 0 : i32
    %c0_i32_1 = arith.constant 0 : i32
    return %c0_i32, %c0_i32_0 : i32, i32
  }
  func.func @transform_9(%arg0: i32) -> (i32, i32, i32) {
    %c0_i32 = arith.constant 0 : i32
    %c0_i32_0 = arith.constant 0 : i32
    %c0_i32_1 = arith.constant 0 : i32
    return %c0_i32, %arg0, %c0_i32_0 : i32, i32, i32
  }
}

</mosaic_0001>

<bundles_post_ra>
// kernel: tpu_custom_call.1
= control target key start
LH: loop header
LB: loop body
LE: loop exit
PB: predicated region body
PF: predicated region fallthrough
CT: control target
= control target key end

     0   :  { %14 = vsyncpa [#allocation4], 0  ;;  %s8152_s0 = inlined_call_operand.hbm [shape: f32[8,8,128], index: 0, kind: input, shape index: {}]   ;;  %s8153_s1 = inlined_call_operand.hbm [shape: bf16[128,384], index: 1, kind: input, shape index: {}]   ;;  %s8154_s2 = inlined_call_operand.hbm [shape: bf16[128,384], index: 2, kind: input, shape index: {}]   ;;  %s8155_s3 = inlined_call_operand.vmem [shape: f32[1,384], index: 3, kind: input, shape index: {}]   ;;  %s8156_s4 = inlined_call_operand.vmem [shape: f32[1,128], index: 4, kind: input, shape index: {}]   ;;  %s8157_s5 = inlined_call_operand.hbm [shape: bf16[128,384], index: 5, kind: input, shape index: {}]   ;;  %s8158_s6 = inlined_call_operand.hbm [shape: bf16[128,384], index: 6, kind: input, shape index: {}]   ;;  %s8159_s7 = inlined_call_operand.vmem [shape: f32[1,384], index: 7, kind: input, shape index: {}]   ;;  %s8160_s8 = inlined_call_operand.vmem [shape: f32[1,128], index: 8, kind: input, shape index: {}]   ;;  %s8161_s9 = inlined_call_operand.hbm [shape: f32[8,8,128], index: 9, kind: output, shape index: {}]  }
   0x1   :  { %15 = vsyncpa [#allocation7], 0 }
   0x2   :  { %16 = vsyncpa [#allocation10], 0 }
   0x3   :  { %17 = vsyncpa [#allocation5], 0  ;;  %s7174_s30 = smov [#allocation6]   ;;  %s7034_s13 = scalar_lea.hbm %s8153_s1, 3072 }
   0x4   :  { %s35_s10 = sshll.u32 %s7174_s30, 4  ;;  %p7035_p0 = scmp.ne.s32.totalorder %s8153_s1, %s7034_s13  ;;  %s36_s10 = int_to_ptr.vmem [resolvable:$true] %s35_s10 }
   0x5   :  { %p7038_p1 = scmp.lt.u32.totalorder %s7034_s13, %s8153_s1 }
   0x7   :  { %p7040_p2 = pnand %p7038_p1, %p7035_p0 }
   0x9   :  { %7043 = shalt.err (!%p7040_p2)
}
   0xa   :  { %s7044_s18 = scalar_lea.vmem %s36_s10, 3072  ;;  %p7049_p4 = scmp.lt.s32.totalorder %s36_s10, %s36_s10 }
   0xb   :  { %p7045_p3 = scmp.ne.s32.totalorder %s36_s10, %s7044_s18  ;;  %p7050_p5 = scmp.lt.s32.totalorder %s7044_s18, %s7044_s18 }
   0xd   :  { %p7051_p6 = por %p7050_p5, %p7049_p4 }
   0xf   :  { %p7052_p7 = pnand %p7051_p6, %p7045_p3 }
  0x11   :  { %7055 = shalt.err (!%p7052_p7)
}
  0x12   :  { %s7175_s19 = smov 192   ;;  %s7176_s20 = smov 12  }
  0x13   :  { %41 = dma.hbm_to_vmem [thread:$0]  %s8153_s1, 3072, %s36_s10, [#allocation7], %s7175_s19, %s7175_s19, %s7176_s20  }
  0x14   :  { %s7177_s23 = smov [#allocation9]   ;;  %s7178_s25 = smov [#allocation3]  }
  0x15   :  { %s63_s24 = sshll.u32 %s7177_s23, 4  ;;  %s23_s26 = sshll.u32 %s7178_s25, 4  ;;  %s64_s24 = int_to_ptr.vmem [resolvable:$true] %s63_s24  ;;  %s24_s26 = int_to_ptr.vmem [resolvable:$true] %s23_s26 }
  0x16   :  { %s7056_s29 = scalar_lea.hbm %s8157_s5, 3072 }
  0x17   :  { %p7057_p8 = scmp.ne.s32.totalorder %s8157_s5, %s7056_s29  ;;  %p7060_p9 = scmp.lt.u32.totalorder %s7056_s29, %s8157_s5 }
  0x19   :  { %p7062_p10 = pnand %p7060_p9, %p7057_p8 }
  0x1b   :  { %7065 = shalt.err (!%p7062_p10)
}
  0x1c   :  { %s7066_s1 = scalar_lea.vmem %s64_s24, 3072  ;;  %p7071_p12 = scmp.lt.s32.totalorder %s64_s24, %s64_s24 }
  0x1d   :  { %p7067_p11 = scmp.ne.s32.totalorder %s64_s24, %s7066_s1  ;;  %p7072_p13 = scmp.lt.s32.totalorder %s7066_s1, %s7066_s1 }
  0x1f   :  { %p7073_p0 = por %p7072_p13, %p7071_p12 }
  0x21   :  { %p7074_p1 = pnand %p7073_p0, %p7067_p11 }
  0x23   :  { %7077 = shalt.err (!%p7074_p1)
}
  0x24   :  { %69 = dma.hbm_to_vmem [thread:$0]  %s8157_s5, 3072, %s64_s24, [#allocation10], %s7175_s19, %s7175_s19, %s7176_s20  }
  0x25   :  { %s7078_s17 = scalar_lea.hbm %s8152_s0, 1024 }
  0x26   :  { %p7079_p2 = scmp.ne.s32.totalorder %s8152_s0, %s7078_s17  ;;  %p7082_p3 = scmp.lt.u32.totalorder %s7078_s17, %s8152_s0 }
  0x28   :  { %p7084_p4 = pnand %p7082_p3, %p7079_p2 }
  0x2a   :  { %7087 = shalt.err (!%p7084_p4)
}
  0x2b   :  { %s7088_s25 = scalar_lea.vmem %s24_s26, 1024  ;;  %p7093_p6 = scmp.lt.s32.totalorder %s24_s26, %s24_s26 }
  0x2c   :  { %p7089_p5 = scmp.ne.s32.totalorder %s24_s26, %s7088_s25  ;;  %p7094_p7 = scmp.lt.s32.totalorder %s7088_s25, %s7088_s25 }
  0x2e   :  { %p7095_p8 = por %p7094_p7, %p7093_p6 }
  0x30   :  { %p7096_p9 = pnand %p7095_p8, %p7089_p5 }
  0x32   :  { %7099 = shalt.err (!%p7096_p9)
}
  0x33   :  { %s7179_s5 = smov 128   ;;  %s7180_s24 = smov 8  }
  0x34   :  { %29 = dma.hbm_to_vmem [thread:$0]  %s8152_s0, 1024, %s24_s26, [#allocation4], %s7179_s5, %s7179_s5, %s7180_s24  }
  0x35   :  { %s7181_s29 = smov [#allocation8]   ;;  %s7182_s11 = smov [#allocation11]  }
  0x36   :  { %s47_s30 = sshll.u32 %s7181_s29, 4  ;;  %s75_s12 = sshll.u32 %s7182_s11, 4  ;;  %s48_s30 = int_to_ptr.vmem [resolvable:$true] %s47_s30  ;;  %s76_s12 = int_to_ptr.vmem [resolvable:$true] %s75_s12 }
  0x37   :  { %s7100_s10 = scalar_lea.hbm %s8154_s2, 3072 }
  0x38   :  { %p7101_p10 = scmp.ne.s32.totalorder %s8154_s2, %s7100_s10  ;;  %p7104_p11 = scmp.lt.u32.totalorder %s7100_s10, %s8154_s2 }
  0x3a   :  { %p7106_p12 = pnand %p7104_p11, %p7101_p10 }
  0x3c   :  { %7109 = shalt.err (!%p7106_p12)
}
  0x3d   :  { %s7110_s0 = scalar_lea.vmem %s48_s30, 3072  ;;  %p7115_p0 = scmp.lt.s32.totalorder %s48_s30, %s48_s30 }
  0x3e   :  { %p7111_p13 = scmp.ne.s32.totalorder %s48_s30, %s7110_s0  ;;  %p7116_p1 = scmp.lt.s32.totalorder %s7110_s0, %s7110_s0 }
  0x40   :  { %p7117_p2 = por %p7116_p1, %p7115_p0 }
  0x42   :  { %p7118_p3 = pnand %p7117_p2, %p7111_p13 }
  0x44   :  { %7121 = shalt.err (!%p7118_p3)
}
  0x45   :  { %53 = dma.hbm_to_vmem [thread:$0]  %s8154_s2, 3072, %s48_s30, [#allocation7], %s7175_s19, %s7175_s19, %s7176_s20  }
  0x46   :  { %s7122_s23 = scalar_lea.hbm %s8158_s6, 3072 }
  0x47   :  { %p7123_p4 = scmp.ne.s32.totalorder %s8158_s6, %s7122_s23  ;;  %p7126_p5 = scmp.lt.u32.totalorder %s7122_s23, %s8158_s6 }
  0x49   :  { %p7128_p6 = pnand %p7126_p5, %p7123_p4 }
  0x4b   :  { %7131 = shalt.err (!%p7128_p6)
}
  0x4c   :  { %s7132_s11 = scalar_lea.vmem %s76_s12, 3072  ;;  %p7137_p8 = scmp.lt.s32.totalorder %s76_s12, %s76_s12 }
  0x4d   :  { %p7133_p7 = scmp.ne.s32.totalorder %s76_s12, %s7132_s11  ;;  %p7138_p9 = scmp.lt.s32.totalorder %s7132_s11, %s7132_s11 }
  0x4f   :  { %p7139_p10 = por %p7138_p9, %p7137_p8 }
  0x51   :  { %p7140_p11 = pnand %p7139_p10, %p7133_p7 }
  0x53   :  { %7143 = shalt.err (!%p7140_p11)
}
  0x54   :  { %81 = dma.hbm_to_vmem [thread:$0]  %s8158_s6, 3072, %s76_s12, [#allocation10], %s7175_s19, %s7175_s19, %s7176_s20  }
  0x55   :  { %7166 = dma.done.wait [#allocation4], 1024  }
  0x56   :  { %7167 = vsyncadd [#allocation4], 4294966272 }
  0x57   :  { %7168 = dma.done.wait [#allocation7], 6144  }
  0x58   :  { %7169 = vsyncadd [#allocation7], 4294961152 }
  0x59   :  { %7170 = dma.done.wait [#allocation10], 6144  }
  0x5a   :  { %7171 = vsyncadd [#allocation10], 4294961152  ;;  %v7183_v0 = vmov 0   ;;  %v6536_v1 = vld [vmem:[#allocation6 + $0x4] ss:$12 sps:$4 sm:$0xff]   ;;  %v103_v13 = vld [vmem:[#allocation3 + $0x8] sm:$0xff] }
  0x5b   :  { %323 = vmatprep.mubr.bf16.mxu0 %v7183_v0  ;;  %v6538_v2 = vld [vmem:[#allocation6] ss:$12 sps:$4 sm:$0xff]   ;;  %291 = vmatprep.subr.bf16.mxu0 %v6536_v1  ;;  %v6539_v3 = vld [vmem:[#allocation6 + $0x1c] ss:$12 sps:$4 sm:$0xff]   ;;  %v6541_v4 = vld [vmem:[#allocation6 + $0x18] ss:$12 sps:$4 sm:$0xff]  }
  0x5c   :  { %292 = vmatpush1.bf16.msra.mxu0 %v6538_v2  ;;  %v6542_v5 = vld [vmem:[#allocation6 + $0x34] ss:$12 sps:$4 sm:$0xff]   ;;  %v6544_v6 = vld [vmem:[#allocation6 + $0x30] ss:$12 sps:$4 sm:$0xff]   ;;  %v6545_v7 = vld [vmem:[#allocation6 + $0x4c] ss:$12 sps:$4 sm:$0xff]  }
  0x5d   :  { %293 = vmatprep.subr.bf16.mxu0 %v6539_v3  ;;  %v6556_v8 = vld [vmem:[#allocation6 + $0x8] ss:$12 sps:$4 sm:$0xff]   ;;  %v6548_v10 = vld [vmem:[#allocation6 + $0x64] ss:$12 sps:$4 sm:$0xff]   ;;  %v6560_v11 = vld [vmem:[#allocation6 + $0x20] ss:$12 sps:$4 sm:$0xff]  }
  0x5e   :  { %v6547_v9 = vld [vmem:[#allocation6 + $0x48] ss:$12 sps:$4 sm:$0xff]   ;;  %6155 = vmatprep.subr.bf16.mxu1 %v6556_v8  ;;  %v102_v12 = vld [vmem:[#allocation3] sm:$0xff]  ;;  %v6566_v18 = vld [vmem:[#allocation6 + $0x50] ss:$12 sps:$4 sm:$0xff]   ;;  %v7184_v42 = vmov 0.0  }
  0x5f   :  { %6156 = vmatpush3.bf16.msra.mxu1 %v6556_v8  ;;  %v6562_v14 = vld [vmem:[#allocation6 + $0x38] ss:$12 sps:$4 sm:$0xff]   ;;  %v6550_v15 = vld [vmem:[#allocation6 + $0x60] ss:$12 sps:$4 sm:$0xff]   ;;  %v110_v16 = vpack.c.bf16 %v103_v13, %v102_v12  ;;  %v6551_v17 = vld [vmem:[#allocation6 + $0x7c] ss:$12 sps:$4 sm:$0xff]  }
  0x60   :  { %294 = vmatpush1.bf16.msra.mxu0 %v6541_v4  ;;  %6157 = vmatprep.subr.bf16.mxu1 %v6560_v11  ;;  %v6553_v19 = vld [vmem:[#allocation6 + $0x78] ss:$12 sps:$4 sm:$0xff]   ;;  %v6554_v20 = vld [vmem:[#allocation6 + $0x94] ss:$12 sps:$4 sm:$0xff]   ;;  %v6557_v22 = vld [vmem:[#allocation6 + $0x90] ss:$12 sps:$4 sm:$0xff]  }
  0x61   :  { %295 = vmatprep.subr.bf16.mxu0 %v6542_v5  ;;  %6171 = vmatprep.mubr.bf16.mxu1 %v110_v16  ;;  %v6570_v21 = vld [vmem:[#allocation6 + $0x68] ss:$12 sps:$4 sm:$0xff]   ;;  %v6558_v23 = vld [vmem:[#allocation6 + $0xac] ss:$12 sps:$4 sm:$0xff]   ;;  %v7313_v26 = vld [vmem:[#allocation8 + $0x4] ss:$12 sps:$4 sm:$0xff]  }
  0x62   :  { %v6574_v24 = vld [vmem:[#allocation6 + $0x80] ss:$12 sps:$4 sm:$0xff]   ;;  %v6561_v25 = vld [vmem:[#allocation6 + $0xa8] ss:$12 sps:$4 sm:$0xff]   ;;  %v6578_v27 = vld [vmem:[#allocation6 + $0x98] ss:$12 sps:$4 sm:$0xff]  }
  0x63   :  { %6158 = vmatpush3.bf16.msra.mxu1 %v6560_v11  ;;  %v7315_v28 = vld [vmem:[#allocation8] ss:$12 sps:$4 sm:$0xff]   ;;  %v7318_v29 = vld [vmem:[#allocation8 + $0x1c] ss:$12 sps:$4 sm:$0xff]   ;;  %v7320_v30 = vld [vmem:[#allocation8 + $0x18] ss:$12 sps:$4 sm:$0xff]  }
  0x64   :  { %296 = vmatpush1.bf16.msra.mxu0 %v6544_v6  ;;  %6159 = vmatprep.subr.bf16.mxu1 %v6562_v14  ;;  %v6582_v31 = vld [vmem:[#allocation6 + $0xb0] ss:$12 sps:$4 sm:$0xff]   ;;  %v7325_v34 = vld [vmem:[#allocation8 + $0x34] ss:$12 sps:$4 sm:$0xff]   ;;  %v7329_v37 = vld [vmem:[#allocation8 + $0x4c] ss:$12 sps:$4 sm:$0xff]  }
  0x65   :  { %297 = vmatprep.subr.bf16.mxu0 %v6545_v7  ;;  %v104_v32 = vld [vmem:[#allocation3 + $0x10] sm:$0xff]  ;;  %v105_v33 = vld [vmem:[#allocation3 + $0x18] sm:$0xff]  ;;  %v106_v38 = vld [vmem:[#allocation3 + $0x20] sm:$0xff]  ;;  %vm7185_vm0 = vmmov 0   ;;  %v148_v7 = vlaneseq }
  0x66   :  { %v7327_v35 = vld [vmem:[#allocation8 + $0x30] ss:$12 sps:$4 sm:$0xff]   ;;  %v111_v36 = vpack.c.bf16 %v105_v33, %v104_v32  ;;  %v107_v39 = vld [vmem:[#allocation3 + $0x28] sm:$0xff]  ;;  %v6594_v50 = vld [vmem:[#allocation8 + $0x38] ss:$12 sps:$4 sm:$0xff]  }
  0x67   :  { %6160 = vmatpush3.bf16.msra.mxu1 %v6562_v14  ;;  %v6589_v40 = vld [vmem:[#allocation8 + $0x8] ss:$12 sps:$4 sm:$0xff]   ;;  %v7336_v43 = vld [vmem:[#allocation8 + $0x64] ss:$12 sps:$4 sm:$0xff]   ;;  %v112_v44 = vpack.c.bf16 %v107_v39, %v106_v38  ;;  %v6593_v45 = vld [vmem:[#allocation8 + $0x20] ss:$12 sps:$4 sm:$0xff]  }
  0x68   :  { %298 = vmatpush1.bf16.msra.mxu0 %v6547_v9  ;;  %6161 = vmatprep.subr.bf16.mxu1 %v6566_v18  ;;  %v7333_v41 = vld [vmem:[#allocation8 + $0x48] ss:$12 sps:$4 sm:$0xff]   ;;  %v6579_v46 = vld [vmem:[#allocation8 + $0x60] ss:$12 sps:$4 sm:$0xff]   ;;  %v109_v48 = vld [vmem:[#allocation3 + $0x38] sm:$0xff]  ;;  %v7394_v8 = vshrl.u32 %v148_v7, 7 }
  0x69   :  { %299 = vmatprep.subr.bf16.mxu0 %v6548_v10  ;;  %v108_v47 = vld [vmem:[#allocation3 + $0x30] sm:$0xff]  ;;  %v6585_v49 = vld [vmem:[#allocation8 + $0x7c] ss:$12 sps:$4 sm:$0xff]   ;;  %v6583_v51 = vld [vmem:[#allocation8 + $0x78] ss:$12 sps:$4 sm:$0xff]  }
  0x6a   :  { %v113_v52 = vpack.c.bf16 %v109_v48, %v108_v47  ;;  %v7344_v53 = vld [vmem:[#allocation8 + $0x94] ss:$12 sps:$4 sm:$0xff]   ;;  %v6595_v54 = vld [vmem:[#allocation8 + $0x50] ss:$12 sps:$4 sm:$0xff]   ;;  %v7352_v56 = vld [vmem:[#allocation8 + $0xac] ss:$12 sps:$4 sm:$0xff]  }
  0x6b   :  { %6162 = vmatpush3.bf16.msra.mxu1 %v6566_v18  ;;  %v7348_v55 = vld [vmem:[#allocation8 + $0x90] ss:$12 sps:$4 sm:$0xff]   ;;  %v6596_v57 = vld [vmem:[#allocation8 + $0x68] ss:$12 sps:$4 sm:$0xff]   ;;  %v6597_v59 = vld [vmem:[#allocation8 + $0x80] ss:$12 sps:$4 sm:$0xff]  }
  0x6c   :  { %300 = vmatpush1.bf16.msra.mxu0 %v6550_v15  ;;  %6163 = vmatprep.subr.bf16.mxu1 %v6570_v21  ;;  %v7356_v58 = vld [vmem:[#allocation8 + $0xa8] ss:$12 sps:$4 sm:$0xff]   ;;  %v6598_v60 = vld [vmem:[#allocation8 + $0x98] ss:$12 sps:$4 sm:$0xff]   ;;  %v6599_v61 = vld [vmem:[#allocation8 + $0xb0] ss:$12 sps:$4 sm:$0xff]  }
  0x6d   :  { %301 = vmatprep.subr.bf16.mxu0 %v6551_v17  ;;  %v6600_v62 = vld [vmem:[#allocation8 + $0x8] ss:$12 sps:$4 sm:$0xff]   ;;  %v6601_v63 = vld [vmem:[#allocation8 + $0x20] ss:$12 sps:$4 sm:$0xff]   ;;  %v6602_v1 = vld [vmem:[#allocation8 + $0x38] ss:$12 sps:$4 sm:$0xff]  }
  0x6e   :  { %v6603_v2 = vld [vmem:[#allocation8 + $0x50] ss:$12 sps:$4 sm:$0xff]   ;;  %v6604_v3 = vld [vmem:[#allocation8 + $0x68] ss:$12 sps:$4 sm:$0xff]   ;;  %v6605_v4 = vld [vmem:[#allocation8 + $0x80] ss:$12 sps:$4 sm:$0xff]  }
  0x6f   :  { %6164 = vmatpush3.bf16.msra.mxu1 %v6570_v21  ;;  %v6606_v5 = vld [vmem:[#allocation8 + $0x98] ss:$12 sps:$4 sm:$0xff]   ;;  %v6607_v6 = vld [vmem:[#allocation8 + $0xb0] ss:$12 sps:$4 sm:$0xff]   ;;  %v150_v9 = vsub.s32 0, %v7394_v8  ;;  %v154_v11 = vsub.s32 1, %v7394_v8 }
  0x70   :  { %302 = vmatpush1.bf16.msra.mxu0 %v6553_v19  ;;  %6165 = vmatprep.subr.bf16.mxu1 %v6574_v24  ;;  %v146_v10 = vld [vmem:[%s8155_s3] sm:$0x7]  ;;  %v158_v21 = vsub.s32 2, %v7394_v8 }
  0x71   :  { %303 = vmatprep.subr.bf16.mxu0 %v6554_v20  ;;  %v7403_v12 = vrot.slane %v146_v10, %v150_v9  ;;  %v7407_v13 = vrot.slane %v146_v10, %v154_v11 }
  0x73   :  { %6166 = vmatpush3.bf16.msra.mxu1 %v6574_v24 }
  0x74   :  { %304 = vmatpush1.bf16.msra.mxu0 %v6557_v22  ;;  %6167 = vmatprep.subr.bf16.mxu1 %v6578_v27 }
  0x75   :  { %305 = vmatprep.subr.bf16.mxu0 %v6558_v23 }
  0x77   :  { %6168 = vmatpush3.bf16.msra.mxu1 %v6578_v27 }
  0x78   :  { %306 = vmatpush1.bf16.msra.mxu0 %v6561_v25  ;;  %6169 = vmatprep.subr.bf16.mxu1 %v6582_v31  ;;  %v159_v25 = vrot.slane %v146_v10, %v158_v21 }
  0x79   :  { %715 = vmatprep.subr.bf16.mxu0 %v7313_v26 }
  0x7b   :  { %324 = vmatmul.mubr.bf16.vlgmr.msra.gmra.mrb[0].mxu0 %v110_v16  ;;  %6170 = vmatpush3.bf16.msra.mxu1 %v6582_v31 }
  0x7c   :  { %716 = vmatpush1.bf16.msra.mxu0 %v7315_v28  ;;  %333 = vmatprep.mubr.bf16.mxu0 %v7183_v0 }
  0x7d   :  { %717 = vmatprep.subr.bf16.mxu0 %v7318_v29  ;;  %6179 = vmatprep.subr.bf16.mxu1 %v7184_v42 }
  0x7e   :  { %6172 = vmatmul.mubr.bf16.vlgmr.msra.gmra.mrb[0].mxu1 %v111_v36 }
  0x7f   :  { %6180 = vmatpush3.bf16.msra.mxu1 %v6589_v40  ;;  %6175 = vmatprep.mubr.bf16.mxu1 %v112_v44 }
  0x80   :  { %718 = vmatpush1.bf16.msra.mxu0 %v7320_v30  ;;  %6181 = vmatprep.subr.bf16.mxu1 %v7184_v42 }
  0x81   :  { %719 = vmatprep.subr.bf16.mxu0 %v7325_v34 }
  0x83   :  { %334 = vmatmul.mubr.bf16.gmra.mrb[4].mxu0 %v111_v36  ;;  %6182 = vmatpush3.bf16.msra.mxu1 %v6593_v45 }
  0x84   :  { %720 = vmatpush1.bf16.msra.mxu0 %v7327_v35  ;;  %343 = vmatprep.mubr.bf16.mxu0 %v7183_v0 }
  0x85   :  { %721 = vmatprep.subr.bf16.mxu0 %v7329_v37  ;;  %6183 = vmatprep.subr.bf16.mxu1 %v7184_v42 }
  0x86   :  { %6176 = vmatmul.mubr.bf16.gmra.mrb[4].mxu1 %v113_v52 }
  0x87   :  { %6184 = vmatpush3.bf16.msra.mxu1 %v6594_v50  ;;  %6195 = vmatprep.mubr.msk.bf16.mxu1 %vm7185_vm0, %v7184_v42 }
  0x88   :  { %722 = vmatpush1.bf16.msra.mxu0 %v7333_v41  ;;  %6185 = vmatprep.subr.bf16.mxu1 %v7184_v42 }
  0x89   :  { %723 = vmatprep.subr.bf16.mxu0 %v7336_v43 }
  0x8b   :  { %344 = vmatmul.mubr.bf16.gmra.mrb[8].mxu0 %v112_v44  ;;  %6186 = vmatpush3.bf16.msra.mxu1 %v6595_v54 }
  0x8c   :  { %724 = vmatpush1.bf16.msra.mxu0 %v6579_v46  ;;  %353 = vmatprep.mubr.bf16.mxu0 %v7183_v0 }
  0x8d   :  { %725 = vmatprep.subr.bf16.mxu0 %v6585_v49  ;;  %6187 = vmatprep.subr.bf16.mxu1 %v7184_v42 }
  0x8f   :  { %6188 = vmatpush3.bf16.msra.mxu1 %v6596_v57 }
  0x90   :  { %726 = vmatpush1.bf16.msra.mxu0 %v6583_v51  ;;  %6189 = vmatprep.subr.bf16.mxu1 %v7184_v42 }
  0x91   :  { %727 = vmatprep.subr.bf16.mxu0 %v7344_v53 }
  0x93   :  { %354 = vmatmul.mubr.bf16.gmra.mrb[12].mxu0 %v113_v52  ;;  %6190 = vmatpush3.bf16.msra.mxu1 %v6597_v59 }
  0x94   :  { %728 = vmatpush1.bf16.msra.mxu0 %v7348_v55  ;;  %747 = vmatprep.mubr.bf16.mxu0 %v7183_v0 }
  0x95   :  { %729 = vmatprep.subr.bf16.mxu0 %v7352_v56  ;;  %6191 = vmatprep.subr.bf16.mxu1 %v7184_v42 }
  0x97   :  { %6192 = vmatpush3.bf16.msra.mxu1 %v6598_v60 }
  0x98   :  { %730 = vmatpush1.bf16.msra.mxu0 %v7356_v58  ;;  %6193 = vmatprep.subr.bf16.mxu1 %v7184_v42 }
  0x99   :  { %992 = vmatprep.subr.bf16.mxu0 %v7313_v26 }
  0x9b   :  { %748 = vmatmul.mubr.bf16.vlgmr.msra.gmra.mrb[16].mxu0 %v7183_v0  ;;  %6194 = vmatpush3.bf16.msra.mxu1 %v6599_v61 }
  0x9c   :  { %993 = vmatpush1.bf16.msra.mxu0 %v7315_v28  ;;  %1024 = vmatprep.mubr.bf16.mxu0 %v7183_v0 }
  0x9d   :  { %994 = vmatprep.subr.bf16.mxu0 %v7318_v29  ;;  %6199 = vmatprep.subr.bf16.mxu1 %v7184_v42 }
  0x9e   :  { %6196 = vmatmul.mubr.bf16.vlgmr.msra.gmra.mrb[8].mxu1 %v7183_v0 }
  0x9f   :  { %6215 = vmatprep.mubr.msk.bf16.mxu1 %vm7185_vm0, %v7184_v42  ;;  %6200 = vmatpush3.bf16.msra.mxu1 %v6600_v62 }
  0xa0   :  { %995 = vmatpush1.bf16.msra.mxu0 %v7320_v30  ;;  %6201 = vmatprep.subr.bf16.mxu1 %v7184_v42 }
  0xa1   :  { %996 = vmatprep.subr.bf16.mxu0 %v7325_v34 }
  0xa3   :  { %6202 = vmatpush3.bf16.msra.mxu1 %v6601_v63 }
  0xa4   :  { %997 = vmatpush1.bf16.msra.mxu0 %v7327_v35  ;;  %6203 = vmatprep.subr.bf16.mxu1 %v7184_v42 }
  0xa5   :  { %998 = vmatprep.subr.bf16.mxu0 %v7329_v37 }
  0xa7   :  { %6204 = vmatpush3.bf16.msra.mxu1 %v6602_v1 }
  0xa8   :  { %999 = vmatpush1.bf16.msra.mxu0 %v7333_v41  ;;  %6205 = vmatprep.subr.bf16.mxu1 %v7184_v42 }
  0xa9   :  { %1000 = vmatprep.subr.bf16.mxu0 %v7336_v43 }
  0xab   :  { %6206 = vmatpush3.bf16.msra.mxu1 %v6603_v2 }
  0xac   :  { %1001 = vmatpush1.bf16.msra.mxu0 %v6579_v46  ;;  %6207 = vmatprep.subr.bf16.mxu1 %v7184_v42 }
  0xad   :  { %1002 = vmatprep.subr.bf16.mxu0 %v6585_v49 }
  0xaf   :  { %6208 = vmatpush3.bf16.msra.mxu1 %v6604_v3 }
  0xb0   :  { %1003 = vmatpush1.bf16.msra.mxu0 %v6583_v51  ;;  %6209 = vmatprep.subr.bf16.mxu1 %v7184_v42 }
  0xb1   :  { %1004 = vmatprep.subr.bf16.mxu0 %v7344_v53 }
  0xb3   :  { %6210 = vmatpush3.bf16.msra.mxu1 %v6605_v4 }
  0xb4   :  { %1005 = vmatpush1.bf16.msra.mxu0 %v7348_v55  ;;  %6211 = vmatprep.subr.bf16.mxu1 %v7184_v42 }
  0xb5   :  { %1006 = vmatprep.subr.bf16.mxu0 %v7352_v56 }
  0xb7   :  { %6212 = vmatpush3.bf16.msra.mxu1 %v6606_v5 }
  0xb8   :  { %1007 = vmatpush1.bf16.msra.mxu0 %v7356_v58  ;;  %6213 = vmatprep.subr.bf16.mxu1 %v7184_v42 }
  0xb9   :  { %1264 = vmatprep.subr.bf16.mxu0 %v7313_v26 }
  0xbb   :  { %6214 = vmatpush3.bf16.msra.mxu1 %v6607_v6 }
  0xbc   :  { %6219 = vmatprep.subr.bf16.mxu1 %v7184_v42 }
 0x14e   :  { %v325_v14 = vpop.f32.mrb[0].mxu0 }
 0x14f   :  { %v326_v15 = vadd.f32 %v325_v14, %v7403_v12  ;;  %v327_v16 = vpop.f32.mrb[1].mxu0 }
 0x150   :  { %v328_v17 = vadd.f32 %v327_v16, %v7407_v13  ;;  %v329_v18 = vpop.f32.mrb[2].mxu0 }
 0x151   :  { %v330_v19 = vadd.f32 %v329_v18, %v7403_v12  ;;  %v331_v20 = vpop.f32.mrb[3].mxu0  ;;  %v6173_v31 = vpop.f32.mrb[0].mxu1 }
 0x152   :  { %v7413_v22 = vpack.c.bf16 %v328_v17, %v326_v15  ;;  %v332_v23 = vadd.f32 %v331_v20, %v7407_v13  ;;  %v407_v34 = vadd.f32 %v6173_v31, %v159_v25  ;;  %v398_v35 = vpop.f32.mrb[1].mxu1 }
 0x153   :  { %v399_v38 = vadd.f32 %v398_v35, %v159_v25  ;;  %v6174_v39 = vpop.f32.mrb[2].mxu1 }
 0x154   :  { %v7416_v24 = vpack.c.bf16 %v332_v23, %v330_v19  ;;  %v5960_v40 = vpack.c.bf16 %v407_v34, %v407_v34  ;;  %v410_v41 = vadd.f32 %v6174_v39, %v159_v25  ;;  %v401_v43 = vpop.f32.mrb[3].mxu1 }
 0x155   :  { %v5956_v45 = vpack.c.bf16 %v399_v38, %v399_v38  ;;  %v402_v46 = vadd.f32 %v401_v43, %v159_v25 }
 0x156   :  { %v335_v26 = vpop.f32.mrb[4].mxu0  ;;  %538 = vst [vmem:[#allocation2 + $0x20] sm:$0xf] %v5960_v40  ;;  %v5962_v47 = vpack.c.bf16 %v410_v41, %v410_v41 }
 0x157   :  { %v336_v27 = vadd.f32 %v335_v26, %v7403_v12  ;;  %v337_v28 = vpop.f32.mrb[5].mxu0  ;;  %534 = vst [vmem:[#allocation2 + $0x8] sm:$0xf] %v5956_v45  ;;  %v5958_v49 = vpack.c.bf16 %v402_v46, %v402_v46 }
 0x158   :  { %v338_v29 = vadd.f32 %v337_v28, %v7407_v13  ;;  %v339_v30 = vpop.f32.mrb[6].mxu0  ;;  %540 = vst [vmem:[#allocation2 + $0x2c] sm:$0xf] %v5962_v47 }
 0x159   :  { %v340_v32 = vadd.f32 %v339_v30, %v7403_v12  ;;  %v341_v33 = vpop.f32.mrb[7].mxu0  ;;  %536 = vst [vmem:[#allocation2 + $0x14] sm:$0xf] %v5958_v49  ;;  %v6177_v57 = vpop.f32.mrb[4].mxu1  ;;  %v552_v30 = vunpack.c.l.bf16 %v7413_v22 }
 0x15a   :  { %v7423_v36 = vpack.c.bf16 %v338_v29, %v336_v27  ;;  %v342_v37 = vadd.f32 %v341_v33, %v7407_v13  ;;  %v423_v61 = vadd.f32 %v6177_v57, %v159_v25  ;;  %v414_v62 = vpop.f32.mrb[5].mxu1 }
 0x15b   :  { %v415_v2 = vadd.f32 %v414_v62, %v159_v25  ;;  %v6178_v3 = vpop.f32.mrb[6].mxu1 }
 0x15c   :  { %v7426_v44 = vpack.c.bf16 %v342_v37, %v340_v32  ;;  %v5968_v4 = vpack.c.bf16 %v423_v61, %v423_v61  ;;  %v426_v5 = vadd.f32 %v6178_v3, %v159_v25  ;;  %v417_v6 = vpop.f32.mrb[7].mxu1  ;;  %v553_v32 = vunpack.c.h.bf16 %v7413_v22  ;;  %v7441_v22 = vld [vmem:[%s8156_s4] ss:$0 sm:$0xff] }
 0x15d   :  { %v5964_v10 = vpack.c.bf16 %v415_v2, %v415_v2  ;;  %v418_v14 = vadd.f32 %v417_v6, %v159_v25  ;;  %v7452_v3 = vld [vmem:[#allocation8] ss:$12 sps:$4 sm:$0xff]  }
 0x15e   :  { %v345_v48 = vpop.f32.mrb[8].mxu0  ;;  %546 = vst [vmem:[#allocation2 + $0x50] sm:$0xf] %v5968_v4  ;;  %v5970_v15 = vpack.c.bf16 %v426_v5, %v426_v5  ;;  %v7456_v4 = vld [vmem:[#allocation8 + $0x1c] ss:$12 sps:$4 sm:$0xff]  }
 0x15f   :  { %v346_v50 = vadd.f32 %v345_v48, %v7403_v12  ;;  %v347_v51 = vpop.f32.mrb[9].mxu0  ;;  %542 = vst [vmem:[#allocation2 + $0x38] sm:$0xf] %v5964_v10  ;;  %v5966_v17 = vpack.c.bf16 %v418_v14, %v418_v14  ;;  %v7461_v5 = vld [vmem:[#allocation8 + $0x18] ss:$12 sps:$4 sm:$0xff]  }
 0x160   :  { %v348_v52 = vadd.f32 %v347_v51, %v7407_v13  ;;  %v349_v54 = vpop.f32.mrb[10].mxu0  ;;  %548 = vst [vmem:[#allocation2 + $0x5c] sm:$0xf] %v5970_v15  ;;  %v7464_v6 = vld [vmem:[#allocation8 + $0x34] ss:$12 sps:$4 sm:$0xff]  }
 0x161   :  { %v350_v59 = vadd.f32 %v349_v54, %v7403_v12  ;;  %v351_v60 = vpop.f32.mrb[11].mxu0  ;;  %544 = vst [vmem:[#allocation2 + $0x44] sm:$0xf] %v5966_v17  ;;  %v7470_v10 = vld [vmem:[#allocation8 + $0x4c] ss:$12 sps:$4 sm:$0xff]  }
 0x162   :  { %v5963_v63 = vpack.c.bf16 %v348_v52, %v346_v50  ;;  %v352_v1 = vadd.f32 %v351_v60, %v7407_v13  ;;  %v7444_v50 = vld [vmem:[#allocation2 + $0x8] ss:$12 sps:$4 sm:$0xff]   ;;  %v7476_v15 = vld [vmem:[#allocation8 + $0x64] ss:$12 sps:$4 sm:$0xff]  }
 0x163   :  { %v554_v52 = vunpack.c.l.bf16 %v7444_v50  ;;  %v7473_v14 = vld [vmem:[#allocation8 + $0x48] ss:$12 sps:$4 sm:$0xff]  }
 0x164   :  { %541 = vst [vmem:[#allocation2 + $0x30] sm:$0xff] %v5963_v63  ;;  %v5965_v7 = vpack.c.bf16 %v352_v1, %v350_v59  ;;  %v7482_v17 = vld [vmem:[#allocation8 + $0x7c] ss:$12 sps:$4 sm:$0xff]  }
 0x166   :  { %543 = vst [vmem:[#allocation2 + $0x3c] sm:$0xff] %v5965_v7  ;;  %v355_v16 = vpop.f32.mrb[12].mxu0  ;;  %v7467_v7 = vld [vmem:[#allocation8 + $0x30] ss:$12 sps:$4 sm:$0xff]  }
 0x167   :  { %v356_v18 = vadd.f32 %v355_v16, %v7403_v12  ;;  %v357_v19 = vpop.f32.mrb[13].mxu0  ;;  %v7479_v16 = vld [vmem:[#allocation8 + $0x60] ss:$12 sps:$4 sm:$0xff]  }
 0x168   :  { %v358_v20 = vadd.f32 %v357_v19, %v7407_v13  ;;  %v359_v23 = vpop.f32.mrb[14].mxu0  ;;  %v7027_v19 = vld [vmem:[#allocation8 + $0x4] ss:$12 sps:$4 sm:$0xff]  }
 0x169   :  { %v360_v26 = vadd.f32 %v359_v23, %v7403_v12  ;;  %v361_v27 = vpop.f32.mrb[15].mxu0  ;;  %v6609_v23 = vld [vmem:[#allocation8 + $0x20] ss:$12 sps:$4 sm:$0xff]  }
 0x16a   :  { %v5967_v28 = vpack.c.bf16 %v358_v20, %v356_v18  ;;  %v362_v25 = vadd.f32 %v361_v27, %v7407_v13  ;;  %v7485_v18 = vld [vmem:[#allocation8 + $0x78] ss:$12 sps:$4 sm:$0xff]   ;;  %v6608_v20 = vld [vmem:[#allocation8 + $0x8] ss:$12 sps:$4 sm:$0xff]   ;;  %v6615_v27 = vld [vmem:[#allocation8 + $0xb0] ss:$12 sps:$4 sm:$0xff]  }
 0x16c   :  { %545 = vst [vmem:[#allocation2 + $0x48] sm:$0xff] %v5967_v28  ;;  %v5969_v29 = vpack.c.bf16 %v362_v25, %v360_v26  ;;  %v6610_v26 = vld [vmem:[#allocation8 + $0x38] ss:$12 sps:$4 sm:$0xff]   ;;  %v828_v28 = vunpack.c.l.bf16 %v7416_v24 }
 0x16e   :  { %547 = vst [vmem:[#allocation2 + $0x54] sm:$0xff] %v5969_v29  ;;  %v749_v31 = vpop.f32.mrb[16].mxu0 }
 0x16f   :  { %v796_v33 = vadd.f32 %v749_v31, %v552_v30  ;;  %v751_v34 = vpop.f32.mrb[17].mxu0  ;;  %v829_v30 = vunpack.c.h.bf16 %v7416_v24 }
 0x170   :  { %v803_v35 = vadd.f32 %v751_v34, %v553_v32  ;;  %v753_v37 = vpop.f32.mrb[18].mxu0 }
 0x171   :  { %v5521_v38 = vmul.f32 -1.442695, %v796_v33  ;;  %v754_v39 = vpop.f32.mrb[19].mxu0  ;;  %v790_v40 = vpop.f32.mrb[8].mxu1 }
 0x172   :  { %v5522_v12 = vmul.f32 -1.442695, %v803_v35  ;;  %v6197_v41 = vpop.f32.mrb[9].mxu1  ;;  %v816_v49 = vadd.f32 %v7441_v22, %v790_v40 }
 0x173   :  { %6824 = vpow2.f32 %v5521_v38  ;;  %v793_v13 = vpop.f32.mrb[10].mxu1 }
 0x174   :  { %6826 = vpow2.f32 %v5522_v12  ;;  %v6198_v43 = vpop.f32.mrb[11].mxu1 }
 0x17d   :  { %v6825_v45 = vpop.eup %6824 }
 0x17e   :  { %v800_v46 = vadd.f32 1.0, %v6825_v45  ;;  %v6827_v47 = vpop.eup %6826 }
 0x17f   :  { %v807_v48 = vadd.f32 1.0, %v6827_v47  ;;  %v830_v47 = vunpack.c.h.bf16 %v7444_v50  ;;  %v7028_v50 = vld [vmem:[#allocation8 + $0x94] ss:$12 sps:$4 sm:$0xff]  }
 0x180   :  { %6828 = vrcp.f32 %v800_v46 }
 0x181   :  { %6830 = vrcp.f32 %v807_v48 }
 0x18a   :  { %v6829_v51 = vpop.eup %6828 }
 0x18b   :  { %v817_v54 = vmul.f32 %v6829_v51, %v816_v49  ;;  %v6831_v59 = vpop.eup %6830 }
 0x18c   :  { %v820_v60 = vsub.f32 1.0, %v6831_v59  ;;  %v822_v63 = vmul.f32 0.0, %v6831_v59 }
 0x18d   :  { %v818_v57 = vadd.f32 %v817_v54, %v554_v52 }
 0x18f   :  { %6832 = vtanh.f32 %v818_v57 }
 0x199   :  { %v6833_v61 = vpop.eup %6832 }
 0x19a   :  { %v821_v62 = vmul.f32 %v6833_v61, %v820_v60 }
 0x19c   :  { %v7447_v1 = vadd.f32 %v822_v63, %v821_v62  ;;  %v7029_v62 = vld [vmem:[#allocation8 + $0x90] ss:$12 sps:$4 sm:$0xff]   ;;  %v7030_v63 = vld [vmem:[#allocation8 + $0xac] ss:$12 sps:$4 sm:$0xff]  }
 0x19e   :  { %824 = vst [vmem:[#allocation12] sm:$0xff] %v7447_v1  ;;  %v831_v2 = vpack.c.bf16 %v7447_v1, %v7447_v1 }
 0x1a0   :  { %1025 = vmatmul.mubr.bf16.vlgmr.msra.gmra.mrb[20].mxu0 %v831_v2  ;;  %6216 = vmatmul.mubr.bf16.vlgmr.msra.gmra.mrb[12].mxu1 %v831_v2  ;;  %v6616_v2 = vld [vmem:[#allocation8 + $0x8] ss:$12 sps:$4 sm:$0xff]  }
 0x1a1   :  { %1265 = vmatpush1.bf16.msra.mxu0 %v7452_v3  ;;  %1296 = vmatprep.mubr.bf16.mxu0 %v7183_v0 }
 0x1a2   :  { %1266 = vmatprep.subr.bf16.mxu0 %v7456_v4  ;;  %6235 = vmatprep.mubr.msk.bf16.mxu1 %vm7185_vm0, %v7184_v42 }
 0x1a3   :  { %6220 = vmatpush3.bf16.msra.mxu1 %v6608_v20 }
 0x1a4   :  { %6221 = vmatprep.subr.bf16.mxu1 %v7184_v42 }
 0x1a5   :  { %1267 = vmatpush1.bf16.msra.mxu0 %v7461_v5 }
 0x1a6   :  { %1268 = vmatprep.subr.bf16.mxu0 %v7464_v6 }
 0x1a7   :  { %6222 = vmatpush3.bf16.msra.mxu1 %v6609_v23 }
 0x1a8   :  { %6223 = vmatprep.subr.bf16.mxu1 %v7184_v42 }
 0x1a9   :  { %1269 = vmatpush1.bf16.msra.mxu0 %v7467_v7 }
 0x1aa   :  { %1270 = vmatprep.subr.bf16.mxu0 %v7470_v10 }
 0x1ab   :  { %6224 = vmatpush3.bf16.msra.mxu1 %v6610_v26 }
 0x1ac   :  { %6225 = vmatprep.subr.bf16.mxu1 %v7184_v42 }
 0x1ad   :  { %1271 = vmatpush1.bf16.msra.mxu0 %v7473_v14 }
 0x1ae   :  { %1272 = vmatprep.subr.bf16.mxu0 %v7476_v15 }
 0x1b1   :  { %1273 = vmatpush1.bf16.msra.mxu0 %v7479_v16 }
 0x1b2   :  { %1274 = vmatprep.subr.bf16.mxu0 %v7482_v17 }
 0x1b5   :  { %1275 = vmatpush1.bf16.msra.mxu0 %v7485_v18 }
 0x1b6   :  { %1276 = vmatprep.subr.bf16.mxu0 %v7344_v53  ;;  %v6611_v53 = vld [vmem:[#allocation8 + $0x50] ss:$12 sps:$4 sm:$0xff]  }
 0x1b7   :  { %6226 = vmatpush3.bf16.msra.mxu1 %v6611_v53 }
 0x1b8   :  { %6227 = vmatprep.subr.bf16.mxu1 %v7184_v42 }
 0x1b9   :  { %1277 = vmatpush1.bf16.msra.mxu0 %v7348_v55  ;;  %v6612_v55 = vld [vmem:[#allocation8 + $0x68] ss:$12 sps:$4 sm:$0xff]  }
 0x1ba   :  { %1278 = vmatprep.subr.bf16.mxu0 %v7352_v56  ;;  %v6613_v56 = vld [vmem:[#allocation8 + $0x80] ss:$12 sps:$4 sm:$0xff]  }
 0x1bb   :  { %6228 = vmatpush3.bf16.msra.mxu1 %v6612_v55 }
 0x1bc   :  { %6229 = vmatprep.subr.bf16.mxu1 %v7184_v42 }
 0x1bd   :  { %1279 = vmatpush1.bf16.msra.mxu0 %v7356_v58  ;;  %v6614_v58 = vld [vmem:[#allocation8 + $0x98] ss:$12 sps:$4 sm:$0xff]  }
 0x1be   :  { %1536 = vmatprep.subr.bf16.mxu0 %v7027_v19 }
 0x1bf   :  { %6230 = vmatpush3.bf16.msra.mxu1 %v6613_v56 }
 0x1c0   :  { %6231 = vmatprep.subr.bf16.mxu1 %v7184_v42 }
 0x1c3   :  { %6232 = vmatpush3.bf16.msra.mxu1 %v6614_v58 }
 0x1c4   :  { %6233 = vmatprep.subr.bf16.mxu1 %v7184_v42 }
 0x1c7   :  { %6234 = vmatpush3.bf16.msra.mxu1 %v6615_v27 }
 0x1c8   :  { %6239 = vmatprep.subr.bf16.mxu1 %v7184_v42 }
 0x273   :  { %v1026_v25 = vpop.f32.mrb[20].mxu0  ;;  %v1067_v29 = vpop.f32.mrb[12].mxu1 }
 0x274   :  { %v1073_v31 = vadd.f32 %v1026_v25, %v828_v28  ;;  %v1028_v32 = vpop.f32.mrb[21].mxu0  ;;  %v6217_v33 = vpop.f32.mrb[13].mxu1  ;;  %v1087_v46 = vadd.f32 %v7441_v22, %v1067_v29 }
 0x275   :  { %v1080_v34 = vadd.f32 %v1028_v32, %v829_v30  ;;  %v1030_v35 = vpop.f32.mrb[22].mxu0  ;;  %v1070_v37 = vpop.f32.mrb[14].mxu1  ;;  %v7534_v32 = vld [vmem:[#allocation2 + $0x20] ss:$12 sps:$4 sm:$0xff]  }
 0x276   :  { %v5548_v38 = vmul.f32 -1.442695, %v1073_v31  ;;  %v1031_v39 = vpop.f32.mrb[23].mxu0  ;;  %v6218_v12 = vpop.f32.mrb[15].mxu1 }
 0x277   :  { %v5549_v40 = vmul.f32 -1.442695, %v1080_v34  ;;  %v1102_v34 = vunpack.c.l.bf16 %v7534_v32 }
 0x278   :  { %6834 = vpow2.f32 %v5548_v38 }
 0x279   :  { %6836 = vpow2.f32 %v5549_v40 }
 0x282   :  { %v6835_v41 = vpop.eup %6834 }
 0x283   :  { %v1077_v13 = vadd.f32 1.0, %v6835_v41  ;;  %v6837_v43 = vpop.eup %6836 }
 0x284   :  { %v1084_v45 = vadd.f32 1.0, %v6837_v43 }
 0x285   :  { %6838 = vrcp.f32 %v1077_v13 }
 0x286   :  { %6840 = vrcp.f32 %v1084_v45  ;;  %v7547_v45 = vld [vmem:[#allocation8 + $0x4] ss:$12 sps:$4 sm:$0xff]  }
 0x28f   :  { %v6839_v24 = vpop.eup %6838 }
 0x290   :  { %v1088_v48 = vmul.f32 %v6839_v24, %v1087_v46  ;;  %v6841_v51 = vpop.eup %6840  ;;  %v7549_v46 = vld [vmem:[#allocation8] ss:$12 sps:$4 sm:$0xff]   ;;  %v6627_v24 = vld [vmem:[#allocation8 + $0x8] ss:$12 sps:$4 sm:$0xff]  }
 0x291   :  { %v1091_v52 = vsub.f32 1.0, %v6841_v51  ;;  %v1093_v59 = vmul.f32 %v6841_v51, %v7447_v1  ;;  %v7031_v1 = vld [vmem:[#allocation8 + $0xa8] ss:$12 sps:$4 sm:$0xff]  }
 0x292   :  { %v1089_v49 = vadd.f32 %v1088_v48, %v830_v47  ;;  %v7553_v47 = vld [vmem:[#allocation8 + $0x1c] ss:$12 sps:$4 sm:$0xff]   ;;  %v7556_v48 = vld [vmem:[#allocation8 + $0x18] ss:$12 sps:$4 sm:$0xff]   ;;  %v7560_v51 = vld [vmem:[#allocation8 + $0x34] ss:$12 sps:$4 sm:$0xff]  }
 0x294   :  { %6842 = vtanh.f32 %v1089_v49  ;;  %v6631_v49 = vld [vmem:[#allocation8 + $0x20] ss:$12 sps:$4 sm:$0xff]  }
 0x29e   :  { %v6843_v54 = vpop.eup %6842 }
 0x29f   :  { %v1092_v57 = vmul.f32 %v6843_v54, %v1091_v52  ;;  %v7563_v52 = vld [vmem:[#allocation8 + $0x30] ss:$12 sps:$4 sm:$0xff]   ;;  %v6635_v54 = vld [vmem:[#allocation8 + $0x38] ss:$12 sps:$4 sm:$0xff]  }
 0x2a1   :  { %v7505_v60 = vadd.f32 %v1093_v59, %v1092_v57  ;;  %v7567_v57 = vld [vmem:[#allocation8 + $0x4c] ss:$12 sps:$4 sm:$0xff]   ;;  %v7570_v59 = vld [vmem:[#allocation8 + $0x48] ss:$12 sps:$4 sm:$0xff]  }
 0x2a3   :  { %1096 = vst [vmem:[#allocation12 + $0x8] sm:$0xff] %v7505_v60  ;;  %v1103_v61 = vpack.c.bf16 %v7505_v60, %v7505_v60 }
 0x2a5   :  { %1297 = vmatmul.mubr.bf16.vlgmr.msra.gmra.mrb[24].mxu0 %v1103_v61  ;;  %6236 = vmatmul.mubr.bf16.vlgmr.msra.gmra.mrb[16].mxu1 %v1103_v61  ;;  %v7574_v61 = vld [vmem:[#allocation8 + $0x60] ss:$12 sps:$4 sm:$0xff]  }
 0x2a6   :  { %1537 = vmatpush1.bf16.msra.mxu0 %v7452_v3  ;;  %1568 = vmatprep.mubr.bf16.mxu0 %v7183_v0  ;;  %v6617_v3 = vld [vmem:[#allocation8 + $0x20] ss:$12 sps:$4 sm:$0xff]  }
 0x2a7   :  { %1538 = vmatprep.subr.bf16.mxu0 %v7456_v4  ;;  %6255 = vmatprep.mubr.msk.bf16.mxu1 %vm7185_vm0, %v7184_v42  ;;  %v6618_v4 = vld [vmem:[#allocation8 + $0x38] ss:$12 sps:$4 sm:$0xff]  }
 0x2a8   :  { %6240 = vmatpush3.bf16.msra.mxu1 %v6616_v2  ;;  %v6647_v2 = vld [vmem:[#allocation8 + $0x80] ss:$12 sps:$4 sm:$0xff]  }
 0x2a9   :  { %6241 = vmatprep.subr.bf16.mxu1 %v7184_v42 }
 0x2aa   :  { %1539 = vmatpush1.bf16.msra.mxu0 %v7461_v5  ;;  %v6619_v5 = vld [vmem:[#allocation8 + $0x50] ss:$12 sps:$4 sm:$0xff]  }
 0x2ab   :  { %1540 = vmatprep.subr.bf16.mxu0 %v7464_v6  ;;  %v6620_v6 = vld [vmem:[#allocation8 + $0x68] ss:$12 sps:$4 sm:$0xff]  }
 0x2ac   :  { %6242 = vmatpush3.bf16.msra.mxu1 %v6617_v3  ;;  %v7587_v3 = vld [vmem:[#allocation8 + $0x94] ss:$12 sps:$4 sm:$0xff]  }
 0x2ad   :  { %6243 = vmatprep.subr.bf16.mxu1 %v7184_v42 }
 0x2ae   :  { %1541 = vmatpush1.bf16.msra.mxu0 %v7467_v7  ;;  %v6621_v7 = vld [vmem:[#allocation8 + $0x80] ss:$12 sps:$4 sm:$0xff]  }
 0x2af   :  { %1542 = vmatprep.subr.bf16.mxu0 %v7470_v10  ;;  %v6622_v10 = vld [vmem:[#allocation8 + $0x98] ss:$12 sps:$4 sm:$0xff]  }
 0x2b0   :  { %6244 = vmatpush3.bf16.msra.mxu1 %v6618_v4  ;;  %v7590_v4 = vld [vmem:[#allocation8 + $0x90] ss:$12 sps:$4 sm:$0xff]  }
 0x2b1   :  { %6245 = vmatprep.subr.bf16.mxu1 %v7184_v42 }
 0x2b2   :  { %1543 = vmatpush1.bf16.msra.mxu0 %v7473_v14  ;;  %v6623_v14 = vld [vmem:[#allocation8 + $0xb0] ss:$12 sps:$4 sm:$0xff]  }
 0x2b3   :  { %1544 = vmatprep.subr.bf16.mxu0 %v7476_v15  ;;  %v1100_v15 = vunpack.c.l.bf16 %v7423_v36 }
 0x2b4   :  { %6246 = vmatpush3.bf16.msra.mxu1 %v6619_v5  ;;  %v6651_v5 = vld [vmem:[#allocation8 + $0x98] ss:$12 sps:$4 sm:$0xff]  }
 0x2b5   :  { %6247 = vmatprep.subr.bf16.mxu1 %v7184_v42 }
 0x2b6   :  { %1545 = vmatpush1.bf16.msra.mxu0 %v7479_v16 }
 0x2b7   :  { %1546 = vmatprep.subr.bf16.mxu0 %v7482_v17 }
 0x2b8   :  { %6248 = vmatpush3.bf16.msra.mxu1 %v6620_v6  ;;  %v7594_v6 = vld [vmem:[#allocation8 + $0xac] ss:$12 sps:$4 sm:$0xff]  }
 0x2b9   :  { %6249 = vmatprep.subr.bf16.mxu1 %v7184_v42 }
 0x2ba   :  { %1547 = vmatpush1.bf16.msra.mxu0 %v7485_v18  ;;  %v1101_v18 = vunpack.c.h.bf16 %v7423_v36 }
 0x2bb   :  { %1548 = vmatprep.subr.bf16.mxu0 %v7028_v50  ;;  %v7576_v50 = vld [vmem:[#allocation8 + $0x64] ss:$12 sps:$4 sm:$0xff]  }
 0x2bc   :  { %6250 = vmatpush3.bf16.msra.mxu1 %v6621_v7  ;;  %v7597_v7 = vld [vmem:[#allocation8 + $0xa8] ss:$12 sps:$4 sm:$0xff]  }
 0x2bd   :  { %6251 = vmatprep.subr.bf16.mxu1 %v7184_v42 }
 0x2be   :  { %1549 = vmatpush1.bf16.msra.mxu0 %v7029_v62  ;;  %v6643_v62 = vld [vmem:[#allocation8 + $0x68] ss:$12 sps:$4 sm:$0xff]  }
 0x2bf   :  { %1550 = vmatprep.subr.bf16.mxu0 %v7030_v63  ;;  %v7579_v63 = vld [vmem:[#allocation8 + $0x7c] ss:$12 sps:$4 sm:$0xff]  }
 0x2c0   :  { %6252 = vmatpush3.bf16.msra.mxu1 %v6622_v10  ;;  %v6655_v10 = vld [vmem:[#allocation8 + $0xb0] ss:$12 sps:$4 sm:$0xff]  }
 0x2c1   :  { %6253 = vmatprep.subr.bf16.mxu1 %v7184_v42 }
 0x2c2   :  { %1551 = vmatpush1.bf16.msra.mxu0 %v7031_v1  ;;  %v7583_v1 = vld [vmem:[#allocation8 + $0x78] ss:$12 sps:$4 sm:$0xff]  }
 0x2c3   :  { %1808 = vmatprep.subr.bf16.mxu0 %v7547_v45 }
 0x2c4   :  { %6254 = vmatpush3.bf16.msra.mxu1 %v6623_v14  ;;  %v1372_v14 = vunpack.c.l.bf16 %v7426_v44 }
 0x2c5   :  { %6259 = vmatprep.subr.bf16.mxu1 %v7184_v42 }
 0x378   :  { %v1298_v16 = vpop.f32.mrb[24].mxu0  ;;  %v1339_v17 = vpop.f32.mrb[16].mxu1 }
 0x379   :  { %v1345_v19 = vadd.f32 %v1298_v16, %v1100_v15  ;;  %v1300_v20 = vpop.f32.mrb[25].mxu0  ;;  %v6237_v23 = vpop.f32.mrb[17].mxu1  ;;  %v1359_v36 = vadd.f32 %v7441_v22, %v1339_v17  ;;  %v1373_v17 = vunpack.c.h.bf16 %v7426_v44 }
 0x37a   :  { %v1352_v26 = vadd.f32 %v1300_v20, %v1101_v18  ;;  %v1302_v53 = vpop.f32.mrb[26].mxu0  ;;  %v1342_v55 = vpop.f32.mrb[18].mxu1 }
 0x37b   :  { %v5574_v56 = vmul.f32 -1.442695, %v1345_v19  ;;  %v1303_v58 = vpop.f32.mrb[27].mxu0  ;;  %v6238_v27 = vpop.f32.mrb[19].mxu1 }
 0x37c   :  { %v5575_v28 = vmul.f32 -1.442695, %v1352_v26 }
 0x37d   :  { %6844 = vpow2.f32 %v5574_v56 }
 0x37e   :  { %6846 = vpow2.f32 %v5575_v28 }
 0x387   :  { %v6845_v25 = vpop.eup %6844 }
 0x388   :  { %v1349_v29 = vadd.f32 1.0, %v6845_v25  ;;  %v6847_v30 = vpop.eup %6846 }
 0x389   :  { %v1356_v31 = vadd.f32 1.0, %v6847_v30 }
 0x38a   :  { %6848 = vrcp.f32 %v1349_v29 }
 0x38b   :  { %6850 = vrcp.f32 %v1356_v31 }
 0x394   :  { %v6849_v33 = vpop.eup %6848 }
 0x395   :  { %v1360_v35 = vmul.f32 %v6849_v33, %v1359_v36  ;;  %v6851_v38 = vpop.eup %6850  ;;  %v1374_v36 = vunpack.c.h.bf16 %v7534_v32  ;;  %v6656_v32 = vld [vmem:[#allocation8 + $0x8] ss:$12 sps:$4 sm:$0xff]  }
 0x396   :  { %v1363_v39 = vsub.f32 1.0, %v6851_v38  ;;  %v1365_v41 = vmul.f32 %v6851_v38, %v7505_v60  ;;  %v6639_v60 = vld [vmem:[#allocation8 + $0x50] ss:$12 sps:$4 sm:$0xff]  }
 0x397   :  { %v1361_v37 = vadd.f32 %v1360_v35, %v1102_v34 }
 0x399   :  { %6852 = vtanh.f32 %v1361_v37 }
 0x3a3   :  { %v6853_v12 = vpop.eup %6852 }
 0x3a4   :  { %v1364_v40 = vmul.f32 %v6853_v12, %v1363_v39 }
 0x3a6   :  { %v7539_v13 = vadd.f32 %v1365_v41, %v1364_v40 }
 0x3a8   :  { %1368 = vst [vmem:[#allocation12 + $0x10] sm:$0xff] %v7539_v13  ;;  %v1375_v43 = vpack.c.bf16 %v7539_v13, %v7539_v13 }
 0x3aa   :  { %1569 = vmatmul.mubr.bf16.vlgmr.msra.gmra.mrb[28].mxu0 %v1375_v43  ;;  %6256 = vmatmul.mubr.bf16.vlgmr.msra.gmra.mrb[20].mxu1 %v1375_v43  ;;  %v6658_v43 = vld [vmem:[#allocation8 + $0x38] ss:$12 sps:$4 sm:$0xff]  }
 0x3ab   :  { %1840 = vmatprep.mubr.bf16.mxu0 %v7183_v0  ;;  %6275 = vmatprep.mubr.msk.bf16.mxu1 %vm7185_vm0, %v7184_v42 }
 0x3ac   :  { %1809 = vmatpush1.bf16.msra.mxu0 %v7549_v46  ;;  %6260 = vmatpush3.bf16.msra.mxu1 %v6627_v24  ;;  %v6659_v24 = vld [vmem:[#allocation8 + $0x50] ss:$12 sps:$4 sm:$0xff]  }
 0x3ad   :  { %6261 = vmatprep.subr.bf16.mxu1 %v7184_v42  ;;  %1810 = vmatprep.subr.bf16.mxu0 %v7553_v47 }
 0x3b0   :  { %1811 = vmatpush1.bf16.msra.mxu0 %v7556_v48  ;;  %6262 = vmatpush3.bf16.msra.mxu1 %v6631_v49  ;;  %v6660_v49 = vld [vmem:[#allocation8 + $0x68] ss:$12 sps:$4 sm:$0xff]  }
 0x3b1   :  { %6263 = vmatprep.subr.bf16.mxu1 %v7184_v42  ;;  %1812 = vmatprep.subr.bf16.mxu0 %v7560_v51 }
 0x3b4   :  { %1813 = vmatpush1.bf16.msra.mxu0 %v7563_v52  ;;  %6264 = vmatpush3.bf16.msra.mxu1 %v6635_v54  ;;  %v6661_v54 = vld [vmem:[#allocation8 + $0x80] ss:$12 sps:$4 sm:$0xff]  }
 0x3b5   :  { %6265 = vmatprep.subr.bf16.mxu1 %v7184_v42  ;;  %1814 = vmatprep.subr.bf16.mxu0 %v7567_v57 }
 0x3b8   :  { %1815 = vmatpush1.bf16.msra.mxu0 %v7570_v59  ;;  %6266 = vmatpush3.bf16.msra.mxu1 %v6639_v60  ;;  %v6662_v60 = vld [vmem:[#allocation8 + $0x98] ss:$12 sps:$4 sm:$0xff]  }
 0x3b9   :  { %6267 = vmatprep.subr.bf16.mxu1 %v7184_v42  ;;  %1816 = vmatprep.subr.bf16.mxu0 %v7576_v50 }
 0x3bc   :  { %1817 = vmatpush1.bf16.msra.mxu0 %v7574_v61  ;;  %6268 = vmatpush3.bf16.msra.mxu1 %v6643_v62  ;;  %v6663_v62 = vld [vmem:[#allocation8 + $0xb0] ss:$12 sps:$4 sm:$0xff]  }
 0x3bd   :  { %1818 = vmatprep.subr.bf16.mxu0 %v7579_v63  ;;  %6269 = vmatprep.subr.bf16.mxu1 %v7184_v42 }
 0x3c0   :  { %1819 = vmatpush1.bf16.msra.mxu0 %v7583_v1  ;;  %6270 = vmatpush3.bf16.msra.mxu1 %v6647_v2  ;;  %v1642_v2 = vld [vmem:[#allocation2 + $0x30] sm:$0xff] }
 0x3c1   :  { %1820 = vmatprep.subr.bf16.mxu0 %v7587_v3  ;;  %6271 = vmatprep.subr.bf16.mxu1 %v7184_v42 }
 0x3c4   :  { %1821 = vmatpush1.bf16.msra.mxu0 %v7590_v4  ;;  %6272 = vmatpush3.bf16.msra.mxu1 %v6651_v5  ;;  %v1644_v5 = vunpack.c.l.bf16 %v1642_v2 }
 0x3c5   :  { %1822 = vmatprep.subr.bf16.mxu0 %v7594_v6  ;;  %6273 = vmatprep.subr.bf16.mxu1 %v7184_v42 }
 0x3c8   :  { %1823 = vmatpush1.bf16.msra.mxu0 %v7597_v7  ;;  %6274 = vmatpush3.bf16.msra.mxu1 %v6655_v10 }
 0x3c9   :  { %2080 = vmatprep.subr.bf16.mxu0 %v7547_v45  ;;  %6279 = vmatprep.subr.bf16.mxu1 %v7184_v42 }
 0x47d   :  { %v1570_v15 = vpop.f32.mrb[28].mxu0  ;;  %v1611_v16 = vpop.f32.mrb[20].mxu1 }
 0x47e   :  { %v1617_v18 = vadd.f32 %v1570_v15, %v1372_v14  ;;  %v1572_v19 = vpop.f32.mrb[29].mxu0  ;;  %v6257_v20 = vpop.f32.mrb[21].mxu1  ;;  %v1631_v31 = vadd.f32 %v7441_v22, %v1611_v16 }
 0x47f   :  { %v1624_v23 = vadd.f32 %v1572_v19, %v1373_v17  ;;  %v1574_v26 = vpop.f32.mrb[30].mxu0  ;;  %v1614_v53 = vpop.f32.mrb[22].mxu1 }
 0x480   :  { %v5600_v55 = vmul.f32 -1.442695, %v1617_v18  ;;  %v1575_v56 = vpop.f32.mrb[31].mxu0  ;;  %v6258_v58 = vpop.f32.mrb[23].mxu1  ;;  %v1645_v18 = vunpack.c.h.bf16 %v1642_v2 }
 0x481   :  { %v5601_v27 = vmul.f32 -1.442695, %v1624_v23 }
 0x482   :  { %6854 = vpow2.f32 %v5600_v55 }
 0x483   :  { %6856 = vpow2.f32 %v5601_v27 }
 0x48c   :  { %v6855_v28 = vpop.eup %6854 }
 0x48d   :  { %v1621_v25 = vadd.f32 1.0, %v6855_v28  ;;  %v6857_v29 = vpop.eup %6856 }
 0x48e   :  { %v1628_v30 = vadd.f32 1.0, %v6857_v29  ;;  %v7640_v29 = vld [vmem:[#allocation2 + $0x38] ss:$12 sps:$4 sm:$0xff]  }
 0x48f   :  { %6858 = vrcp.f32 %v1621_v25 }
 0x490   :  { %6860 = vrcp.f32 %v1628_v30 }
 0x499   :  { %v6859_v44 = vpop.eup %6858 }
 0x49a   :  { %v1632_v33 = vmul.f32 %v6859_v44, %v1631_v31  ;;  %v6861_v35 = vpop.eup %6860  ;;  %v1646_v44 = vunpack.c.l.bf16 %v7640_v29 }
 0x49b   :  { %v1635_v37 = vsub.f32 1.0, %v6861_v35  ;;  %v1637_v12 = vmul.f32 %v6861_v35, %v7539_v13  ;;  %v6657_v13 = vld [vmem:[#allocation8 + $0x20] ss:$12 sps:$4 sm:$0xff]  }
 0x49c   :  { %v1633_v34 = vadd.f32 %v1632_v33, %v1374_v36 }
 0x49e   :  { %6862 = vtanh.f32 %v1633_v34 }
 0x4a8   :  { %v6863_v38 = vpop.eup %6862 }
 0x4a9   :  { %v1636_v39 = vmul.f32 %v6863_v38, %v1635_v37 }
 0x4ab   :  { %v7609_v40 = vadd.f32 %v1637_v12, %v1636_v39 }
 0x4ad   :  { %v1647_v41 = vpack.c.bf16 %v7609_v40, %v7609_v40 }
 0x4af   :  { %1841 = vmatmul.mubr.bf16.vlgmr.msra.gmra.mrb[32].mxu0 %v1647_v41  ;;  %6276 = vmatmul.mubr.bf16.vlgmr.msra.gmra.mrb[24].mxu1 %v1647_v41 }
 0x4b0   :  { %2081 = vmatpush1.bf16.msra.mxu0 %v7549_v46  ;;  %2112 = vmatprep.mubr.bf16.mxu0 %v7183_v0 }
 0x4b1   :  { %2082 = vmatprep.subr.bf16.mxu0 %v7553_v47  ;;  %6295 = vmatprep.mubr.msk.bf16.mxu1 %vm7185_vm0, %v7184_v42 }
 0x4b2   :  { %6280 = vmatpush3.bf16.msra.mxu1 %v6656_v32  ;;  %v6664_v32 = vld [vmem:[#allocation8 + $0x8] ss:$12 sps:$4 sm:$0xff]  }
 0x4b3   :  { %6281 = vmatprep.subr.bf16.mxu1 %v7184_v42 }
 0x4b4   :  { %2083 = vmatpush1.bf16.msra.mxu0 %v7556_v48 }
 0x4b5   :  { %2084 = vmatprep.subr.bf16.mxu0 %v7560_v51 }
 0x4b6   :  { %6282 = vmatpush3.bf16.msra.mxu1 %v6657_v13  ;;  %v6665_v13 = vld [vmem:[#allocation8 + $0x20] ss:$12 sps:$4 sm:$0xff]  }
 0x4b7   :  { %6283 = vmatprep.subr.bf16.mxu1 %v7184_v42 }
 0x4b8   :  { %2085 = vmatpush1.bf16.msra.mxu0 %v7563_v52 }
 0x4b9   :  { %2086 = vmatprep.subr.bf16.mxu0 %v7567_v57 }
 0x4ba   :  { %6284 = vmatpush3.bf16.msra.mxu1 %v6658_v43  ;;  %v6666_v43 = vld [vmem:[#allocation8 + $0x38] ss:$12 sps:$4 sm:$0xff]  }
 0x4bb   :  { %6285 = vmatprep.subr.bf16.mxu1 %v7184_v42 }
 0x4bc   :  { %2087 = vmatpush1.bf16.msra.mxu0 %v7570_v59 }
 0x4bd   :  { %2088 = vmatprep.subr.bf16.mxu0 %v7576_v50 }
 0x4be   :  { %6286 = vmatpush3.bf16.msra.mxu1 %v6659_v24  ;;  %v6667_v24 = vld [vmem:[#allocation8 + $0x50] ss:$12 sps:$4 sm:$0xff]  }
 0x4bf   :  { %6287 = vmatprep.subr.bf16.mxu1 %v7184_v42 }
 0x4c0   :  { %2089 = vmatpush1.bf16.msra.mxu0 %v7574_v61 }
 0x4c1   :  { %2090 = vmatprep.subr.bf16.mxu0 %v7579_v63 }
 0x4c2   :  { %6288 = vmatpush3.bf16.msra.mxu1 %v6660_v49  ;;  %v6668_v49 = vld [vmem:[#allocation8 + $0x68] ss:$12 sps:$4 sm:$0xff]  }
 0x4c3   :  { %6289 = vmatprep.subr.bf16.mxu1 %v7184_v42 }
 0x4c4   :  { %2091 = vmatpush1.bf16.msra.mxu0 %v7583_v1 }
 0x4c5   :  { %2092 = vmatprep.subr.bf16.mxu0 %v7587_v3 }
 0x4c6   :  { %6290 = vmatpush3.bf16.msra.mxu1 %v6661_v54  ;;  %v6669_v54 = vld [vmem:[#allocation8 + $0x80] ss:$12 sps:$4 sm:$0xff]  }
 0x4c7   :  { %6291 = vmatprep.subr.bf16.mxu1 %v7184_v42 }
 0x4c8   :  { %2093 = vmatpush1.bf16.msra.mxu0 %v7590_v4 }
 0x4c9   :  { %2094 = vmatprep.subr.bf16.mxu0 %v7594_v6 }
 0x4ca   :  { %6292 = vmatpush3.bf16.msra.mxu1 %v6662_v60  ;;  %v6671_v60 = vld [vmem:[#allocation8 + $0xb0] ss:$12 sps:$4 sm:$0xff]  }
 0x4cb   :  { %6293 = vmatprep.subr.bf16.mxu1 %v7184_v42 }
 0x4cc   :  { %2095 = vmatpush1.bf16.msra.mxu0 %v7597_v7 }
 0x4cd   :  { %2352 = vmatprep.subr.bf16.mxu0 %v7547_v45 }
 0x4ce   :  { %6294 = vmatpush3.bf16.msra.mxu1 %v6663_v62  ;;  %v1914_v62 = vld [vmem:[#allocation2 + $0x3c] sm:$0xff] }
 0x4cf   :  { %6299 = vmatprep.subr.bf16.mxu1 %v7184_v42  ;;  %v1916_v2 = vunpack.c.l.bf16 %v1914_v62 }
 0x582   :  { %v1842_v10 = vpop.f32.mrb[32].mxu0  ;;  %v1883_v14 = vpop.f32.mrb[24].mxu1 }
 0x583   :  { %v1889_v15 = vadd.f32 %v1842_v10, %v1644_v5  ;;  %v1844_v16 = vpop.f32.mrb[33].mxu0  ;;  %v6277_v17 = vpop.f32.mrb[25].mxu1  ;;  %v1903_v30 = vadd.f32 %v7441_v22, %v1883_v14 }
 0x584   :  { %v1846_v19 = vpop.f32.mrb[34].mxu0  ;;  %v1886_v20 = vpop.f32.mrb[26].mxu1  ;;  %v1896_v55 = vadd.f32 %v1844_v16, %v1645_v18  ;;  %v1917_v17 = vunpack.c.h.bf16 %v1914_v62 }
 0x585   :  { %v5626_v23 = vmul.f32 -1.442695, %v1889_v15  ;;  %v1847_v26 = vpop.f32.mrb[35].mxu0  ;;  %v6278_v53 = vpop.f32.mrb[27].mxu1 }
 0x586   :  { %v5627_v56 = vmul.f32 -1.442695, %v1896_v55 }
 0x587   :  { %6864 = vpow2.f32 %v5626_v23 }
 0x588   :  { %6866 = vpow2.f32 %v5627_v56 }
 0x591   :  { %v6865_v58 = vpop.eup %6864 }
 0x592   :  { %v1893_v27 = vadd.f32 1.0, %v6865_v58  ;;  %v6867_v28 = vpop.eup %6866 }
 0x593   :  { %v1900_v25 = vadd.f32 1.0, %v6867_v28 }
 0x594   :  { %6868 = vrcp.f32 %v1893_v27 }
 0x595   :  { %6870 = vrcp.f32 %v1900_v25 }
 0x59e   :  { %v6869_v31 = vpop.eup %6868 }
 0x59f   :  { %v1904_v36 = vmul.f32 %v6869_v31, %v1903_v30  ;;  %v6871_v34 = vpop.eup %6870  ;;  %v1918_v31 = vunpack.c.h.bf16 %v7640_v29 }
 0x5a0   :  { %v1907_v35 = vsub.f32 1.0, %v6871_v34  ;;  %v1909_v39 = vmul.f32 %v6871_v34, %v7609_v40 }
 0x5a1   :  { %v1905_v33 = vadd.f32 %v1904_v36, %v1646_v44 }
 0x5a3   :  { %6872 = vtanh.f32 %v1905_v33 }
 0x5ad   :  { %v6873_v37 = vpop.eup %6872 }
 0x5ae   :  { %v1908_v38 = vmul.f32 %v6873_v37, %v1907_v35 }
 0x5b0   :  { %v7645_v12 = vadd.f32 %v1909_v39, %v1908_v38 }
 0x5b2   :  { %v1919_v41 = vpack.c.bf16 %v7645_v12, %v7645_v12 }
 0x5b4   :  { %2113 = vmatmul.mubr.bf16.vlgmr.msra.gmra.mrb[36].mxu0 %v1919_v41  ;;  %6296 = vmatmul.mubr.bf16.vlgmr.msra.gmra.mrb[28].mxu1 %v1919_v41 }
 0x5b5   :  { %2353 = vmatpush1.bf16.msra.mxu0 %v7549_v46  ;;  %2384 = vmatprep.mubr.bf16.mxu0 %v7183_v0 }
 0x5b6   :  { %2354 = vmatprep.subr.bf16.mxu0 %v7553_v47  ;;  %6315 = vmatprep.mubr.msk.bf16.mxu1 %vm7185_vm0, %v7184_v42 }
 0x5b7   :  { %6300 = vmatpush3.bf16.msra.mxu1 %v6664_v32 }
 0x5b8   :  { %6301 = vmatprep.subr.bf16.mxu1 %v7184_v42 }
 0x5b9   :  { %2355 = vmatpush1.bf16.msra.mxu0 %v7556_v48 }
 0x5ba   :  { %2356 = vmatprep.subr.bf16.mxu0 %v7560_v51 }
 0x5bb   :  { %6302 = vmatpush3.bf16.msra.mxu1 %v6665_v13 }
 0x5bc   :  { %6303 = vmatprep.subr.bf16.mxu1 %v7184_v42 }
 0x5bd   :  { %2357 = vmatpush1.bf16.msra.mxu0 %v7563_v52 }
 0x5be   :  { %2358 = vmatprep.subr.bf16.mxu0 %v7567_v57 }
 0x5bf   :  { %6304 = vmatpush3.bf16.msra.mxu1 %v6666_v43 }
 0x5c0   :  { %6305 = vmatprep.subr.bf16.mxu1 %v7184_v42 }
 0x5c1   :  { %2359 = vmatpush1.bf16.msra.mxu0 %v7570_v59 }
 0x5c2   :  { %2360 = vmatprep.subr.bf16.mxu0 %v7576_v50 }
 0x5c3   :  { %6306 = vmatpush3.bf16.msra.mxu1 %v6667_v24 }
 0x5c4   :  { %6307 = vmatprep.subr.bf16.mxu1 %v7184_v42 }
 0x5c5   :  { %2361 = vmatpush1.bf16.msra.mxu0 %v7574_v61 }
 0x5c6   :  { %2362 = vmatprep.subr.bf16.mxu0 %v7579_v63 }
 0x5c7   :  { %6308 = vmatpush3.bf16.msra.mxu1 %v6668_v49 }
 0x5c8   :  { %6309 = vmatprep.subr.bf16.mxu1 %v7184_v42 }
 0x5c9   :  { %2363 = vmatpush1.bf16.msra.mxu0 %v7583_v1 }
 0x5ca   :  { %2364 = vmatprep.subr.bf16.mxu0 %v7587_v3 }
 0x5cb   :  { %6310 = vmatpush3.bf16.msra.mxu1 %v6669_v54 }
 0x5cc   :  { %6311 = vmatprep.subr.bf16.mxu1 %v7184_v42 }
 0x5cd   :  { %2365 = vmatpush1.bf16.msra.mxu0 %v7590_v4 }
 0x5ce   :  { %2366 = vmatprep.subr.bf16.mxu0 %v7594_v6 }
 0x5d1   :  { %2367 = vmatpush1.bf16.msra.mxu0 %v7597_v7 }
 0x5d2   :  { %2624 = vmatprep.subr.bf16.mxu0 %v7547_v45  ;;  %v6670_v45 = vld [vmem:[#allocation8 + $0x98] ss:$12 sps:$4 sm:$0xff]  }
 0x5d3   :  { %6312 = vmatpush3.bf16.msra.mxu1 %v6670_v45 }
 0x5d4   :  { %6313 = vmatprep.subr.bf16.mxu1 %v7184_v42 }
 0x5d7   :  { %6314 = vmatpush3.bf16.msra.mxu1 %v6671_v60 }
 0x5d8   :  { %6319 = vmatprep.subr.bf16.mxu1 %v7184_v42 }
 0x687   :  { %v2114_v5 = vpop.f32.mrb[36].mxu0  ;;  %v2155_v10 = vpop.f32.mrb[28].mxu1 }
 0x688   :  { %v2161_v14 = vadd.f32 %v2114_v5, %v1916_v2  ;;  %v2116_v15 = vpop.f32.mrb[37].mxu0  ;;  %v6297_v16 = vpop.f32.mrb[29].mxu1  ;;  %v2175_v25 = vadd.f32 %v7441_v22, %v2155_v10  ;;  %v2730_v10 = vld [vmem:[#allocation12 + $0x8] sm:$0xff] }
 0x689   :  { %v2118_v18 = vpop.f32.mrb[38].mxu0  ;;  %v2158_v19 = vpop.f32.mrb[30].mxu1  ;;  %v2168_v53 = vadd.f32 %v2116_v15, %v1917_v17  ;;  %v2729_v15 = vld [vmem:[#allocation12] sm:$0xff]  ;;  %v2746_v16 = vmul.f32 0.70710677, %v2730_v10 }
 0x68a   :  { %v5652_v20 = vmul.f32 -1.442695, %v2161_v14  ;;  %v2119_v23 = vpop.f32.mrb[39].mxu0  ;;  %v6298_v26 = vpop.f32.mrb[31].mxu1  ;;  %v7708_v18 = vld [vmem:[#allocation2 + $0x50] ss:$12 sps:$4 sm:$0xff]  }
 0x68b   :  { %v5653_v55 = vmul.f32 -1.442695, %v2168_v53  ;;  %v2190_v26 = vunpack.c.l.bf16 %v7708_v18 }
 0x68c   :  { %6874 = vpow2.f32 %v5652_v20  ;;  %v2745_v20 = vmul.f32 0.70710677, %v2729_v15 }
 0x68d   :  { %6876 = vpow2.f32 %v5653_v55 }
 0x696   :  { %v6875_v56 = vpop.eup %6874 }
 0x697   :  { %v2165_v58 = vadd.f32 1.0, %v6875_v56  ;;  %v6877_v27 = vpop.eup %6876 }
 0x698   :  { %v2172_v28 = vadd.f32 1.0, %v6877_v27 }
 0x699   :  { %6878 = vrcp.f32 %v2165_v58 }
 0x69a   :  { %6880 = vrcp.f32 %v2172_v28 }
 0x6a3   :  { %v6879_v30 = vpop.eup %6878 }
 0x6a4   :  { %v2176_v44 = vmul.f32 %v6879_v30, %v2175_v25  ;;  %v6881_v33 = vpop.eup %6880 }
 0x6a5   :  { %v2179_v34 = vsub.f32 1.0, %v6881_v33  ;;  %v2181_v38 = vmul.f32 %v6881_v33, %v7645_v12 }
 0x6a6   :  { %v2177_v36 = vadd.f32 %v2176_v44, %v1918_v31 }
 0x6a8   :  { %6882 = vtanh.f32 %v2177_v36 }
 0x6b2   :  { %v6883_v35 = vpop.eup %6882 }
 0x6b3   :  { %v2180_v37 = vmul.f32 %v6883_v35, %v2179_v34  ;;  %v2737_v34 = vmul.f32 0.5, %v2729_v15  ;;  %v6711_v15 = vld [vmem:[#allocation9 + $0xb0] ss:$12 sps:$4 sm:$0xff]  }
 0x6b5   :  { %v7679_v39 = vadd.f32 %v2181_v38, %v2180_v37  ;;  %v6680_v37 = vld [vmem:[#allocation9] ss:$12 sps:$4 sm:$0xff]  }
 0x6b7   :  { %v2191_v41 = vpack.c.bf16 %v7679_v39, %v7679_v39 }
 0x6b9   :  { %2385 = vmatmul.mubr.bf16.vlgmr.msra.gmra.mrb[40].mxu0 %v2191_v41  ;;  %6316 = vmatmul.mubr.bf16.vlgmr.msra.gmra.mrb[32].mxu1 %v2191_v41 }
 0x6ba   :  { %2625 = vmatpush1.bf16.msra.mxu0 %v7549_v46  ;;  %2656 = vmatprep.mubr.bf16.mxu0 %v7183_v0  ;;  %v6672_v46 = vld [vmem:[#allocation8 + $0x8] ss:$12 sps:$4 sm:$0xff]  }
 0x6bb   :  { %2626 = vmatprep.subr.bf16.mxu0 %v7553_v47  ;;  %6335 = vmatprep.mubr.msk.bf16.mxu1 %vm7185_vm0, %v7184_v42  ;;  %v6673_v47 = vld [vmem:[#allocation8 + $0x20] ss:$12 sps:$4 sm:$0xff]  }
 0x6bc   :  { %6320 = vmatpush3.bf16.msra.mxu1 %v6672_v46  ;;  %v6686_v46 = vld [vmem:[#allocation9 + $0x1c] ss:$12 sps:$4 sm:$0xff]  }
 0x6bd   :  { %6321 = vmatprep.subr.bf16.mxu1 %v7184_v42 }
 0x6be   :  { %2627 = vmatpush1.bf16.msra.mxu0 %v7556_v48  ;;  %v6674_v48 = vld [vmem:[#allocation8 + $0x38] ss:$12 sps:$4 sm:$0xff]  }
 0x6bf   :  { %2628 = vmatprep.subr.bf16.mxu0 %v7560_v51  ;;  %v6675_v51 = vld [vmem:[#allocation8 + $0x50] ss:$12 sps:$4 sm:$0xff]  }
 0x6c0   :  { %6322 = vmatpush3.bf16.msra.mxu1 %v6673_v47  ;;  %v6687_v47 = vld [vmem:[#allocation9 + $0x20] ss:$12 sps:$4 sm:$0xff]  }
 0x6c1   :  { %6323 = vmatprep.subr.bf16.mxu1 %v7184_v42 }
 0x6c2   :  { %2629 = vmatpush1.bf16.msra.mxu0 %v7563_v52  ;;  %v6676_v52 = vld [vmem:[#allocation8 + $0x68] ss:$12 sps:$4 sm:$0xff]  }
 0x6c3   :  { %2630 = vmatprep.subr.bf16.mxu0 %v7567_v57  ;;  %v6682_v57 = vld [vmem:[#allocation9 + $0x4] ss:$12 sps:$4 sm:$0xff]  }
 0x6c4   :  { %6324 = vmatpush3.bf16.msra.mxu1 %v6674_v48 }
 0x6c5   :  { %6325 = vmatprep.subr.bf16.mxu1 %v7184_v42 }
 0x6c6   :  { %2631 = vmatpush1.bf16.msra.mxu0 %v7570_v59  ;;  %v6677_v59 = vld [vmem:[#allocation8 + $0x80] ss:$12 sps:$4 sm:$0xff]  }
 0x6c7   :  { %2632 = vmatprep.subr.bf16.mxu0 %v7576_v50  ;;  %v6679_v50 = vld [vmem:[#allocation8 + $0xb0] ss:$12 sps:$4 sm:$0xff]  }
 0x6c8   :  { %6326 = vmatpush3.bf16.msra.mxu1 %v6675_v51  ;;  %v6684_v51 = vld [vmem:[#allocation9 + $0x18] ss:$12 sps:$4 sm:$0xff]  }
 0x6c9   :  { %6327 = vmatprep.subr.bf16.mxu1 %v7184_v42 }
 0x6ca   :  { %2633 = vmatpush1.bf16.msra.mxu0 %v7574_v61  ;;  %v6678_v61 = vld [vmem:[#allocation8 + $0x98] ss:$12 sps:$4 sm:$0xff]  }
 0x6cb   :  { %2634 = vmatprep.subr.bf16.mxu0 %v7579_v63  ;;  %v6683_v63 = vld [vmem:[#allocation9 + $0x8] ss:$12 sps:$4 sm:$0xff]  }
 0x6cc   :  { %6328 = vmatpush3.bf16.msra.mxu1 %v6676_v52  ;;  %v6690_v52 = vld [vmem:[#allocation9 + $0x34] ss:$12 sps:$4 sm:$0xff]  }
 0x6cd   :  { %6329 = vmatprep.subr.bf16.mxu1 %v7184_v42 }
 0x6ce   :  { %2635 = vmatpush1.bf16.msra.mxu0 %v7583_v1  ;;  %v2186_v1 = vld [vmem:[#allocation2 + $0x48] sm:$0xff] }
 0x6cf   :  { %2636 = vmatprep.subr.bf16.mxu0 %v7587_v3  ;;  %v2188_v3 = vunpack.c.l.bf16 %v2186_v1  ;;  %v2189_v13 = vunpack.c.h.bf16 %v2186_v1  ;;  %v6694_v1 = vld [vmem:[#allocation9 + $0x4c] ss:$12 sps:$4 sm:$0xff]  }
 0x6d0   :  { %6330 = vmatpush3.bf16.msra.mxu1 %v6677_v59  ;;  %v2731_v59 = vld [vmem:[#allocation12 + $0x10] sm:$0xff] }
 0x6d1   :  { %6331 = vmatprep.subr.bf16.mxu1 %v7184_v42 }
 0x6d2   :  { %2637 = vmatpush1.bf16.msra.mxu0 %v7590_v4 }
 0x6d3   :  { %2638 = vmatprep.subr.bf16.mxu0 %v7594_v6 }
 0x6d4   :  { %6332 = vmatpush3.bf16.msra.mxu1 %v6678_v61  ;;  %v6688_v61 = vld [vmem:[#allocation9 + $0x30] ss:$12 sps:$4 sm:$0xff]  }
 0x6d5   :  { %6333 = vmatprep.subr.bf16.mxu1 %v7184_v42 }
 0x6d6   :  { %2639 = vmatpush1.bf16.msra.mxu0 %v7597_v7 }
 0x6d7   :  { %2958 = vmatprep.subr.bf16.mxu0 %v6682_v57  ;;  %v6691_v57 = vld [vmem:[#allocation9 + $0x38] ss:$12 sps:$4 sm:$0xff]  }
 0x6d8   :  { %6334 = vmatpush3.bf16.msra.mxu1 %v6679_v50  ;;  %v2748_v50 = vmul.f32 0.70710677, %v7609_v40 }
 0x6d9   :  { %6339 = vmatprep.subr.bf16.mxu1 %v6683_v63 }
 0x78c   :  { %v2386_v4 = vpop.f32.mrb[40].mxu0  ;;  %v2427_v6 = vpop.f32.mrb[32].mxu1 }
 0x78d   :  { %v2433_v7 = vadd.f32 %v2386_v4, %v2188_v3  ;;  %v2388_v29 = vpop.f32.mrb[41].mxu0  ;;  %v6317_v32 = vpop.f32.mrb[33].mxu1  ;;  %v2447_v19 = vadd.f32 %v7441_v22, %v2427_v6  ;;  %v2738_v22 = vmul.f32 0.5, %v2730_v10  ;;  %v6695_v3 = vld [vmem:[#allocation9 + $0x50] ss:$12 sps:$4 sm:$0xff]  }
 0x78e   :  { %v2390_v43 = vpop.f32.mrb[42].mxu0  ;;  %v2430_v24 = vpop.f32.mrb[34].mxu1  ;;  %v2440_v60 = vadd.f32 %v2388_v29, %v2189_v13  ;;  %v2747_v4 = vmul.f32 0.70710677, %v2731_v59  ;;  %v2749_v6 = vmul.f32 0.70710677, %v7645_v12 }
 0x78f   :  { %v5678_v49 = vmul.f32 -1.442695, %v2433_v7  ;;  %v2391_v54 = vpop.f32.mrb[43].mxu0  ;;  %v6318_v45 = vpop.f32.mrb[35].mxu1  ;;  %v6692_v7 = vld [vmem:[#allocation9 + $0x48] ss:$12 sps:$4 sm:$0xff]  }
 0x790   :  { %v5679_v62 = vmul.f32 -1.442695, %v2440_v60  ;;  %v6698_v29 = vld [vmem:[#allocation9 + $0x64] ss:$12 sps:$4 sm:$0xff]   ;;  %v6699_v32 = vld [vmem:[#allocation9 + $0x68] ss:$12 sps:$4 sm:$0xff]  }
 0x791   :  { %6884 = vpow2.f32 %v5678_v49  ;;  %v6696_v13 = vld [vmem:[#allocation9 + $0x60] ss:$12 sps:$4 sm:$0xff]   ;;  %v6702_v43 = vld [vmem:[#allocation9 + $0x7c] ss:$12 sps:$4 sm:$0xff]   ;;  %v6700_v49 = vld [vmem:[#allocation9 + $0x78] ss:$12 sps:$4 sm:$0xff]  }
 0x792   :  { %6886 = vpow2.f32 %v5679_v62  ;;  %v6703_v24 = vld [vmem:[#allocation9 + $0x80] ss:$12 sps:$4 sm:$0xff]   ;;  %v6707_v45 = vld [vmem:[#allocation9 + $0x98] ss:$12 sps:$4 sm:$0xff]  }
 0x793   :  { %v6706_v54 = vld [vmem:[#allocation9 + $0x94] ss:$12 sps:$4 sm:$0xff]  }
 0x79b   :  { %v6885_v2 = vpop.eup %6884 }
 0x79c   :  { %v2437_v5 = vadd.f32 1.0, %v6885_v2  ;;  %v6887_v14 = vpop.eup %6886 }
 0x79d   :  { %v2444_v17 = vadd.f32 1.0, %v6887_v14  ;;  %v6710_v14 = vld [vmem:[#allocation9 + $0xac] ss:$12 sps:$4 sm:$0xff]  }
 0x79e   :  { %6888 = vrcp.f32 %v2437_v5  ;;  %v6704_v5 = vld [vmem:[#allocation9 + $0x90] ss:$12 sps:$4 sm:$0xff]  }
 0x79f   :  { %6890 = verf.f32 %v2746_v16 }
 0x7a0   :  { %6892 = vrcp.f32 %v2444_v17 }
 0x7a1   :  { %6894 = verf.f32 %v2745_v20 }
 0x7a8   :  { %v6889_v23 = vpop.eup %6888 }
 0x7a9   :  { %v2448_v53 = vmul.f32 %v6889_v23, %v2447_v19  ;;  %v6891_v56 = vpop.eup %6890  ;;  %v2740_v19 = vmul.f32 0.5, %v7609_v40  ;;  %v6708_v23 = vld [vmem:[#allocation9 + $0xa8] ss:$12 sps:$4 sm:$0xff]  }
 0x7aa   :  { %v6893_v58 = vpop.eup %6892  ;;  %v2762_v25 = vadd.f32 1.0, %v6891_v56 }
 0x7ab   :  { %v2449_v55 = vadd.f32 %v2448_v53, %v2190_v26  ;;  %v6895_v27 = vpop.eup %6894  ;;  %v2451_v28 = vsub.f32 1.0, %v6893_v58  ;;  %v2453_v44 = vmul.f32 %v6893_v58, %v7679_v39  ;;  %v2742_v26 = vmul.f32 0.5, %v7679_v39 }
 0x7ac   :  { %v2761_v36 = vadd.f32 1.0, %v6895_v27  ;;  %v2770_v35 = vmul.f32 %v2762_v25, %v2738_v22  ;;  %v2741_v58 = vmul.f32 0.5, %v7645_v12  ;;  %v7732_v12 = vld [vmem:[#allocation11 + $0x4] ss:$12 sps:$4 sm:$0xff]   ;;  %v7744_v22 = vld [vmem:[#allocation11 + $0x34] ss:$12 sps:$4 sm:$0xff]  }
 0x7ad   :  { %6896 = vtanh.f32 %v2449_v55  ;;  %v2739_v55 = vmul.f32 0.5, %v2731_v59  ;;  %v6737_v59 = vld [vmem:[#allocation11 + $0x20] ss:$12 sps:$4 sm:$0xff]  }
 0x7ae   :  { %v2769_v41 = vmul.f32 %v2761_v36, %v2737_v34  ;;  %6898 = verf.f32 %v2748_v50  ;;  %v7746_v36 = vld [vmem:[#allocation11 + $0x30] ss:$12 sps:$4 sm:$0xff]   ;;  %v7750_v34 = vld [vmem:[#allocation11 + $0x4c] ss:$12 sps:$4 sm:$0xff]  }
 0x7af   :  { %v6739_v50 = vld [vmem:[#allocation11 + $0x50] ss:$12 sps:$4 sm:$0xff]  }
 0x7b0   :  { %v7717_v48 = vpack.c.bf16 %v2770_v35, %v2769_v41  ;;  %v7752_v35 = vld [vmem:[#allocation11 + $0x48] ss:$12 sps:$4 sm:$0xff]  }
 0x7b1   :  { %v7762_v41 = vld [vmem:[#allocation11 + $0x7c] ss:$12 sps:$4 sm:$0xff]  }
 0x7b7   :  { %v6897_v30 = vpop.eup %6896 }
 0x7b8   :  { %v2452_v31 = vmul.f32 %v6897_v30, %v2451_v28  ;;  %v6899_v60 = vpop.eup %6898 }
 0x7b9   :  { %v2764_v16 = vadd.f32 1.0, %v6899_v60 }
 0x7ba   :  { %v7713_v33 = vadd.f32 %v2453_v44, %v2452_v31  ;;  %v7738_v31 = vld [vmem:[#allocation11 + $0x1c] ss:$12 sps:$4 sm:$0xff]   ;;  %v7740_v44 = vld [vmem:[#allocation11 + $0x18] ss:$12 sps:$4 sm:$0xff]  }
 0x7bb   :  { %v2772_v56 = vmul.f32 %v2764_v16, %v2740_v19  ;;  %v2813_v19 = vld [vmem:[%s8159_s7] sm:$0x7] }
 0x7bc   :  { %v2463_v38 = vpack.c.bf16 %v7713_v33, %v7713_v33 }
 0x7be   :  { %2657 = vmatmul.mubr.bf16.vlgmr.msra.gmra.mrb[44].mxu0 %v2463_v38  ;;  %6336 = vmatmul.mubr.bf16.vlgmr.msra.gmra.mrb[36].mxu1 %v2463_v38  ;;  %v7758_v38 = vld [vmem:[#allocation11 + $0x60] ss:$12 sps:$4 sm:$0xff]  }
 0x7bf   :  { %2959 = vmatpush1.bf16.msra.mxu0 %v6680_v37  ;;  %6340 = vmatpush3.bf16.msra.mxu1 %v6683_v63  ;;  %v2750_v63 = vmul.f32 0.70710677, %v7679_v39  ;;  %v7734_v39 = vld [vmem:[#allocation11] ss:$12 sps:$4 sm:$0xff]   ;;  %v7755_v37 = vld [vmem:[#allocation11 + $0x64] ss:$12 sps:$4 sm:$0xff]  }
 0x7c0   :  { %6355 = vmatprep.mubr.bf16.mxu1 %v7717_v48  ;;  %2960 = vmatprep.subr.bf16.mxu0 %v6686_v46  ;;  %v7764_v46 = vld [vmem:[#allocation11 + $0x78] ss:$12 sps:$4 sm:$0xff]  }
 0x7c1   :  { %6341 = vmatprep.subr.bf16.mxu1 %v6687_v47  ;;  %2990 = vmatprep.mubr.bf16.mxu0 %v7183_v0  ;;  %6900 = verf.f32 %v2750_v63  ;;  %v6742_v63 = vld [vmem:[#allocation11 + $0x98] ss:$12 sps:$4 sm:$0xff]  }
 0x7c2   :  { %6902 = verf.f32 %v2747_v4  ;;  %v6743_v4 = vld [vmem:[#allocation11 + $0xb0] ss:$12 sps:$4 sm:$0xff]  }
 0x7c3   :  { %2961 = vmatpush1.bf16.msra.mxu0 %v6684_v51  ;;  %6342 = vmatpush3.bf16.msra.mxu1 %v6687_v47  ;;  %6904 = verf.f32 %v2749_v6  ;;  %v7768_v47 = vld [vmem:[#allocation11 + $0x94] ss:$12 sps:$4 sm:$0xff]  }
 0x7c4   :  { %2962 = vmatprep.subr.bf16.mxu0 %v6690_v52  ;;  %6343 = vmatprep.subr.bf16.mxu1 %v6691_v57  ;;  %v6733_v51 = vld [vmem:[#allocation11 + $0x8] ss:$12 sps:$4 sm:$0xff]   ;;  %v7773_v52 = vld [vmem:[#allocation11 + $0xac] ss:$12 sps:$4 sm:$0xff]  }
 0x7c5   :  { %v2458_v6 = vld [vmem:[#allocation2 + $0x54] sm:$0xff] }
 0x7c7   :  { %2963 = vmatpush1.bf16.msra.mxu0 %v6688_v61  ;;  %6344 = vmatpush3.bf16.msra.mxu1 %v6691_v57  ;;  %v7776_v57 = vld [vmem:[#allocation11 + $0xa8] ss:$12 sps:$4 sm:$0xff]   ;;  %v6738_v61 = vld [vmem:[#allocation11 + $0x38] ss:$12 sps:$4 sm:$0xff]  }
 0x7c8   :  { %2964 = vmatprep.subr.bf16.mxu0 %v6694_v1  ;;  %6345 = vmatprep.subr.bf16.mxu1 %v6695_v3  ;;  %v6740_v1 = vld [vmem:[#allocation11 + $0x68] ss:$12 sps:$4 sm:$0xff]  }
 0x7cb   :  { %2965 = vmatpush1.bf16.msra.mxu0 %v6692_v7  ;;  %6346 = vmatpush3.bf16.msra.mxu1 %v6695_v3  ;;  %v6901_v62 = vpop.eup %6900  ;;  %v6741_v3 = vld [vmem:[#allocation11 + $0x80] ss:$12 sps:$4 sm:$0xff]   ;;  %v2460_v7 = vunpack.c.l.bf16 %v2458_v6 }
 0x7cc   :  { %2966 = vmatprep.subr.bf16.mxu0 %v6698_v29  ;;  %6347 = vmatprep.subr.bf16.mxu1 %v6699_v32  ;;  %v6903_v2 = vpop.eup %6902  ;;  %v2766_v17 = vadd.f32 1.0, %v6901_v62 }
 0x7cd   :  { %v6905_v10 = vpop.eup %6904  ;;  %v2763_v20 = vadd.f32 1.0, %v6903_v2 }
 0x7ce   :  { %v2765_v53 = vadd.f32 1.0, %v6905_v10  ;;  %v2774_v27 = vmul.f32 %v2766_v17, %v2742_v26 }
 0x7cf   :  { %2967 = vmatpush1.bf16.msra.mxu0 %v6696_v13  ;;  %6348 = vmatpush3.bf16.msra.mxu1 %v6699_v32  ;;  %v2771_v28 = vmul.f32 %v2763_v20, %v2739_v55  ;;  %v7032_v20 = vld [vmem:[%s8156_s4] ss:$0 sm:$0xff] }
 0x7d0   :  { %2968 = vmatprep.subr.bf16.mxu0 %v6702_v43  ;;  %6349 = vmatprep.subr.bf16.mxu1 %v6703_v24  ;;  %v2773_v25 = vmul.f32 %v2765_v53, %v2741_v58  ;;  %v2462_v53 = vunpack.c.h.bf16 %v7708_v18  ;;  %v7802_v58 = vrot.slane %v2813_v19, %v158_v21 }
 0x7d1   :  { %v2778_v30 = vpack.c.bf16 %v2772_v56, %v2771_v28  ;;  %v7798_v56 = vrot.slane %v2813_v19, %v150_v9 }
 0x7d2   :  { %v2779_v40 = vpack.c.bf16 %v2774_v27, %v2773_v25  ;;  %v7806_v27 = vrot.slane %v2813_v19, %v154_v11 }
 0x7d3   :  { %2969 = vmatpush1.bf16.msra.mxu0 %v6700_v49  ;;  %6350 = vmatpush3.bf16.msra.mxu1 %v6703_v24  ;;  %v2461_v49 = vunpack.c.h.bf16 %v2458_v6 }
 0x7d4   :  { %2970 = vmatprep.subr.bf16.mxu0 %v6706_v54  ;;  %6351 = vmatprep.subr.bf16.mxu1 %v6707_v45 }
 0x7d7   :  { %2971 = vmatpush1.bf16.msra.mxu0 %v6704_v5  ;;  %6352 = vmatpush3.bf16.msra.mxu1 %v6707_v45 }
 0x7d8   :  { %2972 = vmatprep.subr.bf16.mxu0 %v6710_v14  ;;  %6353 = vmatprep.subr.bf16.mxu1 %v6711_v15 }
 0x7db   :  { %2973 = vmatpush1.bf16.msra.mxu0 %v6708_v23  ;;  %6354 = vmatpush3.bf16.msra.mxu1 %v6711_v15 }
 0x7dc   :  { %6363 = vmatprep.subr.bf16.mxu1 %v7184_v42  ;;  %3382 = vmatprep.subr.bf16.mxu0 %v7732_v12 }
 0x7de   :  { %2991 = vmatmul.mubr.bf16.vlgmr.msra.gmra.mrb[48].mxu0 %v7717_v48  ;;  %6356 = vmatmul.mubr.bf16.vlgmr.msra.gmra.mrb[40].mxu1 %v2778_v30  ;;  %v7770_v48 = vld [vmem:[#allocation11 + $0x90] ss:$12 sps:$4 sm:$0xff]  }
 0x7df   :  { %6359 = vmatprep.mubr.bf16.mxu1 %v2779_v40  ;;  %3000 = vmatprep.mubr.bf16.mxu0 %v7183_v0 }
 0x7e0   :  { %3383 = vmatpush1.bf16.msra.mxu0 %v7734_v39  ;;  %6364 = vmatpush3.bf16.msra.mxu1 %v6733_v51 }
 0x7e1   :  { %3384 = vmatprep.subr.bf16.mxu0 %v7738_v31  ;;  %6365 = vmatprep.subr.bf16.mxu1 %v7184_v42 }
 0x7e4   :  { %3385 = vmatpush1.bf16.msra.mxu0 %v7740_v44  ;;  %6366 = vmatpush3.bf16.msra.mxu1 %v6737_v59 }
 0x7e5   :  { %3386 = vmatprep.subr.bf16.mxu0 %v7744_v22  ;;  %6367 = vmatprep.subr.bf16.mxu1 %v7184_v42 }
 0x7e6   :  { %3001 = vmatmul.mubr.bf16.gmra.mrb[52].mxu0 %v2778_v30 }
 0x7e7   :  { %3010 = vmatprep.mubr.bf16.mxu0 %v7183_v0 }
 0x7e8   :  { %3387 = vmatpush1.bf16.msra.mxu0 %v7746_v36  ;;  %6368 = vmatpush3.bf16.msra.mxu1 %v6738_v61 }
 0x7e9   :  { %3388 = vmatprep.subr.bf16.mxu0 %v7750_v34  ;;  %6369 = vmatprep.subr.bf16.mxu1 %v7184_v42 }
 0x7ec   :  { %3389 = vmatpush1.bf16.msra.mxu0 %v7752_v35  ;;  %6370 = vmatpush3.bf16.msra.mxu1 %v6739_v50 }
 0x7ed   :  { %3390 = vmatprep.subr.bf16.mxu0 %v7755_v37  ;;  %6371 = vmatprep.subr.bf16.mxu1 %v7184_v42 }
 0x7ee   :  { %3011 = vmatmul.mubr.bf16.gmra.mrb[56].mxu0 %v2779_v40 }
 0x7ef   :  { %3020 = vmatprep.mubr.bf16.mxu0 %v7183_v0 }
 0x7f0   :  { %3391 = vmatpush1.bf16.msra.mxu0 %v7758_v38  ;;  %6372 = vmatpush3.bf16.msra.mxu1 %v6740_v1 }
 0x7f1   :  { %3392 = vmatprep.subr.bf16.mxu0 %v7762_v41  ;;  %6373 = vmatprep.subr.bf16.mxu1 %v7184_v42 }
 0x7f4   :  { %3393 = vmatpush1.bf16.msra.mxu0 %v7764_v46  ;;  %6374 = vmatpush3.bf16.msra.mxu1 %v6741_v3 }
 0x7f5   :  { %3394 = vmatprep.subr.bf16.mxu0 %v7768_v47  ;;  %6375 = vmatprep.subr.bf16.mxu1 %v7184_v42 }
 0x7f8   :  { %3395 = vmatpush1.bf16.msra.mxu0 %v7770_v48  ;;  %6376 = vmatpush3.bf16.msra.mxu1 %v6742_v63 }
 0x7f9   :  { %3396 = vmatprep.subr.bf16.mxu0 %v7773_v52  ;;  %6377 = vmatprep.subr.bf16.mxu1 %v7184_v42 }
 0x7fc   :  { %3397 = vmatpush1.bf16.msra.mxu0 %v7776_v57  ;;  %6378 = vmatpush3.bf16.msra.mxu1 %v6743_v4 }
 0x7fd   :  { %3658 = vmatprep.subr.bf16.mxu0 %v7732_v12  ;;  %6383 = vmatprep.subr.bf16.mxu1 %v7184_v42 }
 0x891   :  { %v2658_v29 = vpop.f32.mrb[44].mxu0  ;;  %v2699_v32 = vpop.f32.mrb[36].mxu1 }
 0x892   :  { %v2705_v13 = vadd.f32 %v2658_v29, %v2460_v7  ;;  %v2660_v43 = vpop.f32.mrb[45].mxu0  ;;  %v6337_v24 = vpop.f32.mrb[37].mxu1  ;;  %v2719_v23 = vadd.f32 %v7032_v20, %v2699_v32 }
 0x893   :  { %v2662_v54 = vpop.f32.mrb[46].mxu0  ;;  %v2702_v45 = vpop.f32.mrb[38].mxu1  ;;  %v2712_v5 = vadd.f32 %v2660_v43, %v2461_v49 }
 0x894   :  { %v5704_v60 = vmul.f32 -1.442695, %v2705_v13  ;;  %v2663_v62 = vpop.f32.mrb[47].mxu0  ;;  %v6338_v2 = vpop.f32.mrb[39].mxu1 }
 0x895   :  { %v5705_v10 = vmul.f32 -1.442695, %v2712_v5  ;;  %v2751_v5 = vmul.f32 0.70710677, %v7713_v33 }
 0x896   :  { %6906 = vpow2.f32 %v5704_v60 }
 0x897   :  { %6908 = vpow2.f32 %v5705_v10 }
 0x8a0   :  { %v6907_v14 = vpop.eup %6906 }
 0x8a1   :  { %v2709_v15 = vadd.f32 1.0, %v6907_v14  ;;  %v6909_v16 = vpop.eup %6908 }
 0x8a2   :  { %v2716_v17 = vadd.f32 1.0, %v6909_v16 }
 0x8a3   :  { %6910 = vrcp.f32 %v2709_v15 }
 0x8a4   :  { %6912 = vrcp.f32 %v2716_v17 }
 0x8ad   :  { %v6911_v26 = vpop.eup %6910 }
 0x8ae   :  { %v2720_v55 = vmul.f32 %v6911_v26, %v2719_v23  ;;  %v6913_v24 = vpop.eup %6912 }
 0x8af   :  { %v2723_v60 = vsub.f32 1.0, %v6913_v24  ;;  %v2725_v17 = vmul.f32 %v6913_v24, %v7713_v33  ;;  %v6750_v24 = vld [vmem:[#allocation11 + $0x98] ss:$12 sps:$4 sm:$0xff]  }
 0x8b0   :  { %v2721_v28 = vadd.f32 %v2720_v55, %v2462_v53 }
 0x8b1   :  { %v2992_v25 = vpop.f32.mrb[48].mxu0  ;;  %v6357_v30 = vpop.f32.mrb[40].mxu1 }
 0x8b2   :  { %6914 = vtanh.f32 %v2721_v28  ;;  %v2993_v18 = vadd.f32 %v2992_v25, %v7798_v56  ;;  %v3074_v40 = vadd.f32 %v6357_v30, %v7802_v58  ;;  %v2994_v51 = vpop.f32.mrb[49].mxu0  ;;  %v3065_v59 = vpop.f32.mrb[41].mxu1 }
 0x8b3   :  { %v2995_v9 = vadd.f32 %v2994_v51, %v7806_v27  ;;  %v3066_v61 = vadd.f32 %v3065_v59, %v7802_v58  ;;  %v2996_v21 = vpop.f32.mrb[50].mxu0  ;;  %v6358_v50 = vpop.f32.mrb[42].mxu1  ;;  %6916 = verf.f32 %v2751_v5 }
 0x8b4   :  { %v5976_v1 = vpack.c.bf16 %v3074_v40, %v3074_v40  ;;  %v2997_v8 = vadd.f32 %v2996_v21, %v7798_v56  ;;  %v3077_v11 = vadd.f32 %v6358_v50, %v7802_v58  ;;  %v2998_v3 = vpop.f32.mrb[51].mxu0  ;;  %v3068_v63 = vpop.f32.mrb[43].mxu1 }
 0x8b5   :  { %v5971_v4 = vpack.c.bf16 %v2995_v9, %v2993_v18  ;;  %v5972_v6 = vpack.c.bf16 %v3066_v61, %v3066_v61  ;;  %v2999_v7 = vadd.f32 %v2998_v3, %v7806_v27  ;;  %v3069_v29 = vadd.f32 %v3068_v63, %v7802_v58 }
 0x8b6   :  { %3205 = vst [vmem:[#allocation2 + $0x20] sm:$0xf] %v5976_v1  ;;  %v5978_v32 = vpack.c.bf16 %v3077_v11, %v3077_v11 }
 0x8b7   :  { %3200 = vst [vmem:[#allocation2] sm:$0xff] %v5971_v4  ;;  %3201 = vst [vmem:[#allocation2 + $0x8] sm:$0xf] %v5972_v6  ;;  %v5973_v13 = vpack.c.bf16 %v2999_v7, %v2997_v8  ;;  %v5974_v43 = vpack.c.bf16 %v3069_v29, %v3069_v29  ;;  %v2743_v8 = vmul.f32 0.5, %v7713_v33  ;;  %v6744_v33 = vld [vmem:[#allocation11 + $0x8] ss:$12 sps:$4 sm:$0xff]  }
 0x8b8   :  { %3207 = vst [vmem:[#allocation2 + $0x2c] sm:$0xf] %v5978_v32  ;;  %v6745_v7 = vld [vmem:[#allocation11 + $0x20] ss:$12 sps:$4 sm:$0xff]   ;;  %v6746_v29 = vld [vmem:[#allocation11 + $0x38] ss:$12 sps:$4 sm:$0xff]  }
 0x8b9   :  { %3202 = vst [vmem:[#allocation2 + $0xc] sm:$0xff] %v5973_v13  ;;  %3203 = vst [vmem:[#allocation2 + $0x14] sm:$0xf] %v5974_v43  ;;  %v3002_v49 = vpop.f32.mrb[52].mxu0  ;;  %v6747_v32 = vld [vmem:[#allocation11 + $0x50] ss:$12 sps:$4 sm:$0xff]  }
 0x8ba   :  { %v3003_v54 = vadd.f32 %v3002_v49, %v7798_v56  ;;  %v3004_v45 = vpop.f32.mrb[53].mxu0  ;;  %v6748_v13 = vld [vmem:[#allocation11 + $0x68] ss:$12 sps:$4 sm:$0xff]   ;;  %v6749_v43 = vld [vmem:[#allocation11 + $0x80] ss:$12 sps:$4 sm:$0xff]  }
 0x8bb   :  { %v3005_v62 = vadd.f32 %v3004_v45, %v7806_v27  ;;  %v3006_v2 = vpop.f32.mrb[54].mxu0  ;;  %v6751_v49 = vld [vmem:[#allocation11 + $0xb0] ss:$12 sps:$4 sm:$0xff]  }
 0x8bc   :  { %v6915_v10 = vpop.eup %6914  ;;  %v3007_v14 = vadd.f32 %v3006_v2, %v7798_v56  ;;  %v3008_v15 = vpop.f32.mrb[55].mxu0 }
 0x8bd   :  { %v2724_v16 = vmul.f32 %v6915_v10, %v2723_v60  ;;  %v5975_v19 = vpack.c.bf16 %v3005_v62, %v3003_v54  ;;  %v3009_v20 = vadd.f32 %v3008_v15, %v7806_v27  ;;  %v6917_v21 = vpop.eup %6916 }
 0x8be   :  { %v2767_v50 = vadd.f32 1.0, %v6917_v21 }
 0x8bf   :  { %v2726_v23 = vadd.f32 %v2725_v17, %v2724_v16  ;;  %3204 = vst [vmem:[#allocation2 + $0x18] sm:$0xff] %v5975_v19  ;;  %v5977_v26 = vpack.c.bf16 %v3009_v20, %v3007_v14 }
 0x8c0   :  { %v2775_v63 = vmul.f32 %v2767_v50, %v2743_v8 }
 0x8c1   :  { %3206 = vst [vmem:[#allocation2 + $0x24] sm:$0xff] %v5977_v26  ;;  %v3012_v53 = vpop.f32.mrb[56].mxu0  ;;  %v2752_v55 = vmul.f32 0.70710677, %v2726_v23  ;;  %v2744_v11 = vmul.f32 0.5, %v2726_v23 }
 0x8c2   :  { %v3013_v28 = vadd.f32 %v3012_v53, %v7798_v56  ;;  %v3014_v25 = vpop.f32.mrb[57].mxu0 }
 0x8c3   :  { %v3015_v30 = vadd.f32 %v3014_v25, %v7806_v27  ;;  %v3016_v18 = vpop.f32.mrb[58].mxu0  ;;  %6918 = verf.f32 %v2752_v55 }
 0x8c4   :  { %v3017_v40 = vadd.f32 %v3016_v18, %v7798_v56  ;;  %v3018_v51 = vpop.f32.mrb[59].mxu0 }
 0x8c5   :  { %v5979_v59 = vpack.c.bf16 %v3015_v30, %v3013_v28  ;;  %v3019_v9 = vadd.f32 %v3018_v51, %v7806_v27 }
 0x8c7   :  { %3208 = vst [vmem:[#allocation2 + $0x30] sm:$0xff] %v5979_v59  ;;  %v7826_v61 = vpack.c.bf16 %v3019_v9, %v3017_v40 }
 0x8c9   :  { %3210 = vst [vmem:[#allocation2 + $0x3c] sm:$0xff] %v7826_v61 }
 0x8cd   :  { %v6919_v1 = vpop.eup %6918 }
 0x8ce   :  { %v2768_v3 = vadd.f32 1.0, %v6919_v1 }
 0x8d0   :  { %v2776_v4 = vmul.f32 %v2768_v3, %v2744_v11 }
 0x8d2   :  { %v2780_v6 = vpack.c.bf16 %v2776_v4, %v2775_v63 }
 0x8d4   :  { %3021 = vmatmul.mubr.bf16.gmra.mrb[60].mxu0 %v2780_v6  ;;  %6360 = vmatmul.mubr.bf16.gmra.mrb[44].mxu1 %v2780_v6 }
 0x8d5   :  { %3414 = vmatprep.mubr.bf16.mxu0 %v7183_v0  ;;  %6379 = vmatprep.mubr.msk.bf16.mxu1 %vm7185_vm0, %v7184_v42 }
 0x8dc   :  { %3415 = vmatmul.mubr.bf16.vlgmr.msra.gmra.mrb[64].mxu0 %v7183_v0  ;;  %6380 = vmatmul.mubr.bf16.vlgmr.msra.gmra.mrb[48].mxu1 %v7183_v0 }
 0x8dd   :  { %3659 = vmatpush1.bf16.msra.mxu0 %v7734_v39  ;;  %3690 = vmatprep.mubr.bf16.mxu0 %v7183_v0 }
 0x8de   :  { %3660 = vmatprep.subr.bf16.mxu0 %v7738_v31  ;;  %6399 = vmatprep.mubr.msk.bf16.mxu1 %vm7185_vm0, %v7184_v42 }
 0x8df   :  { %6384 = vmatpush3.bf16.msra.mxu1 %v6744_v33 }
 0x8e0   :  { %6385 = vmatprep.subr.bf16.mxu1 %v7184_v42 }
 0x8e1   :  { %3661 = vmatpush1.bf16.msra.mxu0 %v7740_v44 }
 0x8e2   :  { %3662 = vmatprep.subr.bf16.mxu0 %v7744_v22 }
 0x8e3   :  { %6386 = vmatpush3.bf16.msra.mxu1 %v6745_v7 }
 0x8e4   :  { %6387 = vmatprep.subr.bf16.mxu1 %v7184_v42 }
 0x8e5   :  { %3663 = vmatpush1.bf16.msra.mxu0 %v7746_v36 }
 0x8e6   :  { %3664 = vmatprep.subr.bf16.mxu0 %v7750_v34 }
 0x8e7   :  { %6388 = vmatpush3.bf16.msra.mxu1 %v6746_v29  ;;  %v7876_v29 = vld [vmem:[%s8160_s8] ss:$0 sm:$0xff] }
 0x8e8   :  { %6389 = vmatprep.subr.bf16.mxu1 %v7184_v42 }
 0x8e9   :  { %3665 = vmatpush1.bf16.msra.mxu0 %v7752_v35 }
 0x8ea   :  { %3666 = vmatprep.subr.bf16.mxu0 %v7755_v37 }
 0x8eb   :  { %6390 = vmatpush3.bf16.msra.mxu1 %v6747_v32 }
 0x8ec   :  { %6391 = vmatprep.subr.bf16.mxu1 %v7184_v42 }
 0x8ed   :  { %3667 = vmatpush1.bf16.msra.mxu0 %v7758_v38 }
 0x8ee   :  { %3668 = vmatprep.subr.bf16.mxu0 %v7762_v41 }
 0x8ef   :  { %6392 = vmatpush3.bf16.msra.mxu1 %v6748_v13 }
 0x8f0   :  { %6393 = vmatprep.subr.bf16.mxu1 %v7184_v42 }
 0x8f1   :  { %3669 = vmatpush1.bf16.msra.mxu0 %v7764_v46 }
 0x8f2   :  { %3670 = vmatprep.subr.bf16.mxu0 %v7768_v47 }
 0x8f3   :  { %6394 = vmatpush3.bf16.msra.mxu1 %v6749_v43 }
 0x8f4   :  { %6395 = vmatprep.subr.bf16.mxu1 %v7184_v42 }
 0x8f5   :  { %3671 = vmatpush1.bf16.msra.mxu0 %v7770_v48 }
 0x8f6   :  { %3672 = vmatprep.subr.bf16.mxu0 %v7773_v52 }
 0x8f7   :  { %6396 = vmatpush3.bf16.msra.mxu1 %v6750_v24 }
 0x8f8   :  { %6397 = vmatprep.subr.bf16.mxu1 %v7184_v42 }
 0x8f9   :  { %3673 = vmatpush1.bf16.msra.mxu0 %v7776_v57 }
 0x8fa   :  { %3928 = vmatprep.subr.bf16.mxu0 %v7732_v12 }
 0x8fb   :  { %6398 = vmatpush3.bf16.msra.mxu1 %v6751_v49 }
 0x8fc   :  { %6403 = vmatprep.subr.bf16.mxu1 %v7184_v42 }
 0x9a7   :  { %v3022_v54 = vpop.f32.mrb[60].mxu0  ;;  %v6361_v45 = vpop.f32.mrb[44].mxu1 }
 0x9a8   :  { %v3023_v60 = vadd.f32 %v3022_v54, %v7798_v56  ;;  %v3090_v62 = vadd.f32 %v6361_v45, %v7802_v58  ;;  %v3024_v2 = vpop.f32.mrb[61].mxu0  ;;  %v3081_v5 = vpop.f32.mrb[45].mxu1 }
 0x9a9   :  { %v3025_v10 = vadd.f32 %v3024_v2, %v7806_v27  ;;  %v3082_v14 = vadd.f32 %v3081_v5, %v7802_v58  ;;  %v3026_v15 = vpop.f32.mrb[62].mxu0  ;;  %v6362_v16 = vpop.f32.mrb[46].mxu1 }
 0x9aa   :  { %v5984_v17 = vpack.c.bf16 %v3090_v62, %v3090_v62  ;;  %v3027_v19 = vadd.f32 %v3026_v15, %v7798_v56  ;;  %v3093_v20 = vadd.f32 %v6362_v16, %v7802_v58  ;;  %v3028_v23 = vpop.f32.mrb[63].mxu0  ;;  %v3084_v26 = vpop.f32.mrb[47].mxu1 }
 0x9ab   :  { %v7868_v53 = vpack.c.bf16 %v3025_v10, %v3023_v60  ;;  %v5980_v55 = vpack.c.bf16 %v3082_v14, %v3082_v14  ;;  %v3029_v28 = vadd.f32 %v3028_v23, %v7806_v27  ;;  %v3085_v25 = vadd.f32 %v3084_v26, %v7802_v58  ;;  %v6752_v26 = vld [vmem:[#allocation11 + $0x8] ss:$12 sps:$4 sm:$0xff]  }
 0x9ac   :  { %3213 = vst [vmem:[#allocation2 + $0x50] sm:$0xf] %v5984_v17  ;;  %v5986_v30 = vpack.c.bf16 %v3093_v20, %v3093_v20 }
 0x9ad   :  { %3212 = vst [vmem:[#allocation2 + $0x48] sm:$0xff] %v7868_v53  ;;  %3209 = vst [vmem:[#allocation2 + $0x38] sm:$0xf] %v5980_v55  ;;  %v5985_v18 = vpack.c.bf16 %v3029_v28, %v3027_v19  ;;  %v5982_v40 = vpack.c.bf16 %v3085_v25, %v3085_v25  ;;  %v6753_v55 = vld [vmem:[#allocation11 + $0x20] ss:$12 sps:$4 sm:$0xff]  }
 0x9ae   :  { %3215 = vst [vmem:[#allocation2 + $0x5c] sm:$0xf] %v5986_v30  ;;  %v6754_v28 = vld [vmem:[#allocation11 + $0x38] ss:$12 sps:$4 sm:$0xff]   ;;  %v6755_v25 = vld [vmem:[#allocation11 + $0x50] ss:$12 sps:$4 sm:$0xff]  }
 0x9af   :  { %3214 = vst [vmem:[#allocation2 + $0x54] sm:$0xff] %v5985_v18  ;;  %3211 = vst [vmem:[#allocation2 + $0x44] sm:$0xf] %v5982_v40  ;;  %v3219_v56 = vunpack.c.l.bf16 %v5985_v18  ;;  %v3416_v51 = vpop.f32.mrb[64].mxu0  ;;  %v3220_v59 = vunpack.c.h.bf16 %v5985_v18  ;;  %v3457_v9 = vpop.f32.mrb[48].mxu1 }
 0x9b0   :  { %v3418_v21 = vpop.f32.mrb[65].mxu0  ;;  %v6381_v50 = vpop.f32.mrb[49].mxu1  ;;  %v3483_v13 = vadd.f32 %v7876_v29, %v3457_v9  ;;  %v6756_v30 = vld [vmem:[#allocation11 + $0x68] ss:$12 sps:$4 sm:$0xff]   ;;  %v6757_v18 = vld [vmem:[#allocation11 + $0x80] ss:$12 sps:$4 sm:$0xff]   ;;  %v3495_v9 = vunpack.c.h.bf16 %v7868_v53 }
 0x9b1   :  { %v3463_v1 = vadd.f32 %v3416_v51, %v3219_v56  ;;  %v3470_v27 = vadd.f32 %v3418_v21, %v3220_v59  ;;  %v3420_v8 = vpop.f32.mrb[66].mxu0  ;;  %v3460_v58 = vpop.f32.mrb[50].mxu1  ;;  %v6759_v40 = vld [vmem:[#allocation11 + $0xb0] ss:$12 sps:$4 sm:$0xff]   ;;  %v3494_v56 = vunpack.c.l.bf16 %v7868_v53 }
 0x9b2   :  { %v3421_v11 = vpop.f32.mrb[67].mxu0  ;;  %v6382_v3 = vpop.f32.mrb[51].mxu1 }
 0x9b3   :  { %v5770_v63 = vmul.f32 -1.442695, %v3463_v1  ;;  %v5771_v4 = vmul.f32 -1.442695, %v3470_v27 }
 0x9b5   :  { %6920 = vpow2.f32 %v5770_v63  ;;  %v7879_v43 = vld [vmem:[#allocation2 + $0x50] ss:$12 sps:$4 sm:$0xff]  }
 0x9b6   :  { %6922 = vpow2.f32 %v5771_v4  ;;  %v3221_v49 = vunpack.c.h.bf16 %v7879_v43 }
 0x9bf   :  { %v6921_v6 = vpop.eup %6920 }
 0x9c0   :  { %v3467_v33 = vadd.f32 1.0, %v6921_v6  ;;  %v6923_v7 = vpop.eup %6922 }
 0x9c1   :  { %v3474_v32 = vadd.f32 1.0, %v6923_v7 }
 0x9c2   :  { %6924 = vrcp.f32 %v3467_v33 }
 0x9c3   :  { %6926 = vrcp.f32 %v3474_v32 }
 0x9cc   :  { %v6925_v24 = vpop.eup %6924 }
 0x9cd   :  { %v3484_v54 = vmul.f32 %v6925_v24, %v3483_v13  ;;  %v6927_v60 = vpop.eup %6926  ;;  %v3496_v24 = vunpack.c.l.bf16 %v7879_v43 }
 0x9ce   :  { %v3487_v62 = vsub.f32 1.0, %v6927_v60  ;;  %v3489_v10 = vmul.f32 0.0, %v6927_v60 }
 0x9cf   :  { %v3485_v45 = vadd.f32 %v3484_v54, %v3221_v49 }
 0x9d1   :  { %6928 = vtanh.f32 %v3485_v45 }
 0x9db   :  { %v6929_v2 = vpop.eup %6928 }
 0x9dc   :  { %v3488_v5 = vmul.f32 %v6929_v2, %v3487_v62 }
 0x9de   :  { %v7882_v14 = vadd.f32 %v3489_v10, %v3488_v5 }
 0x9e0   :  { %v3497_v15 = vpack.c.bf16 %v7882_v14, %v7882_v14  ;;  %v5405_v16 = vmul.f32 0.70710677, %v7882_v14  ;;  %v5397_v19 = vmul.f32 0.5, %v7882_v14 }
 0x9e2   :  { %3691 = vmatmul.mubr.bf16.vlgmr.msra.gmra.mrb[68].mxu0 %v3497_v15  ;;  %6930 = verf.f32 %v5405_v16  ;;  %6400 = vmatmul.mubr.bf16.vlgmr.msra.gmra.mrb[52].mxu1 %v3497_v15 }
 0x9e3   :  { %3929 = vmatpush1.bf16.msra.mxu0 %v7734_v39  ;;  %3960 = vmatprep.mubr.bf16.mxu0 %v7183_v0 }
 0x9e4   :  { %3930 = vmatprep.subr.bf16.mxu0 %v7738_v31  ;;  %6419 = vmatprep.mubr.msk.bf16.mxu1 %vm7185_vm0, %v7184_v42 }
 0x9e5   :  { %6404 = vmatpush3.bf16.msra.mxu1 %v6752_v26 }
 0x9e6   :  { %6405 = vmatprep.subr.bf16.mxu1 %v7184_v42 }
 0x9e7   :  { %3931 = vmatpush1.bf16.msra.mxu0 %v7740_v44 }
 0x9e8   :  { %3932 = vmatprep.subr.bf16.mxu0 %v7744_v22 }
 0x9e9   :  { %6406 = vmatpush3.bf16.msra.mxu1 %v6753_v55 }
 0x9ea   :  { %6407 = vmatprep.subr.bf16.mxu1 %v7184_v42 }
 0x9eb   :  { %3933 = vmatpush1.bf16.msra.mxu0 %v7746_v36 }
 0x9ec   :  { %v6931_v17 = vpop.eup %6930  ;;  %3934 = vmatprep.subr.bf16.mxu0 %v7750_v34 }
 0x9ed   :  { %v5421_v20 = vadd.f32 1.0, %v6931_v17  ;;  %6408 = vmatpush3.bf16.msra.mxu1 %v6754_v28 }
 0x9ee   :  { %6409 = vmatprep.subr.bf16.mxu1 %v7184_v42 }
 0x9ef   :  { %v5429_v23 = vmul.f32 %v5421_v20, %v5397_v19  ;;  %3935 = vmatpush1.bf16.msra.mxu0 %v7752_v35 }
 0x9f0   :  { %3936 = vmatprep.subr.bf16.mxu0 %v7755_v37 }
 0x9f1   :  { %5437 = vst [vmem:[#allocation12 + $0x38] sm:$0xff] %v5429_v23  ;;  %6410 = vmatpush3.bf16.msra.mxu1 %v6755_v25 }
 0x9f2   :  { %6411 = vmatprep.subr.bf16.mxu1 %v7184_v42 }
 0x9f3   :  { %3937 = vmatpush1.bf16.msra.mxu0 %v7758_v38 }
 0x9f4   :  { %3938 = vmatprep.subr.bf16.mxu0 %v7762_v41 }
 0x9f5   :  { %6412 = vmatpush3.bf16.msra.mxu1 %v6756_v30 }
 0x9f6   :  { %6413 = vmatprep.subr.bf16.mxu1 %v7184_v42 }
 0x9f7   :  { %3939 = vmatpush1.bf16.msra.mxu0 %v7764_v46 }
 0x9f8   :  { %3940 = vmatprep.subr.bf16.mxu0 %v7768_v47 }
 0x9f9   :  { %6414 = vmatpush3.bf16.msra.mxu1 %v6757_v18 }
 0x9fa   :  { %6415 = vmatprep.subr.bf16.mxu1 %v7184_v42 }
 0x9fb   :  { %3941 = vmatpush1.bf16.msra.mxu0 %v7770_v48 }
 0x9fc   :  { %3942 = vmatprep.subr.bf16.mxu0 %v7773_v52 }
 0x9ff   :  { %3943 = vmatpush1.bf16.msra.mxu0 %v7776_v57 }
 0xa00   :  { %4198 = vmatprep.subr.bf16.mxu0 %v7732_v12  ;;  %v6758_v12 = vld [vmem:[#allocation11 + $0x98] ss:$12 sps:$4 sm:$0xff]  }
 0xa01   :  { %6416 = vmatpush3.bf16.msra.mxu1 %v6758_v12 }
 0xa02   :  { %6417 = vmatprep.subr.bf16.mxu1 %v7184_v42 }
 0xa05   :  { %6418 = vmatpush3.bf16.msra.mxu1 %v6759_v40 }
 0xa06   :  { %6423 = vmatprep.subr.bf16.mxu1 %v7184_v42 }
 0xab5   :  { %v3692_v51 = vpop.f32.mrb[68].mxu0  ;;  %v3733_v59 = vpop.f32.mrb[52].mxu1 }
 0xab6   :  { %v3739_v21 = vadd.f32 %v3692_v51, %v3494_v56  ;;  %v3694_v50 = vpop.f32.mrb[69].mxu0  ;;  %v6401_v1 = vpop.f32.mrb[53].mxu1  ;;  %v3753_v13 = vadd.f32 %v7876_v29, %v3733_v59  ;;  %v7954_v51 = vld [vmem:[#allocation2 + $0x38] ss:$12 sps:$4 sm:$0xff]  }
 0xab7   :  { %v3746_v27 = vadd.f32 %v3694_v50, %v3495_v9  ;;  %v3696_v8 = vpop.f32.mrb[70].mxu0  ;;  %v3736_v58 = vpop.f32.mrb[54].mxu1  ;;  %v3766_v9 = vunpack.c.h.bf16 %v7954_v51 }
 0xab8   :  { %v5797_v11 = vmul.f32 -1.442695, %v3739_v21  ;;  %v3697_v3 = vpop.f32.mrb[71].mxu0  ;;  %v6402_v63 = vpop.f32.mrb[55].mxu1 }
 0xab9   :  { %v5798_v4 = vmul.f32 -1.442695, %v3746_v27 }
 0xaba   :  { %6932 = vpow2.f32 %v5797_v11 }
 0xabb   :  { %6934 = vpow2.f32 %v5798_v4 }
 0xac4   :  { %v6933_v6 = vpop.eup %6932 }
 0xac5   :  { %v3743_v33 = vadd.f32 1.0, %v6933_v6  ;;  %v6935_v7 = vpop.eup %6934 }
 0xac6   :  { %v3750_v32 = vadd.f32 1.0, %v6935_v7 }
 0xac7   :  { %6936 = vrcp.f32 %v3743_v33 }
 0xac8   :  { %6938 = vrcp.f32 %v3750_v32 }
 0xad1   :  { %v6937_v53 = vpop.eup %6936 }
 0xad2   :  { %v3754_v49 = vmul.f32 %v6937_v53, %v3753_v13  ;;  %v6939_v45 = vpop.eup %6938  ;;  %v7968_v13 = vld [vmem:[#allocation11 + $0x4] ss:$12 sps:$4 sm:$0xff]   ;;  %v7970_v53 = vld [vmem:[#allocation11] ss:$12 sps:$4 sm:$0xff]  }
 0xad3   :  { %v3757_v60 = vsub.f32 1.0, %v6939_v45  ;;  %v3759_v5 = vmul.f32 %v6939_v45, %v7882_v14  ;;  %v6775_v45 = vld [vmem:[#allocation11 + $0x20] ss:$12 sps:$4 sm:$0xff]  }
 0xad4   :  { %v3755_v54 = vadd.f32 %v3754_v49, %v3496_v24  ;;  %v6771_v24 = vld [vmem:[#allocation11 + $0x8] ss:$12 sps:$4 sm:$0xff]  }
 0xad5   :  { %v7974_v49 = vld [vmem:[#allocation11 + $0x1c] ss:$12 sps:$4 sm:$0xff]  }
 0xad6   :  { %6940 = vtanh.f32 %v3755_v54  ;;  %v7977_v54 = vld [vmem:[#allocation11 + $0x18] ss:$12 sps:$4 sm:$0xff]  }
 0xae0   :  { %v6941_v62 = vpop.eup %6940 }
 0xae1   :  { %v3758_v2 = vmul.f32 %v6941_v62, %v3757_v60  ;;  %v7981_v60 = vld [vmem:[#allocation11 + $0x34] ss:$12 sps:$4 sm:$0xff]   ;;  %v7984_v62 = vld [vmem:[#allocation11 + $0x30] ss:$12 sps:$4 sm:$0xff]  }
 0xae3   :  { %v7920_v10 = vadd.f32 %v3759_v5, %v3758_v2  ;;  %v6779_v2 = vld [vmem:[#allocation11 + $0x38] ss:$12 sps:$4 sm:$0xff]  }
 0xae4   :  { %v7988_v5 = vld [vmem:[#allocation11 + $0x4c] ss:$12 sps:$4 sm:$0xff]  }
 0xae5   :  { %v3767_v15 = vpack.c.bf16 %v7920_v10, %v7920_v10  ;;  %v5404_v16 = vmul.f32 0.70710677, %v7920_v10  ;;  %v5396_v14 = vmul.f32 0.5, %v7920_v10 }
 0xae7   :  { %3961 = vmatmul.mubr.bf16.vlgmr.msra.gmra.mrb[72].mxu0 %v3767_v15  ;;  %6942 = verf.f32 %v5404_v16  ;;  %6420 = vmatmul.mubr.bf16.vlgmr.msra.gmra.mrb[56].mxu1 %v3767_v15  ;;  %v6783_v15 = vld [vmem:[#allocation11 + $0x50] ss:$12 sps:$4 sm:$0xff]   ;;  %v7995_v16 = vld [vmem:[#allocation11 + $0x60] ss:$12 sps:$4 sm:$0xff]  }
 0xae8   :  { %4199 = vmatpush1.bf16.msra.mxu0 %v7734_v39  ;;  %4230 = vmatprep.mubr.bf16.mxu0 %v7183_v0 }
 0xae9   :  { %4200 = vmatprep.subr.bf16.mxu0 %v7738_v31  ;;  %6439 = vmatprep.mubr.msk.bf16.mxu1 %vm7185_vm0, %v7184_v42  ;;  %v6760_v31 = vld [vmem:[#allocation11 + $0x8] ss:$12 sps:$4 sm:$0xff]  }
 0xaea   :  { %6424 = vmatpush3.bf16.msra.mxu1 %v6760_v31  ;;  %v6791_v31 = vld [vmem:[#allocation11 + $0x80] ss:$12 sps:$4 sm:$0xff]  }
 0xaeb   :  { %6425 = vmatprep.subr.bf16.mxu1 %v7184_v42 }
 0xaec   :  { %4201 = vmatpush1.bf16.msra.mxu0 %v7740_v44  ;;  %v6761_v44 = vld [vmem:[#allocation11 + $0x20] ss:$12 sps:$4 sm:$0xff]  }
 0xaed   :  { %4202 = vmatprep.subr.bf16.mxu0 %v7744_v22  ;;  %v6762_v22 = vld [vmem:[#allocation11 + $0x38] ss:$12 sps:$4 sm:$0xff]  }
 0xaee   :  { %6426 = vmatpush3.bf16.msra.mxu1 %v6761_v44  ;;  %v8008_v44 = vld [vmem:[#allocation11 + $0x94] ss:$12 sps:$4 sm:$0xff]  }
 0xaef   :  { %6427 = vmatprep.subr.bf16.mxu1 %v7184_v42 }
 0xaf0   :  { %4203 = vmatpush1.bf16.msra.mxu0 %v7746_v36  ;;  %v6763_v36 = vld [vmem:[#allocation11 + $0x50] ss:$12 sps:$4 sm:$0xff]  }
 0xaf1   :  { %v6943_v43 = vpop.eup %6942  ;;  %4204 = vmatprep.subr.bf16.mxu0 %v7750_v34  ;;  %v6764_v34 = vld [vmem:[#allocation11 + $0x68] ss:$12 sps:$4 sm:$0xff]  }
 0xaf2   :  { %v5420_v17 = vadd.f32 1.0, %v6943_v43  ;;  %6428 = vmatpush3.bf16.msra.mxu1 %v6762_v22  ;;  %v7997_v43 = vld [vmem:[#allocation11 + $0x64] ss:$12 sps:$4 sm:$0xff]  }
 0xaf3   :  { %6429 = vmatprep.subr.bf16.mxu1 %v7184_v42  ;;  %v8011_v22 = vld [vmem:[#allocation11 + $0x90] ss:$12 sps:$4 sm:$0xff]  }
 0xaf4   :  { %v5428_v39 = vmul.f32 %v5420_v17, %v5396_v14  ;;  %4205 = vmatpush1.bf16.msra.mxu0 %v7752_v35  ;;  %v6765_v35 = vld [vmem:[#allocation11 + $0x80] ss:$12 sps:$4 sm:$0xff]   ;;  %v6787_v14 = vld [vmem:[#allocation11 + $0x68] ss:$12 sps:$4 sm:$0xff]  }
 0xaf5   :  { %4206 = vmatprep.subr.bf16.mxu0 %v7755_v37  ;;  %v6766_v37 = vld [vmem:[#allocation11 + $0x98] ss:$12 sps:$4 sm:$0xff]   ;;  %v8000_v17 = vld [vmem:[#allocation11 + $0x7c] ss:$12 sps:$4 sm:$0xff]  }
 0xaf6   :  { %5436 = vst [vmem:[#allocation12 + $0x30] sm:$0xff] %v5428_v39  ;;  %6430 = vmatpush3.bf16.msra.mxu1 %v6763_v36  ;;  %v8004_v39 = vld [vmem:[#allocation11 + $0x78] ss:$12 sps:$4 sm:$0xff]  }
 0xaf7   :  { %6431 = vmatprep.subr.bf16.mxu1 %v7184_v42  ;;  %v6795_v36 = vld [vmem:[#allocation11 + $0x98] ss:$12 sps:$4 sm:$0xff]  }
 0xaf8   :  { %4207 = vmatpush1.bf16.msra.mxu0 %v7758_v38  ;;  %v6767_v38 = vld [vmem:[#allocation11 + $0xb0] ss:$12 sps:$4 sm:$0xff]  }
 0xaf9   :  { %4208 = vmatprep.subr.bf16.mxu0 %v7762_v41  ;;  %v3764_v41 = vunpack.c.l.bf16 %v7826_v61 }
 0xafa   :  { %6432 = vmatpush3.bf16.msra.mxu1 %v6764_v34  ;;  %v8015_v34 = vld [vmem:[#allocation11 + $0xac] ss:$12 sps:$4 sm:$0xff]  }
 0xafb   :  { %6433 = vmatprep.subr.bf16.mxu1 %v7184_v42 }
 0xafc   :  { %4209 = vmatpush1.bf16.msra.mxu0 %v7764_v46 }
 0xafd   :  { %4210 = vmatprep.subr.bf16.mxu0 %v7768_v47 }
 0xafe   :  { %6434 = vmatpush3.bf16.msra.mxu1 %v6765_v35  ;;  %v8018_v35 = vld [vmem:[#allocation11 + $0xa8] ss:$12 sps:$4 sm:$0xff]  }
 0xaff   :  { %6435 = vmatprep.subr.bf16.mxu1 %v7184_v42 }
 0xb00   :  { %4211 = vmatpush1.bf16.msra.mxu0 %v7770_v48  ;;  %v3765_v48 = vunpack.c.h.bf16 %v7826_v61 }
 0xb01   :  { %4212 = vmatprep.subr.bf16.mxu0 %v7773_v52 }
 0xb02   :  { %6436 = vmatpush3.bf16.msra.mxu1 %v6766_v37  ;;  %v6799_v37 = vld [vmem:[#allocation11 + $0xb0] ss:$12 sps:$4 sm:$0xff]  }
 0xb03   :  { %6437 = vmatprep.subr.bf16.mxu1 %v7184_v42 }
 0xb04   :  { %4213 = vmatpush1.bf16.msra.mxu0 %v7776_v57 }
 0xb05   :  { %4468 = vmatprep.subr.bf16.mxu0 %v7968_v13 }
 0xb06   :  { %6438 = vmatpush3.bf16.msra.mxu1 %v6767_v38  ;;  %v4032_v38 = vld [vmem:[#allocation2 + $0x30] sm:$0xff] }
 0xb07   :  { %6443 = vmatprep.subr.bf16.mxu1 %v7184_v42 }
 0xbba   :  { %v3962_v46 = vpop.f32.mrb[72].mxu0  ;;  %v4003_v47 = vpop.f32.mrb[56].mxu1 }
 0xbbb   :  { %v4009_v52 = vadd.f32 %v3962_v46, %v3764_v41  ;;  %v3964_v57 = vpop.f32.mrb[73].mxu0  ;;  %v6421_v19 = vpop.f32.mrb[57].mxu1  ;;  %v4023_v61 = vadd.f32 %v7876_v29, %v4003_v47  ;;  %v4034_v41 = vunpack.c.l.bf16 %v4032_v38 }
 0xbbc   :  { %v4016_v20 = vadd.f32 %v3964_v57, %v3765_v48  ;;  %v3966_v23 = vpop.f32.mrb[74].mxu0  ;;  %v4006_v26 = vpop.f32.mrb[58].mxu1  ;;  %v4035_v19 = vunpack.c.h.bf16 %v4032_v38 }
 0xbbd   :  { %v5823_v55 = vmul.f32 -1.442695, %v4009_v52  ;;  %v3967_v28 = vpop.f32.mrb[75].mxu0  ;;  %v6422_v25 = vpop.f32.mrb[59].mxu1 }
 0xbbe   :  { %v5824_v30 = vmul.f32 -1.442695, %v4016_v20 }
 0xbbf   :  { %6944 = vpow2.f32 %v5823_v55 }
 0xbc0   :  { %6946 = vpow2.f32 %v5824_v30 }
 0xbc9   :  { %v6945_v18 = vpop.eup %6944 }
 0xbca   :  { %v4013_v12 = vadd.f32 1.0, %v6945_v18  ;;  %v6947_v40 = vpop.eup %6946 }
 0xbcb   :  { %v4020_v56 = vadd.f32 1.0, %v6947_v40 }
 0xbcc   :  { %6948 = vrcp.f32 %v4013_v12 }
 0xbcd   :  { %6950 = vrcp.f32 %v4020_v56 }
 0xbd6   :  { %v6949_v59 = vpop.eup %6948 }
 0xbd7   :  { %v4024_v21 = vmul.f32 %v6949_v59, %v4023_v61  ;;  %v6951_v1 = vpop.eup %6950 }
 0xbd8   :  { %v4027_v27 = vsub.f32 1.0, %v6951_v1  ;;  %v4029_v11 = vmul.f32 %v6951_v1, %v7920_v10  ;;  %v7991_v10 = vld [vmem:[#allocation11 + $0x48] ss:$12 sps:$4 sm:$0xff]  }
 0xbd9   :  { %v4025_v50 = vadd.f32 %v4024_v21, %v3766_v9  ;;  %v4036_v9 = vunpack.c.l.bf16 %v7954_v51 }
 0xbdb   :  { %6952 = vtanh.f32 %v4025_v50 }
 0xbe5   :  { %v6953_v8 = vpop.eup %6952 }
 0xbe6   :  { %v4028_v58 = vmul.f32 %v6953_v8, %v4027_v27 }
 0xbe8   :  { %v7959_v3 = vadd.f32 %v4029_v11, %v4028_v58 }
 0xbea   :  { %v4037_v63 = vpack.c.bf16 %v7959_v3, %v7959_v3  ;;  %v5403_v4 = vmul.f32 0.70710677, %v7959_v3  ;;  %v5395_v33 = vmul.f32 0.5, %v7959_v3 }
 0xbec   :  { %4231 = vmatmul.mubr.bf16.vlgmr.msra.gmra.mrb[76].mxu0 %v4037_v63  ;;  %6954 = verf.f32 %v5403_v4  ;;  %6440 = vmatmul.mubr.bf16.vlgmr.msra.gmra.mrb[60].mxu1 %v4037_v63 }
 0xbed   :  { %4500 = vmatprep.mubr.bf16.mxu0 %v7183_v0  ;;  %6459 = vmatprep.mubr.msk.bf16.mxu1 %vm7185_vm0, %v7184_v42 }
 0xbee   :  { %4469 = vmatpush1.bf16.msra.mxu0 %v7970_v53  ;;  %6444 = vmatpush3.bf16.msra.mxu1 %v6771_v24  ;;  %v6801_v24 = vld [vmem:[#allocation11 + $0x20] ss:$12 sps:$4 sm:$0xff]  }
 0xbef   :  { %6445 = vmatprep.subr.bf16.mxu1 %v7184_v42  ;;  %4470 = vmatprep.subr.bf16.mxu0 %v7974_v49 }
 0xbf2   :  { %4471 = vmatpush1.bf16.msra.mxu0 %v7977_v54  ;;  %6446 = vmatpush3.bf16.msra.mxu1 %v6775_v45  ;;  %v6802_v45 = vld [vmem:[#allocation11 + $0x38] ss:$12 sps:$4 sm:$0xff]  }
 0xbf3   :  { %6447 = vmatprep.subr.bf16.mxu1 %v7184_v42  ;;  %4472 = vmatprep.subr.bf16.mxu0 %v7981_v60 }
 0xbf6   :  { %v6955_v6 = vpop.eup %6954  ;;  %4473 = vmatpush1.bf16.msra.mxu0 %v7984_v62  ;;  %6448 = vmatpush3.bf16.msra.mxu1 %v6779_v2  ;;  %v6803_v2 = vld [vmem:[#allocation11 + $0x50] ss:$12 sps:$4 sm:$0xff]  }
 0xbf7   :  { %v5419_v7 = vadd.f32 1.0, %v6955_v6  ;;  %6449 = vmatprep.subr.bf16.mxu1 %v7184_v42  ;;  %4474 = vmatprep.subr.bf16.mxu0 %v7988_v5 }
 0xbf9   :  { %v5427_v32 = vmul.f32 %v5419_v7, %v5395_v33 }
 0xbfa   :  { %4475 = vmatpush1.bf16.msra.mxu0 %v7991_v10  ;;  %6450 = vmatpush3.bf16.msra.mxu1 %v6783_v15  ;;  %v6804_v15 = vld [vmem:[#allocation11 + $0x68] ss:$12 sps:$4 sm:$0xff]  }
 0xbfb   :  { %5435 = vst [vmem:[#allocation12 + $0x28] sm:$0xff] %v5427_v32  ;;  %6451 = vmatprep.subr.bf16.mxu1 %v7184_v42  ;;  %4476 = vmatprep.subr.bf16.mxu0 %v7997_v43  ;;  %v6800_v32 = vld [vmem:[#allocation11 + $0x8] ss:$12 sps:$4 sm:$0xff]  }
 0xbfe   :  { %4477 = vmatpush1.bf16.msra.mxu0 %v7995_v16  ;;  %6452 = vmatpush3.bf16.msra.mxu1 %v6787_v14  ;;  %v6805_v14 = vld [vmem:[#allocation11 + $0x80] ss:$12 sps:$4 sm:$0xff]  }
 0xbff   :  { %4478 = vmatprep.subr.bf16.mxu0 %v8000_v17  ;;  %6453 = vmatprep.subr.bf16.mxu1 %v7184_v42 }
 0xc02   :  { %4479 = vmatpush1.bf16.msra.mxu0 %v8004_v39  ;;  %6454 = vmatpush3.bf16.msra.mxu1 %v6791_v31  ;;  %v6806_v31 = vld [vmem:[#allocation11 + $0x98] ss:$12 sps:$4 sm:$0xff]  }
 0xc03   :  { %4480 = vmatprep.subr.bf16.mxu0 %v8008_v44  ;;  %6455 = vmatprep.subr.bf16.mxu1 %v7184_v42 }
 0xc06   :  { %4481 = vmatpush1.bf16.msra.mxu0 %v8011_v22  ;;  %6456 = vmatpush3.bf16.msra.mxu1 %v6795_v36  ;;  %v6807_v36 = vld [vmem:[#allocation11 + $0xb0] ss:$12 sps:$4 sm:$0xff]  }
 0xc07   :  { %4482 = vmatprep.subr.bf16.mxu0 %v8015_v34  ;;  %6457 = vmatprep.subr.bf16.mxu1 %v7184_v42 }
 0xc0a   :  { %4483 = vmatpush1.bf16.msra.mxu0 %v8018_v35  ;;  %6458 = vmatpush3.bf16.msra.mxu1 %v6799_v37  ;;  %v4302_v37 = vld [vmem:[#allocation2 + $0x24] sm:$0xff] }
 0xc0b   :  { %4738 = vmatprep.subr.bf16.mxu0 %v7968_v13  ;;  %6463 = vmatprep.subr.bf16.mxu1 %v7184_v42  ;;  %v4304_v38 = vunpack.c.l.bf16 %v4302_v37 }
 0xcbf   :  { %v4232_v46 = vpop.f32.mrb[76].mxu0  ;;  %v4273_v47 = vpop.f32.mrb[60].mxu1 }
 0xcc0   :  { %v4279_v48 = vadd.f32 %v4232_v46, %v4034_v41  ;;  %v4234_v52 = vpop.f32.mrb[77].mxu0  ;;  %v6441_v57 = vpop.f32.mrb[61].mxu1  ;;  %v4293_v61 = vadd.f32 %v7876_v29, %v4273_v47 }
 0xcc1   :  { %v4236_v20 = vpop.f32.mrb[78].mxu0  ;;  %v4276_v23 = vpop.f32.mrb[62].mxu1  ;;  %v4286_v25 = vadd.f32 %v4234_v52, %v4035_v19  ;;  %v4305_v57 = vunpack.c.h.bf16 %v4302_v37 }
 0xcc2   :  { %v5849_v26 = vmul.f32 -1.442695, %v4279_v48  ;;  %v4237_v55 = vpop.f32.mrb[79].mxu0  ;;  %v6442_v28 = vpop.f32.mrb[63].mxu1 }
 0xcc3   :  { %v5850_v30 = vmul.f32 -1.442695, %v4286_v25 }
 0xcc4   :  { %6956 = vpow2.f32 %v5849_v26 }
 0xcc5   :  { %6958 = vpow2.f32 %v5850_v30 }
 0xcce   :  { %v6957_v18 = vpop.eup %6956 }
 0xccf   :  { %v4283_v12 = vadd.f32 1.0, %v6957_v18  ;;  %v6959_v40 = vpop.eup %6958 }
 0xcd0   :  { %v4290_v56 = vadd.f32 1.0, %v6959_v40 }
 0xcd1   :  { %6960 = vrcp.f32 %v4283_v12 }
 0xcd2   :  { %6962 = vrcp.f32 %v4290_v56  ;;  %v8061_v56 = vld [vmem:[#allocation2 + $0x20] ss:$12 sps:$4 sm:$0xff]  }
 0xcdb   :  { %v6961_v59 = vpop.eup %6960 }
 0xcdc   :  { %v4294_v21 = vmul.f32 %v6961_v59, %v4293_v61  ;;  %v6963_v1 = vpop.eup %6962 }
 0xcdd   :  { %v4297_v27 = vsub.f32 1.0, %v6963_v1  ;;  %v4299_v11 = vmul.f32 %v6963_v1, %v7959_v3 }
 0xcde   :  { %v4295_v50 = vadd.f32 %v4294_v21, %v4036_v9  ;;  %v4306_v9 = vunpack.c.h.bf16 %v8061_v56 }
 0xce0   :  { %6964 = vtanh.f32 %v4295_v50 }
 0xcea   :  { %v6965_v8 = vpop.eup %6964 }
 0xceb   :  { %v4298_v58 = vmul.f32 %v6965_v8, %v4297_v27 }
 0xced   :  { %v8028_v63 = vadd.f32 %v4299_v11, %v4298_v58 }
 0xcef   :  { %v4307_v4 = vpack.c.bf16 %v8028_v63, %v8028_v63  ;;  %v5402_v6 = vmul.f32 0.70710677, %v8028_v63  ;;  %v5394_v3 = vmul.f32 0.5, %v8028_v63 }
 0xcf1   :  { %4501 = vmatmul.mubr.bf16.vlgmr.msra.gmra.mrb[80].mxu0 %v4307_v4  ;;  %6966 = verf.f32 %v5402_v6  ;;  %6460 = vmatmul.mubr.bf16.vlgmr.msra.gmra.mrb[64].mxu1 %v4307_v4 }
 0xcf2   :  { %4739 = vmatpush1.bf16.msra.mxu0 %v7970_v53  ;;  %4770 = vmatprep.mubr.bf16.mxu0 %v7183_v0 }
 0xcf3   :  { %4740 = vmatprep.subr.bf16.mxu0 %v7974_v49  ;;  %6479 = vmatprep.mubr.msk.bf16.mxu1 %vm7185_vm0, %v7184_v42 }
 0xcf4   :  { %6464 = vmatpush3.bf16.msra.mxu1 %v6800_v32  ;;  %v6808_v32 = vld [vmem:[#allocation11 + $0x8] ss:$12 sps:$4 sm:$0xff]  }
 0xcf5   :  { %6465 = vmatprep.subr.bf16.mxu1 %v7184_v42 }
 0xcf6   :  { %4741 = vmatpush1.bf16.msra.mxu0 %v7977_v54 }
 0xcf7   :  { %4742 = vmatprep.subr.bf16.mxu0 %v7981_v60 }
 0xcf8   :  { %6466 = vmatpush3.bf16.msra.mxu1 %v6801_v24  ;;  %v6809_v24 = vld [vmem:[#allocation11 + $0x20] ss:$12 sps:$4 sm:$0xff]  }
 0xcf9   :  { %6467 = vmatprep.subr.bf16.mxu1 %v7184_v42 }
 0xcfa   :  { %4743 = vmatpush1.bf16.msra.mxu0 %v7984_v62 }
 0xcfb   :  { %v6967_v51 = vpop.eup %6966  ;;  %4744 = vmatprep.subr.bf16.mxu0 %v7988_v5 }
 0xcfc   :  { %v5418_v33 = vadd.f32 1.0, %v6967_v51  ;;  %6468 = vmatpush3.bf16.msra.mxu1 %v6802_v45  ;;  %v6810_v45 = vld [vmem:[#allocation11 + $0x38] ss:$12 sps:$4 sm:$0xff]  }
 0xcfd   :  { %6469 = vmatprep.subr.bf16.mxu1 %v7184_v42 }
 0xcfe   :  { %v5426_v7 = vmul.f32 %v5418_v33, %v5394_v3  ;;  %4745 = vmatpush1.bf16.msra.mxu0 %v7991_v10 }
 0xcff   :  { %4746 = vmatprep.subr.bf16.mxu0 %v7997_v43 }
 0xd00   :  { %5434 = vst [vmem:[#allocation12 + $0x20] sm:$0xff] %v5426_v7  ;;  %6470 = vmatpush3.bf16.msra.mxu1 %v6803_v2  ;;  %v6811_v2 = vld [vmem:[#allocation11 + $0x50] ss:$12 sps:$4 sm:$0xff]  }
 0xd01   :  { %6471 = vmatprep.subr.bf16.mxu1 %v7184_v42 }
 0xd02   :  { %4747 = vmatpush1.bf16.msra.mxu0 %v7995_v16 }
 0xd03   :  { %4748 = vmatprep.subr.bf16.mxu0 %v8000_v17 }
 0xd04   :  { %6472 = vmatpush3.bf16.msra.mxu1 %v6804_v15  ;;  %v6812_v15 = vld [vmem:[#allocation11 + $0x68] ss:$12 sps:$4 sm:$0xff]  }
 0xd05   :  { %6473 = vmatprep.subr.bf16.mxu1 %v7184_v42 }
 0xd06   :  { %4749 = vmatpush1.bf16.msra.mxu0 %v8004_v39 }
 0xd07   :  { %4750 = vmatprep.subr.bf16.mxu0 %v8008_v44 }
 0xd08   :  { %6474 = vmatpush3.bf16.msra.mxu1 %v6805_v14  ;;  %v6813_v14 = vld [vmem:[#allocation11 + $0x80] ss:$12 sps:$4 sm:$0xff]  }
 0xd09   :  { %6475 = vmatprep.subr.bf16.mxu1 %v7184_v42 }
 0xd0a   :  { %4751 = vmatpush1.bf16.msra.mxu0 %v8011_v22 }
 0xd0b   :  { %4752 = vmatprep.subr.bf16.mxu0 %v8015_v34 }
 0xd0c   :  { %6476 = vmatpush3.bf16.msra.mxu1 %v6806_v31  ;;  %v6815_v31 = vld [vmem:[#allocation11 + $0xb0] ss:$12 sps:$4 sm:$0xff]  }
 0xd0d   :  { %6477 = vmatprep.subr.bf16.mxu1 %v7184_v42 }
 0xd0e   :  { %4753 = vmatpush1.bf16.msra.mxu0 %v8018_v35 }
 0xd0f   :  { %5008 = vmatprep.subr.bf16.mxu0 %v7968_v13 }
 0xd10   :  { %6478 = vmatpush3.bf16.msra.mxu1 %v6807_v36  ;;  %v4572_v36 = vld [vmem:[#allocation2 + $0x18] sm:$0xff] }
 0xd11   :  { %6483 = vmatprep.subr.bf16.mxu1 %v7184_v42  ;;  %v4574_v37 = vunpack.c.l.bf16 %v4572_v36 }
 0xdc4   :  { %v4502_v41 = vpop.f32.mrb[80].mxu0  ;;  %v4543_v46 = vpop.f32.mrb[64].mxu1 }
 0xdc5   :  { %v4549_v47 = vadd.f32 %v4502_v41, %v4304_v38  ;;  %v4504_v48 = vpop.f32.mrb[81].mxu0  ;;  %v6461_v52 = vpop.f32.mrb[65].mxu1  ;;  %v4563_v61 = vadd.f32 %v7876_v29, %v4543_v46 }
 0xdc6   :  { %v4506_v19 = vpop.f32.mrb[82].mxu0  ;;  %v4546_v20 = vpop.f32.mrb[66].mxu1  ;;  %v4556_v28 = vadd.f32 %v4504_v48, %v4305_v57  ;;  %v4575_v52 = vunpack.c.h.bf16 %v4572_v36  ;;  %v7033_v36 = vld [vmem:[%s8160_s8] ss:$0 sm:$0xff]  ;;  %s7186_s8 = smov [#allocation12]  }
 0xdc7   :  { %v5875_v23 = vmul.f32 -1.442695, %v4549_v47  ;;  %v4507_v26 = vpop.f32.mrb[83].mxu0  ;;  %v6462_v55 = vpop.f32.mrb[67].mxu1  ;;  %s5443_s16 = sshll.u32 %s7186_s8, 4  ;;  %s5444_s16 = int_to_ptr.vmem [resolvable:$true] %s5443_s16 }
 0xdc8   :  { %v5876_v25 = vmul.f32 -1.442695, %v4556_v28  ;;  %s7144_s17 = scalar_lea.vmem %s5444_s16, 1024  ;;  %p7149_p13 = scmp.lt.s32.totalorder %s5444_s16, %s5444_s16 }
 0xdc9   :  { %6968 = vpow2.f32 %v5875_v23  ;;  %p7145_p12 = scmp.ne.s32.totalorder %s5444_s16, %s7144_s17  ;;  %p7150_p0 = scmp.lt.s32.totalorder %s7144_s17, %s7144_s17 }
 0xdca   :  { %6970 = vpow2.f32 %v5876_v25 }
 0xdcb   :  { %p7151_p1 = por %p7150_p0, %p7149_p13 }
 0xdcd   :  { %p7152_p2 = pnand %p7151_p1, %p7145_p12 }
 0xdd3   :  { %v6969_v30 = vpop.eup %6968 }
 0xdd4   :  { %v4553_v18 = vadd.f32 1.0, %v6969_v30  ;;  %v6971_v12 = vpop.eup %6970 }
 0xdd5   :  { %v4560_v40 = vadd.f32 1.0, %v6971_v12 }
 0xdd6   :  { %6972 = vrcp.f32 %v4553_v18 }
 0xdd7   :  { %6974 = vrcp.f32 %v4560_v40 }
 0xde0   :  { %v6973_v59 = vpop.eup %6972 }
 0xde1   :  { %v4564_v21 = vmul.f32 %v6973_v59, %v4563_v61  ;;  %v6975_v1 = vpop.eup %6974  ;;  %v4576_v59 = vunpack.c.l.bf16 %v8061_v56 }
 0xde2   :  { %v4567_v27 = vsub.f32 1.0, %v6975_v1  ;;  %v4569_v11 = vmul.f32 %v6975_v1, %v8028_v63 }
 0xde3   :  { %v4565_v50 = vadd.f32 %v4564_v21, %v4306_v9 }
 0xde5   :  { %6976 = vtanh.f32 %v4565_v50 }
 0xdef   :  { %v6977_v8 = vpop.eup %6976 }
 0xdf0   :  { %v4568_v58 = vmul.f32 %v6977_v8, %v4567_v27 }
 0xdf2   :  { %v8066_v4 = vadd.f32 %v4569_v11, %v4568_v58 }
 0xdf4   :  { %v4577_v6 = vpack.c.bf16 %v8066_v4, %v8066_v4  ;;  %v5401_v51 = vmul.f32 0.70710677, %v8066_v4  ;;  %v5393_v3 = vmul.f32 0.5, %v8066_v4 }
 0xdf6   :  { %4771 = vmatmul.mubr.bf16.vlgmr.msra.gmra.mrb[84].mxu0 %v4577_v6  ;;  %6978 = verf.f32 %v5401_v51  ;;  %6480 = vmatmul.mubr.bf16.vlgmr.msra.gmra.mrb[68].mxu1 %v4577_v6 }
 0xdf7   :  { %5009 = vmatpush1.bf16.msra.mxu0 %v7970_v53  ;;  %5040 = vmatprep.mubr.bf16.mxu0 %v7183_v0 }
 0xdf8   :  { %5010 = vmatprep.subr.bf16.mxu0 %v7974_v49  ;;  %6499 = vmatprep.mubr.msk.bf16.mxu1 %vm7185_vm0, %v7184_v42 }
 0xdf9   :  { %6484 = vmatpush3.bf16.msra.mxu1 %v6808_v32 }
 0xdfa   :  { %6485 = vmatprep.subr.bf16.mxu1 %v7184_v42 }
 0xdfb   :  { %5011 = vmatpush1.bf16.msra.mxu0 %v7977_v54 }
 0xdfc   :  { %5012 = vmatprep.subr.bf16.mxu0 %v7981_v60 }
 0xdfd   :  { %6486 = vmatpush3.bf16.msra.mxu1 %v6809_v24 }
 0xdfe   :  { %6487 = vmatprep.subr.bf16.mxu1 %v7184_v42 }
 0xdff   :  { %5013 = vmatpush1.bf16.msra.mxu0 %v7984_v62 }
 0xe00   :  { %v6979_v63 = vpop.eup %6978  ;;  %5014 = vmatprep.subr.bf16.mxu0 %v7988_v5 }
 0xe01   :  { %v5417_v33 = vadd.f32 1.0, %v6979_v63  ;;  %6488 = vmatpush3.bf16.msra.mxu1 %v6810_v45 }
 0xe02   :  { %6489 = vmatprep.subr.bf16.mxu1 %v7184_v42 }
 0xe03   :  { %v5425_v7 = vmul.f32 %v5417_v33, %v5393_v3  ;;  %5015 = vmatpush1.bf16.msra.mxu0 %v7991_v10 }
 0xe04   :  { %5016 = vmatprep.subr.bf16.mxu0 %v7997_v43 }
 0xe05   :  { %5433 = vst [vmem:[#allocation12 + $0x18] sm:$0xff] %v5425_v7  ;;  %6490 = vmatpush3.bf16.msra.mxu1 %v6811_v2 }
 0xe06   :  { %6491 = vmatprep.subr.bf16.mxu1 %v7184_v42 }
 0xe07   :  { %5017 = vmatpush1.bf16.msra.mxu0 %v7995_v16 }
 0xe08   :  { %5018 = vmatprep.subr.bf16.mxu0 %v8000_v17 }
 0xe09   :  { %6492 = vmatpush3.bf16.msra.mxu1 %v6812_v15 }
 0xe0a   :  { %6493 = vmatprep.subr.bf16.mxu1 %v7184_v42 }
 0xe0b   :  { %5019 = vmatpush1.bf16.msra.mxu0 %v8004_v39 }
 0xe0c   :  { %5020 = vmatprep.subr.bf16.mxu0 %v8008_v44 }
 0xe0d   :  { %6494 = vmatpush3.bf16.msra.mxu1 %v6813_v14 }
 0xe0e   :  { %6495 = vmatprep.subr.bf16.mxu1 %v7184_v42 }
 0xe0f   :  { %5021 = vmatpush1.bf16.msra.mxu0 %v8011_v22 }
 0xe10   :  { %5022 = vmatprep.subr.bf16.mxu0 %v8015_v34 }
 0xe13   :  { %5023 = vmatpush1.bf16.msra.mxu0 %v8018_v35 }
 0xe14   :  { %5278 = vmatprep.subr.bf16.mxu0 %v7968_v13  ;;  %v6814_v13 = vld [vmem:[#allocation11 + $0x98] ss:$12 sps:$4 sm:$0xff]  }
 0xe15   :  { %6496 = vmatpush3.bf16.msra.mxu1 %v6814_v13 }
 0xe16   :  { %6497 = vmatprep.subr.bf16.mxu1 %v7184_v42 }
 0xe19   :  { %6498 = vmatpush3.bf16.msra.mxu1 %v6815_v31  ;;  %v4843_v31 = vld [vmem:[#allocation2 + $0x8] ss:$12 sps:$4 sm:$0xff]  }
 0xe1a   :  { %6503 = vmatprep.subr.bf16.mxu1 %v7184_v42 }
 0xec9   :  { %v4772_v38 = vpop.f32.mrb[84].mxu0  ;;  %v4813_v41 = vpop.f32.mrb[68].mxu1 }
 0xeca   :  { %v4819_v46 = vadd.f32 %v4772_v38, %v4574_v37  ;;  %v4774_v47 = vpop.f32.mrb[85].mxu0  ;;  %v6481_v48 = vpop.f32.mrb[69].mxu1  ;;  %v4833_v40 = vadd.f32 %v7876_v29, %v4813_v41  ;;  %v4846_v41 = vunpack.c.h.bf16 %v4843_v31 }
 0xecb   :  { %v4776_v57 = vpop.f32.mrb[86].mxu0  ;;  %v4816_v19 = vpop.f32.mrb[70].mxu1  ;;  %v4826_v55 = vadd.f32 %v4774_v47, %v4575_v52 }
 0xecc   :  { %v5901_v20 = vmul.f32 -1.442695, %v4819_v46  ;;  %v4777_v23 = vpop.f32.mrb[87].mxu0  ;;  %v6482_v26 = vpop.f32.mrb[71].mxu1 }
 0xecd   :  { %v5902_v28 = vmul.f32 -1.442695, %v4826_v55 }
 0xece   :  { %6980 = vpow2.f32 %v5901_v20 }
 0xecf   :  { %6982 = vpow2.f32 %v5902_v28 }
 0xed8   :  { %v6981_v25 = vpop.eup %6980 }
 0xed9   :  { %v4823_v30 = vadd.f32 1.0, %v6981_v25  ;;  %v6983_v18 = vpop.eup %6982 }
 0xeda   :  { %v4830_v12 = vadd.f32 1.0, %v6983_v18 }
 0xedb   :  { %6984 = vrcp.f32 %v4823_v30 }
 0xedc   :  { %6986 = vrcp.f32 %v4830_v12  ;;  %v5112_v12 = vld [vmem:[#allocation2] sm:$0xff] }
 0xee5   :  { %v6985_v61 = vpop.eup %6984 }
 0xee6   :  { %v4834_v9 = vmul.f32 %v6985_v61, %v4833_v40  ;;  %v6987_v50 = vpop.eup %6986  ;;  %v5114_v40 = vunpack.c.l.bf16 %v5112_v12 }
 0xee7   :  { %v4837_v1 = vsub.f32 1.0, %v6987_v50  ;;  %v4839_v58 = vmul.f32 %v6987_v50, %v8066_v4 }
 0xee8   :  { %v4835_v21 = vadd.f32 %v4834_v9, %v4576_v59 }
 0xeea   :  { %6988 = vtanh.f32 %v4835_v21 }
 0xef4   :  { %v6989_v27 = vpop.eup %6988 }
 0xef5   :  { %v4838_v8 = vmul.f32 %v6989_v27, %v4837_v1  ;;  %v5115_v1 = vunpack.c.h.bf16 %v5112_v12 }
 0xef7   :  { %v8102_v11 = vadd.f32 %v4839_v58, %v4838_v8 }
 0xef9   :  { %v4847_v6 = vpack.c.bf16 %v8102_v11, %v8102_v11  ;;  %v5400_v29 = vmul.f32 0.70710677, %v8102_v11  ;;  %v5392_v4 = vmul.f32 0.5, %v8102_v11 }
 0xefb   :  { %5041 = vmatmul.mubr.bf16.vlgmr.msra.gmra.mrb[88].mxu0 %v4847_v6  ;;  %6990 = verf.f32 %v5400_v29  ;;  %6500 = vmatmul.mubr.bf16.vlgmr.msra.gmra.mrb[72].mxu1 %v4847_v6 }
 0xefc   :  { %5279 = vmatpush1.bf16.msra.mxu0 %v7970_v53  ;;  %5310 = vmatprep.mubr.bf16.mxu0 %v7183_v0  ;;  %v6816_v0 = vld [vmem:[#allocation11 + $0x8] ss:$12 sps:$4 sm:$0xff]  }
 0xefd   :  { %5280 = vmatprep.subr.bf16.mxu0 %v7974_v49  ;;  %6519 = vmatprep.mubr.msk.bf16.mxu1 %vm7185_vm0, %v7184_v42  ;;  %v6817_v49 = vld [vmem:[#allocation11 + $0x20] ss:$12 sps:$4 sm:$0xff]  }
 0xefe   :  { %6504 = vmatpush3.bf16.msra.mxu1 %v6816_v0 }
 0xeff   :  { %6505 = vmatprep.subr.bf16.mxu1 %v7184_v42 }
 0xf00   :  { %5281 = vmatpush1.bf16.msra.mxu0 %v7977_v54  ;;  %v6818_v54 = vld [vmem:[#allocation11 + $0x38] ss:$12 sps:$4 sm:$0xff]  }
 0xf01   :  { %5282 = vmatprep.subr.bf16.mxu0 %v7981_v60  ;;  %v6819_v60 = vld [vmem:[#allocation11 + $0x50] ss:$12 sps:$4 sm:$0xff]  }
 0xf02   :  { %6506 = vmatpush3.bf16.msra.mxu1 %v6817_v49 }
 0xf03   :  { %6507 = vmatprep.subr.bf16.mxu1 %v7184_v42 }
 0xf04   :  { %5283 = vmatpush1.bf16.msra.mxu0 %v7984_v62  ;;  %v6820_v62 = vld [vmem:[#allocation11 + $0x68] ss:$12 sps:$4 sm:$0xff]  }
 0xf05   :  { %v6991_v56 = vpop.eup %6990  ;;  %5284 = vmatprep.subr.bf16.mxu0 %v7988_v5  ;;  %v6821_v5 = vld [vmem:[#allocation11 + $0x80] ss:$12 sps:$4 sm:$0xff]  }
 0xf06   :  { %v5416_v51 = vadd.f32 1.0, %v6991_v56  ;;  %6508 = vmatpush3.bf16.msra.mxu1 %v6818_v54 }
 0xf07   :  { %6509 = vmatprep.subr.bf16.mxu1 %v7184_v42 }
 0xf08   :  { %v5424_v53 = vmul.f32 %v5416_v51, %v5392_v4  ;;  %5285 = vmatpush1.bf16.msra.mxu0 %v7991_v10  ;;  %v6822_v10 = vld [vmem:[#allocation11 + $0x98] ss:$12 sps:$4 sm:$0xff]  }
 0xf09   :  { %5286 = vmatprep.subr.bf16.mxu0 %v7997_v43  ;;  %v4842_v43 = vld [vmem:[#allocation2 + $0xc] sm:$0xff] }
 0xf0a   :  { %5432 = vst [vmem:[#allocation12 + $0x10] sm:$0xff] %v5424_v53  ;;  %6510 = vmatpush3.bf16.msra.mxu1 %v6819_v60  ;;  %v4845_v63 = vunpack.c.h.bf16 %v4842_v43  ;;  %v5116_v60 = vunpack.c.l.bf16 %v4843_v31 }
 0xf0b   :  { %6511 = vmatprep.subr.bf16.mxu1 %v7184_v42 }
 0xf0c   :  { %5287 = vmatpush1.bf16.msra.mxu0 %v7995_v16  ;;  %v6823_v16 = vld [vmem:[#allocation11 + $0xb0] ss:$12 sps:$4 sm:$0xff]  }
 0xf0d   :  { %5288 = vmatprep.subr.bf16.mxu0 %v8000_v17  ;;  %v4844_v17 = vunpack.c.l.bf16 %v4842_v43 }
 0xf0e   :  { %6512 = vmatpush3.bf16.msra.mxu1 %v6820_v62 }
 0xf0f   :  { %6513 = vmatprep.subr.bf16.mxu1 %v7184_v42 }
 0xf10   :  { %5289 = vmatpush1.bf16.msra.mxu0 %v8004_v39 }
 0xf11   :  { %5290 = vmatprep.subr.bf16.mxu0 %v8008_v44 }
 0xf12   :  { %6514 = vmatpush3.bf16.msra.mxu1 %v6821_v5 }
 0xf13   :  { %6515 = vmatprep.subr.bf16.mxu1 %v7184_v42 }
 0xf14   :  { %5291 = vmatpush1.bf16.msra.mxu0 %v8011_v22 }
 0xf15   :  { %5292 = vmatprep.subr.bf16.mxu0 %v8015_v34 }
 0xf16   :  { %6516 = vmatpush3.bf16.msra.mxu1 %v6822_v10 }
 0xf17   :  { %6517 = vmatprep.subr.bf16.mxu1 %v7184_v42 }
 0xf18   :  { %5293 = vmatpush1.bf16.msra.mxu0 %v8018_v35 }
 0xf1a   :  { %6518 = vmatpush3.bf16.msra.mxu1 %v6823_v16 }
 0xfce   :  { %v5042_v39 = vpop.f32.mrb[88].mxu0  ;;  %v5083_v44 = vpop.f32.mrb[72].mxu1 }
 0xfcf   :  { %v5089_v22 = vadd.f32 %v5042_v39, %v4844_v17  ;;  %v5044_v34 = vpop.f32.mrb[89].mxu0  ;;  %v6501_v35 = vpop.f32.mrb[73].mxu1  ;;  %v5103_v37 = vadd.f32 %v7033_v36, %v5083_v44 }
 0xfd0   :  { %v5046_v3 = vpop.f32.mrb[90].mxu0  ;;  %v5086_v33 = vpop.f32.mrb[74].mxu1  ;;  %v5096_v45 = vadd.f32 %v5044_v34, %v4845_v63 }
 0xfd1   :  { %v5927_v7 = vmul.f32 -1.442695, %v5089_v22  ;;  %v5047_v32 = vpop.f32.mrb[91].mxu0  ;;  %v6502_v24 = vpop.f32.mrb[75].mxu1 }
 0xfd2   :  { %v5928_v2 = vmul.f32 -1.442695, %v5096_v45 }
 0xfd3   :  { %6992 = vpow2.f32 %v5927_v7 }
 0xfd4   :  { %6994 = vpow2.f32 %v5928_v2 }
 0xfdd   :  { %v6993_v15 = vpop.eup %6992 }
 0xfde   :  { %v5093_v42 = vadd.f32 1.0, %v6993_v15  ;;  %v6995_v14 = vpop.eup %6994 }
 0xfdf   :  { %v5100_v13 = vadd.f32 1.0, %v6995_v14 }
 0xfe0   :  { %6996 = vrcp.f32 %v5093_v42 }
 0xfe1   :  { %6998 = vrcp.f32 %v5100_v13 }
 0xfea   :  { %v6997_v38 = vpop.eup %6996 }
 0xfeb   :  { %v5104_v46 = vmul.f32 %v6997_v38, %v5103_v37  ;;  %v6999_v48 = vpop.eup %6998 }
 0xfec   :  { %v5107_v52 = vsub.f32 1.0, %v6999_v48  ;;  %v5109_v20 = vmul.f32 %v6999_v48, %v8102_v11 }
 0xfed   :  { %v5105_v47 = vadd.f32 %v5104_v46, %v4846_v41 }
 0xfef   :  { %7000 = vtanh.f32 %v5105_v47 }
 0xff9   :  { %v7001_v57 = vpop.eup %7000 }
 0xffa   :  { %v5108_v19 = vmul.f32 %v7001_v57, %v5107_v52 }
 0xffc   :  { %v5110_v23 = vadd.f32 %v5109_v20, %v5108_v19 }
 0xffe   :  { %v5117_v26 = vpack.c.bf16 %v5110_v23, %v5110_v23  ;;  %v5399_v55 = vmul.f32 0.70710677, %v5110_v23  ;;  %v5391_v25 = vmul.f32 0.5, %v5110_v23 }
0x1000   :  { %5311 = vmatmul.mubr.bf16.vlgmr.msra.gmra.mrb[92].mxu0 %v5117_v26  ;;  %7002 = verf.f32 %v5399_v55  ;;  %6520 = vmatmul.mubr.bf16.vlgmr.msra.gmra.mrb[76].mxu1 %v5117_v26 }
0x100a   :  { %v7003_v28 = vpop.eup %7002 }
0x100b   :  { %v5415_v30 = vadd.f32 1.0, %v7003_v28 }
0x100d   :  { %v5423_v18 = vmul.f32 %v5415_v30, %v5391_v25 }
0x100f   :  { %5431 = vst [vmem:[#allocation12 + $0x8] sm:$0xff] %v5423_v18 }
0x10d3   :  { %v5312_v61 = vpop.f32.mrb[92].mxu0  ;;  %v5353_v59 = vpop.f32.mrb[76].mxu1 }
0x10d4   :  { %v5359_v9 = vadd.f32 %v5312_v61, %v5114_v40  ;;  %v5314_v21 = vpop.f32.mrb[93].mxu0  ;;  %v6521_v50 = vpop.f32.mrb[77].mxu1  ;;  %v5373_v49 = vadd.f32 %v7033_v36, %v5353_v59 }
0x10d5   :  { %v5316_v27 = vpop.f32.mrb[94].mxu0  ;;  %v5356_v8 = vpop.f32.mrb[78].mxu1  ;;  %v5366_v29 = vadd.f32 %v5314_v21, %v5115_v1 }
0x10d6   :  { %v5953_v58 = vmul.f32 -1.442695, %v5359_v9  ;;  %v5317_v11 = vpop.f32.mrb[95].mxu0  ;;  %v6522_v6 = vpop.f32.mrb[79].mxu1 }
0x10d7   :  { %v5954_v56 = vmul.f32 -1.442695, %v5366_v29 }
0x10d8   :  { %7004 = vpow2.f32 %v5953_v58 }
0x10d9   :  { %7006 = vpow2.f32 %v5954_v56 }
0x10e2   :  { %v7005_v4 = vpop.eup %7004 }
0x10e3   :  { %v5363_v51 = vadd.f32 1.0, %v7005_v4  ;;  %v7007_v53 = vpop.eup %7006 }
0x10e4   :  { %v5370_v0 = vadd.f32 1.0, %v7007_v53 }
0x10e5   :  { %7008 = vrcp.f32 %v5363_v51 }
0x10e6   :  { %7010 = vrcp.f32 %v5370_v0 }
0x10ef   :  { %v7009_v54 = vpop.eup %7008 }
0x10f0   :  { %v5374_v62 = vmul.f32 %v7009_v54, %v5373_v49  ;;  %v7011_v10 = vpop.eup %7010 }
0x10f1   :  { %v5377_v16 = vsub.f32 1.0, %v7011_v10  ;;  %v5379_v39 = vmul.f32 %v7011_v10, %v5110_v23 }
0x10f2   :  { %v5375_v5 = vadd.f32 %v5374_v62, %v5116_v60 }
0x10f4   :  { %7012 = vtanh.f32 %v5375_v5 }
0x10fe   :  { %v7013_v43 = vpop.eup %7012 }
0x10ff   :  { %v5378_v17 = vmul.f32 %v7013_v43, %v5377_v16 }
0x1101   :  { %v5380_v44 = vadd.f32 %v5379_v39, %v5378_v17 }
0x1103   :  { %v5398_v22 = vmul.f32 0.70710677, %v5380_v44  ;;  %v5390_v35 = vmul.f32 0.5, %v5380_v44 }
0x1105   :  { %7014 = verf.f32 %v5398_v22 }
0x110f   :  { %v7015_v34 = vpop.eup %7014 }
0x1110   :  { %v5414_v63 = vadd.f32 1.0, %v7015_v34 }
0x1112   :  { %v5422_v3 = vmul.f32 %v5414_v63, %v5390_v35 }
0x1114   :  { %5430 = vst [vmem:[#allocation12] sm:$0xff] %v5422_v3 }
0x1115   :  { %7155 = shalt.err (!%p7152_p2)
}
0x1116   :  { %s7156_s18 = scalar_lea.hbm %s8161_s9, 1024 }
0x1117   :  { %p7157_p3 = scmp.ne.s32.totalorder %s8161_s9, %s7156_s18  ;;  %p7160_p4 = scmp.lt.u32.totalorder %s7156_s18, %s8161_s9 }
0x1119   :  { %p7162_p5 = pnand %p7160_p4, %p7157_p3 }
0x111b   :  { %7165 = shalt.err (!%p7162_p5)
}
0x111c   :  { %5449 = dma.vmem_to_hbm [thread:$0]  %s5444_s16, 1024, %s8161_s9, [#allocation5], %s7179_s5, %s7179_s5, %s7180_s24  }
0x111d   :  { %7172 = dma.done.wait [#allocation5], 1024  }
0x111e   :  { %7173 = vsyncadd [#allocation5], 4294966272 }
0x111f   :  { %5453 = vsyncpa [#allocation4], 1 }
0x1120   :  { %5454 = vsyncpa [#allocation7], 1 }
0x1121   :  { %5455 = vsyncpa [#allocation10], 1 }
0x1122   :  { %5456 = vsyncpa [#allocation5], 1 }

// kernel: tpu_custom_call.1
= control target key start
LH: loop header
LB: loop body
LE: loop exit
PB: predicated region body
PF: predicated region fallthrough
CT: control target
= control target key end

     0   :  { %14 = vsyncpa [#allocation4], 0  ;;  %s8152_s0 = inlined_call_operand.hbm [shape: f32[8,8,128], index: 0, kind: input, shape index: {}]   ;;  %s8153_s1 = inlined_call_operand.hbm [shape: bf16[128,384], index: 1, kind: input, shape index: {}]   ;;  %s8154_s2 = inlined_call_operand.hbm [shape: bf16[128,384], index: 2, kind: input, shape index: {}]   ;;  %s8155_s3 = inlined_call_operand.vmem [shape: f32[1,384], index: 3, kind: input, shape index: {}]   ;;  %s8156_s4 = inlined_call_operand.vmem [shape: f32[1,128], index: 4, kind: input, shape index: {}]   ;;  %s8157_s5 = inlined_call_operand.hbm [shape: bf16[128,384], index: 5, kind: input, shape index: {}]   ;;  %s8158_s6 = inlined_call_operand.hbm [shape: bf16[128,384], index: 6, kind: input, shape index: {}]   ;;  %s8159_s7 = inlined_call_operand.vmem [shape: f32[1,384], index: 7, kind: input, shape index: {}]   ;;  %s8160_s8 = inlined_call_operand.vmem [shape: f32[1,128], index: 8, kind: input, shape index: {}]   ;;  %s8161_s9 = inlined_call_operand.hbm [shape: f32[8,8,128], index: 9, kind: output, shape index: {}]  }
   0x1   :  { %15 = vsyncpa [#allocation7], 0 }
   0x2   :  { %16 = vsyncpa [#allocation10], 0 }
   0x3   :  { %17 = vsyncpa [#allocation5], 0  ;;  %s7174_s30 = smov [#allocation6]   ;;  %s7034_s13 = scalar_lea.hbm %s8153_s1, 3072 }
   0x4   :  { %s35_s10 = sshll.u32 %s7174_s30, 4  ;;  %p7035_p0 = scmp.ne.s32.totalorder %s8153_s1, %s7034_s13  ;;  %s36_s10 = int_to_ptr.vmem [resolvable:$true] %s35_s10 }
   0x5   :  { %p7038_p1 = scmp.lt.u32.totalorder %s7034_s13, %s8153_s1 }
   0x7   :  { %p7040_p2 = pnand %p7038_p1, %p7035_p0 }
   0x9   :  { %7043 = shalt.err (!%p7040_p2)
}
   0xa   :  { %s7044_s18 = scalar_lea.vmem %s36_s10, 3072  ;;  %p7049_p4 = scmp.lt.s32.totalorder %s36_s10, %s36_s10 }
   0xb   :  { %p7045_p3 = scmp.ne.s32.totalorder %s36_s10, %s7044_s18  ;;  %p7050_p5 = scmp.lt.s32.totalorder %s7044_s18, %s7044_s18 }
   0xd   :  { %p7051_p6 = por %p7050_p5, %p7049_p4 }
   0xf   :  { %p7052_p7 = pnand %p7051_p6, %p7045_p3 }
  0x11   :  { %7055 = shalt.err (!%p7052_p7)
}
  0x12   :  { %s7175_s19 = smov 192   ;;  %s7176_s20 = smov 12  }
  0x13   :  { %41 = dma.hbm_to_vmem [thread:$0]  %s8153_s1, 3072, %s36_s10, [#allocation7], %s7175_s19, %s7175_s19, %s7176_s20  }
  0x14   :  { %s7177_s23 = smov [#allocation9]   ;;  %s7178_s25 = smov [#allocation3]  }
  0x15   :  { %s63_s24 = sshll.u32 %s7177_s23, 4  ;;  %s23_s26 = sshll.u32 %s7178_s25, 4  ;;  %s64_s24 = int_to_ptr.vmem [resolvable:$true] %s63_s24  ;;  %s24_s26 = int_to_ptr.vmem [resolvable:$true] %s23_s26 }
  0x16   :  { %s7056_s29 = scalar_lea.hbm %s8157_s5, 3072 }
  0x17   :  { %p7057_p8 = scmp.ne.s32.totalorder %s8157_s5, %s7056_s29  ;;  %p7060_p9 = scmp.lt.u32.totalorder %s7056_s29, %s8157_s5 }
  0x19   :  { %p7062_p10 = pnand %p7060_p9, %p7057_p8 }
  0x1b   :  { %7065 = shalt.err (!%p7062_p10)
}
  0x1c   :  { %s7066_s1 = scalar_lea.vmem %s64_s24, 3072  ;;  %p7071_p12 = scmp.lt.s32.totalorder %s64_s24, %s64_s24 }
  0x1d   :  { %p7067_p11 = scmp.ne.s32.totalorder %s64_s24, %s7066_s1  ;;  %p7072_p13 = scmp.lt.s32.totalorder %s7066_s1, %s7066_s1 }
  0x1f   :  { %p7073_p0 = por %p7072_p13, %p7071_p12 }
  0x21   :  { %p7074_p1 = pnand %p7073_p0, %p7067_p11 }
  0x23   :  { %7077 = shalt.err (!%p7074_p1)
}
  0x24   :  { %69 = dma.hbm_to_vmem [thread:$0]  %s8157_s5, 3072, %s64_s24, [#allocation10], %s7175_s19, %s7175_s19, %s7176_s20  }
  0x25   :  { %s7078_s17 = scalar_lea.hbm %s8152_s0, 1024 }
  0x26   :  { %p7079_p2 = scmp.ne.s32.totalorder %s8152_s0, %s7078_s17  ;;  %p7082_p3 = scmp.lt.u32.totalorder %s7078_s17, %s8152_s0 }
  0x28   :  { %p7084_p4 = pnand %p7082_p3, %p7079_p2 }
  0x2a   :  { %7087 = shalt.err (!%p7084_p4)
}
  0x2b   :  { %s7088_s25 = scalar_lea.vmem %s24_s26, 1024  ;;  %p7093_p6 = scmp.lt.s32.totalorder %s24_s26, %s24_s26 }
  0x2c   :  { %p7089_p5 = scmp.ne.s32.totalorder %s24_s26, %s7088_s25  ;;  %p7094_p7 = scmp.lt.s32.totalorder %s7088_s25, %s7088_s25 }
  0x2e   :  { %p7095_p8 = por %p7094_p7, %p7093_p6 }
  0x30   :  { %p7096_p9 = pnand %p7095_p8, %p7089_p5 }
  0x32   :  { %7099 = shalt.err (!%p7096_p9)
}
  0x33   :  { %s7179_s5 = smov 128   ;;  %s7180_s24 = smov 8  }
  0x34   :  { %29 = dma.hbm_to_vmem [thread:$0]  %s8152_s0, 1024, %s24_s26, [#allocation4], %s7179_s5, %s7179_s5, %s7180_s24  }
  0x35   :  { %s7181_s29 = smov [#allocation8]   ;;  %s7182_s11 = smov [#allocation11]  }
  0x36   :  { %s47_s30 = sshll.u32 %s7181_s29, 4  ;;  %s75_s12 = sshll.u32 %s7182_s11, 4  ;;  %s48_s30 = int_to_ptr.vmem [resolvable:$true] %s47_s30  ;;  %s76_s12 = int_to_ptr.vmem [resolvable:$true] %s75_s12 }
  0x37   :  { %s7100_s10 = scalar_lea.hbm %s8154_s2, 3072 }
  0x38   :  { %p7101_p10 = scmp.ne.s32.totalorder %s8154_s2, %s7100_s10  ;;  %p7104_p11 = scmp.lt.u32.totalorder %s7100_s10, %s8154_s2 }
  0x3a   :  { %p7106_p12 = pnand %p7104_p11, %p7101_p10 }
  0x3c   :  { %7109 = shalt.err (!%p7106_p12)
}
  0x3d   :  { %s7110_s0 = scalar_lea.vmem %s48_s30, 3072  ;;  %p7115_p0 = scmp.lt.s32.totalorder %s48_s30, %s48_s30 }
  0x3e   :  { %p7111_p13 = scmp.ne.s32.totalorder %s48_s30, %s7110_s0  ;;  %p7116_p1 = scmp.lt.s32.totalorder %s7110_s0, %s7110_s0 }
  0x40   :  { %p7117_p2 = por %p7116_p1, %p7115_p0 }
  0x42   :  { %p7118_p3 = pnand %p7117_p2, %p7111_p13 }
  0x44   :  { %7121 = shalt.err (!%p7118_p3)
}
  0x45   :  { %53 = dma.hbm_to_vmem [thread:$0]  %s8154_s2, 3072, %s48_s30, [#allocation7], %s7175_s19, %s7175_s19, %s7176_s20  }
  0x46   :  { %s7122_s23 = scalar_lea.hbm %s8158_s6, 3072 }
  0x47   :  { %p7123_p4 = scmp.ne.s32.totalorder %s8158_s6, %s7122_s23  ;;  %p7126_p5 = scmp.lt.u32.totalorder %s7122_s23, %s8158_s6 }
  0x49   :  { %p7128_p6 = pnand %p7126_p5, %p7123_p4 }
  0x4b   :  { %7131 = shalt.err (!%p7128_p6)
}
  0x4c   :  { %s7132_s11 = scalar_lea.vmem %s76_s12, 3072  ;;  %p7137_p8 = scmp.lt.s32.totalorder %s76_s12, %s76_s12 }
  0x4d   :  { %p7133_p7 = scmp.ne.s32.totalorder %s76_s12, %s7132_s11  ;;  %p7138_p9 = scmp.lt.s32.totalorder %s7132_s11, %s7132_s11 }
  0x4f   :  { %p7139_p10 = por %p7138_p9, %p7137_p8 }
  0x51   :  { %p7140_p11 = pnand %p7139_p10, %p7133_p7 }
  0x53   :  { %7143 = shalt.err (!%p7140_p11)
}
  0x54   :  { %81 = dma.hbm_to_vmem [thread:$0]  %s8158_s6, 3072, %s76_s12, [#allocation10], %s7175_s19, %s7175_s19, %s7176_s20  }
  0x55   :  { %7166 = dma.done.wait [#allocation4], 1024  }
  0x56   :  { %7167 = vsyncadd [#allocation4], 4294966272 }
  0x57   :  { %7168 = dma.done.wait [#allocation7], 6144  }
  0x58   :  { %7169 = vsyncadd [#allocation7], 4294961152 }
  0x59   :  { %7170 = dma.done.wait [#allocation10], 6144  }
  0x5a   :  { %7171 = vsyncadd [#allocation10], 4294961152  ;;  %v7183_v0 = vmov 0   ;;  %v6536_v1 = vld [vmem:[#allocation6 + $0x4] ss:$12 sps:$4 sm:$0xff]   ;;  %v103_v13 = vld [vmem:[#allocation3 + $0x8] sm:$0xff] }
  0x5b   :  { %323 = vmatprep.mubr.bf16.mxu0 %v7183_v0  ;;  %v6538_v2 = vld [vmem:[#allocation6] ss:$12 sps:$4 sm:$0xff]   ;;  %291 = vmatprep.subr.bf16.mxu0 %v6536_v1  ;;  %v6539_v3 = vld [vmem:[#allocation6 + $0x1c] ss:$12 sps:$4 sm:$0xff]   ;;  %v6541_v4 = vld [vmem:[#allocation6 + $0x18] ss:$12 sps:$4 sm:$0xff]  }
  0x5c   :  { %292 = vmatpush1.bf16.msra.mxu0 %v6538_v2  ;;  %v6542_v5 = vld [vmem:[#allocation6 + $0x34] ss:$12 sps:$4 sm:$0xff]   ;;  %v6544_v6 = vld [vmem:[#allocation6 + $0x30] ss:$12 sps:$4 sm:$0xff]   ;;  %v6545_v7 = vld [vmem:[#allocation6 + $0x4c] ss:$12 sps:$4 sm:$0xff]  }
  0x5d   :  { %293 = vmatprep.subr.bf16.mxu0 %v6539_v3  ;;  %v6556_v8 = vld [vmem:[#allocation6 + $0x8] ss:$12 sps:$4 sm:$0xff]   ;;  %v6548_v10 = vld [vmem:[#allocation6 + $0x64] ss:$12 sps:$4 sm:$0xff]   ;;  %v6560_v11 = vld [vmem:[#allocation6 + $0x20] ss:$12 sps:$4 sm:$0xff]  }
  0x5e   :  { %v6547_v9 = vld [vmem:[#allocation6 + $0x48] ss:$12 sps:$4 sm:$0xff]   ;;  %6155 = vmatprep.subr.bf16.mxu1 %v6556_v8  ;;  %v102_v12 = vld [vmem:[#allocation3] sm:$0xff]  ;;  %v6566_v18 = vld [vmem:[#allocation6 + $0x50] ss:$12 sps:$4 sm:$0xff]   ;;  %v7184_v42 = vmov 0.0  }
  0x5f   :  { %6156 = vmatpush3.bf16.msra.mxu1 %v6556_v8  ;;  %v6562_v14 = vld [vmem:[#allocation6 + $0x38] ss:$12 sps:$4 sm:$0xff]   ;;  %v6550_v15 = vld [vmem:[#allocation6 + $0x60] ss:$12 sps:$4 sm:$0xff]   ;;  %v110_v16 = vpack.c.bf16 %v103_v13, %v102_v12  ;;  %v6551_v17 = vld [vmem:[#allocation6 + $0x7c] ss:$12 sps:$4 sm:$0xff]  }
  0x60   :  { %294 = vmatpush1.bf16.msra.mxu0 %v6541_v4  ;;  %6157 = vmatprep.subr.bf16.mxu1 %v6560_v11  ;;  %v6553_v19 = vld [vmem:[#allocation6 + $0x78] ss:$12 sps:$4 sm:$0xff]   ;;  %v6554_v20 = vld [vmem:[#allocation6 + $0x94] ss:$12 sps:$4 sm:$0xff]   ;;  %v6557_v22 = vld [vmem:[#allocation6 + $0x90] ss:$12 sps:$4 sm:$0xff]  }
  0x61   :  { %295 = vmatprep.subr.bf16.mxu0 %v6542_v5  ;;  %6171 = vmatprep.mubr.bf16.mxu1 %v110_v16  ;;  %v6570_v21 = vld [vmem:[#allocation6 + $0x68] ss:$12 sps:$4 sm:$0xff]   ;;  %v6558_v23 = vld [vmem:[#allocation6 + $0xac] ss:$12 sps:$4 sm:$0xff]   ;;  %v7313_v26 = vld [vmem:[#allocation8 + $0x4] ss:$12 sps:$4 sm:$0xff]  }
  0x62   :  { %v6574_v24 = vld [vmem:[#allocation6 + $0x80] ss:$12 sps:$4 sm:$0xff]   ;;  %v6561_v25 = vld [vmem:[#allocation6 + $0xa8] ss:$12 sps:$4 sm:$0xff]   ;;  %v6578_v27 = vld [vmem:[#allocation6 + $0x98] ss:$12 sps:$4 sm:$0xff]  }
  0x63   :  { %6158 = vmatpush3.bf16.msra.mxu1 %v6560_v11  ;;  %v7315_v28 = vld [vmem:[#allocation8] ss:$12 sps:$4 sm:$0xff]   ;;  %v7318_v29 = vld [vmem:[#allocation8 + $0x1c] ss:$12 sps:$4 sm:$0xff]   ;;  %v7320_v30 = vld [vmem:[#allocation8 + $0x18] ss:$12 sps:$4 sm:$0xff]  }
  0x64   :  { %296 = vmatpush1.bf16.msra.mxu0 %v6544_v6  ;;  %6159 = vmatprep.subr.bf16.mxu1 %v6562_v14  ;;  %v6582_v31 = vld [vmem:[#allocation6 + $0xb0] ss:$12 sps:$4 sm:$0xff]   ;;  %v7325_v34 = vld [vmem:[#allocation8 + $0x34] ss:$12 sps:$4 sm:$0xff]   ;;  %v7329_v37 = vld [vmem:[#allocation8 + $0x4c] ss:$12 sps:$4 sm:$0xff]  }
  0x65   :  { %297 = vmatprep.subr.bf16.mxu0 %v6545_v7  ;;  %v104_v32 = vld [vmem:[#allocation3 + $0x10] sm:$0xff]  ;;  %v105_v33 = vld [vmem:[#allocation3 + $0x18] sm:$0xff]  ;;  %v106_v38 = vld [vmem:[#allocation3 + $0x20] sm:$0xff]  ;;  %vm7185_vm0 = vmmov 0   ;;  %v148_v7 = vlaneseq }
  0x66   :  { %v7327_v35 = vld [vmem:[#allocation8 + $0x30] ss:$12 sps:$4 sm:$0xff]   ;;  %v111_v36 = vpack.c.bf16 %v105_v33, %v104_v32  ;;  %v107_v39 = vld [vmem:[#allocation3 + $0x28] sm:$0xff]  ;;  %v6594_v50 = vld [vmem:[#allocation8 + $0x38] ss:$12 sps:$4 sm:$0xff]  }
  0x67   :  { %6160 = vmatpush3.bf16.msra.mxu1 %v6562_v14  ;;  %v6589_v40 = vld [vmem:[#allocation8 + $0x8] ss:$12 sps:$4 sm:$0xff]   ;;  %v7336_v43 = vld [vmem:[#allocation8 + $0x64] ss:$12 sps:$4 sm:$0xff]   ;;  %v112_v44 = vpack.c.bf16 %v107_v39, %v106_v38  ;;  %v6593_v45 = vld [vmem:[#allocation8 + $0x20] ss:$12 sps:$4 sm:$0xff]  }
  0x68   :  { %298 = vmatpush1.bf16.msra.mxu0 %v6547_v9  ;;  %6161 = vmatprep.subr.bf16.mxu1 %v6566_v18  ;;  %v7333_v41 = vld [vmem:[#allocation8 + $0x48] ss:$12 sps:$4 sm:$0xff]   ;;  %v6579_v46 = vld [vmem:[#allocation8 + $0x60] ss:$12 sps:$4 sm:$0xff]   ;;  %v109_v48 = vld [vmem:[#allocation3 + $0x38] sm:$0xff]  ;;  %v7394_v8 = vshrl.u32 %v148_v7, 7 }
  0x69   :  { %299 = vmatprep.subr.bf16.mxu0 %v6548_v10  ;;  %v108_v47 = vld [vmem:[#allocation3 + $0x30] sm:$0xff]  ;;  %v6585_v49 = vld [vmem:[#allocation8 + $0x7c] ss:$12 sps:$4 sm:$0xff]   ;;  %v6583_v51 = vld [vmem:[#allocation8 + $0x78] ss:$12 sps:$4 sm:$0xff]  }
  0x6a   :  { %v113_v52 = vpack.c.bf16 %v109_v48, %v108_v47  ;;  %v7344_v53 = vld [vmem:[#allocation8 + $0x94] ss:$12 sps:$4 sm:$0xff]   ;;  %v6595_v54 = vld [vmem:[#allocation8 + $0x50] ss:$12 sps:$4 sm:$0xff]   ;;  %v7352_v56 = vld [vmem:[#allocation8 + $0xac] ss:$12 sps:$4 sm:$0xff]  }
  0x6b   :  { %6162 = vmatpush3.bf16.msra.mxu1 %v6566_v18  ;;  %v7348_v55 = vld [vmem:[#allocation8 + $0x90] ss:$12 sps:$4 sm:$0xff]   ;;  %v6596_v57 = vld [vmem:[#allocation8 + $0x68] ss:$12 sps:$4 sm:$0xff]   ;;  %v6597_v59 = vld [vmem:[#allocation8 + $0x80] ss:$12 sps:$4 sm:$0xff]  }
  0x6c   :  { %300 = vmatpush1.bf16.msra.mxu0 %v6550_v15  ;;  %6163 = vmatprep.subr.bf16.mxu1 %v6570_v21  ;;  %v7356_v58 = vld [vmem:[#allocation8 + $0xa8] ss:$12 sps:$4 sm:$0xff]   ;;  %v6598_v60 = vld [vmem:[#allocation8 + $0x98] ss:$12 sps:$4 sm:$0xff]   ;;  %v6599_v61 = vld [vmem:[#allocation8 + $0xb0] ss:$12 sps:$4 sm:$0xff]  }
  0x6d   :  { %301 = vmatprep.subr.bf16.mxu0 %v6551_v17  ;;  %v6600_v62 = vld [vmem:[#allocation8 + $0x8] ss:$12 sps:$4 sm:$0xff]   ;;  %v6601_v63 = vld [vmem:[#allocation8 + $0x20] ss:$12 sps:$4 sm:$0xff]   ;;  %v6602_v1 = vld [vmem:[#allocation8 + $0x38] ss:$12 sps:$4 sm:$0xff]  }
  0x6e   :  { %v6603_v2 = vld [vmem:[#allocation8 + $0x50] ss:$12 sps:$4 sm:$0xff]   ;;  %v6604_v3 = vld [vmem:[#allocation8 + $0x68] ss:$12 sps:$4 sm:$0xff]   ;;  %v6605_v4 = vld [vmem:[#allocation8 + $0x80] ss:$12 sps:$4 sm:$0xff]  }
  0x6f   :  { %6164 = vmatpush3.bf16.msra.mxu1 %v6570_v21  ;;  %v6606_v5 = vld [vmem:[#allocation8 + $0x98] ss:$12 sps:$4 sm:$0xff]   ;;  %v6607_v6 = vld [vmem:[#allocation8 + $0xb0] ss:$12 sps:$4 sm:$0xff]   ;;  %v150_v9 = vsub.s32 0, %v7394_v8  ;;  %v154_v11 = vsub.s32 1, %v7394_v8 }
  0x70   :  { %302 = vmatpush1.bf16.msra.mxu0 %v6553_v19  ;;  %6165 = vmatprep.subr.bf16.mxu1 %v6574_v24  ;;  %v146_v10 = vld [vmem:[%s8155_s3] sm:$0x7]  ;;  %v158_v21 = vsub.s32 2, %v7394_v8 }
  0x71   :  { %303 = vmatprep.subr.bf16.mxu0 %v6554_v20  ;;  %v7403_v12 = vrot.slane %v146_v10, %v150_v9  ;;  %v7407_v13 = vrot.slane %v146_v10, %v154_v11 }
  0x73   :  { %6166 = vmatpush3.bf16.msra.mxu1 %v6574_v24 }
  0x74   :  { %304 = vmatpush1.bf16.msra.mxu0 %v6557_v22  ;;  %6167 = vmatprep.subr.bf16.mxu1 %v6578_v27 }
  0x75   :  { %305 = vmatprep.subr.bf16.mxu0 %v6558_v23 }
  0x77   :  { %6168 = vmatpush3.bf16.msra.mxu1 %v6578_v27 }
  0x78   :  { %306 = vmatpush1.bf16.msra.mxu0 %v6561_v25  ;;  %6169 = vmatprep.subr.bf16.mxu1 %v6582_v31  ;;  %v159_v25 = vrot.slane %v146_v10, %v158_v21 }
  0x79   :  { %715 = vmatprep.subr.bf16.mxu0 %v7313_v26 }
  0x7b   :  { %324 = vmatmul.mubr.bf16.vlgmr.msra.gmra.mrb[0].mxu0 %v110_v16  ;;  %6170 = vmatpush3.bf16.msra.mxu1 %v6582_v31 }
  0x7c   :  { %716 = vmatpush1.bf16.msra.mxu0 %v7315_v28  ;;  %333 = vmatprep.mubr.bf16.mxu0 %v7183_v0 }
  0x7d   :  { %717 = vmatprep.subr.bf16.mxu0 %v7318_v29  ;;  %6179 = vmatprep.subr.bf16.mxu1 %v7184_v42 }
  0x7e   :  { %6172 = vmatmul.mubr.bf16.vlgmr.msra.gmra.mrb[0].mxu1 %v111_v36 }
  0x7f   :  { %6180 = vmatpush3.bf16.msra.mxu1 %v6589_v40  ;;  %6175 = vmatprep.mubr.bf16.mxu1 %v112_v44 }
  0x80   :  { %718 = vmatpush1.bf16.msra.mxu0 %v7320_v30  ;;  %6181 = vmatprep.subr.bf16.mxu1 %v7184_v42 }
  0x81   :  { %719 = vmatprep.subr.bf16.mxu0 %v7325_v34 }
  0x83   :  { %334 = vmatmul.mubr.bf16.gmra.mrb[4].mxu0 %v111_v36  ;;  %6182 = vmatpush3.bf16.msra.mxu1 %v6593_v45 }
  0x84   :  { %720 = vmatpush1.bf16.msra.mxu0 %v7327_v35  ;;  %343 = vmatprep.mubr.bf16.mxu0 %v7183_v0 }
  0x85   :  { %721 = vmatprep.subr.bf16.mxu0 %v7329_v37  ;;  %6183 = vmatprep.subr.bf16.mxu1 %v7184_v42 }
  0x86   :  { %6176 = vmatmul.mubr.bf16.gmra.mrb[4].mxu1 %v113_v52 }
  0x87   :  { %6184 = vmatpush3.bf16.msra.mxu1 %v6594_v50  ;;  %6195 = vmatprep.mubr.msk.bf16.mxu1 %vm7185_vm0, %v7184_v42 }
  0x88   :  { %722 = vmatpush1.bf16.msra.mxu0 %v7333_v41  ;;  %6185 = vmatprep.subr.bf16.mxu1 %v7184_v42 }
  0x89   :  { %723 = vmatprep.subr.bf16.mxu0 %v7336_v43 }
  0x8b   :  { %344 = vmatmul.mubr.bf16.gmra.mrb[8].mxu0 %v112_v44  ;;  %6186 = vmatpush3.bf16.msra.mxu1 %v6595_v54 }
  0x8c   :  { %724 = vmatpush1.bf16.msra.mxu0 %v6579_v46  ;;  %353 = vmatprep.mubr.bf16.mxu0 %v7183_v0 }
  0x8d   :  { %725 = vmatprep.subr.bf16.mxu0 %v6585_v49  ;;  %6187 = vmatprep.subr.bf16.mxu1 %v7184_v42 }
  0x8f   :  { %6188 = vmatpush3.bf16.msra.mxu1 %v6596_v57 }
  0x90   :  { %726 = vmatpush1.bf16.msra.mxu0 %v6583_v51  ;;  %6189 = vmatprep.subr.bf16.mxu1 %v7184_v42 }
  0x91   :  { %727 = vmatprep.subr.bf16.mxu0 %v7344_v53 }
  0x93   :  { %354 = vmatmul.mubr.bf16.gmra.mrb[12].mxu0 %v113_v52  ;;  %6190 = vmatpush3.bf16.msra.mxu1 %v6597_v59 }
  0x94   :  { %728 = vmatpush1.bf16.msra.mxu0 %v7348_v55  ;;  %747 = vmatprep.mubr.bf16.mxu0 %v7183_v0 }
  0x95   :  { %729 = vmatprep.subr.bf16.mxu0 %v7352_v56  ;;  %6191 = vmatprep.subr.bf16.mxu1 %v7184_v42 }
  0x97   :  { %6192 = vmatpush3.bf16.msra.mxu1 %v6598_v60 }
  0x98   :  { %730 = vmatpush1.bf16.msra.mxu0 %v7356_v58  ;;  %6193 = vmatprep.subr.bf16.mxu1 %v7184_v42 }
  0x99   :  { %992 = vmatprep.subr.bf16.mxu0 %v7313_v26 }
  0x9b   :  { %748 = vmatmul.mubr.bf16.vlgmr.msra.gmra.mrb[16].mxu0 %v7183_v0  ;;  %6194 = vmatpush3.bf16.msra.mxu1 %v6599_v61 }
  0x9c   :  { %993 = vmatpush1.bf16.msra.mxu0 %v7315_v28  ;;  %1024 = vmatprep.mubr.bf16.mxu0 %v7183_v0 }
  0x9d   :  { %994 = vmatprep.subr.bf16.mxu0 %v7318_v29  ;;  %6199 = vmatprep.subr.bf16.mxu1 %v7184_v42 }
  0x9e   :  { %6196 = vmatmul.mubr.bf16.vlgmr.msra.gmra.mrb[8].mxu1 %v7183_v0 }
  0x9f   :  { %6215 = vmatprep.mubr.msk.bf16.mxu1 %vm7185_vm0, %v7184_v42  ;;  %6200 = vmatpush3.bf16.msra.mxu1 %v6600_v62 }
  0xa0   :  { %995 = vmatpush1.bf16.msra.mxu0 %v7320_v30  ;;  %6201 = vmatprep.subr.bf16.mxu1 %v7184_v42 }
  0xa1   :  { %996 = vmatprep.subr.bf16.mxu0 %v7325_v34 }
  0xa3   :  { %6202 = vmatpush3.bf16.msra.mxu1 %v6601_v63 }
  0xa4   :  { %997 = vmatpush1.bf16.msra.mxu0 %v7327_v35  ;;  %6203 = vmatprep.subr.bf16.mxu1 %v7184_v42 }
  0xa5   :  { %998 = vmatprep.subr.bf16.mxu0 %v7329_v37 }
  0xa7   :  { %6204 = vmatpush3.bf16.msra.mxu1 %v6602_v1 }
  0xa8   :  { %999 = vmatpush1.bf16.msra.mxu0 %v7333_v41  ;;  %6205 = vmatprep.subr.bf16.mxu1 %v7184_v42 }
  0xa9   :  { %1000 = vmatprep.subr.bf16.mxu0 %v7336_v43 }
  0xab   :  { %6206 = vmatpush3.bf16.msra.mxu1 %v6603_v2 }
  0xac   :  { %1001 = vmatpush1.bf16.msra.mxu0 %v6579_v46  ;;  %6207 = vmatprep.subr.bf16.mxu1 %v7184_v42 }
  0xad   :  { %1002 = vmatprep.subr.bf16.mxu0 %v6585_v49 }
  0xaf   :  { %6208 = vmatpush3.bf16.msra.mxu1 %v6604_v3 }
  0xb0   :  { %1003 = vmatpush1.bf16.msra.mxu0 %v6583_v51  ;;  %6209 = vmatprep.subr.bf16.mxu1 %v7184_v42 }
  0xb1   :  { %1004 = vmatprep.subr.bf16.mxu0 %v7344_v53 }
  0xb3   :  { %6210 = vmatpush3.bf16.msra.mxu1 %v6605_v4 }
  0xb4   :  { %1005 = vmatpush1.bf16.msra.mxu0 %v7348_v55  ;;  %6211 = vmatprep.subr.bf16.mxu1 %v7184_v42 }
  0xb5   :  { %1006 = vmatprep.subr.bf16.mxu0 %v7352_v56 }
  0xb7   :  { %6212 = vmatpush3.bf16.msra.mxu1 %v6606_v5 }
  0xb8   :  { %1007 = vmatpush1.bf16.msra.mxu0 %v7356_v58  ;;  %6213 = vmatprep.subr.bf16.mxu1 %v7184_v42 }
  0xb9   :  { %1264 = vmatprep.subr.bf16.mxu0 %v7313_v26 }
  0xbb   :  { %6214 = vmatpush3.bf16.msra.mxu1 %v6607_v6 }
  0xbc   :  { %6219 = vmatprep.subr.bf16.mxu1 %v7184_v42 }
 0x14e   :  { %v325_v14 = vpop.f32.mrb[0].mxu0 }
 0x14f   :  { %v326_v15 = vadd.f32 %v325_v14, %v7403_v12  ;;  %v327_v16 = vpop.f32.mrb[1].mxu0 }
 0x150   :  { %v328_v17 = vadd.f32 %v327_v16, %v7407_v13  ;;  %v329_v18 = vpop.f32.mrb[2].mxu0 }
 0x151   :  { %v330_v19 = vadd.f32 %v329_v18, %v7403_v12  ;;  %v331_v20 = vpop.f32.mrb[3].mxu0  ;;  %v6173_v31 = vpop.f32.mrb[0].mxu1 }
 0x152   :  { %v7413_v22 = vpack.c.bf16 %v328_v17, %v326_v15  ;;  %v332_v23 = vadd.f32 %v331_v20, %v7407_v13  ;;  %v407_v34 = vadd.f32 %v6173_v31, %v159_v25  ;;  %v398_v35 = vpop.f32.mrb[1].mxu1 }
 0x153   :  { %v399_v38 = vadd.f32 %v398_v35, %v159_v25  ;;  %v6174_v39 = vpop.f32.mrb[2].mxu1 }
 0x154   :  { %v7416_v24 = vpack.c.bf16 %v332_v23, %v330_v19  ;;  %v5960_v40 = vpack.c.bf16 %v407_v34, %v407_v34  ;;  %v410_v41 = vadd.f32 %v6174_v39, %v159_v25  ;;  %v401_v43 = vpop.f32.mrb[3].mxu1 }
 0x155   :  { %v5956_v45 = vpack.c.bf16 %v399_v38, %v399_v38  ;;  %v402_v46 = vadd.f32 %v401_v43, %v159_v25 }
 0x156   :  { %v335_v26 = vpop.f32.mrb[4].mxu0  ;;  %538 = vst [vmem:[#allocation2 + $0x20] sm:$0xf] %v5960_v40  ;;  %v5962_v47 = vpack.c.bf16 %v410_v41, %v410_v41 }
 0x157   :  { %v336_v27 = vadd.f32 %v335_v26, %v7403_v12  ;;  %v337_v28 = vpop.f32.mrb[5].mxu0  ;;  %534 = vst [vmem:[#allocation2 + $0x8] sm:$0xf] %v5956_v45  ;;  %v5958_v49 = vpack.c.bf16 %v402_v46, %v402_v46 }
 0x158   :  { %v338_v29 = vadd.f32 %v337_v28, %v7407_v13  ;;  %v339_v30 = vpop.f32.mrb[6].mxu0  ;;  %540 = vst [vmem:[#allocation2 + $0x2c] sm:$0xf] %v5962_v47 }
 0x159   :  { %v340_v32 = vadd.f32 %v339_v30, %v7403_v12  ;;  %v341_v33 = vpop.f32.mrb[7].mxu0  ;;  %536 = vst [vmem:[#allocation2 + $0x14] sm:$0xf] %v5958_v49  ;;  %v6177_v57 = vpop.f32.mrb[4].mxu1  ;;  %v552_v30 = vunpack.c.l.bf16 %v7413_v22 }
 0x15a   :  { %v7423_v36 = vpack.c.bf16 %v338_v29, %v336_v27  ;;  %v342_v37 = vadd.f32 %v341_v33, %v7407_v13  ;;  %v423_v61 = vadd.f32 %v6177_v57, %v159_v25  ;;  %v414_v62 = vpop.f32.mrb[5].mxu1 }
 0x15b   :  { %v415_v2 = vadd.f32 %v414_v62, %v159_v25  ;;  %v6178_v3 = vpop.f32.mrb[6].mxu1 }
 0x15c   :  { %v7426_v44 = vpack.c.bf16 %v342_v37, %v340_v32  ;;  %v5968_v4 = vpack.c.bf16 %v423_v61, %v423_v61  ;;  %v426_v5 = vadd.f32 %v6178_v3, %v159_v25  ;;  %v417_v6 = vpop.f32.mrb[7].mxu1  ;;  %v553_v32 = vunpack.c.h.bf16 %v7413_v22  ;;  %v7441_v22 = vld [vmem:[%s8156_s4] ss:$0 sm:$0xff] }
 0x15d   :  { %v5964_v10 = vpack.c.bf16 %v415_v2, %v415_v2  ;;  %v418_v14 = vadd.f32 %v417_v6, %v159_v25  ;;  %v7452_v3 = vld [vmem:[#allocation8] ss:$12 sps:$4 sm:$0xff]  }
 0x15e   :  { %v345_v48 = vpop.f32.mrb[8].mxu0  ;;  %546 = vst [vmem:[#allocation2 + $0x50] sm:$0xf] %v5968_v4  ;;  %v5970_v15 = vpack.c.bf16 %v426_v5, %v426_v5  ;;  %v7456_v4 = vld [vmem:[#allocation8 + $0x1c] ss:$12 sps:$4 sm:$0xff]  }
 0x15f   :  { %v346_v50 = vadd.f32 %v345_v48, %v7403_v12  ;;  %v347_v51 = vpop.f32.mrb[9].mxu0  ;;  %542 = vst [vmem:[#allocation2 + $0x38] sm:$0xf] %v5964_v10  ;;  %v5966_v17 = vpack.c.bf16 %v418_v14, %v418_v14  ;;  %v7461_v5 = vld [vmem:[#allocation8 + $0x18] ss:$12 sps:$4 sm:$0xff]  }
 0x160   :  { %v348_v52 = vadd.f32 %v347_v51, %v7407_v13  ;;  %v349_v54 = vpop.f32.mrb[10].mxu0  ;;  %548 = vst [vmem:[#allocation2 + $0x5c] sm:$0xf] %v5970_v15  ;;  %v7464_v6 = vld [vmem:[#allocation8 + $0x34] ss:$12 sps:$4 sm:$0xff]  }
 0x161   :  { %v350_v59 = vadd.f32 %v349_v54, %v7403_v12  ;;  %v351_v60 = vpop.f32.mrb[11].mxu0  ;;  %544 = vst [vmem:[#allocation2 + $0x44] sm:$0xf] %v5966_v17  ;;  %v7470_v10 = vld [vmem:[#allocation8 + $0x4c] ss:$12 sps:$4 sm:$0xff]  }
 0x162   :  { %v5963_v63 = vpack.c.bf16 %v348_v52, %v346_v50  ;;  %v352_v1 = vadd.f32 %v351_v60, %v7407_v13  ;;  %v7444_v50 = vld [vmem:[#allocation2 + $0x8] ss:$12 sps:$4 sm:$0xff]   ;;  %v7476_v15 = vld [vmem:[#allocation8 + $0x64] ss:$12 sps:$4 sm:$0xff]  }
 0x163   :  { %v554_v52 = vunpack.c.l.bf16 %v7444_v50  ;;  %v7473_v14 = vld [vmem:[#allocation8 + $0x48] ss:$12 sps:$4 sm:$0xff]  }
 0x164   :  { %541 = vst [vmem:[#allocation2 + $0x30] sm:$0xff] %v5963_v63  ;;  %v5965_v7 = vpack.c.bf16 %v352_v1, %v350_v59  ;;  %v7482_v17 = vld [vmem:[#allocation8 + $0x7c] ss:$12 sps:$4 sm:$0xff]  }
 0x166   :  { %543 = vst [vmem:[#allocation2 + $0x3c] sm:$0xff] %v5965_v7  ;;  %v355_v16 = vpop.f32.mrb[12].mxu0  ;;  %v7467_v7 = vld [vmem:[#allocation8 + $0x30] ss:$12 sps:$4 sm:$0xff]  }
 0x167   :  { %v356_v18 = vadd.f32 %v355_v16, %v7403_v12  ;;  %v357_v19 = vpop.f32.mrb[13].mxu0  ;;  %v7479_v16 = vld [vmem:[#allocation8 + $0x60] ss:$12 sps:$4 sm:$0xff]  }
 0x168   :  { %v358_v20 = vadd.f32 %v357_v19, %v7407_v13  ;;  %v359_v23 = vpop.f32.mrb[14].mxu0  ;;  %v7027_v19 = vld [vmem:[#allocation8 + $0x4] ss:$12 sps:$4 sm:$0xff]  }
 0x169   :  { %v360_v26 = vadd.f32 %v359_v23, %v7403_v12  ;;  %v361_v27 = vpop.f32.mrb[15].mxu0  ;;  %v6609_v23 = vld [vmem:[#allocation8 + $0x20] ss:$12 sps:$4 sm:$0xff]  }
 0x16a   :  { %v5967_v28 = vpack.c.bf16 %v358_v20, %v356_v18  ;;  %v362_v25 = vadd.f32 %v361_v27, %v7407_v13  ;;  %v7485_v18 = vld [vmem:[#allocation8 + $0x78] ss:$12 sps:$4 sm:$0xff]   ;;  %v6608_v20 = vld [vmem:[#allocation8 + $0x8] ss:$12 sps:$4 sm:$0xff]   ;;  %v6615_v27 = vld [vmem:[#allocation8 + $0xb0] ss:$12 sps:$4 sm:$0xff]  }
 0x16c   :  { %545 = vst [vmem:[#allocation2 + $0x48] sm:$0xff] %v5967_v28  ;;  %v5969_v29 = vpack.c.bf16 %v362_v25, %v360_v26  ;;  %v6610_v26 = vld [vmem:[#allocation8 + $0x38] ss:$12 sps:$4 sm:$0xff]   ;;  %v828_v28 = vunpack.c.l.bf16 %v7416_v24 }
 0x16e   :  { %547 = vst [vmem:[#allocation2 + $0x54] sm:$0xff] %v5969_v29  ;;  %v749_v31 = vpop.f32.mrb[16].mxu0 }
 0x16f   :  { %v796_v33 = vadd.f32 %v749_v31, %v552_v30  ;;  %v751_v34 = vpop.f32.mrb[17].mxu0  ;;  %v829_v30 = vunpack.c.h.bf16 %v7416_v24 }
 0x170   :  { %v803_v35 = vadd.f32 %v751_v34, %v553_v32  ;;  %v753_v37 = vpop.f32.mrb[18].mxu0 }
 0x171   :  { %v5521_v38 = vmul.f32 -1.442695, %v796_v33  ;;  %v754_v39 = vpop.f32.mrb[19].mxu0  ;;  %v790_v40 = vpop.f32.mrb[8].mxu1 }
 0x172   :  { %v5522_v12 = vmul.f32 -1.442695, %v803_v35  ;;  %v6197_v41 = vpop.f32.mrb[9].mxu1  ;;  %v816_v49 = vadd.f32 %v7441_v22, %v790_v40 }
 0x173   :  { %6824 = vpow2.f32 %v5521_v38  ;;  %v793_v13 = vpop.f32.mrb[10].mxu1 }
 0x174   :  { %6826 = vpow2.f32 %v5522_v12  ;;  %v6198_v43 = vpop.f32.mrb[11].mxu1 }
 0x17d   :  { %v6825_v45 = vpop.eup %6824 }
 0x17e   :  { %v800_v46 = vadd.f32 1.0, %v6825_v45  ;;  %v6827_v47 = vpop.eup %6826 }
 0x17f   :  { %v807_v48 = vadd.f32 1.0, %v6827_v47  ;;  %v830_v47 = vunpack.c.h.bf16 %v7444_v50  ;;  %v7028_v50 = vld [vmem:[#allocation8 + $0x94] ss:$12 sps:$4 sm:$0xff]  }
 0x180   :  { %6828 = vrcp.f32 %v800_v46 }
 0x181   :  { %6830 = vrcp.f32 %v807_v48 }
 0x18a   :  { %v6829_v51 = vpop.eup %6828 }
 0x18b   :  { %v817_v54 = vmul.f32 %v6829_v51, %v816_v49  ;;  %v6831_v59 = vpop.eup %6830 }
 0x18c   :  { %v820_v60 = vsub.f32 1.0, %v6831_v59  ;;  %v822_v63 = vmul.f32 0.0, %v6831_v59 }
 0x18d   :  { %v818_v57 = vadd.f32 %v817_v54, %v554_v52 }
 0x18f   :  { %6832 = vtanh.f32 %v818_v57 }
 0x199   :  { %v6833_v61 = vpop.eup %6832 }
 0x19a   :  { %v821_v62 = vmul.f32 %v6833_v61, %v820_v60 }
 0x19c   :  { %v7447_v1 = vadd.f32 %v822_v63, %v821_v62  ;;  %v7029_v62 = vld [vmem:[#allocation8 + $0x90] ss:$12 sps:$4 sm:$0xff]   ;;  %v7030_v63 = vld [vmem:[#allocation8 + $0xac] ss:$12 sps:$4 sm:$0xff]  }
 0x19e   :  { %824 = vst [vmem:[#allocation12] sm:$0xff] %v7447_v1  ;;  %v831_v2 = vpack.c.bf16 %v7447_v1, %v7447_v1 }
 0x1a0   :  { %1025 = vmatmul.mubr.bf16.vlgmr.msra.gmra.mrb[20].mxu0 %v831_v2  ;;  %6216 = vmatmul.mubr.bf16.vlgmr.msra.gmra.mrb[12].mxu1 %v831_v2  ;;  %v6616_v2 = vld [vmem:[#allocation8 + $0x8] ss:$12 sps:$4 sm:$0xff]  }
 0x1a1   :  { %1265 = vmatpush1.bf16.msra.mxu0 %v7452_v3  ;;  %1296 = vmatprep.mubr.bf16.mxu0 %v7183_v0 }
 0x1a2   :  { %1266 = vmatprep.subr.bf16.mxu0 %v7456_v4  ;;  %6235 = vmatprep.mubr.msk.bf16.mxu1 %vm7185_vm0, %v7184_v42 }
 0x1a3   :  { %6220 = vmatpush3.bf16.msra.mxu1 %v6608_v20 }
 0x1a4   :  { %6221 = vmatprep.subr.bf16.mxu1 %v7184_v42 }
 0x1a5   :  { %1267 = vmatpush1.bf16.msra.mxu0 %v7461_v5 }
 0x1a6   :  { %1268 = vmatprep.subr.bf16.mxu0 %v7464_v6 }
 0x1a7   :  { %6222 = vmatpush3.bf16.msra.mxu1 %v6609_v23 }
 0x1a8   :  { %6223 = vmatprep.subr.bf16.mxu1 %v7184_v42 }
 0x1a9   :  { %1269 = vmatpush1.bf16.msra.mxu0 %v7467_v7 }
 0x1aa   :  { %1270 = vmatprep.subr.bf16.mxu0 %v7470_v10 }
 0x1ab   :  { %6224 = vmatpush3.bf16.msra.mxu1 %v6610_v26 }
 0x1ac   :  { %6225 = vmatprep.subr.bf16.mxu1 %v7184_v42 }
 0x1ad   :  { %1271 = vmatpush1.bf16.msra.mxu0 %v7473_v14 }
 0x1ae   :  { %1272 = vmatprep.subr.bf16.mxu0 %v7476_v15 }
 0x1b1   :  { %1273 = vmatpush1.bf16.msra.mxu0 %v7479_v16 }
 0x1b2   :  { %1274 = vmatprep.subr.bf16.mxu0 %v7482_v17 }
 0x1b5   :  { %1275 = vmatpush1.bf16.msra.mxu0 %v7485_v18 }
 0x1b6   :  { %1276 = vmatprep.subr.bf16.mxu0 %v7344_v53  ;;  %v6611_v53 = vld [vmem:[#allocation8 + $0x50] ss:$12 sps:$4 sm:$0xff]  }
 0x1b7   :  { %6226 = vmatpush3.bf16.msra.mxu1 %v6611_v53 }
 0x1b8   :  { %6227 = vmatprep.subr.bf16.mxu1 %v7184_v42 }
 0x1b9   :  { %1277 = vmatpush1.bf16.msra.mxu0 %v7348_v55  ;;  %v6612_v55 = vld [vmem:[#allocation8 + $0x68] ss:$12 sps:$4 sm:$0xff]  }
 0x1ba   :  { %1278 = vmatprep.subr.bf16.mxu0 %v7352_v56  ;;  %v6613_v56 = vld [vmem:[#allocation8 + $0x80] ss:$12 sps:$4 sm:$0xff]  }
 0x1bb   :  { %6228 = vmatpush3.bf16.msra.mxu1 %v6612_v55 }
 0x1bc   :  { %6229 = vmatprep.subr.bf16.mxu1 %v7184_v42 }
 0x1bd   :  { %1279 = vmatpush1.bf16.msra.mxu0 %v7356_v58  ;;  %v6614_v58 = vld [vmem:[#allocation8 + $0x98] ss:$12 sps:$4 sm:$0xff]  }
 0x1be   :  { %1536 = vmatprep.subr.bf16.mxu0 %v7027_v19 }
 0x1bf   :  { %6230 = vmatpush3.bf16.msra.mxu1 %v6613_v56 }
 0x1c0   :  { %6231 = vmatprep.subr.bf16.mxu1 %v7184_v42 }
 0x1c3   :  { %6232 = vmatpush3.bf16.msra.mxu1 %v6614_v58 }
 0x1c4   :  { %6233 = vmatprep.subr.bf16.mxu1 %v7184_v42 }
 0x1c7   :  { %6234 = vmatpush3.bf16.msra.mxu1 %v6615_v27 }
 0x1c8   :  { %6239 = vmatprep.subr.bf16.mxu1 %v7184_v42 }
 0x273   :  { %v1026_v25 = vpop.f32.mrb[20].mxu0  ;;  %v1067_v29 = vpop.f32.mrb[12].mxu1 }
 0x274   :  { %v1073_v31 = vadd.f32 %v1026_v25, %v828_v28  ;;  %v1028_v32 = vpop.f32.mrb[21].mxu0  ;;  %v6217_v33 = vpop.f32.mrb[13].mxu1  ;;  %v1087_v46 = vadd.f32 %v7441_v22, %v1067_v29 }
 0x275   :  { %v1080_v34 = vadd.f32 %v1028_v32, %v829_v30  ;;  %v1030_v35 = vpop.f32.mrb[22].mxu0  ;;  %v1070_v37 = vpop.f32.mrb[14].mxu1  ;;  %v7534_v32 = vld [vmem:[#allocation2 + $0x20] ss:$12 sps:$4 sm:$0xff]  }
 0x276   :  { %v5548_v38 = vmul.f32 -1.442695, %v1073_v31  ;;  %v1031_v39 = vpop.f32.mrb[23].mxu0  ;;  %v6218_v12 = vpop.f32.mrb[15].mxu1 }
 0x277   :  { %v5549_v40 = vmul.f32 -1.442695, %v1080_v34  ;;  %v1102_v34 = vunpack.c.l.bf16 %v7534_v32 }
 0x278   :  { %6834 = vpow2.f32 %v5548_v38 }
 0x279   :  { %6836 = vpow2.f32 %v5549_v40 }
 0x282   :  { %v6835_v41 = vpop.eup %6834 }
 0x283   :  { %v1077_v13 = vadd.f32 1.0, %v6835_v41  ;;  %v6837_v43 = vpop.eup %6836 }
 0x284   :  { %v1084_v45 = vadd.f32 1.0, %v6837_v43 }
 0x285   :  { %6838 = vrcp.f32 %v1077_v13 }
 0x286   :  { %6840 = vrcp.f32 %v1084_v45  ;;  %v7547_v45 = vld [vmem:[#allocation8 + $0x4] ss:$12 sps:$4 sm:$0xff]  }
 0x28f   :  { %v6839_v24 = vpop.eup %6838 }
 0x290   :  { %v1088_v48 = vmul.f32 %v6839_v24, %v1087_v46  ;;  %v6841_v51 = vpop.eup %6840  ;;  %v7549_v46 = vld [vmem:[#allocation8] ss:$12 sps:$4 sm:$0xff]   ;;  %v6627_v24 = vld [vmem:[#allocation8 + $0x8] ss:$12 sps:$4 sm:$0xff]  }
 0x291   :  { %v1091_v52 = vsub.f32 1.0, %v6841_v51  ;;  %v1093_v59 = vmul.f32 %v6841_v51, %v7447_v1  ;;  %v7031_v1 = vld [vmem:[#allocation8 + $0xa8] ss:$12 sps:$4 sm:$0xff]  }
 0x292   :  { %v1089_v49 = vadd.f32 %v1088_v48, %v830_v47  ;;  %v7553_v47 = vld [vmem:[#allocation8 + $0x1c] ss:$12 sps:$4 sm:$0xff]   ;;  %v7556_v48 = vld [vmem:[#allocation8 + $0x18] ss:$12 sps:$4 sm:$0xff]   ;;  %v7560_v51 = vld [vmem:[#allocation8 + $0x34] ss:$12 sps:$4 sm:$0xff]  }
 0x294   :  { %6842 = vtanh.f32 %v1089_v49  ;;  %v6631_v49 = vld [vmem:[#allocation8 + $0x20] ss:$12 sps:$4 sm:$0xff]  }
 0x29e   :  { %v6843_v54 = vpop.eup %6842 }
 0x29f   :  { %v1092_v57 = vmul.f32 %v6843_v54, %v1091_v52  ;;  %v7563_v52 = vld [vmem:[#allocation8 + $0x30] ss:$12 sps:$4 sm:$0xff]   ;;  %v6635_v54 = vld [vmem:[#allocation8 + $0x38] ss:$12 sps:$4 sm:$0xff]  }
 0x2a1   :  { %v7505_v60 = vadd.f32 %v1093_v59, %v1092_v57  ;;  %v7567_v57 = vld [vmem:[#allocation8 + $0x4c] ss:$12 sps:$4 sm:$0xff]   ;;  %v7570_v59 = vld [vmem:[#allocation8 + $0x48] ss:$12 sps:$4 sm:$0xff]  }
 0x2a3   :  { %1096 = vst [vmem:[#allocation12 + $0x8] sm:$0xff] %v7505_v60  ;;  %v1103_v61 = vpack.c.bf16 %v7505_v60, %v7505_v60 }
 0x2a5   :  { %1297 = vmatmul.mubr.bf16.vlgmr.msra.gmra.mrb[24].mxu0 %v1103_v61  ;;  %6236 = vmatmul.mubr.bf16.vlgmr.msra.gmra.mrb[16].mxu1 %v1103_v61  ;;  %v7574_v61 = vld [vmem:[#allocation8 + $0x60] ss:$12 sps:$4 sm:$0xff]  }
 0x2a6   :  { %1537 = vmatpush1.bf16.msra.mxu0 %v7452_v3  ;;  %1568 = vmatprep.mubr.bf16.mxu0 %v7183_v0  ;;  %v6617_v3 = vld [vmem:[#allocation8 + $0x20] ss:$12 sps:$4 sm:$0xff]  }
 0x2a7   :  { %1538 = vmatprep.subr.bf16.mxu0 %v7456_v4  ;;  %6255 = vmatprep.mubr.msk.bf16.mxu1 %vm7185_vm0, %v7184_v42  ;;  %v6618_v4 = vld [vmem:[#allocation8 + $0x38] ss:$12 sps:$4 sm:$0xff]  }
 0x2a8   :  { %6240 = vmatpush3.bf16.msra.mxu1 %v6616_v2  ;;  %v6647_v2 = vld [vmem:[#allocation8 + $0x80] ss:$12 sps:$4 sm:$0xff]  }
 0x2a9   :  { %6241 = vmatprep.subr.bf16.mxu1 %v7184_v42 }
 0x2aa   :  { %1539 = vmatpush1.bf16.msra.mxu0 %v7461_v5  ;;  %v6619_v5 = vld [vmem:[#allocation8 + $0x50] ss:$12 sps:$4 sm:$0xff]  }
 0x2ab   :  { %1540 = vmatprep.subr.bf16.mxu0 %v7464_v6  ;;  %v6620_v6 = vld [vmem:[#allocation8 + $0x68] ss:$12 sps:$4 sm:$0xff]  }
 0x2ac   :  { %6242 = vmatpush3.bf16.msra.mxu1 %v6617_v3  ;;  %v7587_v3 = vld [vmem:[#allocation8 + $0x94] ss:$12 sps:$4 sm:$0xff]  }
 0x2ad   :  { %6243 = vmatprep.subr.bf16.mxu1 %v7184_v42 }
 0x2ae   :  { %1541 = vmatpush1.bf16.msra.mxu0 %v7467_v7  ;;  %v6621_v7 = vld [vmem:[#allocation8 + $0x80] ss:$12 sps:$4 sm:$0xff]  }
 0x2af   :  { %1542 = vmatprep.subr.bf16.mxu0 %v7470_v10  ;;  %v6622_v10 = vld [vmem:[#allocation8 + $0x98] ss:$12 sps:$4 sm:$0xff]  }
 0x2b0   :  { %6244 = vmatpush3.bf16.msra.mxu1 %v6618_v4  ;;  %v7590_v4 = vld [vmem:[#allocation8 + $0x90] ss:$12 sps:$4 sm:$0xff]  }
 0x2b1   :  { %6245 = vmatprep.subr.bf16.mxu1 %v7184_v42 }
 0x2b2   :  { %1543 = vmatpush1.bf16.msra.mxu0 %v7473_v14  ;;  %v6623_v14 = vld [vmem:[#allocation8 + $0xb0] ss:$12 sps:$4 sm:$0xff]  }
 0x2b3   :  { %1544 = vmatprep.subr.bf16.mxu0 %v7476_v15  ;;  %v1100_v15 = vunpack.c.l.bf16 %v7423_v36 }
 0x2b4   :  { %6246 = vmatpush3.bf16.msra.mxu1 %v6619_v5  ;;  %v6651_v5 = vld [vmem:[#allocation8 + $0x98] ss:$12 sps:$4 sm:$0xff]  }
 0x2b5   :  { %6247 = vmatprep.subr.bf16.mxu1 %v7184_v42 }
 0x2b6   :  { %1545 = vmatpush1.bf16.msra.mxu0 %v7479_v16 }
 0x2b7   :  { %1546 = vmatprep.subr.bf16.mxu0 %v7482_v17 }
 0x2b8   :  { %6248 = vmatpush3.bf16.msra.mxu1 %v6620_v6  ;;  %v7594_v6 = vld [vmem:[#allocation8 + $0xac] ss:$12 sps:$4 sm:$0xff]  }
 0x2b9   :  { %6249 = vmatprep.subr.bf16.mxu1 %v7184_v42 }
 0x2ba   :  { %1547 = vmatpush1.bf16.msra.mxu0 %v7485_v18  ;;  %v1101_v18 = vunpack.c.h.bf16 %v7423_v36 }
 0x2bb   :  { %1548 = vmatprep.subr.bf16.mxu0 %v7028_v50  ;;  %v7576_v50 = vld [vmem:[#allocation8 + $0x64] ss:$12 sps:$4 sm:$0xff]  }
 0x2bc   :  { %6250 = vmatpush3.bf16.msra.mxu1 %v6621_v7  ;;  %v7597_v7 = vld [vmem:[#allocation8 + $0xa8] ss:$12 sps:$4 sm:$0xff]  }
 0x2bd   :  { %6251 = vmatprep.subr.bf16.mxu1 %v7184_v42 }
 0x2be   :  { %1549 = vmatpush1.bf16.msra.mxu0 %v7029_v62  ;;  %v6643_v62 = vld [vmem:[#allocation8 + $0x68] ss:$12 sps:$4 sm:$0xff]  }
 0x2bf   :  { %1550 = vmatprep.subr.bf16.mxu0 %v7030_v63  ;;  %v7579_v63 = vld [vmem:[#allocation8 + $0x7c] ss:$12 sps:$4 sm:$0xff]  }
 0x2c0   :  { %6252 = vmatpush3.bf16.msra.mxu1 %v6622_v10  ;;  %v6655_v10 = vld [vmem:[#allocation8 + $0xb0] ss:$12 sps:$4 sm:$0xff]  }
 0x2c1   :  { %6253 = vmatprep.subr.bf16.mxu1 %v7184_v42 }
 0x2c2   :  { %1551 = vmatpush1.bf16.msra.mxu0 %v7031_v1  ;;  %v7583_v1 = vld [vmem:[#allocation8 + $0x78] ss:$12 sps:$4 sm:$0xff]  }
 0x2c3   :  { %1808 = vmatprep.subr.bf16.mxu0 %v7547_v45 }
 0x2c4   :  { %6254 = vmatpush3.bf16.msra.mxu1 %v6623_v14  ;;  %v1372_v14 = vunpack.c.l.bf16 %v7426_v44 }
 0x2c5   :  { %6259 = vmatprep.subr.bf16.mxu1 %v7184_v42 }
 0x378   :  { %v1298_v16 = vpop.f32.mrb[24].mxu0  ;;  %v1339_v17 = vpop.f32.mrb[16].mxu1 }
 0x379   :  { %v1345_v19 = vadd.f32 %v1298_v16, %v1100_v15  ;;  %v1300_v20 = vpop.f32.mrb[25].mxu0  ;;  %v6237_v23 = vpop.f32.mrb[17].mxu1  ;;  %v1359_v36 = vadd.f32 %v7441_v22, %v1339_v17  ;;  %v1373_v17 = vunpack.c.h.bf16 %v7426_v44 }
 0x37a   :  { %v1352_v26 = vadd.f32 %v1300_v20, %v1101_v18  ;;  %v1302_v53 = vpop.f32.mrb[26].mxu0  ;;  %v1342_v55 = vpop.f32.mrb[18].mxu1 }
 0x37b   :  { %v5574_v56 = vmul.f32 -1.442695, %v1345_v19  ;;  %v1303_v58 = vpop.f32.mrb[27].mxu0  ;;  %v6238_v27 = vpop.f32.mrb[19].mxu1 }
 0x37c   :  { %v5575_v28 = vmul.f32 -1.442695, %v1352_v26 }
 0x37d   :  { %6844 = vpow2.f32 %v5574_v56 }
 0x37e   :  { %6846 = vpow2.f32 %v5575_v28 }
 0x387   :  { %v6845_v25 = vpop.eup %6844 }
 0x388   :  { %v1349_v29 = vadd.f32 1.0, %v6845_v25  ;;  %v6847_v30 = vpop.eup %6846 }
 0x389   :  { %v1356_v31 = vadd.f32 1.0, %v6847_v30 }
 0x38a   :  { %6848 = vrcp.f32 %v1349_v29 }
 0x38b   :  { %6850 = vrcp.f32 %v1356_v31 }
 0x394   :  { %v6849_v33 = vpop.eup %6848 }
 0x395   :  { %v1360_v35 = vmul.f32 %v6849_v33, %v1359_v36  ;;  %v6851_v38 = vpop.eup %6850  ;;  %v1374_v36 = vunpack.c.h.bf16 %v7534_v32  ;;  %v6656_v32 = vld [vmem:[#allocation8 + $0x8] ss:$12 sps:$4 sm:$0xff]  }
 0x396   :  { %v1363_v39 = vsub.f32 1.0, %v6851_v38  ;;  %v1365_v41 = vmul.f32 %v6851_v38, %v7505_v60  ;;  %v6639_v60 = vld [vmem:[#allocation8 + $0x50] ss:$12 sps:$4 sm:$0xff]  }
 0x397   :  { %v1361_v37 = vadd.f32 %v1360_v35, %v1102_v34 }
 0x399   :  { %6852 = vtanh.f32 %v1361_v37 }
 0x3a3   :  { %v6853_v12 = vpop.eup %6852 }
 0x3a4   :  { %v1364_v40 = vmul.f32 %v6853_v12, %v1363_v39 }
 0x3a6   :  { %v7539_v13 = vadd.f32 %v1365_v41, %v1364_v40 }
 0x3a8   :  { %1368 = vst [vmem:[#allocation12 + $0x10] sm:$0xff] %v7539_v13  ;;  %v1375_v43 = vpack.c.bf16 %v7539_v13, %v7539_v13 }
 0x3aa   :  { %1569 = vmatmul.mubr.bf16.vlgmr.msra.gmra.mrb[28].mxu0 %v1375_v43  ;;  %6256 = vmatmul.mubr.bf16.vlgmr.msra.gmra.mrb[20].mxu1 %v1375_v43  ;;  %v6658_v43 = vld [vmem:[#allocation8 + $0x38] ss:$12 sps:$4 sm:$0xff]  }
 0x3ab   :  { %1840 = vmatprep.mubr.bf16.mxu0 %v7183_v0  ;;  %6275 = vmatprep.mubr.msk.bf16.mxu1 %vm7185_vm0, %v7184_v42 }
 0x3ac   :  { %1809 = vmatpush1.bf16.msra.mxu0 %v7549_v46  ;;  %6260 = vmatpush3.bf16.msra.mxu1 %v6627_v24  ;;  %v6659_v24 = vld [vmem:[#allocation8 + $0x50] ss:$12 sps:$4 sm:$0xff]  }
 0x3ad   :  { %6261 = vmatprep.subr.bf16.mxu1 %v7184_v42  ;;  %1810 = vmatprep.subr.bf16.mxu0 %v7553_v47 }
 0x3b0   :  { %1811 = vmatpush1.bf16.msra.mxu0 %v7556_v48  ;;  %6262 = vmatpush3.bf16.msra.mxu1 %v6631_v49  ;;  %v6660_v49 = vld [vmem:[#allocation8 + $0x68] ss:$12 sps:$4 sm:$0xff]  }
 0x3b1   :  { %6263 = vmatprep.subr.bf16.mxu1 %v7184_v42  ;;  %1812 = vmatprep.subr.bf16.mxu0 %v7560_v51 }
 0x3b4   :  { %1813 = vmatpush1.bf16.msra.mxu0 %v7563_v52  ;;  %6264 = vmatpush3.bf16.msra.mxu1 %v6635_v54  ;;  %v6661_v54 = vld [vmem:[#allocation8 + $0x80] ss:$12 sps:$4 sm:$0xff]  }
 0x3b5   :  { %6265 = vmatprep.subr.bf16.mxu1 %v7184_v42  ;;  %1814 = vmatprep.subr.bf16.mxu0 %v7567_v57 }
 0x3b8   :  { %1815 = vmatpush1.bf16.msra.mxu0 %v7570_v59  ;;  %6266 = vmatpush3.bf16.msra.mxu1 %v6639_v60  ;;  %v6662_v60 = vld [vmem:[#allocation8 + $0x98] ss:$12 sps:$4 sm:$0xff]  }
 0x3b9   :  { %6267 = vmatprep.subr.bf16.mxu1 %v7184_v42  ;;  %1816 = vmatprep.subr.bf16.mxu0 %v7576_v50 }
 0x3bc   :  { %1817 = vmatpush1.bf16.msra.mxu0 %v7574_v61  ;;  %6268 = vmatpush3.bf16.msra.mxu1 %v6643_v62  ;;  %v6663_v62 = vld [vmem:[#allocation8 + $0xb0] ss:$12 sps:$4 sm:$0xff]  }
 0x3bd   :  { %1818 = vmatprep.subr.bf16.mxu0 %v7579_v63  ;;  %6269 = vmatprep.subr.bf16.mxu1 %v7184_v42 }
 0x3c0   :  { %1819 = vmatpush1.bf16.msra.mxu0 %v7583_v1  ;;  %6270 = vmatpush3.bf16.msra.mxu1 %v6647_v2  ;;  %v1642_v2 = vld [vmem:[#allocation2 + $0x30] sm:$0xff] }
 0x3c1   :  { %1820 = vmatprep.subr.bf16.mxu0 %v7587_v3  ;;  %6271 = vmatprep.subr.bf16.mxu1 %v7184_v42 }
 0x3c4   :  { %1821 = vmatpush1.bf16.msra.mxu0 %v7590_v4  ;;  %6272 = vmatpush3.bf16.msra.mxu1 %v6651_v5  ;;  %v1644_v5 = vunpack.c.l.bf16 %v1642_v2 }
 0x3c5   :  { %1822 = vmatprep.subr.bf16.mxu0 %v7594_v6  ;;  %6273 = vmatprep.subr.bf16.mxu1 %v7184_v42 }
 0x3c8   :  { %1823 = vmatpush1.bf16.msra.mxu0 %v7597_v7  ;;  %6274 = vmatpush3.bf16.msra.mxu1 %v6655_v10 }
 0x3c9   :  { %2080 = vmatprep.subr.bf16.mxu0 %v7547_v45  ;;  %6279 = vmatprep.subr.bf16.mxu1 %v7184_v42 }
 0x47d   :  { %v1570_v15 = vpop.f32.mrb[28].mxu0  ;;  %v1611_v16 = vpop.f32.mrb[20].mxu1 }
 0x47e   :  { %v1617_v18 = vadd.f32 %v1570_v15, %v1372_v14  ;;  %v1572_v19 = vpop.f32.mrb[29].mxu0  ;;  %v6257_v20 = vpop.f32.mrb[21].mxu1  ;;  %v1631_v31 = vadd.f32 %v7441_v22, %v1611_v16 }
 0x47f   :  { %v1624_v23 = vadd.f32 %v1572_v19, %v1373_v17  ;;  %v1574_v26 = vpop.f32.mrb[30].mxu0  ;;  %v1614_v53 = vpop.f32.mrb[22].mxu1 }
 0x480   :  { %v5600_v55 = vmul.f32 -1.442695, %v1617_v18  ;;  %v1575_v56 = vpop.f32.mrb[31].mxu0  ;;  %v6258_v58 = vpop.f32.mrb[23].mxu1  ;;  %v1645_v18 = vunpack.c.h.bf16 %v1642_v2 }
 0x481   :  { %v5601_v27 = vmul.f32 -1.442695, %v1624_v23 }
 0x482   :  { %6854 = vpow2.f32 %v5600_v55 }
 0x483   :  { %6856 = vpow2.f32 %v5601_v27 }
 0x48c   :  { %v6855_v28 = vpop.eup %6854 }
 0x48d   :  { %v1621_v25 = vadd.f32 1.0, %v6855_v28  ;;  %v6857_v29 = vpop.eup %6856 }
 0x48e   :  { %v1628_v30 = vadd.f32 1.0, %v6857_v29  ;;  %v7640_v29 = vld [vmem:[#allocation2 + $0x38] ss:$12 sps:$4 sm:$0xff]  }
 0x48f   :  { %6858 = vrcp.f32 %v1621_v25 }
 0x490   :  { %6860 = vrcp.f32 %v1628_v30 }
 0x499   :  { %v6859_v44 = vpop.eup %6858 }
 0x49a   :  { %v1632_v33 = vmul.f32 %v6859_v44, %v1631_v31  ;;  %v6861_v35 = vpop.eup %6860  ;;  %v1646_v44 = vunpack.c.l.bf16 %v7640_v29 }
 0x49b   :  { %v1635_v37 = vsub.f32 1.0, %v6861_v35  ;;  %v1637_v12 = vmul.f32 %v6861_v35, %v7539_v13  ;;  %v6657_v13 = vld [vmem:[#allocation8 + $0x20] ss:$12 sps:$4 sm:$0xff]  }
 0x49c   :  { %v1633_v34 = vadd.f32 %v1632_v33, %v1374_v36 }
 0x49e   :  { %6862 = vtanh.f32 %v1633_v34 }
 0x4a8   :  { %v6863_v38 = vpop.eup %6862 }
 0x4a9   :  { %v1636_v39 = vmul.f32 %v6863_v38, %v1635_v37 }
 0x4ab   :  { %v7609_v40 = vadd.f32 %v1637_v12, %v1636_v39 }
 0x4ad   :  { %v1647_v41 = vpack.c.bf16 %v7609_v40, %v7609_v40 }
 0x4af   :  { %1841 = vmatmul.mubr.bf16.vlgmr.msra.gmra.mrb[32].mxu0 %v1647_v41  ;;  %6276 = vmatmul.mubr.bf16.vlgmr.msra.gmra.mrb[24].mxu1 %v1647_v41 }
 0x4b0   :  { %2081 = vmatpush1.bf16.msra.mxu0 %v7549_v46  ;;  %2112 = vmatprep.mubr.bf16.mxu0 %v7183_v0 }
 0x4b1   :  { %2082 = vmatprep.subr.bf16.mxu0 %v7553_v47  ;;  %6295 = vmatprep.mubr.msk.bf16.mxu1 %vm7185_vm0, %v7184_v42 }
 0x4b2   :  { %6280 = vmatpush3.bf16.msra.mxu1 %v6656_v32  ;;  %v6664_v32 = vld [vmem:[#allocation8 + $0x8] ss:$12 sps:$4 sm:$0xff]  }
 0x4b3   :  { %6281 = vmatprep.subr.bf16.mxu1 %v7184_v42 }
 0x4b4   :  { %2083 = vmatpush1.bf16.msra.mxu0 %v7556_v48 }
 0x4b5   :  { %2084 = vmatprep.subr.bf16.mxu0 %v7560_v51 }
 0x4b6   :  { %6282 = vmatpush3.bf16.msra.mxu1 %v6657_v13  ;;  %v6665_v13 = vld [vmem:[#allocation8 + $0x20] ss:$12 sps:$4 sm:$0xff]  }
 0x4b7   :  { %6283 = vmatprep.subr.bf16.mxu1 %v7184_v42 }
 0x4b8   :  { %2085 = vmatpush1.bf16.msra.mxu0 %v7563_v52 }
 0x4b9   :  { %2086 = vmatprep.subr.bf16.mxu0 %v7567_v57 }
 0x4ba   :  { %6284 = vmatpush3.bf16.msra.mxu1 %v6658_v43  ;;  %v6666_v43 = vld [vmem:[#allocation8 + $0x38] ss:$12 sps:$4 sm:$0xff]  }
 0x4bb   :  { %6285 = vmatprep.subr.bf16.mxu1 %v7184_v42 }
 0x4bc   :  { %2087 = vmatpush1.bf16.msra.mxu0 %v7570_v59 }
 0x4bd   :  { %2088 = vmatprep.subr.bf16.mxu0 %v7576_v50 }
 0x4be   :  { %6286 = vmatpush3.bf16.msra.mxu1 %v6659_v24  ;;  %v6667_v24 = vld [vmem:[#allocation8 + $0x50] ss:$12 sps:$4 sm:$0xff]  }
 0x4bf   :  { %6287 = vmatprep.subr.bf16.mxu1 %v7184_v42 }
 0x4c0   :  { %2089 = vmatpush1.bf16.msra.mxu0 %v7574_v61 }
 0x4c1   :  { %2090 = vmatprep.subr.bf16.mxu0 %v7579_v63 }
 0x4c2   :  { %6288 = vmatpush3.bf16.msra.mxu1 %v6660_v49  ;;  %v6668_v49 = vld [vmem:[#allocation8 + $0x68] ss:$12 sps:$4 sm:$0xff]  }
 0x4c3   :  { %6289 = vmatprep.subr.bf16.mxu1 %v7184_v42 }
 0x4c4   :  { %2091 = vmatpush1.bf16.msra.mxu0 %v7583_v1 }
 0x4c5   :  { %2092 = vmatprep.subr.bf16.mxu0 %v7587_v3 }
 0x4c6   :  { %6290 = vmatpush3.bf16.msra.mxu1 %v6661_v54  ;;  %v6669_v54 = vld [vmem:[#allocation8 + $0x80] ss:$12 sps:$4 sm:$0xff]  }
 0x4c7   :  { %6291 = vmatprep.subr.bf16.mxu1 %v7184_v42 }
 0x4c8   :  { %2093 = vmatpush1.bf16.msra.mxu0 %v7590_v4 }
 0x4c9   :  { %2094 = vmatprep.subr.bf16.mxu0 %v7594_v6 }
 0x4ca   :  { %6292 = vmatpush3.bf16.msra.mxu1 %v6662_v60  ;;  %v6671_v60 = vld [vmem:[#allocation8 + $0xb0] ss:$12 sps:$4 sm:$0xff]  }
 0x4cb   :  { %6293 = vmatprep.subr.bf16.mxu1 %v7184_v42 }
 0x4cc   :  { %2095 = vmatpush1.bf16.msra.mxu0 %v7597_v7 }
 0x4cd   :  { %2352 = vmatprep.subr.bf16.mxu0 %v7547_v45 }
 0x4ce   :  { %6294 = vmatpush3.bf16.msra.mxu1 %v6663_v62  ;;  %v1914_v62 = vld [vmem:[#allocation2 + $0x3c] sm:$0xff] }
 0x4cf   :  { %6299 = vmatprep.subr.bf16.mxu1 %v7184_v42  ;;  %v1916_v2 = vunpack.c.l.bf16 %v1914_v62 }
 0x582   :  { %v1842_v10 = vpop.f32.mrb[32].mxu0  ;;  %v1883_v14 = vpop.f32.mrb[24].mxu1 }
 0x583   :  { %v1889_v15 = vadd.f32 %v1842_v10, %v1644_v5  ;;  %v1844_v16 = vpop.f32.mrb[33].mxu0  ;;  %v6277_v17 = vpop.f32.mrb[25].mxu1  ;;  %v1903_v30 = vadd.f32 %v7441_v22, %v1883_v14 }
 0x584   :  { %v1846_v19 = vpop.f32.mrb[34].mxu0  ;;  %v1886_v20 = vpop.f32.mrb[26].mxu1  ;;  %v1896_v55 = vadd.f32 %v1844_v16, %v1645_v18  ;;  %v1917_v17 = vunpack.c.h.bf16 %v1914_v62 }
 0x585   :  { %v5626_v23 = vmul.f32 -1.442695, %v1889_v15  ;;  %v1847_v26 = vpop.f32.mrb[35].mxu0  ;;  %v6278_v53 = vpop.f32.mrb[27].mxu1 }
 0x586   :  { %v5627_v56 = vmul.f32 -1.442695, %v1896_v55 }
 0x587   :  { %6864 = vpow2.f32 %v5626_v23 }
 0x588   :  { %6866 = vpow2.f32 %v5627_v56 }
 0x591   :  { %v6865_v58 = vpop.eup %6864 }
 0x592   :  { %v1893_v27 = vadd.f32 1.0, %v6865_v58  ;;  %v6867_v28 = vpop.eup %6866 }
 0x593   :  { %v1900_v25 = vadd.f32 1.0, %v6867_v28 }
 0x594   :  { %6868 = vrcp.f32 %v1893_v27 }
 0x595   :  { %6870 = vrcp.f32 %v1900_v25 }
 0x59e   :  { %v6869_v31 = vpop.eup %6868 }
 0x59f   :  { %v1904_v36 = vmul.f32 %v6869_v31, %v1903_v30  ;;  %v6871_v34 = vpop.eup %6870  ;;  %v1918_v31 = vunpack.c.h.bf16 %v7640_v29 }
 0x5a0   :  { %v1907_v35 = vsub.f32 1.0, %v6871_v34  ;;  %v1909_v39 = vmul.f32 %v6871_v34, %v7609_v40 }
 0x5a1   :  { %v1905_v33 = vadd.f32 %v1904_v36, %v1646_v44 }
 0x5a3   :  { %6872 = vtanh.f32 %v1905_v33 }
 0x5ad   :  { %v6873_v37 = vpop.eup %6872 }
 0x5ae   :  { %v1908_v38 = vmul.f32 %v6873_v37, %v1907_v35 }
 0x5b0   :  { %v7645_v12 = vadd.f32 %v1909_v39, %v1908_v38 }
 0x5b2   :  { %v1919_v41 = vpack.c.bf16 %v7645_v12, %v7645_v12 }
 0x5b4   :  { %2113 = vmatmul.mubr.bf16.vlgmr.msra.gmra.mrb[36].mxu0 %v1919_v41  ;;  %6296 = vmatmul.mubr.bf16.vlgmr.msra.gmra.mrb[28].mxu1 %v1919_v41 }
 0x5b5   :  { %2353 = vmatpush1.bf16.msra.mxu0 %v7549_v46  ;;  %2384 = vmatprep.mubr.bf16.mxu0 %v7183_v0 }
 0x5b6   :  { %2354 = vmatprep.subr.bf16.mxu0 %v7553_v47  ;;  %6315 = vmatprep.mubr.msk.bf16.mxu1 %vm7185_vm0, %v7184_v42 }
 0x5b7   :  { %6300 = vmatpush3.bf16.msra.mxu1 %v6664_v32 }
 0x5b8   :  { %6301 = vmatprep.subr.bf16.mxu1 %v7184_v42 }
 0x5b9   :  { %2355 = vmatpush1.bf16.msra.mxu0 %v7556_v48 }
 0x5ba   :  { %2356 = vmatprep.subr.bf16.mxu0 %v7560_v51 }
 0x5bb   :  { %6302 = vmatpush3.bf16.msra.mxu1 %v6665_v13 }
 0x5bc   :  { %6303 = vmatprep.subr.bf16.mxu1 %v7184_v42 }
 0x5bd   :  { %2357 = vmatpush1.bf16.msra.mxu0 %v7563_v52 }
 0x5be   :  { %2358 = vmatprep.subr.bf16.mxu0 %v7567_v57 }
 0x5bf   :  { %6304 = vmatpush3.bf16.msra.mxu1 %v6666_v43 }
 0x5c0   :  { %6305 = vmatprep.subr.bf16.mxu1 %v7184_v42 }
 0x5c1   :  { %2359 = vmatpush1.bf16.msra.mxu0 %v7570_v59 }
 0x5c2   :  { %2360 = vmatprep.subr.bf16.mxu0 %v7576_v50 }
 0x5c3   :  { %6306 = vmatpush3.bf16.msra.mxu1 %v6667_v24 }
 0x5c4   :  { %6307 = vmatprep.subr.bf16.mxu1 %v7184_v42 }
 0x5c5   :  { %2361 = vmatpush1.bf16.msra.mxu0 %v7574_v61 }
 0x5c6   :  { %2362 = vmatprep.subr.bf16.mxu0 %v7579_v63 }
 0x5c7   :  { %6308 = vmatpush3.bf16.msra.mxu1 %v6668_v49 }
 0x5c8   :  { %6309 = vmatprep.subr.bf16.mxu1 %v7184_v42 }
 0x5c9   :  { %2363 = vmatpush1.bf16.msra.mxu0 %v7583_v1 }
 0x5ca   :  { %2364 = vmatprep.subr.bf16.mxu0 %v7587_v3 }
 0x5cb   :  { %6310 = vmatpush3.bf16.msra.mxu1 %v6669_v54 }
 0x5cc   :  { %6311 = vmatprep.subr.bf16.mxu1 %v7184_v42 }
 0x5cd   :  { %2365 = vmatpush1.bf16.msra.mxu0 %v7590_v4 }
 0x5ce   :  { %2366 = vmatprep.subr.bf16.mxu0 %v7594_v6 }
 0x5d1   :  { %2367 = vmatpush1.bf16.msra.mxu0 %v7597_v7 }
 0x5d2   :  { %2624 = vmatprep.subr.bf16.mxu0 %v7547_v45  ;;  %v6670_v45 = vld [vmem:[#allocation8 + $0x98] ss:$12 sps:$4 sm:$0xff]  }
 0x5d3   :  { %6312 = vmatpush3.bf16.msra.mxu1 %v6670_v45 }
 0x5d4   :  { %6313 = vmatprep.subr.bf16.mxu1 %v7184_v42 }
 0x5d7   :  { %6314 = vmatpush3.bf16.msra.mxu1 %v6671_v60 }
 0x5d8   :  { %6319 = vmatprep.subr.bf16.mxu1 %v7184_v42 }
 0x687   :  { %v2114_v5 = vpop.f32.mrb[36].mxu0  ;;  %v2155_v10 = vpop.f32.mrb[28].mxu1 }
 0x688   :  { %v2161_v14 = vadd.f32 %v2114_v5, %v1916_v2  ;;  %v2116_v15 = vpop.f32.mrb[37].mxu0  ;;  %v6297_v16 = vpop.f32.mrb[29].mxu1  ;;  %v2175_v25 = vadd.f32 %v7441_v22, %v2155_v10  ;;  %v2730_v10 = vld [vmem:[#allocation12 + $0x8] sm:$0xff] }
 0x689   :  { %v2118_v18 = vpop.f32.mrb[38].mxu0  ;;  %v2158_v19 = vpop.f32.mrb[30].mxu1  ;;  %v2168_v53 = vadd.f32 %v2116_v15, %v1917_v17  ;;  %v2729_v15 = vld [vmem:[#allocation12] sm:$0xff]  ;;  %v2746_v16 = vmul.f32 0.70710677, %v2730_v10 }
 0x68a   :  { %v5652_v20 = vmul.f32 -1.442695, %v2161_v14  ;;  %v2119_v23 = vpop.f32.mrb[39].mxu0  ;;  %v6298_v26 = vpop.f32.mrb[31].mxu1  ;;  %v7708_v18 = vld [vmem:[#allocation2 + $0x50] ss:$12 sps:$4 sm:$0xff]  }
 0x68b   :  { %v5653_v55 = vmul.f32 -1.442695, %v2168_v53  ;;  %v2190_v26 = vunpack.c.l.bf16 %v7708_v18 }
 0x68c   :  { %6874 = vpow2.f32 %v5652_v20  ;;  %v2745_v20 = vmul.f32 0.70710677, %v2729_v15 }
 0x68d   :  { %6876 = vpow2.f32 %v5653_v55 }
 0x696   :  { %v6875_v56 = vpop.eup %6874 }
 0x697   :  { %v2165_v58 = vadd.f32 1.0, %v6875_v56  ;;  %v6877_v27 = vpop.eup %6876 }
 0x698   :  { %v2172_v28 = vadd.f32 1.0, %v6877_v27 }
 0x699   :  { %6878 = vrcp.f32 %v2165_v58 }
 0x69a   :  { %6880 = vrcp.f32 %v2172_v28 }
 0x6a3   :  { %v6879_v30 = vpop.eup %6878 }
 0x6a4   :  { %v2176_v44 = vmul.f32 %v6879_v30, %v2175_v25  ;;  %v6881_v33 = vpop.eup %6880 }
 0x6a5   :  { %v2179_v34 = vsub.f32 1.0, %v6881_v33  ;;  %v2181_v38 = vmul.f32 %v6881_v33, %v7645_v12 }
 0x6a6   :  { %v2177_v36 = vadd.f32 %v2176_v44, %v1918_v31 }
 0x6a8   :  { %6882 = vtanh.f32 %v2177_v36 }
 0x6b2   :  { %v6883_v35 = vpop.eup %6882 }
 0x6b3   :  { %v2180_v37 = vmul.f32 %v6883_v35, %v2179_v34  ;;  %v2737_v34 = vmul.f32 0.5, %v2729_v15  ;;  %v6711_v15 = vld [vmem:[#allocation9 + $0xb0] ss:$12 sps:$4 sm:$0xff]  }
 0x6b5   :  { %v7679_v39 = vadd.f32 %v2181_v38, %v2180_v37  ;;  %v6680_v37 = vld [vmem:[#allocation9] ss:$12 sps:$4 sm:$0xff]  }
 0x6b7   :  { %v2191_v41 = vpack.c.bf16 %v7679_v39, %v7679_v39 }
 0x6b9   :  { %2385 = vmatmul.mubr.bf16.vlgmr.msra.gmra.mrb[40].mxu0 %v2191_v41  ;;  %6316 = vmatmul.mubr.bf16.vlgmr.msra.gmra.mrb[32].mxu1 %v2191_v41 }
 0x6ba   :  { %2625 = vmatpush1.bf16.msra.mxu0 %v7549_v46  ;;  %2656 = vmatprep.mubr.bf16.mxu0 %v7183_v0  ;;  %v6672_v46 = vld [vmem:[#allocation8 + $0x8] ss:$12 sps:$4 sm:$0xff]  }
 0x6bb   :  { %2626 = vmatprep.subr.bf16.mxu0 %v7553_v47  ;;  %6335 = vmatprep.mubr.msk.bf16.mxu1 %vm7185_vm0, %v7184_v42  ;;  %v6673_v47 = vld [vmem:[#allocation8 + $0x20] ss:$12 sps:$4 sm:$0xff]  }
 0x6bc   :  { %6320 = vmatpush3.bf16.msra.mxu1 %v6672_v46  ;;  %v6686_v46 = vld [vmem:[#allocation9 + $0x1c] ss:$12 sps:$4 sm:$0xff]  }
 0x6bd   :  { %6321 = vmatprep.subr.bf16.mxu1 %v7184_v42 }
 0x6be   :  { %2627 = vmatpush1.bf16.msra.mxu0 %v7556_v48  ;;  %v6674_v48 = vld [vmem:[#allocation8 + $0x38] ss:$12 sps:$4 sm:$0xff]  }
 0x6bf   :  { %2628 = vmatprep.subr.bf16.mxu0 %v7560_v51  ;;  %v6675_v51 = vld [vmem:[#allocation8 + $0x50] ss:$12 sps:$4 sm:$0xff]  }
 0x6c0   :  { %6322 = vmatpush3.bf16.msra.mxu1 %v6673_v47  ;;  %v6687_v47 = vld [vmem:[#allocation9 + $0x20] ss:$12 sps:$4 sm:$0xff]  }
 0x6c1   :  { %6323 = vmatprep.subr.bf16.mxu1 %v7184_v42 }
 0x6c2   :  { %2629 = vmatpush1.bf16.msra.mxu0 %v7563_v52  ;;  %v6676_v52 = vld [vmem:[#allocation8 + $0x68] ss:$12 sps:$4 sm:$0xff]  }
 0x6c3   :  { %2630 = vmatprep.subr.bf16.mxu0 %v7567_v57  ;;  %v6682_v57 = vld [vmem:[#allocation9 + $0x4] ss:$12 sps:$4 sm:$0xff]  }
 0x6c4   :  { %6324 = vmatpush3.bf16.msra.mxu1 %v6674_v48 }
 0x6c5   :  { %6325 = vmatprep.subr.bf16.mxu1 %v7184_v42 }
 0x6c6   :  { %2631 = vmatpush1.bf16.msra.mxu0 %v7570_v59  ;;  %v6677_v59 = vld [vmem:[#allocation8 + $0x80] ss:$12 sps:$4 sm:$0xff]  }
 0x6c7   :  { %2632 = vmatprep.subr.bf16.mxu0 %v7576_v50  ;;  %v6679_v50 = vld [vmem:[#allocation8 + $0xb0] ss:$12 sps:$4 sm:$0xff]  }
 0x6c8   :  { %6326 = vmatpush3.bf16.msra.mxu1 %v6675_v51  ;;  %v6684_v51 = vld [vmem:[#allocation9 + $0x18] ss:$12 sps:$4 sm:$0xff]  }
 0x6c9   :  { %6327 = vmatprep.subr.bf16.mxu1 %v7184_v42 }
 0x6ca   :  { %2633 = vmatpush1.bf16.msra.mxu0 %v7574_v61  ;;  %v6678_v61 = vld [vmem:[#allocation8 + $0x98] ss:$12 sps:$4 sm:$0xff]  }
 0x6cb   :  { %2634 = vmatprep.subr.bf16.mxu0 %v7579_v63  ;;  %v6683_v63 = vld [vmem:[#allocation9 + $0x8] ss:$12 sps:$4 sm:$0xff]  }
 0x6cc   :  { %6328 = vmatpush3.bf16.msra.mxu1 %v6676_v52  ;;  %v6690_v52 = vld [vmem:[#allocation9 + $0x34] ss:$12 sps:$4 sm:$0xff]  }
 0x6cd   :  { %6329 = vmatprep.subr.bf16.mxu1 %v7184_v42 }
 0x6ce   :  { %2635 = vmatpush1.bf16.msra.mxu0 %v7583_v1  ;;  %v2186_v1 = vld [vmem:[#allocation2 + $0x48] sm:$0xff] }
 0x6cf   :  { %2636 = vmatprep.subr.bf16.mxu0 %v7587_v3  ;;  %v2188_v3 = vunpack.c.l.bf16 %v2186_v1  ;;  %v2189_v13 = vunpack.c.h.bf16 %v2186_v1  ;;  %v6694_v1 = vld [vmem:[#allocation9 + $0x4c] ss:$12 sps:$4 sm:$0xff]  }
 0x6d0   :  { %6330 = vmatpush3.bf16.msra.mxu1 %v6677_v59  ;;  %v2731_v59 = vld [vmem:[#allocation12 + $0x10] sm:$0xff] }
 0x6d1   :  { %6331 = vmatprep.subr.bf16.mxu1 %v7184_v42 }
 0x6d2   :  { %2637 = vmatpush1.bf16.msra.mxu0 %v7590_v4 }
 0x6d3   :  { %2638 = vmatprep.subr.bf16.mxu0 %v7594_v6 }
 0x6d4   :  { %6332 = vmatpush3.bf16.msra.mxu1 %v6678_v61  ;;  %v6688_v61 = vld [vmem:[#allocation9 + $0x30] ss:$12 sps:$4 sm:$0xff]  }
 0x6d5   :  { %6333 = vmatprep.subr.bf16.mxu1 %v7184_v42 }
 0x6d6   :  { %2639 = vmatpush1.bf16.msra.mxu0 %v7597_v7 }
 0x6d7   :  { %2958 = vmatprep.subr.bf16.mxu0 %v6682_v57  ;;  %v6691_v57 = vld [vmem:[#allocation9 + $0x38] ss:$12 sps:$4 sm:$0xff]  }
 0x6d8   :  { %6334 = vmatpush3.bf16.msra.mxu1 %v6679_v50  ;;  %v2748_v50 = vmul.f32 0.70710677, %v7609_v40 }
 0x6d9   :  { %6339 = vmatprep.subr.bf16.mxu1 %v6683_v63 }
 0x78c   :  { %v2386_v4 = vpop.f32.mrb[40].mxu0  ;;  %v2427_v6 = vpop.f32.mrb[32].mxu1 }
 0x78d   :  { %v2433_v7 = vadd.f32 %v2386_v4, %v2188_v3  ;;  %v2388_v29 = vpop.f32.mrb[41].mxu0  ;;  %v6317_v32 = vpop.f32.mrb[33].mxu1  ;;  %v2447_v19 = vadd.f32 %v7441_v22, %v2427_v6  ;;  %v2738_v22 = vmul.f32 0.5, %v2730_v10  ;;  %v6695_v3 = vld [vmem:[#allocation9 + $0x50] ss:$12 sps:$4 sm:$0xff]  }
 0x78e   :  { %v2390_v43 = vpop.f32.mrb[42].mxu0  ;;  %v2430_v24 = vpop.f32.mrb[34].mxu1  ;;  %v2440_v60 = vadd.f32 %v2388_v29, %v2189_v13  ;;  %v2747_v4 = vmul.f32 0.70710677, %v2731_v59  ;;  %v2749_v6 = vmul.f32 0.70710677, %v7645_v12 }
 0x78f   :  { %v5678_v49 = vmul.f32 -1.442695, %v2433_v7  ;;  %v2391_v54 = vpop.f32.mrb[43].mxu0  ;;  %v6318_v45 = vpop.f32.mrb[35].mxu1  ;;  %v6692_v7 = vld [vmem:[#allocation9 + $0x48] ss:$12 sps:$4 sm:$0xff]  }
 0x790   :  { %v5679_v62 = vmul.f32 -1.442695, %v2440_v60  ;;  %v6698_v29 = vld [vmem:[#allocation9 + $0x64] ss:$12 sps:$4 sm:$0xff]   ;;  %v6699_v32 = vld [vmem:[#allocation9 + $0x68] ss:$12 sps:$4 sm:$0xff]  }
 0x791   :  { %6884 = vpow2.f32 %v5678_v49  ;;  %v6696_v13 = vld [vmem:[#allocation9 + $0x60] ss:$12 sps:$4 sm:$0xff]   ;;  %v6702_v43 = vld [vmem:[#allocation9 + $0x7c] ss:$12 sps:$4 sm:$0xff]   ;;  %v6700_v49 = vld [vmem:[#allocation9 + $0x78] ss:$12 sps:$4 sm:$0xff]  }
 0x792   :  { %6886 = vpow2.f32 %v5679_v62  ;;  %v6703_v24 = vld [vmem:[#allocation9 + $0x80] ss:$12 sps:$4 sm:$0xff]   ;;  %v6707_v45 = vld [vmem:[#allocation9 + $0x98] ss:$12 sps:$4 sm:$0xff]  }
 0x793   :  { %v6706_v54 = vld [vmem:[#allocation9 + $0x94] ss:$12 sps:$4 sm:$0xff]  }
 0x79b   :  { %v6885_v2 = vpop.eup %6884 }
 0x79c   :  { %v2437_v5 = vadd.f32 1.0, %v6885_v2  ;;  %v6887_v14 = vpop.eup %6886 }
 0x79d   :  { %v2444_v17 = vadd.f32 1.0, %v6887_v14  ;;  %v6710_v14 = vld [vmem:[#allocation9 + $0xac] ss:$12 sps:$4 sm:$0xff]  }
 0x79e   :  { %6888 = vrcp.f32 %v2437_v5  ;;  %v6704_v5 = vld [vmem:[#allocation9 + $0x90] ss:$12 sps:$4 sm:$0xff]  }
 0x79f   :  { %6890 = verf.f32 %v2746_v16 }
 0x7a0   :  { %6892 = vrcp.f32 %v2444_v17 }
 0x7a1   :  { %6894 = verf.f32 %v2745_v20 }
 0x7a8   :  { %v6889_v23 = vpop.eup %6888 }
 0x7a9   :  { %v2448_v53 = vmul.f32 %v6889_v23, %v2447_v19  ;;  %v6891_v56 = vpop.eup %6890  ;;  %v2740_v19 = vmul.f32 0.5, %v7609_v40  ;;  %v6708_v23 = vld [vmem:[#allocation9 + $0xa8] ss:$12 sps:$4 sm:$0xff]  }
 0x7aa   :  { %v6893_v58 = vpop.eup %6892  ;;  %v2762_v25 = vadd.f32 1.0, %v6891_v56 }
 0x7ab   :  { %v2449_v55 = vadd.f32 %v2448_v53, %v2190_v26  ;;  %v6895_v27 = vpop.eup %6894  ;;  %v2451_v28 = vsub.f32 1.0, %v6893_v58  ;;  %v2453_v44 = vmul.f32 %v6893_v58, %v7679_v39  ;;  %v2742_v26 = vmul.f32 0.5, %v7679_v39 }
 0x7ac   :  { %v2761_v36 = vadd.f32 1.0, %v6895_v27  ;;  %v2770_v35 = vmul.f32 %v2762_v25, %v2738_v22  ;;  %v2741_v58 = vmul.f32 0.5, %v7645_v12  ;;  %v7732_v12 = vld [vmem:[#allocation11 + $0x4] ss:$12 sps:$4 sm:$0xff]   ;;  %v7744_v22 = vld [vmem:[#allocation11 + $0x34] ss:$12 sps:$4 sm:$0xff]  }
 0x7ad   :  { %6896 = vtanh.f32 %v2449_v55  ;;  %v2739_v55 = vmul.f32 0.5, %v2731_v59  ;;  %v6737_v59 = vld [vmem:[#allocation11 + $0x20] ss:$12 sps:$4 sm:$0xff]  }
 0x7ae   :  { %v2769_v41 = vmul.f32 %v2761_v36, %v2737_v34  ;;  %6898 = verf.f32 %v2748_v50  ;;  %v7746_v36 = vld [vmem:[#allocation11 + $0x30] ss:$12 sps:$4 sm:$0xff]   ;;  %v7750_v34 = vld [vmem:[#allocation11 + $0x4c] ss:$12 sps:$4 sm:$0xff]  }
 0x7af   :  { %v6739_v50 = vld [vmem:[#allocation11 + $0x50] ss:$12 sps:$4 sm:$0xff]  }
 0x7b0   :  { %v7717_v48 = vpack.c.bf16 %v2770_v35, %v2769_v41  ;;  %v7752_v35 = vld [vmem:[#allocation11 + $0x48] ss:$12 sps:$4 sm:$0xff]  }
 0x7b1   :  { %v7762_v41 = vld [vmem:[#allocation11 + $0x7c] ss:$12 sps:$4 sm:$0xff]  }
 0x7b7   :  { %v6897_v30 = vpop.eup %6896 }
 0x7b8   :  { %v2452_v31 = vmul.f32 %v6897_v30, %v2451_v28  ;;  %v6899_v60 = vpop.eup %6898 }
 0x7b9   :  { %v2764_v16 = vadd.f32 1.0, %v6899_v60 }
 0x7ba   :  { %v7713_v33 = vadd.f32 %v2453_v44, %v2452_v31  ;;  %v7738_v31 = vld [vmem:[#allocation11 + $0x1c] ss:$12 sps:$4 sm:$0xff]   ;;  %v7740_v44 = vld [vmem:[#allocation11 + $0x18] ss:$12 sps:$4 sm:$0xff]  }
 0x7bb   :  { %v2772_v56 = vmul.f32 %v2764_v16, %v2740_v19  ;;  %v2813_v19 = vld [vmem:[%s8159_s7] sm:$0x7] }
 0x7bc   :  { %v2463_v38 = vpack.c.bf16 %v7713_v33, %v7713_v33 }
 0x7be   :  { %2657 = vmatmul.mubr.bf16.vlgmr.msra.gmra.mrb[44].mxu0 %v2463_v38  ;;  %6336 = vmatmul.mubr.bf16.vlgmr.msra.gmra.mrb[36].mxu1 %v2463_v38  ;;  %v7758_v38 = vld [vmem:[#allocation11 + $0x60] ss:$12 sps:$4 sm:$0xff]  }
 0x7bf   :  { %2959 = vmatpush1.bf16.msra.mxu0 %v6680_v37  ;;  %6340 = vmatpush3.bf16.msra.mxu1 %v6683_v63  ;;  %v2750_v63 = vmul.f32 0.70710677, %v7679_v39  ;;  %v7734_v39 = vld [vmem:[#allocation11] ss:$12 sps:$4 sm:$0xff]   ;;  %v7755_v37 = vld [vmem:[#allocation11 + $0x64] ss:$12 sps:$4 sm:$0xff]  }
 0x7c0   :  { %6355 = vmatprep.mubr.bf16.mxu1 %v7717_v48  ;;  %2960 = vmatprep.subr.bf16.mxu0 %v6686_v46  ;;  %v7764_v46 = vld [vmem:[#allocation11 + $0x78] ss:$12 sps:$4 sm:$0xff]  }
 0x7c1   :  { %6341 = vmatprep.subr.bf16.mxu1 %v6687_v47  ;;  %2990 = vmatprep.mubr.bf16.mxu0 %v7183_v0  ;;  %6900 = verf.f32 %v2750_v63  ;;  %v6742_v63 = vld [vmem:[#allocation11 + $0x98] ss:$12 sps:$4 sm:$0xff]  }
 0x7c2   :  { %6902 = verf.f32 %v2747_v4  ;;  %v6743_v4 = vld [vmem:[#allocation11 + $0xb0] ss:$12 sps:$4 sm:$0xff]  }
 0x7c3   :  { %2961 = vmatpush1.bf16.msra.mxu0 %v6684_v51  ;;  %6342 = vmatpush3.bf16.msra.mxu1 %v6687_v47  ;;  %6904 = verf.f32 %v2749_v6  ;;  %v7768_v47 = vld [vmem:[#allocation11 + $0x94] ss:$12 sps:$4 sm:$0xff]  }
 0x7c4   :  { %2962 = vmatprep.subr.bf16.mxu0 %v6690_v52  ;;  %6343 = vmatprep.subr.bf16.mxu1 %v6691_v57  ;;  %v6733_v51 = vld [vmem:[#allocation11 + $0x8] ss:$12 sps:$4 sm:$0xff]   ;;  %v7773_v52 = vld [vmem:[#allocation11 + $0xac] ss:$12 sps:$4 sm:$0xff]  }
 0x7c5   :  { %v2458_v6 = vld [vmem:[#allocation2 + $0x54] sm:$0xff] }
 0x7c7   :  { %2963 = vmatpush1.bf16.msra.mxu0 %v6688_v61  ;;  %6344 = vmatpush3.bf16.msra.mxu1 %v6691_v57  ;;  %v7776_v57 = vld [vmem:[#allocation11 + $0xa8] ss:$12 sps:$4 sm:$0xff]   ;;  %v6738_v61 = vld [vmem:[#allocation11 + $0x38] ss:$12 sps:$4 sm:$0xff]  }
 0x7c8   :  { %2964 = vmatprep.subr.bf16.mxu0 %v6694_v1  ;;  %6345 = vmatprep.subr.bf16.mxu1 %v6695_v3  ;;  %v6740_v1 = vld [vmem:[#allocation11 + $0x68] ss:$12 sps:$4 sm:$0xff]  }
 0x7cb   :  { %2965 = vmatpush1.bf16.msra.mxu0 %v6692_v7  ;;  %6346 = vmatpush3.bf16.msra.mxu1 %v6695_v3  ;;  %v6901_v62 = vpop.eup %6900  ;;  %v6741_v3 = vld [vmem:[#allocation11 + $0x80] ss:$12 sps:$4 sm:$0xff]   ;;  %v2460_v7 = vunpack.c.l.bf16 %v2458_v6 }
 0x7cc   :  { %2966 = vmatprep.subr.bf16.mxu0 %v6698_v29  ;;  %6347 = vmatprep.subr.bf16.mxu1 %v6699_v32  ;;  %v6903_v2 = vpop.eup %6902  ;;  %v2766_v17 = vadd.f32 1.0, %v6901_v62 }
 0x7cd   :  { %v6905_v10 = vpop.eup %6904  ;;  %v2763_v20 = vadd.f32 1.0, %v6903_v2 }
 0x7ce   :  { %v2765_v53 = vadd.f32 1.0, %v6905_v10  ;;  %v2774_v27 = vmul.f32 %v2766_v17, %v2742_v26 }
 0x7cf   :  { %2967 = vmatpush1.bf16.msra.mxu0 %v6696_v13  ;;  %6348 = vmatpush3.bf16.msra.mxu1 %v6699_v32  ;;  %v2771_v28 = vmul.f32 %v2763_v20, %v2739_v55  ;;  %v7032_v20 = vld [vmem:[%s8156_s4] ss:$0 sm:$0xff] }
 0x7d0   :  { %2968 = vmatprep.subr.bf16.mxu0 %v6702_v43  ;;  %6349 = vmatprep.subr.bf16.mxu1 %v6703_v24  ;;  %v2773_v25 = vmul.f32 %v2765_v53, %v2741_v58  ;;  %v2462_v53 = vunpack.c.h.bf16 %v7708_v18  ;;  %v7802_v58 = vrot.slane %v2813_v19, %v158_v21 }
 0x7d1   :  { %v2778_v30 = vpack.c.bf16 %v2772_v56, %v2771_v28  ;;  %v7798_v56 = vrot.slane %v2813_v19, %v150_v9 }
 0x7d2   :  { %v2779_v40 = vpack.c.bf16 %v2774_v27, %v2773_v25  ;;  %v7806_v27 = vrot.slane %v2813_v19, %v154_v11 }
 0x7d3   :  { %2969 = vmatpush1.bf16.msra.mxu0 %v6700_v49  ;;  %6350 = vmatpush3.bf16.msra.mxu1 %v6703_v24  ;;  %v2461_v49 = vunpack.c.h.bf16 %v2458_v6 }
 0x7d4   :  { %2970 = vmatprep.subr.bf16.mxu0 %v6706_v54  ;;  %6351 = vmatprep.subr.bf16.mxu1 %v6707_v45 }
 0x7d7   :  { %2971 = vmatpush1.bf16.msra.mxu0 %v6704_v5  ;;  %6352 = vmatpush3.bf16.msra.mxu1 %v6707_v45 }
 0x7d8   :  { %2972 = vmatprep.subr.bf16.mxu0 %v6710_v14  ;;  %6353 = vmatprep.subr.bf16.mxu1 %v6711_v15 }
 0x7db   :  { %2973 = vmatpush1.bf16.msra.mxu0 %v6708_v23  ;;  %6354 = vmatpush3.bf16.msra.mxu1 %v6711_v15 }
 0x7dc   :  { %6363 = vmatprep.subr.bf16.mxu1 %v7184_v42  ;;  %3382 = vmatprep.subr.bf16.mxu0 %v7732_v12 }
 0x7de   :  { %2991 = vmatmul.mubr.bf16.vlgmr.msra.gmra.mrb[48].mxu0 %v7717_v48  ;;  %6356 = vmatmul.mubr.bf16.vlgmr.msra.gmra.mrb[40].mxu1 %v2778_v30  ;;  %v7770_v48 = vld [vmem:[#allocation11 + $0x90] ss:$12 sps:$4 sm:$0xff]  }
 0x7df   :  { %6359 = vmatprep.mubr.bf16.mxu1 %v2779_v40  ;;  %3000 = vmatprep.mubr.bf16.mxu0 %v7183_v0 }
 0x7e0   :  { %3383 = vmatpush1.bf16.msra.mxu0 %v7734_v39  ;;  %6364 = vmatpush3.bf16.msra.mxu1 %v6733_v51 }
 0x7e1   :  { %3384 = vmatprep.subr.bf16.mxu0 %v7738_v31  ;;  %6365 = vmatprep.subr.bf16.mxu1 %v7184_v42 }
 0x7e4   :  { %3385 = vmatpush1.bf16.msra.mxu0 %v7740_v44  ;;  %6366 = vmatpush3.bf16.msra.mxu1 %v6737_v59 }
 0x7e5   :  { %3386 = vmatprep.subr.bf16.mxu0 %v7744_v22  ;;  %6367 = vmatprep.subr.bf16.mxu1 %v7184_v42 }
 0x7e6   :  { %3001 = vmatmul.mubr.bf16.gmra.mrb[52].mxu0 %v2778_v30 }
 0x7e7   :  { %3010 = vmatprep.mubr.bf16.mxu0 %v7183_v0 }
 0x7e8   :  { %3387 = vmatpush1.bf16.msra.mxu0 %v7746_v36  ;;  %6368 = vmatpush3.bf16.msra.mxu1 %v6738_v61 }
 0x7e9   :  { %3388 = vmatprep.subr.bf16.mxu0 %v7750_v34  ;;  %6369 = vmatprep.subr.bf16.mxu1 %v7184_v42 }
 0x7ec   :  { %3389 = vmatpush1.bf16.msra.mxu0 %v7752_v35  ;;  %6370 = vmatpush3.bf16.msra.mxu1 %v6739_v50 }
 0x7ed   :  { %3390 = vmatprep.subr.bf16.mxu0 %v7755_v37  ;;  %6371 = vmatprep.subr.bf16.mxu1 %v7184_v42 }
 0x7ee   :  { %3011 = vmatmul.mubr.bf16.gmra.mrb[56].mxu0 %v2779_v40 }
 0x7ef   :  { %3020 = vmatprep.mubr.bf16.mxu0 %v7183_v0 }
 0x7f0   :  { %3391 = vmatpush1.bf16.msra.mxu0 %v7758_v38  ;;  %6372 = vmatpush3.bf16.msra.mxu1 %v6740_v1 }
 0x7f1   :  { %3392 = vmatprep.subr.bf16.mxu0 %v7762_v41  ;;  %6373 = vmatprep.subr.bf16.mxu1 %v7184_v42 }
 0x7f4   :  { %3393 = vmatpush1.bf16.msra.mxu0 %v7764_v46  ;;  %6374 = vmatpush3.bf16.msra.mxu1 %v6741_v3 }
 0x7f5   :  { %3394 = vmatprep.subr.bf16.mxu0 %v7768_v47  ;;  %6375 = vmatprep.subr.bf16.mxu1 %v7184_v42 }
 0x7f8   :  { %3395 = vmatpush1.bf16.msra.mxu0 %v7770_v48  ;;  %6376 = vmatpush3.bf16.msra.mxu1 %v6742_v63 }
 0x7f9   :  { %3396 = vmatprep.subr.bf16.mxu0 %v7773_v52  ;;  %6377 = vmatprep.subr.bf16.mxu1 %v7184_v42 }
 0x7fc   :  { %3397 = vmatpush1.bf16.msra.mxu0 %v7776_v57  ;;  %6378 = vmatpush3.bf16.msra.mxu1 %v6743_v4 }
 0x7fd   :  { %3658 = vmatprep.subr.bf16.mxu0 %v7732_v12  ;;  %6383 = vmatprep.subr.bf16.mxu1 %v7184_v42 }
 0x891   :  { %v2658_v29 = vpop.f32.mrb[44].mxu0  ;;  %v2699_v32 = vpop.f32.mrb[36].mxu1 }
 0x892   :  { %v2705_v13 = vadd.f32 %v2658_v29, %v2460_v7  ;;  %v2660_v43 = vpop.f32.mrb[45].mxu0  ;;  %v6337_v24 = vpop.f32.mrb[37].mxu1  ;;  %v2719_v23 = vadd.f32 %v7032_v20, %v2699_v32 }
 0x893   :  { %v2662_v54 = vpop.f32.mrb[46].mxu0  ;;  %v2702_v45 = vpop.f32.mrb[38].mxu1  ;;  %v2712_v5 = vadd.f32 %v2660_v43, %v2461_v49 }
 0x894   :  { %v5704_v60 = vmul.f32 -1.442695, %v2705_v13  ;;  %v2663_v62 = vpop.f32.mrb[47].mxu0  ;;  %v6338_v2 = vpop.f32.mrb[39].mxu1 }
 0x895   :  { %v5705_v10 = vmul.f32 -1.442695, %v2712_v5  ;;  %v2751_v5 = vmul.f32 0.70710677, %v7713_v33 }
 0x896   :  { %6906 = vpow2.f32 %v5704_v60 }
 0x897   :  { %6908 = vpow2.f32 %v5705_v10 }
 0x8a0   :  { %v6907_v14 = vpop.eup %6906 }
 0x8a1   :  { %v2709_v15 = vadd.f32 1.0, %v6907_v14  ;;  %v6909_v16 = vpop.eup %6908 }
 0x8a2   :  { %v2716_v17 = vadd.f32 1.0, %v6909_v16 }
 0x8a3   :  { %6910 = vrcp.f32 %v2709_v15 }
 0x8a4   :  { %6912 = vrcp.f32 %v2716_v17 }
 0x8ad   :  { %v6911_v26 = vpop.eup %6910 }
 0x8ae   :  { %v2720_v55 = vmul.f32 %v6911_v26, %v2719_v23  ;;  %v6913_v24 = vpop.eup %6912 }
 0x8af   :  { %v2723_v60 = vsub.f32 1.0, %v6913_v24  ;;  %v2725_v17 = vmul.f32 %v6913_v24, %v7713_v33  ;;  %v6750_v24 = vld [vmem:[#allocation11 + $0x98] ss:$12 sps:$4 sm:$0xff]  }
 0x8b0   :  { %v2721_v28 = vadd.f32 %v2720_v55, %v2462_v53 }
 0x8b1   :  { %v2992_v25 = vpop.f32.mrb[48].mxu0  ;;  %v6357_v30 = vpop.f32.mrb[40].mxu1 }
 0x8b2   :  { %6914 = vtanh.f32 %v2721_v28  ;;  %v2993_v18 = vadd.f32 %v2992_v25, %v7798_v56  ;;  %v3074_v40 = vadd.f32 %v6357_v30, %v7802_v58  ;;  %v2994_v51 = vpop.f32.mrb[49].mxu0  ;;  %v3065_v59 = vpop.f32.mrb[41].mxu1 }
 0x8b3   :  { %v2995_v9 = vadd.f32 %v2994_v51, %v7806_v27  ;;  %v3066_v61 = vadd.f32 %v3065_v59, %v7802_v58  ;;  %v2996_v21 = vpop.f32.mrb[50].mxu0  ;;  %v6358_v50 = vpop.f32.mrb[42].mxu1  ;;  %6916 = verf.f32 %v2751_v5 }
 0x8b4   :  { %v5976_v1 = vpack.c.bf16 %v3074_v40, %v3074_v40  ;;  %v2997_v8 = vadd.f32 %v2996_v21, %v7798_v56  ;;  %v3077_v11 = vadd.f32 %v6358_v50, %v7802_v58  ;;  %v2998_v3 = vpop.f32.mrb[51].mxu0  ;;  %v3068_v63 = vpop.f32.mrb[43].mxu1 }
 0x8b5   :  { %v5971_v4 = vpack.c.bf16 %v2995_v9, %v2993_v18  ;;  %v5972_v6 = vpack.c.bf16 %v3066_v61, %v3066_v61  ;;  %v2999_v7 = vadd.f32 %v2998_v3, %v7806_v27  ;;  %v3069_v29 = vadd.f32 %v3068_v63, %v7802_v58 }
 0x8b6   :  { %3205 = vst [vmem:[#allocation2 + $0x20] sm:$0xf] %v5976_v1  ;;  %v5978_v32 = vpack.c.bf16 %v3077_v11, %v3077_v11 }
 0x8b7   :  { %3200 = vst [vmem:[#allocation2] sm:$0xff] %v5971_v4  ;;  %3201 = vst [vmem:[#allocation2 + $0x8] sm:$0xf] %v5972_v6  ;;  %v5973_v13 = vpack.c.bf16 %v2999_v7, %v2997_v8  ;;  %v5974_v43 = vpack.c.bf16 %v3069_v29, %v3069_v29  ;;  %v2743_v8 = vmul.f32 0.5, %v7713_v33  ;;  %v6744_v33 = vld [vmem:[#allocation11 + $0x8] ss:$12 sps:$4 sm:$0xff]  }
 0x8b8   :  { %3207 = vst [vmem:[#allocation2 + $0x2c] sm:$0xf] %v5978_v32  ;;  %v6745_v7 = vld [vmem:[#allocation11 + $0x20] ss:$12 sps:$4 sm:$0xff]   ;;  %v6746_v29 = vld [vmem:[#allocation11 + $0x38] ss:$12 sps:$4 sm:$0xff]  }
 0x8b9   :  { %3202 = vst [vmem:[#allocation2 + $0xc] sm:$0xff] %v5973_v13  ;;  %3203 = vst [vmem:[#allocation2 + $0x14] sm:$0xf] %v5974_v43  ;;  %v3002_v49 = vpop.f32.mrb[52].mxu0  ;;  %v6747_v32 = vld [vmem:[#allocation11 + $0x50] ss:$12 sps:$4 sm:$0xff]  }
 0x8ba   :  { %v3003_v54 = vadd.f32 %v3002_v49, %v7798_v56  ;;  %v3004_v45 = vpop.f32.mrb[53].mxu0  ;;  %v6748_v13 = vld [vmem:[#allocation11 + $0x68] ss:$12 sps:$4 sm:$0xff]   ;;  %v6749_v43 = vld [vmem:[#allocation11 + $0x80] ss:$12 sps:$4 sm:$0xff]  }
 0x8bb   :  { %v3005_v62 = vadd.f32 %v3004_v45, %v7806_v27  ;;  %v3006_v2 = vpop.f32.mrb[54].mxu0  ;;  %v6751_v49 = vld [vmem:[#allocation11 + $0xb0] ss:$12 sps:$4 sm:$0xff]  }
 0x8bc   :  { %v6915_v10 = vpop.eup %6914  ;;  %v3007_v14 = vadd.f32 %v3006_v2, %v7798_v56  ;;  %v3008_v15 = vpop.f32.mrb[55].mxu0 }
 0x8bd   :  { %v2724_v16 = vmul.f32 %v6915_v10, %v2723_v60  ;;  %v5975_v19 = vpack.c.bf16 %v3005_v62, %v3003_v54  ;;  %v3009_v20 = vadd.f32 %v3008_v15, %v7806_v27  ;;  %v6917_v21 = vpop.eup %6916 }
 0x8be   :  { %v2767_v50 = vadd.f32 1.0, %v6917_v21 }
 0x8bf   :  { %v2726_v23 = vadd.f32 %v2725_v17, %v2724_v16  ;;  %3204 = vst [vmem:[#allocation2 + $0x18] sm:$0xff] %v5975_v19  ;;  %v5977_v26 = vpack.c.bf16 %v3009_v20, %v3007_v14 }
 0x8c0   :  { %v2775_v63 = vmul.f32 %v2767_v50, %v2743_v8 }
 0x8c1   :  { %3206 = vst [vmem:[#allocation2 + $0x24] sm:$0xff] %v5977_v26  ;;  %v3012_v53 = vpop.f32.mrb[56].mxu0  ;;  %v2752_v55 = vmul.f32 0.70710677, %v2726_v23  ;;  %v2744_v11 = vmul.f32 0.5, %v2726_v23 }
 0x8c2   :  { %v3013_v28 = vadd.f32 %v3012_v53, %v7798_v56  ;;  %v3014_v25 = vpop.f32.mrb[57].mxu0 }
 0x8c3   :  { %v3015_v30 = vadd.f32 %v3014_v25, %v7806_v27  ;;  %v3016_v18 = vpop.f32.mrb[58].mxu0  ;;  %6918 = verf.f32 %v2752_v55 }
 0x8c4   :  { %v3017_v40 = vadd.f32 %v3016_v18, %v7798_v56  ;;  %v3018_v51 = vpop.f32.mrb[59].mxu0 }
 0x8c5   :  { %v5979_v59 = vpack.c.bf16 %v3015_v30, %v3013_v28  ;;  %v3019_v9 = vadd.f32 %v3018_v51, %v7806_v27 }
 0x8c7   :  { %3208 = vst [vmem:[#allocation2 + $0x30] sm:$0xff] %v5979_v59  ;;  %v7826_v61 = vpack.c.bf16 %v3019_v9, %v3017_v40 }
 0x8c9   :  { %3210 = vst [vmem:[#allocation2 + $0x3c] sm:$0xff] %v7826_v61 }
 0x8cd   :  { %v6919_v1 = vpop.eup %6918 }
 0x8ce   :  { %v2768_v3 = vadd.f32 1.0, %v6919_v1 }
 0x8d0   :  { %v2776_v4 = vmul.f32 %v2768_v3, %v2744_v11 }
 0x8d2   :  { %v2780_v6 = vpack.c.bf16 %v2776_v4, %v2775_v63 }
 0x8d4   :  { %3021 = vmatmul.mubr.bf16.gmra.mrb[60].mxu0 %v2780_v6  ;;  %6360 = vmatmul.mubr.bf16.gmra.mrb[44].mxu1 %v2780_v6 }
 0x8d5   :  { %3414 = vmatprep.mubr.bf16.mxu0 %v7183_v0  ;;  %6379 = vmatprep.mubr.msk.bf16.mxu1 %vm7185_vm0, %v7184_v42 }
 0x8dc   :  { %3415 = vmatmul.mubr.bf16.vlgmr.msra.gmra.mrb[64].mxu0 %v7183_v0  ;;  %6380 = vmatmul.mubr.bf16.vlgmr.msra.gmra.mrb[48].mxu1 %v7183_v0 }
 0x8dd   :  { %3659 = vmatpush1.bf16.msra.mxu0 %v7734_v39  ;;  %3690 = vmatprep.mubr.bf16.mxu0 %v7183_v0 }
 0x8de   :  { %3660 = vmatprep.subr.bf16.mxu0 %v7738_v31  ;;  %6399 = vmatprep.mubr.msk.bf16.mxu1 %vm7185_vm0, %v7184_v42 }
 0x8df   :  { %6384 = vmatpush3.bf16.msra.mxu1 %v6744_v33 }
 0x8e0   :  { %6385 = vmatprep.subr.bf16.mxu1 %v7184_v42 }
 0x8e1   :  { %3661 = vmatpush1.bf16.msra.mxu0 %v7740_v44 }
 0x8e2   :  { %3662 = vmatprep.subr.bf16.mxu0 %v7744_v22 }
 0x8e3   :  { %6386 = vmatpush3.bf16.msra.mxu1 %v6745_v7 }
 0x8e4   :  { %6387 = vmatprep.subr.bf16.mxu1 %v7184_v42 }
 0x8e5   :  { %3663 = vmatpush1.bf16.msra.mxu0 %v7746_v36 }
 0x8e6   :  { %3664 = vmatprep.subr.bf16.mxu0 %v7750_v34 }
 0x8e7   :  { %6388 = vmatpush3.bf16.msra.mxu1 %v6746_v29  ;;  %v7876_v29 = vld [vmem:[%s8160_s8] ss:$0 sm:$0xff] }
 0x8e8   :  { %6389 = vmatprep.subr.bf16.mxu1 %v7184_v42 }
 0x8e9   :  { %3665 = vmatpush1.bf16.msra.mxu0 %v7752_v35 }
 0x8ea   :  { %3666 = vmatprep.subr.bf16.mxu0 %v7755_v37 }
 0x8eb   :  { %6390 = vmatpush3.bf16.msra.mxu1 %v6747_v32 }
 0x8ec   :  { %6391 = vmatprep.subr.bf16.mxu1 %v7184_v42 }
 0x8ed   :  { %3667 = vmatpush1.bf16.msra.mxu0 %v7758_v38 }
 0x8ee   :  { %3668 = vmatprep.subr.bf16.mxu0 %v7762_v41 }
 0x8ef   :  { %6392 = vmatpush3.bf16.msra.mxu1 %v6748_v13 }
 0x8f0   :  { %6393 = vmatprep.subr.bf16.mxu1 %v7184_v42 }
 0x8f1   :  { %3669 = vmatpush1.bf16.msra.mxu0 %v7764_v46 }
 0x8f2   :  { %3670 = vmatprep.subr.bf16.mxu0 %v7768_v47 }
 0x8f3   :  { %6394 = vmatpush3.bf16.msra.mxu1 %v6749_v43 }
 0x8f4   :  { %6395 = vmatprep.subr.bf16.mxu1 %v7184_v42 }
 0x8f5   :  { %3671 = vmatpush1.bf16.msra.mxu0 %v7770_v48 }
 0x8f6   :  { %3672 = vmatprep.subr.bf16.mxu0 %v7773_v52 }
 0x8f7   :  { %6396 = vmatpush3.bf16.msra.mxu1 %v6750_v24 }
 0x8f8   :  { %6397 = vmatprep.subr.bf16.mxu1 %v7184_v42 }
 0x8f9   :  { %3673 = vmatpush1.bf16.msra.mxu0 %v7776_v57 }
 0x8fa   :  { %3928 = vmatprep.subr.bf16.mxu0 %v7732_v12 }
 0x8fb   :  { %6398 = vmatpush3.bf16.msra.mxu1 %v6751_v49 }
 0x8fc   :  { %6403 = vmatprep.subr.bf16.mxu1 %v7184_v42 }
 0x9a7   :  { %v3022_v54 = vpop.f32.mrb[60].mxu0  ;;  %v6361_v45 = vpop.f32.mrb[44].mxu1 }
 0x9a8   :  { %v3023_v60 = vadd.f32 %v3022_v54, %v7798_v56  ;;  %v3090_v62 = vadd.f32 %v6361_v45, %v7802_v58  ;;  %v3024_v2 = vpop.f32.mrb[61].mxu0  ;;  %v3081_v5 = vpop.f32.mrb[45].mxu1 }
 0x9a9   :  { %v3025_v10 = vadd.f32 %v3024_v2, %v7806_v27  ;;  %v3082_v14 = vadd.f32 %v3081_v5, %v7802_v58  ;;  %v3026_v15 = vpop.f32.mrb[62].mxu0  ;;  %v6362_v16 = vpop.f32.mrb[46].mxu1 }
 0x9aa   :  { %v5984_v17 = vpack.c.bf16 %v3090_v62, %v3090_v62  ;;  %v3027_v19 = vadd.f32 %v3026_v15, %v7798_v56  ;;  %v3093_v20 = vadd.f32 %v6362_v16, %v7802_v58  ;;  %v3028_v23 = vpop.f32.mrb[63].mxu0  ;;  %v3084_v26 = vpop.f32.mrb[47].mxu1 }
 0x9ab   :  { %v7868_v53 = vpack.c.bf16 %v3025_v10, %v3023_v60  ;;  %v5980_v55 = vpack.c.bf16 %v3082_v14, %v3082_v14  ;;  %v3029_v28 = vadd.f32 %v3028_v23, %v7806_v27  ;;  %v3085_v25 = vadd.f32 %v3084_v26, %v7802_v58  ;;  %v6752_v26 = vld [vmem:[#allocation11 + $0x8] ss:$12 sps:$4 sm:$0xff]  }
 0x9ac   :  { %3213 = vst [vmem:[#allocation2 + $0x50] sm:$0xf] %v5984_v17  ;;  %v5986_v30 = vpack.c.bf16 %v3093_v20, %v3093_v20 }
 0x9ad   :  { %3212 = vst [vmem:[#allocation2 + $0x48] sm:$0xff] %v7868_v53  ;;  %3209 = vst [vmem:[#allocation2 + $0x38] sm:$0xf] %v5980_v55  ;;  %v5985_v18 = vpack.c.bf16 %v3029_v28, %v3027_v19  ;;  %v5982_v40 = vpack.c.bf16 %v3085_v25, %v3085_v25  ;;  %v6753_v55 = vld [vmem:[#allocation11 + $0x20] ss:$12 sps:$4 sm:$0xff]  }
 0x9ae   :  { %3215 = vst [vmem:[#allocation2 + $0x5c] sm:$0xf] %v5986_v30  ;;  %v6754_v28 = vld [vmem:[#allocation11 + $0x38] ss:$12 sps:$4 sm:$0xff]   ;;  %v6755_v25 = vld [vmem:[#allocation11 + $0x50] ss:$12 sps:$4 sm:$0xff]  }
 0x9af   :  { %3214 = vst [vmem:[#allocation2 + $0x54] sm:$0xff] %v5985_v18  ;;  %3211 = vst [vmem:[#allocation2 + $0x44] sm:$0xf] %v5982_v40  ;;  %v3219_v56 = vunpack.c.l.bf16 %v5985_v18  ;;  %v3416_v51 = vpop.f32.mrb[64].mxu0  ;;  %v3220_v59 = vunpack.c.h.bf16 %v5985_v18  ;;  %v3457_v9 = vpop.f32.mrb[48].mxu1 }
 0x9b0   :  { %v3418_v21 = vpop.f32.mrb[65].mxu0  ;;  %v6381_v50 = vpop.f32.mrb[49].mxu1  ;;  %v3483_v13 = vadd.f32 %v7876_v29, %v3457_v9  ;;  %v6756_v30 = vld [vmem:[#allocation11 + $0x68] ss:$12 sps:$4 sm:$0xff]   ;;  %v6757_v18 = vld [vmem:[#allocation11 + $0x80] ss:$12 sps:$4 sm:$0xff]   ;;  %v3495_v9 = vunpack.c.h.bf16 %v7868_v53 }
 0x9b1   :  { %v3463_v1 = vadd.f32 %v3416_v51, %v3219_v56  ;;  %v3470_v27 = vadd.f32 %v3418_v21, %v3220_v59  ;;  %v3420_v8 = vpop.f32.mrb[66].mxu0  ;;  %v3460_v58 = vpop.f32.mrb[50].mxu1  ;;  %v6759_v40 = vld [vmem:[#allocation11 + $0xb0] ss:$12 sps:$4 sm:$0xff]   ;;  %v3494_v56 = vunpack.c.l.bf16 %v7868_v53 }
 0x9b2   :  { %v3421_v11 = vpop.f32.mrb[67].mxu0  ;;  %v6382_v3 = vpop.f32.mrb[51].mxu1 }
 0x9b3   :  { %v5770_v63 = vmul.f32 -1.442695, %v3463_v1  ;;  %v5771_v4 = vmul.f32 -1.442695, %v3470_v27 }
 0x9b5   :  { %6920 = vpow2.f32 %v5770_v63  ;;  %v7879_v43 = vld [vmem:[#allocation2 + $0x50] ss:$12 sps:$4 sm:$0xff]  }
 0x9b6   :  { %6922 = vpow2.f32 %v5771_v4  ;;  %v3221_v49 = vunpack.c.h.bf16 %v7879_v43 }
 0x9bf   :  { %v6921_v6 = vpop.eup %6920 }
 0x9c0   :  { %v3467_v33 = vadd.f32 1.0, %v6921_v6  ;;  %v6923_v7 = vpop.eup %6922 }
 0x9c1   :  { %v3474_v32 = vadd.f32 1.0, %v6923_v7 }
 0x9c2   :  { %6924 = vrcp.f32 %v3467_v33 }
 0x9c3   :  { %6926 = vrcp.f32 %v3474_v32 }
 0x9cc   :  { %v6925_v24 = vpop.eup %6924 }
 0x9cd   :  { %v3484_v54 = vmul.f32 %v6925_v24, %v3483_v13  ;;  %v6927_v60 = vpop.eup %6926  ;;  %v3496_v24 = vunpack.c.l.bf16 %v7879_v43 }
 0x9ce   :  { %v3487_v62 = vsub.f32 1.0, %v6927_v60  ;;  %v3489_v10 = vmul.f32 0.0, %v6927_v60 }
 0x9cf   :  { %v3485_v45 = vadd.f32 %v3484_v54, %v3221_v49 }
 0x9d1   :  { %6928 = vtanh.f32 %v3485_v45 }
 0x9db   :  { %v6929_v2 = vpop.eup %6928 }
 0x9dc   :  { %v3488_v5 = vmul.f32 %v6929_v2, %v3487_v62 }
 0x9de   :  { %v7882_v14 = vadd.f32 %v3489_v10, %v3488_v5 }
 0x9e0   :  { %v3497_v15 = vpack.c.bf16 %v7882_v14, %v7882_v14  ;;  %v5405_v16 = vmul.f32 0.70710677, %v7882_v14  ;;  %v5397_v19 = vmul.f32 0.5, %v7882_v14 }
 0x9e2   :  { %3691 = vmatmul.mubr.bf16.vlgmr.msra.gmra.mrb[68].mxu0 %v3497_v15  ;;  %6930 = verf.f32 %v5405_v16  ;;  %6400 = vmatmul.mubr.bf16.vlgmr.msra.gmra.mrb[52].mxu1 %v3497_v15 }
 0x9e3   :  { %3929 = vmatpush1.bf16.msra.mxu0 %v7734_v39  ;;  %3960 = vmatprep.mubr.bf16.mxu0 %v7183_v0 }
 0x9e4   :  { %3930 = vmatprep.subr.bf16.mxu0 %v7738_v31  ;;  %6419 = vmatprep.mubr.msk.bf16.mxu1 %vm7185_vm0, %v7184_v42 }
 0x9e5   :  { %6404 = vmatpush3.bf16.msra.mxu1 %v6752_v26 }
 0x9e6   :  { %6405 = vmatprep.subr.bf16.mxu1 %v7184_v42 }
 0x9e7   :  { %3931 = vmatpush1.bf16.msra.mxu0 %v7740_v44 }
 0x9e8   :  { %3932 = vmatprep.subr.bf16.mxu0 %v7744_v22 }
 0x9e9   :  { %6406 = vmatpush3.bf16.msra.mxu1 %v6753_v55 }
 0x9ea   :  { %6407 = vmatprep.subr.bf16.mxu1 %v7184_v42 }
 0x9eb   :  { %3933 = vmatpush1.bf16.msra.mxu0 %v7746_v36 }
 0x9ec   :  { %v6931_v17 = vpop.eup %6930  ;;  %3934 = vmatprep.subr.bf16.mxu0 %v7750_v34 }
 0x9ed   :  { %v5421_v20 = vadd.f32 1.0, %v6931_v17  ;;  %6408 = vmatpush3.bf16.msra.mxu1 %v6754_v28 }
 0x9ee   :  { %6409 = vmatprep.subr.bf16.mxu1 %v7184_v42 }
 0x9ef   :  { %v5429_v23 = vmul.f32 %v5421_v20, %v5397_v19  ;;  %3935 = vmatpush1.bf16.msra.mxu0 %v7752_v35 }
 0x9f0   :  { %3936 = vmatprep.subr.bf16.mxu0 %v7755_v37 }
 0x9f1   :  { %5437 = vst [vmem:[#allocation12 + $0x38] sm:$0xff] %v5429_v23  ;;  %6410 = vmatpush3.bf16.msra.mxu1 %v6755_v25 }
 0x9f2   :  { %6411 = vmatprep.subr.bf16.mxu1 %v7184_v42 }
 0x9f3   :  { %3937 = vmatpush1.bf16.msra.mxu0 %v7758_v38 }
 0x9f4   :  { %3938 = vmatprep.subr.bf16.mxu0 %v7762_v41 }
 0x9f5   :  { %6412 = vmatpush3.bf16.msra.mxu1 %v6756_v30 }
 0x9f6   :  { %6413 = vmatprep.subr.bf16.mxu1 %v7184_v42 }
 0x9f7   :  { %3939 = vmatpush1.bf16.msra.mxu0 %v7764_v46 }
 0x9f8   :  { %3940 = vmatprep.subr.bf16.mxu0 %v7768_v47 }
 0x9f9   :  { %6414 = vmatpush3.bf16.msra.mxu1 %v6757_v18 }
 0x9fa   :  { %6415 = vmatprep.subr.bf16.mxu1 %v7184_v42 }
 0x9fb   :  { %3941 = vmatpush1.bf16.msra.mxu0 %v7770_v48 }
 0x9fc   :  { %3942 = vmatprep.subr.bf16.mxu0 %v7773_v52 }
 0x9ff   :  { %3943 = vmatpush1.bf16.msra.mxu0 %v7776_v57 }
 0xa00   :  { %4198 = vmatprep.subr.bf16.mxu0 %v7732_v12  ;;  %v6758_v12 = vld [vmem:[#allocation11 + $0x98] ss:$12 sps:$4 sm:$0xff]  }
 0xa01   :  { %6416 = vmatpush3.bf16.msra.mxu1 %v6758_v12 }
 0xa02   :  { %6417 = vmatprep.subr.bf16.mxu1 %v7184_v42 }
 0xa05   :  { %6418 = vmatpush3.bf16.msra.mxu1 %v6759_v40 }
 0xa06   :  { %6423 = vmatprep.subr.bf16.mxu1 %v7184_v42 }
 0xab5   :  { %v3692_v51 = vpop.f32.mrb[68].mxu0  ;;  %v3733_v59 = vpop.f32.mrb[52].mxu1 }
 0xab6   :  { %v3739_v21 = vadd.f32 %v3692_v51, %v3494_v56  ;;  %v3694_v50 = vpop.f32.mrb[69].mxu0  ;;  %v6401_v1 = vpop.f32.mrb[53].mxu1  ;;  %v3753_v13 = vadd.f32 %v7876_v29, %v3733_v59  ;;  %v7954_v51 = vld [vmem:[#allocation2 + $0x38] ss:$12 sps:$4 sm:$0xff]  }
 0xab7   :  { %v3746_v27 = vadd.f32 %v3694_v50, %v3495_v9  ;;  %v3696_v8 = vpop.f32.mrb[70].mxu0  ;;  %v3736_v58 = vpop.f32.mrb[54].mxu1  ;;  %v3766_v9 = vunpack.c.h.bf16 %v7954_v51 }
 0xab8   :  { %v5797_v11 = vmul.f32 -1.442695, %v3739_v21  ;;  %v3697_v3 = vpop.f32.mrb[71].mxu0  ;;  %v6402_v63 = vpop.f32.mrb[55].mxu1 }
 0xab9   :  { %v5798_v4 = vmul.f32 -1.442695, %v3746_v27 }
 0xaba   :  { %6932 = vpow2.f32 %v5797_v11 }
 0xabb   :  { %6934 = vpow2.f32 %v5798_v4 }
 0xac4   :  { %v6933_v6 = vpop.eup %6932 }
 0xac5   :  { %v3743_v33 = vadd.f32 1.0, %v6933_v6  ;;  %v6935_v7 = vpop.eup %6934 }
 0xac6   :  { %v3750_v32 = vadd.f32 1.0, %v6935_v7 }
 0xac7   :  { %6936 = vrcp.f32 %v3743_v33 }
 0xac8   :  { %6938 = vrcp.f32 %v3750_v32 }
 0xad1   :  { %v6937_v53 = vpop.eup %6936 }
 0xad2   :  { %v3754_v49 = vmul.f32 %v6937_v53, %v3753_v13  ;;  %v6939_v45 = vpop.eup %6938  ;;  %v7968_v13 = vld [vmem:[#allocation11 + $0x4] ss:$12 sps:$4 sm:$0xff]   ;;  %v7970_v53 = vld [vmem:[#allocation11] ss:$12 sps:$4 sm:$0xff]  }
 0xad3   :  { %v3757_v60 = vsub.f32 1.0, %v6939_v45  ;;  %v3759_v5 = vmul.f32 %v6939_v45, %v7882_v14  ;;  %v6775_v45 = vld [vmem:[#allocation11 + $0x20] ss:$12 sps:$4 sm:$0xff]  }
 0xad4   :  { %v3755_v54 = vadd.f32 %v3754_v49, %v3496_v24  ;;  %v6771_v24 = vld [vmem:[#allocation11 + $0x8] ss:$12 sps:$4 sm:$0xff]  }
 0xad5   :  { %v7974_v49 = vld [vmem:[#allocation11 + $0x1c] ss:$12 sps:$4 sm:$0xff]  }
 0xad6   :  { %6940 = vtanh.f32 %v3755_v54  ;;  %v7977_v54 = vld [vmem:[#allocation11 + $0x18] ss:$12 sps:$4 sm:$0xff]  }
 0xae0   :  { %v6941_v62 = vpop.eup %6940 }
 0xae1   :  { %v3758_v2 = vmul.f32 %v6941_v62, %v3757_v60  ;;  %v7981_v60 = vld [vmem:[#allocation11 + $0x34] ss:$12 sps:$4 sm:$0xff]   ;;  %v7984_v62 = vld [vmem:[#allocation11 + $0x30] ss:$12 sps:$4 sm:$0xff]  }
 0xae3   :  { %v7920_v10 = vadd.f32 %v3759_v5, %v3758_v2  ;;  %v6779_v2 = vld [vmem:[#allocation11 + $0x38] ss:$12 sps:$4 sm:$0xff]  }
 0xae4   :  { %v7988_v5 = vld [vmem:[#allocation11 + $0x4c] ss:$12 sps:$4 sm:$0xff]  }
 0xae5   :  { %v3767_v15 = vpack.c.bf16 %v7920_v10, %v7920_v10  ;;  %v5404_v16 = vmul.f32 0.70710677, %v7920_v10  ;;  %v5396_v14 = vmul.f32 0.5, %v7920_v10 }
 0xae7   :  { %3961 = vmatmul.mubr.bf16.vlgmr.msra.gmra.mrb[72].mxu0 %v3767_v15  ;;  %6942 = verf.f32 %v5404_v16  ;;  %6420 = vmatmul.mubr.bf16.vlgmr.msra.gmra.mrb[56].mxu1 %v3767_v15  ;;  %v6783_v15 = vld [vmem:[#allocation11 + $0x50] ss:$12 sps:$4 sm:$0xff]   ;;  %v7995_v16 = vld [vmem:[#allocation11 + $0x60] ss:$12 sps:$4 sm:$0xff]  }
 0xae8   :  { %4199 = vmatpush1.bf16.msra.mxu0 %v7734_v39  ;;  %4230 = vmatprep.mubr.bf16.mxu0 %v7183_v0 }
 0xae9   :  { %4200 = vmatprep.subr.bf16.mxu0 %v7738_v31  ;;  %6439 = vmatprep.mubr.msk.bf16.mxu1 %vm7185_vm0, %v7184_v42  ;;  %v6760_v31 = vld [vmem:[#allocation11 + $0x8] ss:$12 sps:$4 sm:$0xff]  }
 0xaea   :  { %6424 = vmatpush3.bf16.msra.mxu1 %v6760_v31  ;;  %v6791_v31 = vld [vmem:[#allocation11 + $0x80] ss:$12 sps:$4 sm:$0xff]  }
 0xaeb   :  { %6425 = vmatprep.subr.bf16.mxu1 %v7184_v42 }
 0xaec   :  { %4201 = vmatpush1.bf16.msra.mxu0 %v7740_v44  ;;  %v6761_v44 = vld [vmem:[#allocation11 + $0x20] ss:$12 sps:$4 sm:$0xff]  }
 0xaed   :  { %4202 = vmatprep.subr.bf16.mxu0 %v7744_v22  ;;  %v6762_v22 = vld [vmem:[#allocation11 + $0x38] ss:$12 sps:$4 sm:$0xff]  }
 0xaee   :  { %6426 = vmatpush3.bf16.msra.mxu1 %v6761_v44  ;;  %v8008_v44 = vld [vmem:[#allocation11 + $0x94] ss:$12 sps:$4 sm:$0xff]  }
 0xaef   :  { %6427 = vmatprep.subr.bf16.mxu1 %v7184_v42 }
 0xaf0   :  { %4203 = vmatpush1.bf16.msra.mxu0 %v7746_v36  ;;  %v6763_v36 = vld [vmem:[#allocation11 + $0x50] ss:$12 sps:$4 sm:$0xff]  }
 0xaf1   :  { %v6943_v43 = vpop.eup %6942  ;;  %4204 = vmatprep.subr.bf16.mxu0 %v7750_v34  ;;  %v6764_v34 = vld [vmem:[#allocation11 + $0x68] ss:$12 sps:$4 sm:$0xff]  }
 0xaf2   :  { %v5420_v17 = vadd.f32 1.0, %v6943_v43  ;;  %6428 = vmatpush3.bf16.msra.mxu1 %v6762_v22  ;;  %v7997_v43 = vld [vmem:[#allocation11 + $0x64] ss:$12 sps:$4 sm:$0xff]  }
 0xaf3   :  { %6429 = vmatprep.subr.bf16.mxu1 %v7184_v42  ;;  %v8011_v22 = vld [vmem:[#allocation11 + $0x90] ss:$12 sps:$4 sm:$0xff]  }
 0xaf4   :  { %v5428_v39 = vmul.f32 %v5420_v17, %v5396_v14  ;;  %4205 = vmatpush1.bf16.msra.mxu0 %v7752_v35  ;;  %v6765_v35 = vld [vmem:[#allocation11 + $0x80] ss:$12 sps:$4 sm:$0xff]   ;;  %v6787_v14 = vld [vmem:[#allocation11 + $0x68] ss:$12 sps:$4 sm:$0xff]  }
 0xaf5   :  { %4206 = vmatprep.subr.bf16.mxu0 %v7755_v37  ;;  %v6766_v37 = vld [vmem:[#allocation11 + $0x98] ss:$12 sps:$4 sm:$0xff]   ;;  %v8000_v17 = vld [vmem:[#allocation11 + $0x7c] ss:$12 sps:$4 sm:$0xff]  }
 0xaf6   :  { %5436 = vst [vmem:[#allocation12 + $0x30] sm:$0xff] %v5428_v39  ;;  %6430 = vmatpush3.bf16.msra.mxu1 %v6763_v36  ;;  %v8004_v39 = vld [vmem:[#allocation11 + $0x78] ss:$12 sps:$4 sm:$0xff]  }
 0xaf7   :  { %6431 = vmatprep.subr.bf16.mxu1 %v7184_v42  ;;  %v6795_v36 = vld [vmem:[#allocation11 + $0x98] ss:$12 sps:$4 sm:$0xff]  }
 0xaf8   :  { %4207 = vmatpush1.bf16.msra.mxu0 %v7758_v38  ;;  %v6767_v38 = vld [vmem:[#allocation11 + $0xb0] ss:$12 sps:$4 sm:$0xff]  }
 0xaf9   :  { %4208 = vmatprep.subr.bf16.mxu0 %v7762_v41  ;;  %v3764_v41 = vunpack.c.l.bf16 %v7826_v61 }
 0xafa   :  { %6432 = vmatpush3.bf16.msra.mxu1 %v6764_v34  ;;  %v8015_v34 = vld [vmem:[#allocation11 + $0xac] ss:$12 sps:$4 sm:$0xff]  }
 0xafb   :  { %6433 = vmatprep.subr.bf16.mxu1 %v7184_v42 }
 0xafc   :  { %4209 = vmatpush1.bf16.msra.mxu0 %v7764_v46 }
 0xafd   :  { %4210 = vmatprep.subr.bf16.mxu0 %v7768_v47 }
 0xafe   :  { %6434 = vmatpush3.bf16.msra.mxu1 %v6765_v35  ;;  %v8018_v35 = vld [vmem:[#allocation11 + $0xa8] ss:$12 sps:$4 sm:$0xff]  }
 0xaff   :  { %6435 = vmatprep.subr.bf16.mxu1 %v7184_v42 }
 0xb00   :  { %4211 = vmatpush1.bf16.msra.mxu0 %v7770_v48  ;;  %v3765_v48 = vunpack.c.h.bf16 %v7826_v61 }
 0xb01   :  { %4212 = vmatprep.subr.bf16.mxu0 %v7773_v52 }
 0xb02   :  { %6436 = vmatpush3.bf16.msra.mxu1 %v6766_v37  ;;  %v6799_v37 = vld [vmem:[#allocation11 + $0xb0] ss:$12 sps:$4 sm:$0xff]  }
 0xb03   :  { %6437 = vmatprep.subr.bf16.mxu1 %v7184_v42 }
 0xb04   :  { %4213 = vmatpush1.bf16.msra.mxu0 %v7776_v57 }
 0xb05   :  { %4468 = vmatprep.subr.bf16.mxu0 %v7968_v13 }
 0xb06   :  { %6438 = vmatpush3.bf16.msra.mxu1 %v6767_v38  ;;  %v4032_v38 = vld [vmem:[#allocation2 + $0x30] sm:$0xff] }
 0xb07   :  { %6443 = vmatprep.subr.bf16.mxu1 %v7184_v42 }
 0xbba   :  { %v3962_v46 = vpop.f32.mrb[72].mxu0  ;;  %v4003_v47 = vpop.f32.mrb[56].mxu1 }
 0xbbb   :  { %v4009_v52 = vadd.f32 %v3962_v46, %v3764_v41  ;;  %v3964_v57 = vpop.f32.mrb[73].mxu0  ;;  %v6421_v19 = vpop.f32.mrb[57].mxu1  ;;  %v4023_v61 = vadd.f32 %v7876_v29, %v4003_v47  ;;  %v4034_v41 = vunpack.c.l.bf16 %v4032_v38 }
 0xbbc   :  { %v4016_v20 = vadd.f32 %v3964_v57, %v3765_v48  ;;  %v3966_v23 = vpop.f32.mrb[74].mxu0  ;;  %v4006_v26 = vpop.f32.mrb[58].mxu1  ;;  %v4035_v19 = vunpack.c.h.bf16 %v4032_v38 }
 0xbbd   :  { %v5823_v55 = vmul.f32 -1.442695, %v4009_v52  ;;  %v3967_v28 = vpop.f32.mrb[75].mxu0  ;;  %v6422_v25 = vpop.f32.mrb[59].mxu1 }
 0xbbe   :  { %v5824_v30 = vmul.f32 -1.442695, %v4016_v20 }
 0xbbf   :  { %6944 = vpow2.f32 %v5823_v55 }
 0xbc0   :  { %6946 = vpow2.f32 %v5824_v30 }
 0xbc9   :  { %v6945_v18 = vpop.eup %6944 }
 0xbca   :  { %v4013_v12 = vadd.f32 1.0, %v6945_v18  ;;  %v6947_v40 = vpop.eup %6946 }
 0xbcb   :  { %v4020_v56 = vadd.f32 1.0, %v6947_v40 }
 0xbcc   :  { %6948 = vrcp.f32 %v4013_v12 }
 0xbcd   :  { %6950 = vrcp.f32 %v4020_v56 }
 0xbd6   :  { %v6949_v59 = vpop.eup %6948 }
 0xbd7   :  { %v4024_v21 = vmul.f32 %v6949_v59, %v4023_v61  ;;  %v6951_v1 = vpop.eup %6950 }
 0xbd8   :  { %v4027_v27 = vsub.f32 1.0, %v6951_v1  ;;  %v4029_v11 = vmul.f32 %v6951_v1, %v7920_v10  ;;  %v7991_v10 = vld [vmem:[#allocation11 + $0x48] ss:$12 sps:$4 sm:$0xff]  }
 0xbd9   :  { %v4025_v50 = vadd.f32 %v4024_v21, %v3766_v9  ;;  %v4036_v9 = vunpack.c.l.bf16 %v7954_v51 }
 0xbdb   :  { %6952 = vtanh.f32 %v4025_v50 }
 0xbe5   :  { %v6953_v8 = vpop.eup %6952 }
 0xbe6   :  { %v4028_v58 = vmul.f32 %v6953_v8, %v4027_v27 }
 0xbe8   :  { %v7959_v3 = vadd.f32 %v4029_v11, %v4028_v58 }
 0xbea   :  { %v4037_v63 = vpack.c.bf16 %v7959_v3, %v7959_v3  ;;  %v5403_v4 = vmul.f32 0.70710677, %v7959_v3  ;;  %v5395_v33 = vmul.f32 0.5, %v7959_v3 }
 0xbec   :  { %4231 = vmatmul.mubr.bf16.vlgmr.msra.gmra.mrb[76].mxu0 %v4037_v63  ;;  %6954 = verf.f32 %v5403_v4  ;;  %6440 = vmatmul.mubr.bf16.vlgmr.msra.gmra.mrb[60].mxu1 %v4037_v63 }
 0xbed   :  { %4500 = vmatprep.mubr.bf16.mxu0 %v7183_v0  ;;  %6459 = vmatprep.mubr.msk.bf16.mxu1 %vm7185_vm0, %v7184_v42 }
 0xbee   :  { %4469 = vmatpush1.bf16.msra.mxu0 %v7970_v53  ;;  %6444 = vmatpush3.bf16.msra.mxu1 %v6771_v24  ;;  %v6801_v24 = vld [vmem:[#allocation11 + $0x20] ss:$12 sps:$4 sm:$0xff]  }
 0xbef   :  { %6445 = vmatprep.subr.bf16.mxu1 %v7184_v42  ;;  %4470 = vmatprep.subr.bf16.mxu0 %v7974_v49 }
 0xbf2   :  { %4471 = vmatpush1.bf16.msra.mxu0 %v7977_v54  ;;  %6446 = vmatpush3.bf16.msra.mxu1 %v6775_v45  ;;  %v6802_v45 = vld [vmem:[#allocation11 + $0x38] ss:$12 sps:$4 sm:$0xff]  }
 0xbf3   :  { %6447 = vmatprep.subr.bf16.mxu1 %v7184_v42  ;;  %4472 = vmatprep.subr.bf16.mxu0 %v7981_v60 }
 0xbf6   :  { %v6955_v6 = vpop.eup %6954  ;;  %4473 = vmatpush1.bf16.msra.mxu0 %v7984_v62  ;;  %6448 = vmatpush3.bf16.msra.mxu1 %v6779_v2  ;;  %v6803_v2 = vld [vmem:[#allocation11 + $0x50] ss:$12 sps:$4 sm:$0xff]  }
 0xbf7   :  { %v5419_v7 = vadd.f32 1.0, %v6955_v6  ;;  %6449 = vmatprep.subr.bf16.mxu1 %v7184_v42  ;;  %4474 = vmatprep.subr.bf16.mxu0 %v7988_v5 }
 0xbf9   :  { %v5427_v32 = vmul.f32 %v5419_v7, %v5395_v33 }
 0xbfa   :  { %4475 = vmatpush1.bf16.msra.mxu0 %v7991_v10  ;;  %6450 = vmatpush3.bf16.msra.mxu1 %v6783_v15  ;;  %v6804_v15 = vld [vmem:[#allocation11 + $0x68] ss:$12 sps:$4 sm:$0xff]  }
 0xbfb   :  { %5435 = vst [vmem:[#allocation12 + $0x28] sm:$0xff] %v5427_v32  ;;  %6451 = vmatprep.subr.bf16.mxu1 %v7184_v42  ;;  %4476 = vmatprep.subr.bf16.mxu0 %v7997_v43  ;;  %v6800_v32 = vld [vmem:[#allocation11 + $0x8] ss:$12 sps:$4 sm:$0xff]  }
 0xbfe   :  { %4477 = vmatpush1.bf16.msra.mxu0 %v7995_v16  ;;  %6452 = vmatpush3.bf16.msra.mxu1 %v6787_v14  ;;  %v6805_v14 = vld [vmem:[#allocation11 + $0x80] ss:$12 sps:$4 sm:$0xff]  }
 0xbff   :  { %4478 = vmatprep.subr.bf16.mxu0 %v8000_v17  ;;  %6453 = vmatprep.subr.bf16.mxu1 %v7184_v42 }
 0xc02   :  { %4479 = vmatpush1.bf16.msra.mxu0 %v8004_v39  ;;  %6454 = vmatpush3.bf16.msra.mxu1 %v6791_v31  ;;  %v6806_v31 = vld [vmem:[#allocation11 + $0x98] ss:$12 sps:$4 sm:$0xff]  }
 0xc03   :  { %4480 = vmatprep.subr.bf16.mxu0 %v8008_v44  ;;  %6455 = vmatprep.subr.bf16.mxu1 %v7184_v42 }
 0xc06   :  { %4481 = vmatpush1.bf16.msra.mxu0 %v8011_v22  ;;  %6456 = vmatpush3.bf16.msra.mxu1 %v6795_v36  ;;  %v6807_v36 = vld [vmem:[#allocation11 + $0xb0] ss:$12 sps:$4 sm:$0xff]  }
 0xc07   :  { %4482 = vmatprep.subr.bf16.mxu0 %v8015_v34  ;;  %6457 = vmatprep.subr.bf16.mxu1 %v7184_v42 }
 0xc0a   :  { %4483 = vmatpush1.bf16.msra.mxu0 %v8018_v35  ;;  %6458 = vmatpush3.bf16.msra.mxu1 %v6799_v37  ;;  %v4302_v37 = vld [vmem:[#allocation2 + $0x24] sm:$0xff] }
 0xc0b   :  { %4738 = vmatprep.subr.bf16.mxu0 %v7968_v13  ;;  %6463 = vmatprep.subr.bf16.mxu1 %v7184_v42  ;;  %v4304_v38 = vunpack.c.l.bf16 %v4302_v37 }
 0xcbf   :  { %v4232_v46 = vpop.f32.mrb[76].mxu0  ;;  %v4273_v47 = vpop.f32.mrb[60].mxu1 }
 0xcc0   :  { %v4279_v48 = vadd.f32 %v4232_v46, %v4034_v41  ;;  %v4234_v52 = vpop.f32.mrb[77].mxu0  ;;  %v6441_v57 = vpop.f32.mrb[61].mxu1  ;;  %v4293_v61 = vadd.f32 %v7876_v29, %v4273_v47 }
 0xcc1   :  { %v4236_v20 = vpop.f32.mrb[78].mxu0  ;;  %v4276_v23 = vpop.f32.mrb[62].mxu1  ;;  %v4286_v25 = vadd.f32 %v4234_v52, %v4035_v19  ;;  %v4305_v57 = vunpack.c.h.bf16 %v4302_v37 }
 0xcc2   :  { %v5849_v26 = vmul.f32 -1.442695, %v4279_v48  ;;  %v4237_v55 = vpop.f32.mrb[79].mxu0  ;;  %v6442_v28 = vpop.f32.mrb[63].mxu1 }
 0xcc3   :  { %v5850_v30 = vmul.f32 -1.442695, %v4286_v25 }
 0xcc4   :  { %6956 = vpow2.f32 %v5849_v26 }
 0xcc5   :  { %6958 = vpow2.f32 %v5850_v30 }
 0xcce   :  { %v6957_v18 = vpop.eup %6956 }
 0xccf   :  { %v4283_v12 = vadd.f32 1.0, %v6957_v18  ;;  %v6959_v40 = vpop.eup %6958 }
 0xcd0   :  { %v4290_v56 = vadd.f32 1.0, %v6959_v40 }
 0xcd1   :  { %6960 = vrcp.f32 %v4283_v12 }
 0xcd2   :  { %6962 = vrcp.f32 %v4290_v56  ;;  %v8061_v56 = vld [vmem:[#allocation2 + $0x20] ss:$12 sps:$4 sm:$0xff]  }
 0xcdb   :  { %v6961_v59 = vpop.eup %6960 }
 0xcdc   :  { %v4294_v21 = vmul.f32 %v6961_v59, %v4293_v61  ;;  %v6963_v1 = vpop.eup %6962 }
 0xcdd   :  { %v4297_v27 = vsub.f32 1.0, %v6963_v1  ;;  %v4299_v11 = vmul.f32 %v6963_v1, %v7959_v3 }
 0xcde   :  { %v4295_v50 = vadd.f32 %v4294_v21, %v4036_v9  ;;  %v4306_v9 = vunpack.c.h.bf16 %v8061_v56 }
 0xce0   :  { %6964 = vtanh.f32 %v4295_v50 }
 0xcea   :  { %v6965_v8 = vpop.eup %6964 }
 0xceb   :  { %v4298_v58 = vmul.f32 %v6965_v8, %v4297_v27 }
 0xced   :  { %v8028_v63 = vadd.f32 %v4299_v11, %v4298_v58 }
 0xcef   :  { %v4307_v4 = vpack.c.bf16 %v8028_v63, %v8028_v63  ;;  %v5402_v6 = vmul.f32 0.70710677, %v8028_v63  ;;  %v5394_v3 = vmul.f32 0.5, %v8028_v63 }
 0xcf1   :  { %4501 = vmatmul.mubr.bf16.vlgmr.msra.gmra.mrb[80].mxu0 %v4307_v4  ;;  %6966 = verf.f32 %v5402_v6  ;;  %6460 = vmatmul.mubr.bf16.vlgmr.msra.gmra.mrb[64].mxu1 %v4307_v4 }
 0xcf2   :  { %4739 = vmatpush1.bf16.msra.mxu0 %v7970_v53  ;;  %4770 = vmatprep.mubr.bf16.mxu0 %v7183_v0 }
 0xcf3   :  { %4740 = vmatprep.subr.bf16.mxu0 %v7974_v49  ;;  %6479 = vmatprep.mubr.msk.bf16.mxu1 %vm7185_vm0, %v7184_v42 }
 0xcf4   :  { %6464 = vmatpush3.bf16.msra.mxu1 %v6800_v32  ;;  %v6808_v32 = vld [vmem:[#allocation11 + $0x8] ss:$12 sps:$4 sm:$0xff]  }
 0xcf5   :  { %6465 = vmatprep.subr.bf16.mxu1 %v7184_v42 }
 0xcf6   :  { %4741 = vmatpush1.bf16.msra.mxu0 %v7977_v54 }
 0xcf7   :  { %4742 = vmatprep.subr.bf16.mxu0 %v7981_v60 }
 0xcf8   :  { %6466 = vmatpush3.bf16.msra.mxu1 %v6801_v24  ;;  %v6809_v24 = vld [vmem:[#allocation11 + $0x20] ss:$12 sps:$4 sm:$0xff]  }
 0xcf9   :  { %6467 = vmatprep.subr.bf16.mxu1 %v7184_v42 }
 0xcfa   :  { %4743 = vmatpush1.bf16.msra.mxu0 %v7984_v62 }
 0xcfb   :  { %v6967_v51 = vpop.eup %6966  ;;  %4744 = vmatprep.subr.bf16.mxu0 %v7988_v5 }
 0xcfc   :  { %v5418_v33 = vadd.f32 1.0, %v6967_v51  ;;  %6468 = vmatpush3.bf16.msra.mxu1 %v6802_v45  ;;  %v6810_v45 = vld [vmem:[#allocation11 + $0x38] ss:$12 sps:$4 sm:$0xff]  }
 0xcfd   :  { %6469 = vmatprep.subr.bf16.mxu1 %v7184_v42 }
 0xcfe   :  { %v5426_v7 = vmul.f32 %v5418_v33, %v5394_v3  ;;  %4745 = vmatpush1.bf16.msra.mxu0 %v7991_v10 }
 0xcff   :  { %4746 = vmatprep.subr.bf16.mxu0 %v7997_v43 }
 0xd00   :  { %5434 = vst [vmem:[#allocation12 + $0x20] sm:$0xff] %v5426_v7  ;;  %6470 = vmatpush3.bf16.msra.mxu1 %v6803_v2  ;;  %v6811_v2 = vld [vmem:[#allocation11 + $0x50] ss:$12 sps:$4 sm:$0xff]  }
 0xd01   :  { %6471 = vmatprep.subr.bf16.mxu1 %v7184_v42 }
 0xd02   :  { %4747 = vmatpush1.bf16.msra.mxu0 %v7995_v16 }
 0xd03   :  { %4748 = vmatprep.subr.bf16.mxu0 %v8000_v17 }
 0xd04   :  { %6472 = vmatpush3.bf16.msra.mxu1 %v6804_v15  ;;  %v6812_v15 = vld [vmem:[#allocation11 + $0x68] ss:$12 sps:$4 sm:$0xff]  }
 0xd05   :  { %6473 = vmatprep.subr.bf16.mxu1 %v7184_v42 }
 0xd06   :  { %4749 = vmatpush1.bf16.msra.mxu0 %v8004_v39 }
 0xd07   :  { %4750 = vmatprep.subr.bf16.mxu0 %v8008_v44 }
 0xd08   :  { %6474 = vmatpush3.bf16.msra.mxu1 %v6805_v14  ;;  %v6813_v14 = vld [vmem:[#allocation11 + $0x80] ss:$12 sps:$4 sm:$0xff]  }
 0xd09   :  { %6475 = vmatprep.subr.bf16.mxu1 %v7184_v42 }
 0xd0a   :  { %4751 = vmatpush1.bf16.msra.mxu0 %v8011_v22 }
 0xd0b   :  { %4752 = vmatprep.subr.bf16.mxu0 %v8015_v34 }
 0xd0c   :  { %6476 = vmatpush3.bf16.msra.mxu1 %v6806_v31  ;;  %v6815_v31 = vld [vmem:[#allocation11 + $0xb0] ss:$12 sps:$4 sm:$0xff]  }
 0xd0d   :  { %6477 = vmatprep.subr.bf16.mxu1 %v7184_v42 }
 0xd0e   :  { %4753 = vmatpush1.bf16.msra.mxu0 %v8018_v35 }
 0xd0f   :  { %5008 = vmatprep.subr.bf16.mxu0 %v7968_v13 }
 0xd10   :  { %6478 = vmatpush3.bf16.msra.mxu1 %v6807_v36  ;;  %v4572_v36 = vld [vmem:[#allocation2 + $0x18] sm:$0xff] }
 0xd11   :  { %6483 = vmatprep.subr.bf16.mxu1 %v7184_v42  ;;  %v4574_v37 = vunpack.c.l.bf16 %v4572_v36 }
 0xdc4   :  { %v4502_v41 = vpop.f32.mrb[80].mxu0  ;;  %v4543_v46 = vpop.f32.mrb[64].mxu1 }
 0xdc5   :  { %v4549_v47 = vadd.f32 %v4502_v41, %v4304_v38  ;;  %v4504_v48 = vpop.f32.mrb[81].mxu0  ;;  %v6461_v52 = vpop.f32.mrb[65].mxu1  ;;  %v4563_v61 = vadd.f32 %v7876_v29, %v4543_v46 }
 0xdc6   :  { %v4506_v19 = vpop.f32.mrb[82].mxu0  ;;  %v4546_v20 = vpop.f32.mrb[66].mxu1  ;;  %v4556_v28 = vadd.f32 %v4504_v48, %v4305_v57  ;;  %v4575_v52 = vunpack.c.h.bf16 %v4572_v36  ;;  %v7033_v36 = vld [vmem:[%s8160_s8] ss:$0 sm:$0xff]  ;;  %s7186_s8 = smov [#allocation12]  }
 0xdc7   :  { %v5875_v23 = vmul.f32 -1.442695, %v4549_v47  ;;  %v4507_v26 = vpop.f32.mrb[83].mxu0  ;;  %v6462_v55 = vpop.f32.mrb[67].mxu1  ;;  %s5443_s16 = sshll.u32 %s7186_s8, 4  ;;  %s5444_s16 = int_to_ptr.vmem [resolvable:$true] %s5443_s16 }
 0xdc8   :  { %v5876_v25 = vmul.f32 -1.442695, %v4556_v28  ;;  %s7144_s17 = scalar_lea.vmem %s5444_s16, 1024  ;;  %p7149_p13 = scmp.lt.s32.totalorder %s5444_s16, %s5444_s16 }
 0xdc9   :  { %6968 = vpow2.f32 %v5875_v23  ;;  %p7145_p12 = scmp.ne.s32.totalorder %s5444_s16, %s7144_s17  ;;  %p7150_p0 = scmp.lt.s32.totalorder %s7144_s17, %s7144_s17 }
 0xdca   :  { %6970 = vpow2.f32 %v5876_v25 }
 0xdcb   :  { %p7151_p1 = por %p7150_p0, %p7149_p13 }
 0xdcd   :  { %p7152_p2 = pnand %p7151_p1, %p7145_p12 }
 0xdd3   :  { %v6969_v30 = vpop.eup %6968 }
 0xdd4   :  { %v4553_v18 = vadd.f32 1.0, %v6969_v30  ;;  %v6971_v12 = vpop.eup %6970 }
 0xdd5   :  { %v4560_v40 = vadd.f32 1.0, %v6971_v12 }
 0xdd6   :  { %6972 = vrcp.f32 %v4553_v18 }
 0xdd7   :  { %6974 = vrcp.f32 %v4560_v40 }
 0xde0   :  { %v6973_v59 = vpop.eup %6972 }
 0xde1   :  { %v4564_v21 = vmul.f32 %v6973_v59, %v4563_v61  ;;  %v6975_v1 = vpop.eup %6974  ;;  %v4576_v59 = vunpack.c.l.bf16 %v8061_v56 }
 0xde2   :  { %v4567_v27 = vsub.f32 1.0, %v6975_v1  ;;  %v4569_v11 = vmul.f32 %v6975_v1, %v8028_v63 }
 0xde3   :  { %v4565_v50 = vadd.f32 %v4564_v21, %v4306_v9 }
 0xde5   :  { %6976 = vtanh.f32 %v4565_v50 }
 0xdef   :  { %v6977_v8 = vpop.eup %6976 }
 0xdf0   :  { %v4568_v58 = vmul.f32 %v6977_v8, %v4567_v27 }
 0xdf2   :  { %v8066_v4 = vadd.f32 %v4569_v11, %v4568_v58 }
 0xdf4   :  { %v4577_v6 = vpack.c.bf16 %v8066_v4, %v8066_v4  ;;  %v5401_v51 = vmul.f32 0.70710677, %v8066_v4  ;;  %v5393_v3 = vmul.f32 0.5, %v8066_v4 }
 0xdf6   :  { %4771 = vmatmul.mubr.bf16.vlgmr.msra.gmra.mrb[84].mxu0 %v4577_v6  ;;  %6978 = verf.f32 %v5401_v51  ;;  %6480 = vmatmul.mubr.bf16.vlgmr.msra.gmra.mrb[68].mxu1 %v4577_v6 }
 0xdf7   :  { %5009 = vmatpush1.bf16.msra.mxu0 %v7970_v53  ;;  %5040 = vmatprep.mubr.bf16.mxu0 %v7183_v0 }
 0xdf8   :  { %5010 = vmatprep.subr.bf16.mxu0 %v7974_v49  ;;  %6499 = vmatprep.mubr.msk.bf16.mxu1 %vm7185_vm0, %v7184_v42 }
 0xdf9   :  { %6484 = vmatpush3.bf16.msra.mxu1 %v6808_v32 }
 0xdfa   :  { %6485 = vmatprep.subr.bf16.mxu1 %v7184_v42 }
 0xdfb   :  { %5011 = vmatpush1.bf16.msra.mxu0 %v7977_v54 }
 0xdfc   :  { %5012 = vmatprep.subr.bf16.mxu0 %v7981_v60 }
 0xdfd   :  { %6486 = vmatpush3.bf16.msra.mxu1 %v6809_v24 }
 0xdfe   :  { %6487 = vmatprep.subr.bf16.mxu1 %v7184_v42 }
 0xdff   :  { %5013 = vmatpush1.bf16.msra.mxu0 %v7984_v62 }
 0xe00   :  { %v6979_v63 = vpop.eup %6978  ;;  %5014 = vmatprep.subr.bf16.mxu0 %v7988_v5 }
 0xe01   :  { %v5417_v33 = vadd.f32 1.0, %v6979_v63  ;;  %6488 = vmatpush3.bf16.msra.mxu1 %v6810_v45 }
 0xe02   :  { %6489 = vmatprep.subr.bf16.mxu1 %v7184_v42 }
 0xe03   :  { %v5425_v7 = vmul.f32 %v5417_v33, %v5393_v3  ;;  %5015 = vmatpush1.bf16.msra.mxu0 %v7991_v10 }
 0xe04   :  { %5016 = vmatprep.subr.bf16.mxu0 %v7997_v43 }
 0xe05   :  { %5433 = vst [vmem:[#allocation12 + $0x18] sm:$0xff] %v5425_v7  ;;  %6490 = vmatpush3.bf16.msra.mxu1 %v6811_v2 }
 0xe06   :  { %6491 = vmatprep.subr.bf16.mxu1 %v7184_v42 }
 0xe07   :  { %5017 = vmatpush1.bf16.msra.mxu0 %v7995_v16 }
 0xe08   :  { %5018 = vmatprep.subr.bf16.mxu0 %v8000_v17 }
 0xe09   :  { %6492 = vmatpush3.bf16.msra.mxu1 %v6812_v15 }
 0xe0a   :  { %6493 = vmatprep.subr.bf16.mxu1 %v7184_v42 }
 0xe0b   :  { %5019 = vmatpush1.bf16.msra.mxu0 %v8004_v39 }
 0xe0c   :  { %5020 = vmatprep.subr.bf16.mxu0 %v8008_v44 }
 0xe0d   :  { %6494 = vmatpush3.bf16.msra.mxu1 %v6813_v14 }
 0xe0e   :  { %6495 = vmatprep.subr.bf16.mxu1 %v7184_v42 }
 0xe0f   :  { %5021 = vmatpush1.bf16.msra.mxu0 %v8011_v22 }
 0xe10   :  { %5022 = vmatprep.subr.bf16.mxu0 %v8015_v34 }
 0xe13   :  { %5023 = vmatpush1.bf16.msra.mxu0 %v8018_v35 }
 0xe14   :  { %5278 = vmatprep.subr.bf16.mxu0 %v7968_v13  ;;  %v6814_v13 = vld [vmem:[#allocation11 + $0x98] ss:$12 sps:$4 sm:$0xff]  }
 0xe15   :  { %6496 = vmatpush3.bf16.msra.mxu1 %v6814_v13 }
 0xe16   :  { %6497 = vmatprep.subr.bf16.mxu1 %v7184_v42 }
 0xe19   :  { %6498 = vmatpush3.bf16.msra.mxu1 %v6815_v31  ;;  %v4843_v31 = vld [vmem:[#allocation2 + $0x8] ss:$12 sps:$4 sm:$0xff]  }
 0xe1a   :  { %6503 = vmatprep.subr.bf16.mxu1 %v7184_v42 }
 0xec9   :  { %v4772_v38 = vpop.f32.mrb[84].mxu0  ;;  %v4813_v41 = vpop.f32.mrb[68].mxu1 }
 0xeca   :  { %v4819_v46 = vadd.f32 %v4772_v38, %v4574_v37  ;;  %v4774_v47 = vpop.f32.mrb[85].mxu0  ;;  %v6481_v48 = vpop.f32.mrb[69].mxu1  ;;  %v4833_v40 = vadd.f32 %v7876_v29, %v4813_v41  ;;  %v4846_v41 = vunpack.c.h.bf16 %v4843_v31 }
 0xecb   :  { %v4776_v57 = vpop.f32.mrb[86].mxu0  ;;  %v4816_v19 = vpop.f32.mrb[70].mxu1  ;;  %v4826_v55 = vadd.f32 %v4774_v47, %v4575_v52 }
 0xecc   :  { %v5901_v20 = vmul.f32 -1.442695, %v4819_v46  ;;  %v4777_v23 = vpop.f32.mrb[87].mxu0  ;;  %v6482_v26 = vpop.f32.mrb[71].mxu1 }
 0xecd   :  { %v5902_v28 = vmul.f32 -1.442695, %v4826_v55 }
 0xece   :  { %6980 = vpow2.f32 %v5901_v20 }
 0xecf   :  { %6982 = vpow2.f32 %v5902_v28 }
 0xed8   :  { %v6981_v25 = vpop.eup %6980 }
 0xed9   :  { %v4823_v30 = vadd.f32 1.0, %v6981_v25  ;;  %v6983_v18 = vpop.eup %6982 }
 0xeda   :  { %v4830_v12 = vadd.f32 1.0, %v6983_v18 }
 0xedb   :  { %6984 = vrcp.f32 %v4823_v30 }
 0xedc   :  { %6986 = vrcp.f32 %v4830_v12  ;;  %v5112_v12 = vld [vmem:[#allocation2] sm:$0xff] }
 0xee5   :  { %v6985_v61 = vpop.eup %6984 }
 0xee6   :  { %v4834_v9 = vmul.f32 %v6985_v61, %v4833_v40  ;;  %v6987_v50 = vpop.eup %6986  ;;  %v5114_v40 = vunpack.c.l.bf16 %v5112_v12 }
 0xee7   :  { %v4837_v1 = vsub.f32 1.0, %v6987_v50  ;;  %v4839_v58 = vmul.f32 %v6987_v50, %v8066_v4 }
 0xee8   :  { %v4835_v21 = vadd.f32 %v4834_v9, %v4576_v59 }
 0xeea   :  { %6988 = vtanh.f32 %v4835_v21 }
 0xef4   :  { %v6989_v27 = vpop.eup %6988 }
 0xef5   :  { %v4838_v8 = vmul.f32 %v6989_v27, %v4837_v1  ;;  %v5115_v1 = vunpack.c.h.bf16 %v5112_v12 }
 0xef7   :  { %v8102_v11 = vadd.f32 %v4839_v58, %v4838_v8 }
 0xef9   :  { %v4847_v6 = vpack.c.bf16 %v8102_v11, %v8102_v11  ;;  %v5400_v29 = vmul.f32 0.70710677, %v8102_v11  ;;  %v5392_v4 = vmul.f32 0.5, %v8102_v11 }
 0xefb   :  { %5041 = vmatmul.mubr.bf16.vlgmr.msra.gmra.mrb[88].mxu0 %v4847_v6  ;;  %6990 = verf.f32 %v5400_v29  ;;  %6500 = vmatmul.mubr.bf16.vlgmr.msra.gmra.mrb[72].mxu1 %v4847_v6 }
 0xefc   :  { %5279 = vmatpush1.bf16.msra.mxu0 %v7970_v53  ;;  %5310 = vmatprep.mubr.bf16.mxu0 %v7183_v0  ;;  %v6816_v0 = vld [vmem:[#allocation11 + $0x8] ss:$12 sps:$4 sm:$0xff]  }
 0xefd   :  { %5280 = vmatprep.subr.bf16.mxu0 %v7974_v49  ;;  %6519 = vmatprep.mubr.msk.bf16.mxu1 %vm7185_vm0, %v7184_v42  ;;  %v6817_v49 = vld [vmem:[#allocation11 + $0x20] ss:$12 sps:$4 sm:$0xff]  }
 0xefe   :  { %6504 = vmatpush3.bf16.msra.mxu1 %v6816_v0 }
 0xeff   :  { %6505 = vmatprep.subr.bf16.mxu1 %v7184_v42 }
 0xf00   :  { %5281 = vmatpush1.bf16.msra.mxu0 %v7977_v54  ;;  %v6818_v54 = vld [vmem:[#allocation11 + $0x38] ss:$12 sps:$4 sm:$0xff]  }
 0xf01   :  { %5282 = vmatprep.subr.bf16.mxu0 %v7981_v60  ;;  %v6819_v60 = vld [vmem:[#allocation11 + $0x50] ss:$12 sps:$4 sm:$0xff]  }
 0xf02   :  { %6506 = vmatpush3.bf16.msra.mxu1 %v6817_v49 }
 0xf03   :  { %6507 = vmatprep.subr.bf16.mxu1 %v7184_v42 }
 0xf04   :  { %5283 = vmatpush1.bf16.msra.mxu0 %v7984_v62  ;;  %v6820_v62 = vld [vmem:[#allocation11 + $0x68] ss:$12 sps:$4 sm:$0xff]  }
 0xf05   :  { %v6991_v56 = vpop.eup %6990  ;;  %5284 = vmatprep.subr.bf16.mxu0 %v7988_v5  ;;  %v6821_v5 = vld [vmem:[#allocation11 + $0x80] ss:$12 sps:$4 sm:$0xff]  }
 0xf06   :  { %v5416_v51 = vadd.f32 1.0, %v6991_v56  ;;  %6508 = vmatpush3.bf16.msra.mxu1 %v6818_v54 }
 0xf07   :  { %6509 = vmatprep.subr.bf16.mxu1 %v7184_v42 }
 0xf08   :  { %v5424_v53 = vmul.f32 %v5416_v51, %v5392_v4  ;;  %5285 = vmatpush1.bf16.msra.mxu0 %v7991_v10  ;;  %v6822_v10 = vld [vmem:[#allocation11 + $0x98] ss:$12 sps:$4 sm:$0xff]  }
 0xf09   :  { %5286 = vmatprep.subr.bf16.mxu0 %v7997_v43  ;;  %v4842_v43 = vld [vmem:[#allocation2 + $0xc] sm:$0xff] }
 0xf0a   :  { %5432 = vst [vmem:[#allocation12 + $0x10] sm:$0xff] %v5424_v53  ;;  %6510 = vmatpush3.bf16.msra.mxu1 %v6819_v60  ;;  %v4845_v63 = vunpack.c.h.bf16 %v4842_v43  ;;  %v5116_v60 = vunpack.c.l.bf16 %v4843_v31 }
 0xf0b   :  { %6511 = vmatprep.subr.bf16.mxu1 %v7184_v42 }
 0xf0c   :  { %5287 = vmatpush1.bf16.msra.mxu0 %v7995_v16  ;;  %v6823_v16 = vld [vmem:[#allocation11 + $0xb0] ss:$12 sps:$4 sm:$0xff]  }
 0xf0d   :  { %5288 = vmatprep.subr.bf16.mxu0 %v8000_v17  ;;  %v4844_v17 = vunpack.c.l.bf16 %v4842_v43 }
 0xf0e   :  { %6512 = vmatpush3.bf16.msra.mxu1 %v6820_v62 }
 0xf0f   :  { %6513 = vmatprep.subr.bf16.mxu1 %v7184_v42 }
 0xf10   :  { %5289 = vmatpush1.bf16.msra.mxu0 %v8004_v39 }
 0xf11   :  { %5290 = vmatprep.subr.bf16.mxu0 %v8008_v44 }
 0xf12   :  { %6514 = vmatpush3.bf16.msra.mxu1 %v6821_v5 }
 0xf13   :  { %6515 = vmatprep.subr.bf16.mxu1 %v7184_v42 }
 0xf14   :  { %5291 = vmatpush1.bf16.msra.mxu0 %v8011_v22 }
 0xf15   :  { %5292 = vmatprep.subr.bf16.mxu0 %v8015_v34 }
 0xf16   :  { %6516 = vmatpush3.bf16.msra.mxu1 %v6822_v10 }
 0xf17   :  { %6517 = vmatprep.subr.bf16.mxu1 %v7184_v42 }
 0xf18   :  { %5293 = vmatpush1.bf16.msra.mxu0 %v8018_v35 }
 0xf1a   :  { %6518 = vmatpush3.bf16.msra.mxu1 %v6823_v16 }
 0xfce   :  { %v5042_v39 = vpop.f32.mrb[88].mxu0  ;;  %v5083_v44 = vpop.f32.mrb[72].mxu1 }
 0xfcf   :  { %v5089_v22 = vadd.f32 %v5042_v39, %v4844_v17  ;;  %v5044_v34 = vpop.f32.mrb[89].mxu0  ;;  %v6501_v35 = vpop.f32.mrb[73].mxu1  ;;  %v5103_v37 = vadd.f32 %v7033_v36, %v5083_v44 }
 0xfd0   :  { %v5046_v3 = vpop.f32.mrb[90].mxu0  ;;  %v5086_v33 = vpop.f32.mrb[74].mxu1  ;;  %v5096_v45 = vadd.f32 %v5044_v34, %v4845_v63 }
 0xfd1   :  { %v5927_v7 = vmul.f32 -1.442695, %v5089_v22  ;;  %v5047_v32 = vpop.f32.mrb[91].mxu0  ;;  %v6502_v24 = vpop.f32.mrb[75].mxu1 }
 0xfd2   :  { %v5928_v2 = vmul.f32 -1.442695, %v5096_v45 }
 0xfd3   :  { %6992 = vpow2.f32 %v5927_v7 }
 0xfd4   :  { %6994 = vpow2.f32 %v5928_v2 }
 0xfdd   :  { %v6993_v15 = vpop.eup %6992 }
 0xfde   :  { %v5093_v42 = vadd.f32 1.0, %v6993_v15  ;;  %v6995_v14 = vpop.eup %6994 }
 0xfdf   :  { %v5100_v13 = vadd.f32 1.0, %v6995_v14 }
 0xfe0   :  { %6996 = vrcp.f32 %v5093_v42 }
 0xfe1   :  { %6998 = vrcp.f32 %v5100_v13 }
 0xfea   :  { %v6997_v38 = vpop.eup %6996 }
 0xfeb   :  { %v5104_v46 = vmul.f32 %v6997_v38, %v5103_v37  ;;  %v6999_v48 = vpop.eup %6998 }
 0xfec   :  { %v5107_v52 = vsub.f32 1.0, %v6999_v48  ;;  %v5109_v20 = vmul.f32 %v6999_v48, %v8102_v11 }
 0xfed   :  { %v5105_v47 = vadd.f32 %v5104_v46, %v4846_v41 }
 0xfef   :  { %7000 = vtanh.f32 %v5105_v47 }
 0xff9   :  { %v7001_v57 = vpop.eup %7000 }
 0xffa   :  { %v5108_v19 = vmul.f32 %v7001_v57, %v5107_v52 }
 0xffc   :  { %v5110_v23 = vadd.f32 %v5109_v20, %v5108_v19 }
 0xffe   :  { %v5117_v26 = vpack.c.bf16 %v5110_v23, %v5110_v23  ;;  %v5399_v55 = vmul.f32 0.70710677, %v5110_v23  ;;  %v5391_v25 = vmul.f32 0.5, %v5110_v23 }
0x1000   :  { %5311 = vmatmul.mubr.bf16.vlgmr.msra.gmra.mrb[92].mxu0 %v5117_v26  ;;  %7002 = verf.f32 %v5399_v55  ;;  %6520 = vmatmul.mubr.bf16.vlgmr.msra.gmra.mrb[76].mxu1 %v5117_v26 }
0x100a   :  { %v7003_v28 = vpop.eup %7002 }
0x100b   :  { %v5415_v30 = vadd.f32 1.0, %v7003_v28 }
0x100d   :  { %v5423_v18 = vmul.f32 %v5415_v30, %v5391_v25 }
0x100f   :  { %5431 = vst [vmem:[#allocation12 + $0x8] sm:$0xff] %v5423_v18 }
0x10d3   :  { %v5312_v61 = vpop.f32.mrb[92].mxu0  ;;  %v5353_v59 = vpop.f32.mrb[76].mxu1 }
0x10d4   :  { %v5359_v9 = vadd.f32 %v5312_v61, %v5114_v40  ;;  %v5314_v21 = vpop.f32.mrb[93].mxu0  ;;  %v6521_v50 = vpop.f32.mrb[77].mxu1  ;;  %v5373_v49 = vadd.f32 %v7033_v36, %v5353_v59 }
0x10d5   :  { %v5316_v27 = vpop.f32.mrb[94].mxu0  ;;  %v5356_v8 = vpop.f32.mrb[78].mxu1  ;;  %v5366_v29 = vadd.f32 %v5314_v21, %v5115_v1 }
0x10d6   :  { %v5953_v58 = vmul.f32 -1.442695, %v5359_v9  ;;  %v5317_v11 = vpop.f32.mrb[95].mxu0  ;;  %v6522_v6 = vpop.f32.mrb[79].mxu1 }
0x10d7   :  { %v5954_v56 = vmul.f32 -1.442695, %v5366_v29 }
0x10d8   :  { %7004 = vpow2.f32 %v5953_v58 }
0x10d9   :  { %7006 = vpow2.f32 %v5954_v56 }
0x10e2   :  { %v7005_v4 = vpop.eup %7004 }
0x10e3   :  { %v5363_v51 = vadd.f32 1.0, %v7005_v4  ;;  %v7007_v53 = vpop.eup %7006 }
0x10e4   :  { %v5370_v0 = vadd.f32 1.0, %v7007_v53 }
0x10e5   :  { %7008 = vrcp.f32 %v5363_v51 }
0x10e6   :  { %7010 = vrcp.f32 %v5370_v0 }
0x10ef   :  { %v7009_v54 = vpop.eup %7008 }
0x10f0   :  { %v5374_v62 = vmul.f32 %v7009_v54, %v5373_v49  ;;  %v7011_v10 = vpop.eup %7010 }
0x10f1   :  { %v5377_v16 = vsub.f32 1.0, %v7011_v10  ;;  %v5379_v39 = vmul.f32 %v7011_v10, %v5110_v23 }
0x10f2   :  { %v5375_v5 = vadd.f32 %v5374_v62, %v5116_v60 }
0x10f4   :  { %7012 = vtanh.f32 %v5375_v5 }
0x10fe   :  { %v7013_v43 = vpop.eup %7012 }
0x10ff   :  { %v5378_v17 = vmul.f32 %v7013_v43, %v5377_v16 }
0x1101   :  { %v5380_v44 = vadd.f32 %v5379_v39, %v5378_v17 }
0x1103   :  { %v5398_v22 = vmul.f32 0.70710677, %v5380_v44  ;;  %v5390_v35 = vmul.f32 0.5, %v5380_v44 }
0x1105   :  { %7014 = verf.f32 %v5398_v22 }
0x110f   :  { %v7015_v34 = vpop.eup %7014 }
0x1110   :  { %v5414_v63 = vadd.f32 1.0, %v7015_v34 }
0x1112   :  { %v5422_v3 = vmul.f32 %v5414_v63, %v5390_v35 }
0x1114   :  { %5430 = vst [vmem:[#allocation12] sm:$0xff] %v5422_v3 }
0x1115   :  { %7155 = shalt.err (!%p7152_p2)
}
0x1116   :  { %s7156_s18 = scalar_lea.hbm %s8161_s9, 1024 }
0x1117   :  { %p7157_p3 = scmp.ne.s32.totalorder %s8161_s9, %s7156_s18  ;;  %p7160_p4 = scmp.lt.u32.totalorder %s7156_s18, %s8161_s9 }
0x1119   :  { %p7162_p5 = pnand %p7160_p4, %p7157_p3 }
0x111b   :  { %7165 = shalt.err (!%p7162_p5)
}
0x111c   :  { %5449 = dma.vmem_to_hbm [thread:$0]  %s5444_s16, 1024, %s8161_s9, [#allocation5], %s7179_s5, %s7179_s5, %s7180_s24  }
0x111d   :  { %7172 = dma.done.wait [#allocation5], 1024  }
0x111e   :  { %7173 = vsyncadd [#allocation5], 4294966272 }
0x111f   :  { %5453 = vsyncpa [#allocation4], 1 }
0x1120   :  { %5454 = vsyncpa [#allocation7], 1 }
0x1121   :  { %5455 = vsyncpa [#allocation10], 1 }
0x1122   :  { %5456 = vsyncpa [#allocation5], 1 }

</bundles_post_ra>
